<compile_context>
chip_gen: v6e
topology: v6e:2x2x1
jax: 0.10.0
libtpu: 0.0.40
codegen_flags: <defaults>
</compile_context>

<pallas_src>
import functools
import math

import jax
import jax.numpy as jnp
from jax.experimental import pallas as pl
from jax.experimental.pallas import tpu as pltpu

FINGER_LIST = [[0, 1], [2, 3, 4, 5], [6, 7, 8, 9],
               [10, 11, 12, 13], [14, 15, 16, 17], [18, 19, 20, 21]]

NEG_INF = -1e30


def _round_up(x, m):
    return (x + m - 1) // m * m


def _pad_last(a, target):
    pad = target - a.shape[-1]
    if pad == 0:
        return a
    cfg = [(0, 0)] * (a.ndim - 1) + [(0, pad)]
    return jnp.pad(a, cfg)


def _pad2(a, rows, cols):
    return jnp.pad(a, ((0, rows - a.shape[0]), (0, cols - a.shape[1])))


# ----------------------------- in-kernel helpers -----------------------------

def _attn(x, n, s, wqkv, bqkv, wo, bo, bias, scale):
    """Single-head scaled-dot-product self-attention over `n` independent groups of
    `s` rows.  x: (n*s, Dp) f32.  wqkv: (Dp, 3Dp) bf16 (lane-aligned Q|K|V slices).
    Returns the attended + output-projected rows, (n*s, Dp) f32."""
    Dp = x.shape[1]
    p = jnp.dot(x.astype(jnp.bfloat16), wqkv,
                preferred_element_type=jnp.float32) + bqkv          # (n*s, 3Dp) f32
    q = p[:, 0 * Dp:1 * Dp].reshape(n, s, Dp).astype(jnp.bfloat16)
    k = p[:, 1 * Dp:2 * Dp].reshape(n, s, Dp).astype(jnp.bfloat16)
    v = p[:, 2 * Dp:3 * Dp].reshape(n, s, Dp).astype(jnp.bfloat16)

    sc = jnp.einsum('nsd,ntd->nst', q, k,
                    preferred_element_type=jnp.float32) * scale + bias   # (n, s, s)
    sc = sc - jnp.max(sc, axis=-1, keepdims=True)
    w = jnp.exp(sc)
    w = w / jnp.sum(w, axis=-1, keepdims=True)       # exact division (parity concern)
    ctx = jnp.einsum('nst,ntd->nsd', w.astype(jnp.bfloat16), v,
                     preferred_element_type=jnp.float32)
    y = jnp.dot(ctx.reshape(n * s, Dp).astype(jnp.bfloat16), wo,
                preferred_element_type=jnp.float32) + bo
    return y


def _mean_pool(y, groups, size, valid):
    """Mean over groups of `size` rows, averaging only the first `valid` rows."""
    y = y.reshape(groups, size, y.shape[-1])
    if valid < size:
        rid = jax.lax.broadcasted_iota(jnp.int32, (1, size, 1), 1)
        y = jnp.where(rid < valid, y, 0.0)
    return jnp.sum(y, axis=1) * (1.0 / valid)


# ----------------------------- fused HAN kernel (one batch element / step) ---

def _han_kernel(x_ref, depth_ref, jbias_ref, kbias_ref,
                w_in_ref, b_in_ref, wqkv_ref, bqkv_ref, wo_ref, bo_ref,
                wcls_ref, bcls_ref, out_ref, *, scale):
    T = depth_ref.shape[1]
    Dp = depth_ref.shape[2]

    # ---- BatchNorm-folded Linear + ReLU input map: (T*64, C) -> (T*64, Dp) ----
    x = x_ref[0].astype(jnp.bfloat16)
    mapped = jnp.dot(x, w_in_ref[...],
                     preferred_element_type=jnp.float32) + b_in_ref[...]
    mapped = jnp.maximum(mapped, 0.0)

    # ---- Joint attention: per t, 8 slots x 8 (uniformly duplicated) joints. ----
    # Block-diagonal bias keeps attention inside each slot; per-slot mean over the
    # duplicated joints equals the mean over the true joints (uniform duplication).
    yj = _attn(mapped, T, 64, wqkv_ref[0], bqkv_ref[0], wo_ref[0], bo_ref[0],
               jbias_ref[...], scale)
    pooled = _mean_pool(yj, T * 8, 8, 8).reshape(T, 8, Dp)      # (t, slot, Dp)

    # ---- Finger (hand) attention over {depth token, 6 fingers} per t. ----
    # slot 0 <- depth token, slots 1..6 = finger features, slot 7 masked out.
    kbias = kbias_ref[...].reshape(1, 1, 8)
    slot_id = jax.lax.broadcasted_iota(jnp.int32, (1, 8, 1), 1)
    depth = depth_ref[0]                                        # (T, Dp)
    hand_in = jnp.where(slot_id == 0, depth[:, None, :], pooled)
    yh = _attn(hand_in.reshape(T * 8, Dp), T, 8,
               wqkv_ref[1], bqkv_ref[1], wo_ref[1], bo_ref[1], kbias, scale)
    hand = _mean_pool(yh, T, 8, 7)                              # (T, Dp)

    # ---- Temporal attention over T for the 7 real streams (+1 junk slot). ----
    # stream 0 = hand, streams 1..6 = fingers, stream 7 = junk (discarded later).
    streams_t = jnp.where(slot_id == 0, hand[:, None, :], pooled)   # (t, stream, Dp)
    tin = jnp.transpose(streams_t, (1, 0, 2)).reshape(8 * T, Dp)    # (stream, t) rows
    yt = _attn(tin, 8, T, wqkv_ref[2], bqkv_ref[2], wo_ref[2], bo_ref[2],
               0.0, scale)
    temporal = _mean_pool(yt, 8, T, T)                          # (8, Dp)

    # ---- Fusion attention over the 7 real streams (slot 7 masked). ----
    yf = _attn(temporal, 1, 8, wqkv_ref[3], bqkv_ref[3], wo_ref[3], bo_ref[3],
               kbias, scale)
    fusion = _mean_pool(yf, 1, 8, 7)                            # (1, Dp)

    # ---- Classifier (Dropout = identity in eval mode). ----
    logits = jnp.dot(fusion.astype(jnp.bfloat16), wcls_ref[...],
                     preferred_element_type=jnp.float32) + bcls_ref[...]
    out_ref[...] = logits.reshape(1, 1, -1)


def _han_pallas(x_in, depth, jbias, kbias, w_in, b_in, wqkv, bqkv, wo, bo,
                w_cls, b_cls, *, scale):
    B, TJ, C = x_in.shape
    T = depth.shape[1]
    Dp = depth.shape[2]
    NCp = w_cls.shape[1]
    kernel = functools.partial(_han_kernel, scale=scale)
    return pl.pallas_call(
        kernel,
        out_shape=jax.ShapeDtypeStruct((B, 1, NCp), jnp.float32),
        grid=(B,),
        in_specs=[
            pl.BlockSpec((1, TJ, C), lambda b: (b, 0, 0)),          # gathered joints
            pl.BlockSpec((1, T, Dp), lambda b: (b, 0, 0)),          # depth token
            pl.BlockSpec((64, 64), lambda b: (0, 0)),               # joint block-diag bias
            pl.BlockSpec((1, 8), lambda b: (0, 0)),                 # slot-7 key mask
            pl.BlockSpec((C, Dp), lambda b: (0, 0)),                # BN-folded input map
            pl.BlockSpec((1, Dp), lambda b: (0, 0)),
            pl.BlockSpec((4, Dp, 3 * Dp), lambda b: (0, 0, 0)),     # fused Q|K|V (4 layers)
            pl.BlockSpec((4, 1, 3 * Dp), lambda b: (0, 0, 0)),
            pl.BlockSpec((4, Dp, Dp), lambda b: (0, 0, 0)),         # output projections
            pl.BlockSpec((4, 1, Dp), lambda b: (0, 0, 0)),
            pl.BlockSpec((Dp, NCp), lambda b: (0, 0)),              # classifier
            pl.BlockSpec((1, NCp), lambda b: (0, 0)),
        ],
        out_specs=pl.BlockSpec((1, 1, NCp), lambda b: (b, 0, 0)),
        compiler_params=pltpu.CompilerParams(dimension_semantics=("parallel",)),
    )(x_in, depth, jbias, kbias, w_in, b_in, wqkv, bqkv, wo, bo, w_cls, b_cls)


# ----------------------------- parameter init -----------------------------

def init_params(key, C, D, num_classes):
    keys = iter(jax.random.split(key, 64))

    def lin(fan_in, fan_out):
        lim = 1.0 / math.sqrt(fan_in)
        w = jax.random.uniform(next(keys), (fan_in, fan_out), jnp.float32, -lim, lim)
        b = jax.random.uniform(next(keys), (fan_out,), jnp.float32, -lim, lim)
        return w, b

    def attn_params(dim):
        p = {}
        for name in ('q', 'k', 'v', 'o'):
            w, b = lin(dim, dim)
            p['w' + name] = w
            p['b' + name] = b
        return p

    return {
        'bn': {'gamma': jnp.ones((C,), jnp.float32),
               'beta': jnp.zeros((C,), jnp.float32),
               'running_mean': jnp.zeros((C,), jnp.float32),
               'running_var': jnp.ones((C,), jnp.float32)},
        'input_map': dict(zip(('w', 'b'), lin(C, D))),
        'joint_attention': attn_params(D),
        'finger_attention': attn_params(D),
        'temporal_attention': attn_params(D),
        'fusion_attention': attn_params(D),
        'cls': dict(zip(('w', 'b'), lin(D, num_classes))),
    }


# ----------------------------- HAN forward -----------------------------

def han_forward(params, skeleton_features, depth_feature_token, *, training=False):
    B, T, J, C = skeleton_features.shape
    D = params['input_map']['w'].shape[1]
    NC = params['cls']['w'].shape[1]
    Dp = _round_up(D, 128)              # lane-dense feature dim (zero padding is exact)
    NCp = _round_up(NC, 128)            # lane-dense logits; sliced back below
    eps = 1e-5

    # BatchNorm2d folded into the input map.  Eval mode (running stats) by default so
    # BN and Dropout semantics are consistent; training=True uses batch statistics.
    if training:
        mean = jnp.mean(skeleton_features, axis=(0, 1, 2))
        var = jnp.var(skeleton_features, axis=(0, 1, 2))
    else:
        mean = params['bn']['running_mean']
        var = params['bn']['running_var']
    bn_scale = params['bn']['gamma'] * jax.lax.rsqrt(var + eps)
    bn_shift = params['bn']['beta'] - mean * bn_scale
    w_in = bn_scale[:, None] * params['input_map']['w']                      # (C, D)
    b_in = bn_shift @ params['input_map']['w'] + params['input_map']['b']    # (D,)
    w_in = _pad_last(w_in, Dp).astype(jnp.bfloat16)
    b_in = _pad_last(b_in, Dp)[None, :]

    # Gather joints into (b, t*64, C) with layout (t, slot<8>, joint<8>):
    #   slot 0   : dummy (replaced by the depth token after joint attention)
    #   slot 1..6: the 6 fingers, joints uniformly duplicated up to 8
    #              (softmax attention + mean pool are exactly invariant)
    #   slot 7   : dummy (masked out downstream)
    def tile8(idx):
        return idx * (8 // len(idx))
    slot_tbl = ([tile8(FINGER_LIST[0])] + [tile8(f) for f in FINGER_LIST]
                + [tile8(FINGER_LIST[0])])
    slot_idx = jnp.asarray(slot_tbl, dtype=jnp.int32)                        # (8, 8)
    x_in = skeleton_features[:, :, slot_idx, :].reshape(B, T * 64, C)
    depth = _pad_last(depth_feature_token, Dp)                               # (B, T, Dp)

    # Fuse Q|K|V weights (lane-aligned Dp slices) and stack the 4 attention layers.
    layers = [params['joint_attention'], params['finger_attention'],
              params['temporal_attention'], params['fusion_attention']]
    wqkv = jnp.stack([jnp.concatenate([_pad2(p['wq'], Dp, Dp),
                                       _pad2(p['wk'], Dp, Dp),
                                       _pad2(p['wv'], Dp, Dp)], axis=1)
                      for p in layers]).astype(jnp.bfloat16)                 # (4, Dp, 3Dp)
    bqkv = jnp.stack([jnp.concatenate([_pad_last(p['bq'], Dp),
                                       _pad_last(p['bk'], Dp),
                                       _pad_last(p['bv'], Dp)])[None, :]
                      for p in layers])                                      # (4, 1, 3Dp)
    wo = jnp.stack([_pad2(p['wo'], Dp, Dp) for p in layers]).astype(jnp.bfloat16)
    bo = jnp.stack([_pad_last(p['bo'], Dp)[None, :] for p in layers])
    w_cls = _pad2(params['cls']['w'], Dp, NCp).astype(jnp.bfloat16)
    b_cls = _pad_last(params['cls']['b'], NCp)[None, :]

    # Attention score masks, hoisted out of the kernel.
    blk = jnp.arange(64, dtype=jnp.int32) // 8
    jbias = jnp.where(blk[:, None] == blk[None, :], 0.0, NEG_INF).astype(jnp.float32)
    kbias = jnp.where(jnp.arange(8) < 7, 0.0, NEG_INF).astype(jnp.float32)[None, :]

    out = _han_pallas(x_in, depth, jbias, kbias, w_in, b_in, wqkv, bqkv, wo, bo,
                      w_cls, b_cls, scale=1.0 / math.sqrt(D))
    return out[:, 0, :NC]


# ----------------------------- main -----------------------------

if __name__ == "__main__":
    B, T, J, C = 2, 8, 22, 4      # J must be 22 to match FINGER_LIST
    D = 32                        # attention input_dim == output_dim
    num_classes = 5

    key = jax.random.PRNGKey(0)
    k_skel, k_depth, k_param = jax.random.split(key, 3)
    skeleton = jax.random.normal(k_skel, (B, T, J, C), jnp.float32)
    depth_token = jax.random.normal(k_depth, (B, T, D), jnp.float32)
    params = init_params(k_param, C, D, num_classes)

    fwd = jax.jit(functools.partial(han_forward, params))
    out = fwd(skeleton, depth_token)
    out = jax.block_until_ready(out)

    assert out.shape == (B, num_classes), out.shape
    assert bool(jnp.all(jnp.isfinite(out)))
    print("KERNEL_OK")
</pallas_src>

<mosaic_0001>
module attributes {stable_mosaic.version = 11 : i64} {
  func.func @_han_kernel(%arg0: i32, %arg1: memref<1x512x4xf32, #tpu.memory_space<vmem>>, %arg2: memref<1x8x128xf32, #tpu.memory_space<vmem>>, %arg3: memref<64x64xf32, #tpu.memory_space<vmem>>, %arg4: memref<1x8xf32, #tpu.memory_space<vmem>>, %arg5: memref<4x128xbf16, #tpu.memory_space<vmem>>, %arg6: memref<1x128xf32, #tpu.memory_space<vmem>>, %arg7: memref<4x128x384xbf16, #tpu.memory_space<vmem>>, %arg8: memref<4x1x384xf32, #tpu.memory_space<vmem>>, %arg9: memref<4x128x128xbf16, #tpu.memory_space<vmem>>, %arg10: memref<4x1x128xf32, #tpu.memory_space<vmem>>, %arg11: memref<128x128xbf16, #tpu.memory_space<vmem>>, %arg12: memref<1x128xf32, #tpu.memory_space<vmem>>, %arg13: memref<1x1x128xf32, #tpu.memory_space<vmem>>) attributes {dimension_semantics = [#tpu.dimension_semantics<parallel>], iteration_bounds = array<i64: 2>, scalar_prefetch = 0 : i64, scratch_operands = 0 : i64, tpu.core_type = #tpu.core_type<tc>, window_params = [{transform_indices = @transform_0, window_bounds = array<i64: 1, 512, 4>}, {transform_indices = @transform_1, window_bounds = array<i64: 1, 8, 128>}, {pipeline_mode = #tpu.pipeline_mode<synchronous>, transform_indices = @transform_2, window_bounds = array<i64: 64, 64>}, {pipeline_mode = #tpu.pipeline_mode<synchronous>, transform_indices = @transform_3, window_bounds = array<i64: 1, 8>}, {pipeline_mode = #tpu.pipeline_mode<synchronous>, transform_indices = @transform_4, window_bounds = array<i64: 4, 128>}, {pipeline_mode = #tpu.pipeline_mode<synchronous>, transform_indices = @transform_5, window_bounds = array<i64: 1, 128>}, {pipeline_mode = #tpu.pipeline_mode<synchronous>, transform_indices = @transform_6, window_bounds = array<i64: 4, 128, 384>}, {pipeline_mode = #tpu.pipeline_mode<synchronous>, transform_indices = @transform_7, window_bounds = array<i64: 4, 1, 384>}, {pipeline_mode = #tpu.pipeline_mode<synchronous>, transform_indices = @transform_8, window_bounds = array<i64: 4, 128, 128>}, {pipeline_mode = #tpu.pipeline_mode<synchronous>, transform_indices = @transform_9, window_bounds = array<i64: 4, 1, 128>}, {pipeline_mode = #tpu.pipeline_mode<synchronous>, transform_indices = @transform_10, window_bounds = array<i64: 128, 128>}, {pipeline_mode = #tpu.pipeline_mode<synchronous>, transform_indices = @transform_11, window_bounds = array<i64: 1, 128>}, {transform_indices = @transform_12, window_bounds = array<i64: 1, 1, 128>}]} {
    %c0 = arith.constant 0 : index
    %c0_0 = arith.constant 0 : index
    %c0_1 = arith.constant 0 : index
    %0 = vector.load %arg1[%c0, %c0_0, %c0_1] : memref<1x512x4xf32, #tpu.memory_space<vmem>>, vector<1x512x4xf32>
    %1 = vector.shape_cast %0 : vector<1x512x4xf32> to vector<512x4xf32>
    %2 = arith.truncf %1 : vector<512x4xf32> to vector<512x4xbf16>
    %c0_2 = arith.constant 0 : index
    %c0_3 = arith.constant 0 : index
    %3 = vector.load %arg5[%c0_2, %c0_3] : memref<4x128xbf16, #tpu.memory_space<vmem>>, vector<4x128xbf16>
    %cst = arith.constant dense<0.000000e+00> : vector<512x128xf32>
    %4 = tpu.matmul %2, %3, %cst {dimension_numbers = #tpu.dot_dimension_numbers<[1], [0], [0], [1], [0, 0, 1, 1], [], []>} : vector<512x4xbf16>, vector<4x128xbf16>, vector<512x128xf32> -> vector<512x128xf32>
    %c0_4 = arith.constant 0 : index
    %c0_5 = arith.constant 0 : index
    %5 = vector.load %arg6[%c0_4, %c0_5] : memref<1x128xf32, #tpu.memory_space<vmem>>, vector<1x128xf32>
    %6 = vector.broadcast %5 : vector<1x128xf32> to vector<512x128xf32>
    %7 = arith.addf %4, %6 : vector<512x128xf32>
    %cst_6 = arith.constant 0.000000e+00 : f32
    %8 = vector.broadcast %cst_6 : f32 to vector<512x128xf32>
    %9 = arith.maximumf %7, %8 : vector<512x128xf32>
    %c0_7 = arith.constant 0 : index
    %c0_8 = arith.constant 0 : index
    %c0_9 = arith.constant 0 : index
    %10 = vector.load %arg7[%c0_7, %c0_8, %c0_9] : memref<4x128x384xbf16, #tpu.memory_space<vmem>>, vector<1x128x384xbf16>
    %11 = vector.shape_cast %10 : vector<1x128x384xbf16> to vector<128x384xbf16>
    %c0_10 = arith.constant 0 : index
    %c0_11 = arith.constant 0 : index
    %c0_12 = arith.constant 0 : index
    %12 = vector.load %arg8[%c0_10, %c0_11, %c0_12] : memref<4x1x384xf32, #tpu.memory_space<vmem>>, vector<1x1x384xf32>
    %13 = vector.shape_cast %12 : vector<1x1x384xf32> to vector<1x384xf32>
    %c0_13 = arith.constant 0 : index
    %c0_14 = arith.constant 0 : index
    %c0_15 = arith.constant 0 : index
    %14 = vector.load %arg9[%c0_13, %c0_14, %c0_15] : memref<4x128x128xbf16, #tpu.memory_space<vmem>>, vector<1x128x128xbf16>
    %15 = vector.shape_cast %14 : vector<1x128x128xbf16> to vector<128x128xbf16>
    %c0_16 = arith.constant 0 : index
    %c0_17 = arith.constant 0 : index
    %c0_18 = arith.constant 0 : index
    %16 = vector.load %arg10[%c0_16, %c0_17, %c0_18] : memref<4x1x128xf32, #tpu.memory_space<vmem>>, vector<1x1x128xf32>
    %17 = vector.shape_cast %16 : vector<1x1x128xf32> to vector<1x128xf32>
    %c0_19 = arith.constant 0 : index
    %c0_20 = arith.constant 0 : index
    %18 = vector.load %arg3[%c0_19, %c0_20] : memref<64x64xf32, #tpu.memory_space<vmem>>, vector<64x64xf32>
    %19 = arith.truncf %9 : vector<512x128xf32> to vector<512x128xbf16>
    %cst_21 = arith.constant dense<0.000000e+00> : vector<512x384xf32>
    %20 = tpu.matmul %19, %11, %cst_21 {dimension_numbers = #tpu.dot_dimension_numbers<[1], [0], [0], [1], [0, 0, 1, 1], [], []>} : vector<512x128xbf16>, vector<128x384xbf16>, vector<512x384xf32> -> vector<512x384xf32>
    %21 = vector.broadcast %13 : vector<1x384xf32> to vector<512x384xf32>
    %22 = arith.addf %20, %21 : vector<512x384xf32>
    %23 = vector.extract_strided_slice %22 {offsets = [0, 0], sizes = [512, 128], strides = [1, 1]} : vector<512x384xf32> to vector<512x128xf32>
    %24 = vector.shape_cast %23 : vector<512x128xf32> to vector<8x64x128xf32>
    %25 = arith.truncf %24 : vector<8x64x128xf32> to vector<8x64x128xbf16>
    %26 = vector.extract_strided_slice %22 {offsets = [0, 128], sizes = [512, 128], strides = [1, 1]} : vector<512x384xf32> to vector<512x128xf32>
    %27 = vector.shape_cast %26 : vector<512x128xf32> to vector<8x64x128xf32>
    %28 = arith.truncf %27 : vector<8x64x128xf32> to vector<8x64x128xbf16>
    %29 = vector.extract_strided_slice %22 {offsets = [0, 256], sizes = [512, 128], strides = [1, 1]} : vector<512x384xf32> to vector<512x128xf32>
    %30 = vector.shape_cast %29 : vector<512x128xf32> to vector<8x64x128xf32>
    %31 = arith.truncf %30 : vector<8x64x128xf32> to vector<8x64x128xbf16>
    "tpu.trace_start"() <{level = 10 : i32, message = "nsd,ntd->nst"}> : () -> ()
    %cst_22 = arith.constant dense<0.000000e+00> : vector<8x64x64xf32>
    %32 = tpu.matmul %25, %28, %cst_22 {dimension_numbers = #tpu.dot_dimension_numbers<[2], [2], [1], [1], [0, 0, 0, 1, 1, 1], [0], [0]>} : vector<8x64x128xbf16>, vector<8x64x128xbf16>, vector<8x64x64xf32> -> vector<8x64x64xf32>
    "tpu.trace_stop"() : () -> ()
    %cst_23 = arith.constant 0.176776692 : f32
    %33 = vector.broadcast %cst_23 : f32 to vector<8x64x64xf32>
    %34 = arith.mulf %32, %33 : vector<8x64x64xf32>
    %35 = vector.shape_cast %18 : vector<64x64xf32> to vector<1x64x64xf32>
    %36 = vector.broadcast %35 : vector<1x64x64xf32> to vector<8x64x64xf32>
    %37 = arith.addf %34, %36 : vector<8x64x64xf32>
    %cst_24 = arith.constant dense<0xFF800000> : vector<8x64xf32>
    %38 = vector.multi_reduction <maximumf>, %37, %cst_24 [2] : vector<8x64x64xf32> to vector<8x64xf32>
    %39 = vector.shape_cast %38 : vector<8x64xf32> to vector<8x64x1xf32>
    %40 = vector.broadcast %39 : vector<8x64x1xf32> to vector<8x64x64xf32>
    %41 = arith.subf %37, %40 : vector<8x64x64xf32>
    %42 = math.exp %41 : vector<8x64x64xf32>
    %cst_25 = arith.constant dense<0.000000e+00> : vector<8x64xf32>
    %43 = vector.multi_reduction <add>, %42, %cst_25 [2] : vector<8x64x64xf32> to vector<8x64xf32>
    %44 = vector.shape_cast %43 : vector<8x64xf32> to vector<8x64x1xf32>
    %45 = vector.broadcast %44 : vector<8x64x1xf32> to vector<8x64x64xf32>
    %46 = arith.divf %42, %45 : vector<8x64x64xf32>
    %47 = arith.truncf %46 : vector<8x64x64xf32> to vector<8x64x64xbf16>
    "tpu.trace_start"() <{level = 10 : i32, message = "nst,ntd->nsd"}> : () -> ()
    %cst_26 = arith.constant dense<0.000000e+00> : vector<8x64x128xf32>
    %48 = tpu.matmul %47, %31, %cst_26 {dimension_numbers = #tpu.dot_dimension_numbers<[2], [1], [1], [2], [0, 0, 0, 1, 1, 2], [0], [0]>} : vector<8x64x64xbf16>, vector<8x64x128xbf16>, vector<8x64x128xf32> -> vector<8x64x128xf32>
    "tpu.trace_stop"() : () -> ()
    %49 = vector.shape_cast %48 : vector<8x64x128xf32> to vector<512x128xf32>
    %50 = arith.truncf %49 : vector<512x128xf32> to vector<512x128xbf16>
    %cst_27 = arith.constant dense<0.000000e+00> : vector<512x128xf32>
    %51 = tpu.matmul %50, %15, %cst_27 {dimension_numbers = #tpu.dot_dimension_numbers<[1], [0], [0], [1], [0, 0, 1, 1], [], []>} : vector<512x128xbf16>, vector<128x128xbf16>, vector<512x128xf32> -> vector<512x128xf32>
    %52 = vector.broadcast %17 : vector<1x128xf32> to vector<512x128xf32>
    %53 = arith.addf %51, %52 : vector<512x128xf32>
    %54 = vector.shape_cast %53 : vector<512x128xf32> to vector<64x8x128xf32>
    %cst_28 = arith.constant dense<0.000000e+00> : vector<64x128xf32>
    %55 = vector.multi_reduction <add>, %54, %cst_28 [1] : vector<64x8x128xf32> to vector<64x128xf32>
    %cst_29 = arith.constant 1.250000e-01 : f32
    %56 = vector.broadcast %cst_29 : f32 to vector<64x128xf32>
    %57 = arith.mulf %55, %56 : vector<64x128xf32>
    %58 = vector.shape_cast %57 : vector<64x128xf32> to vector<8x8x128xf32>
    %c0_30 = arith.constant 0 : index
    %c0_31 = arith.constant 0 : index
    %59 = vector.load %arg4[%c0_30, %c0_31] : memref<1x8xf32, #tpu.memory_space<vmem>>, vector<1x8xf32>
    %60 = vector.shape_cast %59 : vector<1x8xf32> to vector<1x1x8xf32>
    %61 = tpu.iota {dimensions = array<i32: 1>} : vector<1x8x1xi32>
    %c0_32 = arith.constant 0 : index
    %c0_33 = arith.constant 0 : index
    %c0_34 = arith.constant 0 : index
    %62 = vector.load %arg2[%c0_32, %c0_33, %c0_34] : memref<1x8x128xf32, #tpu.memory_space<vmem>>, vector<1x8x128xf32>
    %63 = vector.shape_cast %62 : vector<1x8x128xf32> to vector<8x128xf32>
    %c0_i32 = arith.constant 0 : i32
    %64 = vector.broadcast %c0_i32 : i32 to vector<1x8x1xi32>
    %65 = arith.cmpi eq, %61, %64 : vector<1x8x1xi32>
    %66 = vector.shape_cast %63 : vector<8x128xf32> to vector<8x1x128xf32>
    %67 = vector.shape_cast %65 : vector<1x8x1xi1> to vector<1x8x1xi1>
    %68 = vector.broadcast %67 : vector<1x8x1xi1> to vector<8x8x128xi1>
    %69 = vector.shape_cast %66 : vector<8x1x128xf32> to vector<8x1x128xf32>
    %70 = vector.broadcast %69 : vector<8x1x128xf32> to vector<8x8x128xf32>
    %71 = arith.select %68, %70, %58 : vector<8x8x128xi1>, vector<8x8x128xf32>
    %72 = vector.shape_cast %71 : vector<8x8x128xf32> to vector<64x128xf32>
    %c1 = arith.constant 1 : index
    %c0_35 = arith.constant 0 : index
    %c0_36 = arith.constant 0 : index
    %73 = vector.load %arg7[%c1, %c0_35, %c0_36] : memref<4x128x384xbf16, #tpu.memory_space<vmem>>, vector<1x128x384xbf16>
    %74 = vector.shape_cast %73 : vector<1x128x384xbf16> to vector<128x384xbf16>
    %c1_37 = arith.constant 1 : index
    %c0_38 = arith.constant 0 : index
    %c0_39 = arith.constant 0 : index
    %75 = vector.load %arg8[%c1_37, %c0_38, %c0_39] : memref<4x1x384xf32, #tpu.memory_space<vmem>>, vector<1x1x384xf32>
    %76 = vector.shape_cast %75 : vector<1x1x384xf32> to vector<1x384xf32>
    %c1_40 = arith.constant 1 : index
    %c0_41 = arith.constant 0 : index
    %c0_42 = arith.constant 0 : index
    %77 = vector.load %arg9[%c1_40, %c0_41, %c0_42] : memref<4x128x128xbf16, #tpu.memory_space<vmem>>, vector<1x128x128xbf16>
    %78 = vector.shape_cast %77 : vector<1x128x128xbf16> to vector<128x128xbf16>
    %c1_43 = arith.constant 1 : index
    %c0_44 = arith.constant 0 : index
    %c0_45 = arith.constant 0 : index
    %79 = vector.load %arg10[%c1_43, %c0_44, %c0_45] : memref<4x1x128xf32, #tpu.memory_space<vmem>>, vector<1x1x128xf32>
    %80 = vector.shape_cast %79 : vector<1x1x128xf32> to vector<1x128xf32>
    %81 = arith.truncf %72 : vector<64x128xf32> to vector<64x128xbf16>
    %cst_46 = arith.constant dense<0.000000e+00> : vector<64x384xf32>
    %82 = tpu.matmul %81, %74, %cst_46 {dimension_numbers = #tpu.dot_dimension_numbers<[1], [0], [0], [1], [0, 0, 1, 1], [], []>} : vector<64x128xbf16>, vector<128x384xbf16>, vector<64x384xf32> -> vector<64x384xf32>
    %83 = vector.broadcast %76 : vector<1x384xf32> to vector<64x384xf32>
    %84 = arith.addf %82, %83 : vector<64x384xf32>
    %85 = vector.extract_strided_slice %84 {offsets = [0, 0], sizes = [64, 128], strides = [1, 1]} : vector<64x384xf32> to vector<64x128xf32>
    %86 = vector.shape_cast %85 : vector<64x128xf32> to vector<8x8x128xf32>
    %87 = arith.truncf %86 : vector<8x8x128xf32> to vector<8x8x128xbf16>
    %88 = vector.extract_strided_slice %84 {offsets = [0, 128], sizes = [64, 128], strides = [1, 1]} : vector<64x384xf32> to vector<64x128xf32>
    %89 = vector.shape_cast %88 : vector<64x128xf32> to vector<8x8x128xf32>
    %90 = arith.truncf %89 : vector<8x8x128xf32> to vector<8x8x128xbf16>
    %91 = vector.extract_strided_slice %84 {offsets = [0, 256], sizes = [64, 128], strides = [1, 1]} : vector<64x384xf32> to vector<64x128xf32>
    %92 = vector.shape_cast %91 : vector<64x128xf32> to vector<8x8x128xf32>
    %93 = arith.truncf %92 : vector<8x8x128xf32> to vector<8x8x128xbf16>
    "tpu.trace_start"() <{level = 10 : i32, message = "nsd,ntd->nst"}> : () -> ()
    %cst_47 = arith.constant dense<0.000000e+00> : vector<8x8x8xf32>
    %94 = tpu.matmul %87, %90, %cst_47 {dimension_numbers = #tpu.dot_dimension_numbers<[2], [2], [1], [1], [0, 0, 0, 1, 1, 1], [0], [0]>} : vector<8x8x128xbf16>, vector<8x8x128xbf16>, vector<8x8x8xf32> -> vector<8x8x8xf32>
    "tpu.trace_stop"() : () -> ()
    %cst_48 = arith.constant 0.176776692 : f32
    %95 = vector.broadcast %cst_48 : f32 to vector<8x8x8xf32>
    %96 = arith.mulf %94, %95 : vector<8x8x8xf32>
    %97 = vector.broadcast %60 : vector<1x1x8xf32> to vector<8x8x8xf32>
    %98 = arith.addf %96, %97 : vector<8x8x8xf32>
    %cst_49 = arith.constant dense<0xFF800000> : vector<8x8xf32>
    %99 = vector.multi_reduction <maximumf>, %98, %cst_49 [2] : vector<8x8x8xf32> to vector<8x8xf32>
    %100 = vector.shape_cast %99 : vector<8x8xf32> to vector<8x8x1xf32>
    %101 = vector.broadcast %100 : vector<8x8x1xf32> to vector<8x8x8xf32>
    %102 = arith.subf %98, %101 : vector<8x8x8xf32>
    %103 = math.exp %102 : vector<8x8x8xf32>
    %cst_50 = arith.constant dense<0.000000e+00> : vector<8x8xf32>
    %104 = vector.multi_reduction <add>, %103, %cst_50 [2] : vector<8x8x8xf32> to vector<8x8xf32>
    %105 = vector.shape_cast %104 : vector<8x8xf32> to vector<8x8x1xf32>
    %106 = vector.broadcast %105 : vector<8x8x1xf32> to vector<8x8x8xf32>
    %107 = arith.divf %103, %106 : vector<8x8x8xf32>
    %108 = arith.truncf %107 : vector<8x8x8xf32> to vector<8x8x8xbf16>
    "tpu.trace_start"() <{level = 10 : i32, message = "nst,ntd->nsd"}> : () -> ()
    %cst_51 = arith.constant dense<0.000000e+00> : vector<8x8x128xf32>
    %109 = tpu.matmul %108, %93, %cst_51 {dimension_numbers = #tpu.dot_dimension_numbers<[2], [1], [1], [2], [0, 0, 0, 1, 1, 2], [0], [0]>} : vector<8x8x8xbf16>, vector<8x8x128xbf16>, vector<8x8x128xf32> -> vector<8x8x128xf32>
    "tpu.trace_stop"() : () -> ()
    %110 = vector.shape_cast %109 : vector<8x8x128xf32> to vector<64x128xf32>
    %111 = arith.truncf %110 : vector<64x128xf32> to vector<64x128xbf16>
    %cst_52 = arith.constant dense<0.000000e+00> : vector<64x128xf32>
    %112 = tpu.matmul %111, %78, %cst_52 {dimension_numbers = #tpu.dot_dimension_numbers<[1], [0], [0], [1], [0, 0, 1, 1], [], []>} : vector<64x128xbf16>, vector<128x128xbf16>, vector<64x128xf32> -> vector<64x128xf32>
    %113 = vector.broadcast %80 : vector<1x128xf32> to vector<64x128xf32>
    %114 = arith.addf %112, %113 : vector<64x128xf32>
    %115 = vector.shape_cast %114 : vector<64x128xf32> to vector<8x8x128xf32>
    %116 = tpu.iota {dimensions = array<i32: 1>} : vector<1x8x1xi32>
    %c7_i32 = arith.constant 7 : i32
    %117 = vector.broadcast %c7_i32 : i32 to vector<1x8x1xi32>
    %118 = arith.cmpi slt, %116, %117 : vector<1x8x1xi32>
    %cst_53 = arith.constant 0.000000e+00 : f32
    %119 = vector.shape_cast %118 : vector<1x8x1xi1> to vector<1x8x1xi1>
    %120 = vector.broadcast %119 : vector<1x8x1xi1> to vector<8x8x128xi1>
    %121 = vector.broadcast %cst_53 : f32 to vector<8x8x128xf32>
    %122 = arith.select %120, %115, %121 : vector<8x8x128xi1>, vector<8x8x128xf32>
    %cst_54 = arith.constant dense<0.000000e+00> : vector<8x128xf32>
    %123 = vector.multi_reduction <add>, %122, %cst_54 [1] : vector<8x8x128xf32> to vector<8x128xf32>
    %cst_55 = arith.constant 0.142857149 : f32
    %124 = vector.broadcast %cst_55 : f32 to vector<8x128xf32>
    %125 = arith.mulf %123, %124 : vector<8x128xf32>
    %c0_i32_56 = arith.constant 0 : i32
    %126 = vector.broadcast %c0_i32_56 : i32 to vector<1x8x1xi32>
    %127 = arith.cmpi eq, %61, %126 : vector<1x8x1xi32>
    %128 = vector.shape_cast %125 : vector<8x128xf32> to vector<8x1x128xf32>
    %129 = vector.shape_cast %127 : vector<1x8x1xi1> to vector<1x8x1xi1>
    %130 = vector.broadcast %129 : vector<1x8x1xi1> to vector<8x8x128xi1>
    %131 = vector.shape_cast %128 : vector<8x1x128xf32> to vector<8x1x128xf32>
    %132 = vector.broadcast %131 : vector<8x1x128xf32> to vector<8x8x128xf32>
    %133 = arith.select %130, %132, %58 : vector<8x8x128xi1>, vector<8x8x128xf32>
    %134 = tpu.transpose %133, [1, 0, 2] : vector<8x8x128xf32> -> vector<8x8x128xf32>
    %135 = vector.shape_cast %134 : vector<8x8x128xf32> to vector<64x128xf32>
    %c2 = arith.constant 2 : index
    %c0_57 = arith.constant 0 : index
    %c0_58 = arith.constant 0 : index
    %136 = vector.load %arg7[%c2, %c0_57, %c0_58] : memref<4x128x384xbf16, #tpu.memory_space<vmem>>, vector<1x128x384xbf16>
    %137 = vector.shape_cast %136 : vector<1x128x384xbf16> to vector<128x384xbf16>
    %c2_59 = arith.constant 2 : index
    %c0_60 = arith.constant 0 : index
    %c0_61 = arith.constant 0 : index
    %138 = vector.load %arg8[%c2_59, %c0_60, %c0_61] : memref<4x1x384xf32, #tpu.memory_space<vmem>>, vector<1x1x384xf32>
    %139 = vector.shape_cast %138 : vector<1x1x384xf32> to vector<1x384xf32>
    %c2_62 = arith.constant 2 : index
    %c0_63 = arith.constant 0 : index
    %c0_64 = arith.constant 0 : index
    %140 = vector.load %arg9[%c2_62, %c0_63, %c0_64] : memref<4x128x128xbf16, #tpu.memory_space<vmem>>, vector<1x128x128xbf16>
    %141 = vector.shape_cast %140 : vector<1x128x128xbf16> to vector<128x128xbf16>
    %c2_65 = arith.constant 2 : index
    %c0_66 = arith.constant 0 : index
    %c0_67 = arith.constant 0 : index
    %142 = vector.load %arg10[%c2_65, %c0_66, %c0_67] : memref<4x1x128xf32, #tpu.memory_space<vmem>>, vector<1x1x128xf32>
    %143 = vector.shape_cast %142 : vector<1x1x128xf32> to vector<1x128xf32>
    %144 = arith.truncf %135 : vector<64x128xf32> to vector<64x128xbf16>
    %cst_68 = arith.constant dense<0.000000e+00> : vector<64x384xf32>
    %145 = tpu.matmul %144, %137, %cst_68 {dimension_numbers = #tpu.dot_dimension_numbers<[1], [0], [0], [1], [0, 0, 1, 1], [], []>} : vector<64x128xbf16>, vector<128x384xbf16>, vector<64x384xf32> -> vector<64x384xf32>
    %146 = vector.broadcast %139 : vector<1x384xf32> to vector<64x384xf32>
    %147 = arith.addf %145, %146 : vector<64x384xf32>
    %148 = vector.extract_strided_slice %147 {offsets = [0, 0], sizes = [64, 128], strides = [1, 1]} : vector<64x384xf32> to vector<64x128xf32>
    %149 = vector.shape_cast %148 : vector<64x128xf32> to vector<8x8x128xf32>
    %150 = arith.truncf %149 : vector<8x8x128xf32> to vector<8x8x128xbf16>
    %151 = vector.extract_strided_slice %147 {offsets = [0, 128], sizes = [64, 128], strides = [1, 1]} : vector<64x384xf32> to vector<64x128xf32>
    %152 = vector.shape_cast %151 : vector<64x128xf32> to vector<8x8x128xf32>
    %153 = arith.truncf %152 : vector<8x8x128xf32> to vector<8x8x128xbf16>
    %154 = vector.extract_strided_slice %147 {offsets = [0, 256], sizes = [64, 128], strides = [1, 1]} : vector<64x384xf32> to vector<64x128xf32>
    %155 = vector.shape_cast %154 : vector<64x128xf32> to vector<8x8x128xf32>
    %156 = arith.truncf %155 : vector<8x8x128xf32> to vector<8x8x128xbf16>
    "tpu.trace_start"() <{level = 10 : i32, message = "nsd,ntd->nst"}> : () -> ()
    %cst_69 = arith.constant dense<0.000000e+00> : vector<8x8x8xf32>
    %157 = tpu.matmul %150, %153, %cst_69 {dimension_numbers = #tpu.dot_dimension_numbers<[2], [2], [1], [1], [0, 0, 0, 1, 1, 1], [0], [0]>} : vector<8x8x128xbf16>, vector<8x8x128xbf16>, vector<8x8x8xf32> -> vector<8x8x8xf32>
    "tpu.trace_stop"() : () -> ()
    %cst_70 = arith.constant 0.176776692 : f32
    %158 = vector.broadcast %cst_70 : f32 to vector<8x8x8xf32>
    %159 = arith.mulf %157, %158 : vector<8x8x8xf32>
    %cst_71 = arith.constant 0.000000e+00 : f32
    %160 = vector.broadcast %cst_71 : f32 to vector<8x8x8xf32>
    %161 = arith.addf %159, %160 : vector<8x8x8xf32>
    %cst_72 = arith.constant dense<0xFF800000> : vector<8x8xf32>
    %162 = vector.multi_reduction <maximumf>, %161, %cst_72 [2] : vector<8x8x8xf32> to vector<8x8xf32>
    %163 = vector.shape_cast %162 : vector<8x8xf32> to vector<8x8x1xf32>
    %164 = vector.broadcast %163 : vector<8x8x1xf32> to vector<8x8x8xf32>
    %165 = arith.subf %161, %164 : vector<8x8x8xf32>
    %166 = math.exp %165 : vector<8x8x8xf32>
    %cst_73 = arith.constant dense<0.000000e+00> : vector<8x8xf32>
    %167 = vector.multi_reduction <add>, %166, %cst_73 [2] : vector<8x8x8xf32> to vector<8x8xf32>
    %168 = vector.shape_cast %167 : vector<8x8xf32> to vector<8x8x1xf32>
    %169 = vector.broadcast %168 : vector<8x8x1xf32> to vector<8x8x8xf32>
    %170 = arith.divf %166, %169 : vector<8x8x8xf32>
    %171 = arith.truncf %170 : vector<8x8x8xf32> to vector<8x8x8xbf16>
    "tpu.trace_start"() <{level = 10 : i32, message = "nst,ntd->nsd"}> : () -> ()
    %cst_74 = arith.constant dense<0.000000e+00> : vector<8x8x128xf32>
    %172 = tpu.matmul %171, %156, %cst_74 {dimension_numbers = #tpu.dot_dimension_numbers<[2], [1], [1], [2], [0, 0, 0, 1, 1, 2], [0], [0]>} : vector<8x8x8xbf16>, vector<8x8x128xbf16>, vector<8x8x128xf32> -> vector<8x8x128xf32>
    "tpu.trace_stop"() : () -> ()
    %173 = vector.shape_cast %172 : vector<8x8x128xf32> to vector<64x128xf32>
    %174 = arith.truncf %173 : vector<64x128xf32> to vector<64x128xbf16>
    %cst_75 = arith.constant dense<0.000000e+00> : vector<64x128xf32>
    %175 = tpu.matmul %174, %141, %cst_75 {dimension_numbers = #tpu.dot_dimension_numbers<[1], [0], [0], [1], [0, 0, 1, 1], [], []>} : vector<64x128xbf16>, vector<128x128xbf16>, vector<64x128xf32> -> vector<64x128xf32>
    %176 = vector.broadcast %143 : vector<1x128xf32> to vector<64x128xf32>
    %177 = arith.addf %175, %176 : vector<64x128xf32>
    %178 = vector.shape_cast %177 : vector<64x128xf32> to vector<8x8x128xf32>
    %cst_76 = arith.constant dense<0.000000e+00> : vector<8x128xf32>
    %179 = vector.multi_reduction <add>, %178, %cst_76 [1] : vector<8x8x128xf32> to vector<8x128xf32>
    %cst_77 = arith.constant 1.250000e-01 : f32
    %180 = vector.broadcast %cst_77 : f32 to vector<8x128xf32>
    %181 = arith.mulf %179, %180 : vector<8x128xf32>
    %c3 = arith.constant 3 : index
    %c0_78 = arith.constant 0 : index
    %c0_79 = arith.constant 0 : index
    %182 = vector.load %arg7[%c3, %c0_78, %c0_79] : memref<4x128x384xbf16, #tpu.memory_space<vmem>>, vector<1x128x384xbf16>
    %183 = vector.shape_cast %182 : vector<1x128x384xbf16> to vector<128x384xbf16>
    %c3_80 = arith.constant 3 : index
    %c0_81 = arith.constant 0 : index
    %c0_82 = arith.constant 0 : index
    %184 = vector.load %arg8[%c3_80, %c0_81, %c0_82] : memref<4x1x384xf32, #tpu.memory_space<vmem>>, vector<1x1x384xf32>
    %185 = vector.shape_cast %184 : vector<1x1x384xf32> to vector<1x384xf32>
    %c3_83 = arith.constant 3 : index
    %c0_84 = arith.constant 0 : index
    %c0_85 = arith.constant 0 : index
    %186 = vector.load %arg9[%c3_83, %c0_84, %c0_85] : memref<4x128x128xbf16, #tpu.memory_space<vmem>>, vector<1x128x128xbf16>
    %187 = vector.shape_cast %186 : vector<1x128x128xbf16> to vector<128x128xbf16>
    %c3_86 = arith.constant 3 : index
    %c0_87 = arith.constant 0 : index
    %c0_88 = arith.constant 0 : index
    %188 = vector.load %arg10[%c3_86, %c0_87, %c0_88] : memref<4x1x128xf32, #tpu.memory_space<vmem>>, vector<1x1x128xf32>
    %189 = vector.shape_cast %188 : vector<1x1x128xf32> to vector<1x128xf32>
    %190 = arith.truncf %181 : vector<8x128xf32> to vector<8x128xbf16>
    %cst_89 = arith.constant dense<0.000000e+00> : vector<8x384xf32>
    %191 = tpu.matmul %190, %183, %cst_89 {dimension_numbers = #tpu.dot_dimension_numbers<[1], [0], [0], [1], [0, 0, 1, 1], [], []>} : vector<8x128xbf16>, vector<128x384xbf16>, vector<8x384xf32> -> vector<8x384xf32>
    %192 = vector.broadcast %185 : vector<1x384xf32> to vector<8x384xf32>
    %193 = arith.addf %191, %192 : vector<8x384xf32>
    %194 = vector.extract_strided_slice %193 {offsets = [0, 0], sizes = [8, 128], strides = [1, 1]} : vector<8x384xf32> to vector<8x128xf32>
    %195 = vector.shape_cast %194 : vector<8x128xf32> to vector<1x8x128xf32>
    %196 = arith.truncf %195 : vector<1x8x128xf32> to vector<1x8x128xbf16>
    %197 = vector.extract_strided_slice %193 {offsets = [0, 128], sizes = [8, 128], strides = [1, 1]} : vector<8x384xf32> to vector<8x128xf32>
    %198 = vector.shape_cast %197 : vector<8x128xf32> to vector<1x8x128xf32>
    %199 = arith.truncf %198 : vector<1x8x128xf32> to vector<1x8x128xbf16>
    %200 = vector.extract_strided_slice %193 {offsets = [0, 256], sizes = [8, 128], strides = [1, 1]} : vector<8x384xf32> to vector<8x128xf32>
    %201 = vector.shape_cast %200 : vector<8x128xf32> to vector<1x8x128xf32>
    %202 = arith.truncf %201 : vector<1x8x128xf32> to vector<1x8x128xbf16>
    "tpu.trace_start"() <{level = 10 : i32, message = "nsd,ntd->nst"}> : () -> ()
    %cst_90 = arith.constant dense<0.000000e+00> : vector<1x8x8xf32>
    %203 = tpu.matmul %196, %199, %cst_90 {dimension_numbers = #tpu.dot_dimension_numbers<[2], [2], [1], [1], [0, 0, 0, 1, 1, 1], [0], [0]>} : vector<1x8x128xbf16>, vector<1x8x128xbf16>, vector<1x8x8xf32> -> vector<1x8x8xf32>
    "tpu.trace_stop"() : () -> ()
    %cst_91 = arith.constant 0.176776692 : f32
    %204 = vector.broadcast %cst_91 : f32 to vector<1x8x8xf32>
    %205 = arith.mulf %203, %204 : vector<1x8x8xf32>
    %206 = vector.broadcast %60 : vector<1x1x8xf32> to vector<1x8x8xf32>
    %207 = arith.addf %205, %206 : vector<1x8x8xf32>
    %cst_92 = arith.constant dense<0xFF800000> : vector<1x8xf32>
    %208 = vector.multi_reduction <maximumf>, %207, %cst_92 [2] : vector<1x8x8xf32> to vector<1x8xf32>
    %209 = vector.shape_cast %208 : vector<1x8xf32> to vector<1x8x1xf32>
    %210 = vector.broadcast %209 : vector<1x8x1xf32> to vector<1x8x8xf32>
    %211 = arith.subf %207, %210 : vector<1x8x8xf32>
    %212 = math.exp %211 : vector<1x8x8xf32>
    %cst_93 = arith.constant dense<0.000000e+00> : vector<1x8xf32>
    %213 = vector.multi_reduction <add>, %212, %cst_93 [2] : vector<1x8x8xf32> to vector<1x8xf32>
    %214 = vector.shape_cast %213 : vector<1x8xf32> to vector<1x8x1xf32>
    %215 = vector.broadcast %214 : vector<1x8x1xf32> to vector<1x8x8xf32>
    %216 = arith.divf %212, %215 : vector<1x8x8xf32>
    %217 = arith.truncf %216 : vector<1x8x8xf32> to vector<1x8x8xbf16>
    "tpu.trace_start"() <{level = 10 : i32, message = "nst,ntd->nsd"}> : () -> ()
    %cst_94 = arith.constant dense<0.000000e+00> : vector<1x8x128xf32>
    %218 = tpu.matmul %217, %202, %cst_94 {dimension_numbers = #tpu.dot_dimension_numbers<[2], [1], [1], [2], [0, 0, 0, 1, 1, 2], [0], [0]>} : vector<1x8x8xbf16>, vector<1x8x128xbf16>, vector<1x8x128xf32> -> vector<1x8x128xf32>
    "tpu.trace_stop"() : () -> ()
    %219 = vector.shape_cast %218 : vector<1x8x128xf32> to vector<8x128xf32>
    %220 = arith.truncf %219 : vector<8x128xf32> to vector<8x128xbf16>
    %cst_95 = arith.constant dense<0.000000e+00> : vector<8x128xf32>
    %221 = tpu.matmul %220, %187, %cst_95 {dimension_numbers = #tpu.dot_dimension_numbers<[1], [0], [0], [1], [0, 0, 1, 1], [], []>} : vector<8x128xbf16>, vector<128x128xbf16>, vector<8x128xf32> -> vector<8x128xf32>
    %222 = vector.broadcast %189 : vector<1x128xf32> to vector<8x128xf32>
    %223 = arith.addf %221, %222 : vector<8x128xf32>
    %224 = vector.shape_cast %223 : vector<8x128xf32> to vector<1x8x128xf32>
    %225 = tpu.iota {dimensions = array<i32: 1>} : vector<1x8x1xi32>
    %c7_i32_96 = arith.constant 7 : i32
    %226 = vector.broadcast %c7_i32_96 : i32 to vector<1x8x1xi32>
    %227 = arith.cmpi slt, %225, %226 : vector<1x8x1xi32>
    %cst_97 = arith.constant 0.000000e+00 : f32
    %228 = vector.shape_cast %227 : vector<1x8x1xi1> to vector<1x8x1xi1>
    %229 = vector.broadcast %228 : vector<1x8x1xi1> to vector<1x8x128xi1>
    %230 = vector.broadcast %cst_97 : f32 to vector<1x8x128xf32>
    %231 = arith.select %229, %224, %230 : vector<1x8x128xi1>, vector<1x8x128xf32>
    %cst_98 = arith.constant dense<0.000000e+00> : vector<1x128xf32>
    %232 = vector.multi_reduction <add>, %231, %cst_98 [1] : vector<1x8x128xf32> to vector<1x128xf32>
    %cst_99 = arith.constant 0.142857149 : f32
    %233 = vector.broadcast %cst_99 : f32 to vector<1x128xf32>
    %234 = arith.mulf %232, %233 : vector<1x128xf32>
    %235 = arith.truncf %234 : vector<1x128xf32> to vector<1x128xbf16>
    %c0_100 = arith.constant 0 : index
    %c0_101 = arith.constant 0 : index
    %236 = vector.load %arg11[%c0_100, %c0_101] : memref<128x128xbf16, #tpu.memory_space<vmem>>, vector<128x128xbf16>
    %cst_102 = arith.constant dense<0.000000e+00> : vector<1x128xf32>
    %237 = tpu.matmul %235, %236, %cst_102 {dimension_numbers = #tpu.dot_dimension_numbers<[1], [0], [0], [1], [0, 0, 1, 1], [], []>} : vector<1x128xbf16>, vector<128x128xbf16>, vector<1x128xf32> -> vector<1x128xf32>
    %c0_103 = arith.constant 0 : index
    %c0_104 = arith.constant 0 : index
    %238 = vector.load %arg12[%c0_103, %c0_104] : memref<1x128xf32, #tpu.memory_space<vmem>>, vector<1x128xf32>
    %239 = arith.addf %237, %238 : vector<1x128xf32>
    %240 = vector.shape_cast %239 : vector<1x128xf32> to vector<1x1x128xf32>
    %c0_105 = arith.constant 0 : index
    %c0_106 = arith.constant 0 : index
    %c0_107 = arith.constant 0 : index
    %241 = vector.load %arg13[%c0_105, %c0_106, %c0_107] : memref<1x1x128xf32, #tpu.memory_space<vmem>>, vector<1x1x128xf32>
    tpu.vector_store %arg13[%c0_105, %c0_106, %c0_107], %240 {strides = array<i32>} : memref<1x1x128xf32, #tpu.memory_space<vmem>>, vector<1x1x128xf32>,
    return
  }
  func.func @transform_0(%arg0: i32) -> (i32, i32, i32) {
    %c0_i32 = arith.constant 0 : i32
    %c0_i32_0 = arith.constant 0 : i32
    %c0_i32_1 = arith.constant 0 : i32
    return %arg0, %c0_i32, %c0_i32_0 : i32, i32, i32
  }
  func.func @transform_1(%arg0: i32) -> (i32, i32, i32) {
    %c0_i32 = arith.constant 0 : i32
    %c0_i32_0 = arith.constant 0 : i32
    %c0_i32_1 = arith.constant 0 : i32
    return %arg0, %c0_i32, %c0_i32_0 : i32, i32, i32
  }
  func.func @transform_2(%arg0: i32) -> (i32, i32) {
    %c0_i32 = arith.constant 0 : i32
    %c0_i32_0 = arith.constant 0 : i32
    %c0_i32_1 = arith.constant 0 : i32
    return %c0_i32, %c0_i32_0 : i32, i32
  }
  func.func @transform_3(%arg0: i32) -> (i32, i32) {
    %c0_i32 = arith.constant 0 : i32
    %c0_i32_0 = arith.constant 0 : i32
    %c0_i32_1 = arith.constant 0 : i32
    return %c0_i32, %c0_i32_0 : i32, i32
  }
  func.func @transform_4(%arg0: i32) -> (i32, i32) {
    %c0_i32 = arith.constant 0 : i32
    %c0_i32_0 = arith.constant 0 : i32
    %c0_i32_1 = arith.constant 0 : i32
    return %c0_i32, %c0_i32_0 : i32, i32
  }
  func.func @transform_5(%arg0: i32) -> (i32, i32) {
    %c0_i32 = arith.constant 0 : i32
    %c0_i32_0 = arith.constant 0 : i32
    %c0_i32_1 = arith.constant 0 : i32
    return %c0_i32, %c0_i32_0 : i32, i32
  }
  func.func @transform_6(%arg0: i32) -> (i32, i32, i32) {
    %c0_i32 = arith.constant 0 : i32
    %c0_i32_0 = arith.constant 0 : i32
    %c0_i32_1 = arith.constant 0 : i32
    %c0_i32_2 = arith.constant 0 : i32
    return %c0_i32, %c0_i32_0, %c0_i32_1 : i32, i32, i32
  }
  func.func @transform_7(%arg0: i32) -> (i32, i32, i32) {
    %c0_i32 = arith.constant 0 : i32
    %c0_i32_0 = arith.constant 0 : i32
    %c0_i32_1 = arith.constant 0 : i32
    %c0_i32_2 = arith.constant 0 : i32
    return %c0_i32, %c0_i32_0, %c0_i32_1 : i32, i32, i32
  }
  func.func @transform_8(%arg0: i32) -> (i32, i32, i32) {
    %c0_i32 = arith.constant 0 : i32
    %c0_i32_0 = arith.constant 0 : i32
    %c0_i32_1 = arith.constant 0 : i32
    %c0_i32_2 = arith.constant 0 : i32
    return %c0_i32, %c0_i32_0, %c0_i32_1 : i32, i32, i32
  }
  func.func @transform_9(%arg0: i32) -> (i32, i32, i32) {
    %c0_i32 = arith.constant 0 : i32
    %c0_i32_0 = arith.constant 0 : i32
    %c0_i32_1 = arith.constant 0 : i32
    %c0_i32_2 = arith.constant 0 : i32
    return %c0_i32, %c0_i32_0, %c0_i32_1 : i32, i32, i32
  }
  func.func @transform_10(%arg0: i32) -> (i32, i32) {
    %c0_i32 = arith.constant 0 : i32
    %c0_i32_0 = arith.constant 0 : i32
    %c0_i32_1 = arith.constant 0 : i32
    return %c0_i32, %c0_i32_0 : i32, i32
  }
  func.func @transform_11(%arg0: i32) -> (i32, i32) {
    %c0_i32 = arith.constant 0 : i32
    %c0_i32_0 = arith.constant 0 : i32
    %c0_i32_1 = arith.constant 0 : i32
    return %c0_i32, %c0_i32_0 : i32, i32
  }
  func.func @transform_12(%arg0: i32) -> (i32, i32, i32) {
    %c0_i32 = arith.constant 0 : i32
    %c0_i32_0 = arith.constant 0 : i32
    %c0_i32_1 = arith.constant 0 : i32
    return %arg0, %c0_i32, %c0_i32_0 : i32, i32, i32
  }
}

</mosaic_0001>

<bundles_post_ra>
// kernel: han_forward.1
= control target key start
LH: loop header
LB: loop body
LE: loop exit
PB: predicated region body
PF: predicated region fallthrough
CT: control target
= control target key end

     0   :  { %s13747_s0 = inlined_call_operand.vmem [shape: f32[2,512,4], index: 0, kind: input, shape index: {}]   ;;  %s13748_s1 = inlined_call_operand.vmem [shape: f32[2,8,128], index: 1, kind: input, shape index: {}]   ;;  %s13749_s2 = inlined_call_operand.vmem [shape: f32[64,64], index: 2, kind: input, shape index: {}]   ;;  %s13750_s3 = inlined_call_operand.vmem [shape: f32[1,8], index: 3, kind: input, shape index: {}]   ;;  %s13751_s4 = inlined_call_operand.vmem [shape: bf16[4,128], index: 4, kind: input, shape index: {}]   ;;  %s13752_s5 = inlined_call_operand.vmem [shape: f32[1,128], index: 5, kind: input, shape index: {}]   ;;  %s13753_s6 = inlined_call_operand.vmem [shape: bf16[4,128,384], index: 6, kind: input, shape index: {}]   ;;  %s13754_s7 = inlined_call_operand.vmem [shape: f32[4,1,384], index: 7, kind: input, shape index: {}]   ;;  %s13755_s8 = inlined_call_operand.vmem [shape: bf16[4,128,128], index: 8, kind: input, shape index: {}]   ;;  %s13756_s9 = inlined_call_operand.vmem [shape: f32[4,1,128], index: 9, kind: input, shape index: {}]   ;;  %s13757_s10 = inlined_call_operand.vmem [shape: bf16[128,128], index: 10, kind: input, shape index: {}]   ;;  %s13758_s11 = inlined_call_operand.vmem [shape: f32[1,128], index: 11, kind: input, shape index: {}]   ;;  %s13759_s12 = inlined_call_operand.hbm [shape: f32[2,1,128], index: 12, kind: output, shape index: {}]  }
   0x1   :  { %13803 = sst [smem:[#allocation64_spill]] %s13751_s4 }
   0x2   :  { %17 = vsyncpa [#allocation3], 0 }
   0x3   :  { %19 = vsyncpa [#allocation3 + $0x1], 0  ;;  %s10862_s21 = smov 0   ;;  %s10864_s22 = smov 0  }
   0x4   :  { %s10866_s23 = smov 0   ;;  %s10868_s24 = smov 0  }
   0x5 LB: > { %s10883_s25 = sadd.s32 4294967295, %s10788_s24   ;;  %s8577_s26 = sadd.s32 4294967294, %s10788_s24   ;;  %s10788_s24 = sphi %s10868_s24, %s13933_s24   ;;  %s10784_s23 = sphi %s10866_s23, %s13932_s23   ;;  %s10780_s22 = sphi %s10864_s22, %s13931_s22   ;;  %s10776_s21 = sphi %s10862_s21, %s13930_s21  }
   0x6   : > { %s10887_s27 = sadd.s32 1, %s10788_s24   ;;  %s294_s28 = sadd.s32 1, %s10784_s23 }
   0x7   : > { %s291_s29 = ssub.s32 %s10788_s24, %s10887_s27  ;;  %p304_p0 = scmp.ne.s32.totalorder %s10784_s23, %s10780_s22 }
   0x8   : > { %p292_p1 = scmp.eq.s32.totalorder %s291_s29, 0  ;;  %p305_p2 = scmp.eq.s32.totalorder %s10883_s25, 1 }
   0x9   : > { %p310_p3 = scmp.ne.s32.totalorder %s10780_s22, %s10776_s21  ;;  %p311_p4 = scmp.eq.s32.totalorder %s8577_s26, 1 }
   0xa   : > { %s10898_s30 = scalar_select %p292_p1, %s10784_s23, %s294_s28  }
   0xb   : > { %p10900_p5 = por %p305_p2, %p304_p0  ;;  %p10904_p6 = por %p311_p4, %p310_p3 }
   0xc   : > { %13804 = sst [smem:[#allocation5_spill]] %s10898_s30  ;;  %p8580_p7 = scmp.ge.s32.totalorder %s10788_s24, 1 }
   0xd   : > { %p374_p8 = scmp.lt.s32.totalorder %s10788_s24, 3 }
   0xf   : > { %p375_p9 = pnand %p8580_p7, %p374_p8 }
  0x11   : > { %378 = sbr.rel (%p375_p9) target bundleno = 5331 (0x14d3), region = 68 }
  0x16   : > { %s13807_s4 = sld [smem:[#allocation64_spill]]  ;;  %vm630_vm0 = vcmask 1041408   ;;  %p419_p10 = scmp.lt.s32.totalorder %s10883_s25, 1  ;;  %v10233_v2 = vld [vmem:[%s13753_s6 + $0xac] ss:$12 sps:$4 sm:$0xff]   ;;  %vm533_vm1 = vcmask 31744  }
  0x17   : > { %v10235_v3 = vld [vmem:[%s13753_s6 + $0xa8] ss:$12 sps:$4 sm:$0xff]   ;;  %1221 = vmatprep.subr.bf16.mxu1 %v10233_v2  ;;  %v10236_v4 = vld [vmem:[%s13753_s6 + $0xb0] ss:$12 sps:$4 sm:$0xff]   ;;  %v10240_v16 = vld [vmem:[%s13753_s6 + $0x98] ss:$12 sps:$4 sm:$0xff]  }
  0x18   : > { %s10921_s26 = scalar_select %p419_p10, %s10883_s25, 1  ;;  %v10237_v5 = vld [vmem:[%s13753_s6 + $0x94] ss:$12 sps:$4 sm:$0xff]   ;;  %1222 = vmatpush1.bf16.msra.mxu1 %v10235_v3  ;;  %v10239_v6 = vld [vmem:[%s13753_s6 + $0x90] ss:$12 sps:$4 sm:$0xff]   ;;  %vm2607_vm2 = vcmask 523264  }
  0x19   : > { %1223 = vmatprep.subr.bf16.mxu1 %v10237_v5  ;;  %v10241_v29 = vld [vmem:[%s13753_s6 + $0x7c] ss:$12 sps:$4 sm:$0xff]   ;;  %v10243_v32 = vld [vmem:[%s13753_s6 + $0x78] ss:$12 sps:$4 sm:$0xff]   ;;  %v10244_v34 = vld [vmem:[%s13753_s6 + $0x80] ss:$12 sps:$4 sm:$0xff]  }
  0x1a   : > { %v10245_v35 = vld [vmem:[%s13753_s6 + $0x64] ss:$12 sps:$4 sm:$0xff]   ;;  %v10247_v36 = vld [vmem:[%s13753_s6 + $0x60] ss:$12 sps:$4 sm:$0xff]   ;;  %v10248_v38 = vld [vmem:[%s13753_s6 + $0x68] ss:$12 sps:$4 sm:$0xff]  }
  0x1b   : > { %v10249_v40 = vld [vmem:[%s13753_s6 + $0x4c] ss:$12 sps:$4 sm:$0xff]   ;;  %v10251_v42 = vld [vmem:[%s13753_s6 + $0x48] ss:$12 sps:$4 sm:$0xff]   ;;  %v10252_v43 = vld [vmem:[%s13753_s6 + $0x50] ss:$12 sps:$4 sm:$0xff]  }
  0x1c   : > { %v525_v0 = vld [vmem:[%s13807_s4] sm:$0x3]  ;;  %s8960_s4 = sshll.u32 %s10921_s26, 9  ;;  %1224 = vmatpush1.bf16.msra.mxu1 %v10239_v6  ;;  %s8583_s29 = sshll.u32 %s10921_s26, 3  ;;  %vm4944_vm3 = vcmask 1041409   ;;  %vm4946_vm4 = vcmask 1042434  }
  0x1d   : > { %10187 = vmatprep.subr.msk.bf16.mxu0 %vm630_vm0, %v525_v0  ;;  %v632_v1 = vsel %vm630_vm0, %v525_v0, 0  ;;  %s10936_s30 = scalar_lea.vmem %s13747_s0, %s8960_s4  ;;  %1225 = vmatprep.subr.bf16.mxu1 %v10241_v29  ;;  %s427_s16 = scalar_lea.vmem %s13748_s1, %s8583_s29  ;;  %vm4948_vm5 = vcmask 1043459   ;;  %vm4950_vm6 = vcmask 1044484   ;;  %vm4952_vm7 = vcmask 1045509  }
  0x1e   : > { %9346 = vmatpush3.bf16.msra.mxu0 %v632_v1  ;;  %v429_v7 = vld [vmem:[%s10936_s30] sm:$0xff]  ;;  %v430_v8 = vld [vmem:[%s10936_s30 + $0x8] sm:$0xff]  ;;  %v431_v9 = vld [vmem:[%s10936_s30 + $0x10] sm:$0xff]  ;;  %vm4954_vm8 = vcmask 1046534   ;;  %vm4956_vm9 = vcmask 1047559   ;;  %vm10793_vm11 = vmmov 0  }
  0x1f   : > { %9411 = vmatprep.subr.bf16.mxu0 %v10236_v4  ;;  %v493_v10 = vpack.c.bf16 %v430_v8, %v429_v7  ;;  %v432_v11 = vld [vmem:[%s10936_s30 + $0x18] sm:$0xff]  ;;  %v433_v12 = vld [vmem:[%s10936_s30 + $0x20] sm:$0xff]  ;;  %v434_v13 = vld [vmem:[%s10936_s30 + $0x28] sm:$0xff]  ;;  %vm5829_vm12 = vcmask 1043456   ;;  %vm5729_vm13 = vcmask 64512   ;;  %s417_s29 = sand.u32 1, %s10780_s22  }
  0x20   : > { %v494_v14 = vpack.c.bf16 %v432_v11, %v431_v9  ;;  %v495_v15 = vpack.c.bf16 %v434_v13, %v433_v12  ;;  %v435_v17 = vld [vmem:[%s10936_s30 + $0x30] sm:$0xff]  ;;  %v436_v18 = vld [vmem:[%s10936_s30 + $0x38] sm:$0xff]  ;;  %v437_v19 = vld [vmem:[%s10936_s30 + $0x40] sm:$0xff]  ;;  %1226 = vmatpush1.bf16.msra.mxu1 %v10243_v32  ;;  %s418_s26 = scalar_lea.vmem [#allocation2], %s417_s29  ;;  %s8498_s4 = scalar_lea.sflag [#allocation3], %s417_s29 }
  0x21   : > { %9347 = vmatprep.mubr.msk.bf16.mxu0 %vm533_vm1, %v493_v10  ;;  %v438_v20 = vld [vmem:[%s10936_s30 + $0x48] sm:$0xff]  ;;  %v496_v21 = vpack.c.bf16 %v436_v18, %v435_v17  ;;  %v439_v23 = vld [vmem:[%s10936_s30 + $0x50] sm:$0xff]  ;;  %v440_v24 = vld [vmem:[%s10936_s30 + $0x58] sm:$0xff]  ;;  %1227 = vmatprep.subr.bf16.mxu1 %v10245_v35  ;;  %s8510_s17 = sshll.u32 %s418_s26, 4  ;;  %s13708_s17 = int_to_ptr.vmem [resolvable:$true] %s8510_s17 }
  0x22   : > { %9348 = vmatmul.mubr.msk.bf16.vlgmr.msra.gmra.mxu0 %vm533_vm1, %v494_v14  ;;  %v497_v22 = vpack.c.bf16 %v438_v20, %v437_v19  ;;  %v441_v25 = vld [vmem:[%s10936_s30 + $0x60] sm:$0xff]  ;;  %v442_v26 = vld [vmem:[%s10936_s30 + $0x68] sm:$0xff]  ;;  %v498_v27 = vpack.c.bf16 %v440_v24, %v439_v23  ;;  %v443_v30 = vld [vmem:[%s10936_s30 + $0x70] sm:$0xff]  ;;  %s10728_s28 = scalar_lea.vmem %s13708_s17, 16 }
  0x23   : > { %9351 = vmatprep.mubr.msk.bf16.mxu0 %vm533_vm1, %v495_v15  ;;  %9412 = vmatpush3.bf16.msra.mxu0 %v10236_v4  ;;  %v499_v28 = vpack.c.bf16 %v442_v26, %v441_v25  ;;  %v444_v31 = vld [vmem:[%s10936_s30 + $0x78] sm:$0xff]  ;;  %v445_v33 = vld [vmem:[%s10936_s30 + $0x80] sm:$0xff]  ;;  %v446_v37 = vld [vmem:[%s10936_s30 + $0x88] sm:$0xff]  ;;  %p10729_p11 = scmp.ne.s32.totalorder %s13708_s17, %s10728_s28 }
  0x24   : > { %9413 = vmatprep.subr.bf16.mxu0 %v10240_v16  ;;  %v500_v39 = vpack.c.bf16 %v444_v31, %v443_v30  ;;  %v501_v41 = vpack.c.bf16 %v446_v37, %v445_v33  ;;  %1228 = vmatpush1.bf16.msra.mxu1 %v10247_v36  ;;  %v447_v44 = vld [vmem:[%s10936_s30 + $0x90] sm:$0xff]  ;;  %v448_v45 = vld [vmem:[%s10936_s30 + $0x98] sm:$0xff]  ;;  %v449_v46 = vld [vmem:[%s10936_s30 + $0xa0] sm:$0xff]  ;;  %v13760_v30 = vmov 0  }
  0x25   : > { %1229 = vmatprep.subr.bf16.mxu1 %v10249_v40  ;;  %v450_v47 = vld [vmem:[%s10936_s30 + $0xa8] sm:$0xff]  ;;  %v502_v48 = vpack.c.bf16 %v448_v45, %v447_v44  ;;  %v451_v50 = vld [vmem:[%s10936_s30 + $0xb0] sm:$0xff]  ;;  %v452_v51 = vld [vmem:[%s10936_s30 + $0xb8] sm:$0xff]  ;;  %1253 = vmatprep.mubr.bf16.mxu1 %v13760_v30  ;;  %p10730_p12 = pnand %p10729_p11, %p10900_p5 }
  0x26   : > { %v503_v49 = vpack.c.bf16 %v450_v47, %v449_v46  ;;  %v453_v52 = vld [vmem:[%s10936_s30 + $0xc0] sm:$0xff]  ;;  %v454_v53 = vld [vmem:[%s10936_s30 + $0xc8] sm:$0xff]  ;;  %v504_v54 = vpack.c.bf16 %v452_v51, %v451_v50  ;;  %v455_v56 = vld [vmem:[%s10936_s30 + $0xd0] sm:$0xff] }
  0x27   : > { %9414 = vmatpush3.bf16.msra.mxu0 %v10240_v16  ;;  %v505_v55 = vpack.c.bf16 %v454_v53, %v453_v52  ;;  %v456_v57 = vld [vmem:[%s10936_s30 + $0xd8] sm:$0xff]  ;;  %v457_v58 = vld [vmem:[%s10936_s30 + $0xe0] sm:$0xff]  ;;  %v458_v59 = vld [vmem:[%s10936_s30 + $0xe8] sm:$0xff]  ;;  %p10731_p13 = pneg %p10730_p12 }
  0x28   : > { %9415 = vmatprep.subr.bf16.mxu0 %v10244_v34  ;;  %1230 = vmatpush1.bf16.msra.mxu1 %v10251_v42  ;;  %v506_v60 = vpack.c.bf16 %v456_v57, %v455_v56  ;;  %v507_v61 = vpack.c.bf16 %v458_v59, %v457_v58  ;;  %v459_v62 = vld [vmem:[%s10936_s30 + $0xf0] sm:$0xff]  ;;  %v460_v63 = vld [vmem:[%s10936_s30 + $0xf8] sm:$0xff]  ;;  %v461_v0 = vld [vmem:[%s10936_s30 + $0x100] sm:$0xff] }
  0x29   : > { %v462_v1 = vld [vmem:[%s10936_s30 + $0x108] sm:$0xff]  ;;  %v508_v2 = vpack.c.bf16 %v460_v63, %v459_v62  ;;  %v463_v4 = vld [vmem:[%s10936_s30 + $0x110] sm:$0xff]  ;;  %v464_v5 = vld [vmem:[%s10936_s30 + $0x118] sm:$0xff] }
  0x2a   : > { %9352 = vmatmul.mubr.msk.bf16.gmra.mxu0 %vm533_vm1, %v496_v21  ;;  %v509_v3 = vpack.c.bf16 %v462_v1, %v461_v0  ;;  %v465_v6 = vld [vmem:[%s10936_s30 + $0x120] sm:$0xff]  ;;  %v466_v7 = vld [vmem:[%s10936_s30 + $0x128] sm:$0xff]  ;;  %v510_v8 = vpack.c.bf16 %v464_v5, %v463_v4  ;;  %v467_v10 = vld [vmem:[%s10936_s30 + $0x130] sm:$0xff] }
  0x2b   : > { %9355 = vmatprep.mubr.msk.bf16.mxu0 %vm533_vm1, %v497_v22  ;;  %9416 = vmatpush3.bf16.msra.mxu0 %v10244_v34  ;;  %v511_v9 = vpack.c.bf16 %v466_v7, %v465_v6  ;;  %v10253_v11 = vld [vmem:[%s13753_s6 + $0x34] ss:$12 sps:$4 sm:$0xff]   ;;  %v468_v12 = vld [vmem:[%s10936_s30 + $0x138] sm:$0xff]  ;;  %v470_v16 = vld [vmem:[%s10936_s30 + $0x148] sm:$0xff] }
  0x2c   : > { %9417 = vmatprep.subr.bf16.mxu0 %v10248_v38  ;;  %v10255_v13 = vld [vmem:[%s13753_s6 + $0x30] ss:$12 sps:$4 sm:$0xff]   ;;  %v10256_v14 = vld [vmem:[%s13753_s6 + $0x38] ss:$12 sps:$4 sm:$0xff]   ;;  %1231 = vmatprep.subr.bf16.mxu1 %v10253_v11  ;;  %v512_v18 = vpack.c.bf16 %v468_v12, %v467_v10  ;;  %v10260_v20 = vld [vmem:[%s13753_s6 + $0x20] ss:$12 sps:$4 sm:$0xff]  }
  0x2d   : > { %v469_v15 = vld [vmem:[%s10936_s30 + $0x140] sm:$0xff]  ;;  %1232 = vmatpush1.bf16.msra.mxu1 %v10255_v13  ;;  %v10257_v17 = vld [vmem:[%s13753_s6 + $0x1c] ss:$12 sps:$4 sm:$0xff]   ;;  %v471_v22 = vld [vmem:[%s10936_s30 + $0x150] sm:$0xff] }
  0x2e   : > { %v10259_v19 = vld [vmem:[%s13753_s6 + $0x18] ss:$12 sps:$4 sm:$0xff]   ;;  %v513_v21 = vpack.c.bf16 %v470_v16, %v469_v15  ;;  %1233 = vmatprep.subr.bf16.mxu1 %v10257_v17  ;;  %v474_v26 = vld [vmem:[%s10936_s30 + $0x168] sm:$0xff]  ;;  %v475_v32 = vld [vmem:[%s10936_s30 + $0x170] sm:$0xff] }
  0x2f   : > { %9418 = vmatpush3.bf16.msra.mxu0 %v10248_v38  ;;  %v472_v23 = vld [vmem:[%s10936_s30 + $0x158] sm:$0xff]  ;;  %v10261_v24 = vld [vmem:[%s13753_s6 + $0x4] ss:$12 sps:$4 sm:$0xff]   ;;  %v478_v35 = vld [vmem:[%s10936_s30 + $0x188] sm:$0xff] }
  0x30   : > { %9419 = vmatprep.subr.bf16.mxu0 %v10252_v43  ;;  %v473_v25 = vld [vmem:[%s10936_s30 + $0x160] sm:$0xff]  ;;  %v514_v29 = vpack.c.bf16 %v472_v23, %v471_v22  ;;  %v476_v33 = vld [vmem:[%s10936_s30 + $0x178] sm:$0xff]  ;;  %v479_v38 = vld [vmem:[%s10936_s30 + $0x190] sm:$0xff] }
  0x31   : > { %1234 = vmatpush1.bf16.msra.mxu1 %v10259_v19  ;;  %v515_v31 = vpack.c.bf16 %v474_v26, %v473_v25  ;;  %v477_v34 = vld [vmem:[%s10936_s30 + $0x180] sm:$0xff]  ;;  %v516_v36 = vpack.c.bf16 %v476_v33, %v475_v32  ;;  %v483_v44 = vld [vmem:[%s10936_s30 + $0x1b0] sm:$0xff]  ;;  %v484_v45 = vld [vmem:[%s10936_s30 + $0x1b8] sm:$0xff] }
  0x32   : > { %9356 = vmatmul.mubr.msk.bf16.gmra.mxu0 %vm533_vm1, %v498_v27  ;;  %v10263_v27 = vld [vmem:[%s13753_s6] ss:$12 sps:$4 sm:$0xff]   ;;  %1235 = vmatprep.subr.bf16.mxu1 %v10261_v24  ;;  %v517_v37 = vpack.c.bf16 %v478_v35, %v477_v34  ;;  %v487_v50 = vld [vmem:[%s10936_s30 + $0x1d0] sm:$0xff]  ;;  %v488_v51 = vld [vmem:[%s10936_s30 + $0x1d8] sm:$0xff] }
  0x33   : > { %9359 = vmatprep.mubr.msk.bf16.mxu0 %vm533_vm1, %v499_v28  ;;  %9420 = vmatpush3.bf16.msra.mxu0 %v10252_v43  ;;  %v10264_v28 = vld [vmem:[%s13753_s6 + $0x8] ss:$12 sps:$4 sm:$0xff]   ;;  %v481_v40 = vld [vmem:[%s10936_s30 + $0x1a0] sm:$0xff]  ;;  %v492_v57 = vld [vmem:[%s10936_s30 + $0x1f8] sm:$0xff] }
  0x34   : > { %9421 = vmatprep.subr.bf16.mxu0 %v10256_v14  ;;  %v485_v46 = vld [vmem:[%s10936_s30 + $0x1c0] sm:$0xff]  ;;  %v486_v47 = vld [vmem:[%s10936_s30 + $0x1c8] sm:$0xff]  ;;  %v491_v56 = vld [vmem:[%s10936_s30 + $0x1f0] sm:$0xff] }
  0x35   : > { %1236 = vmatpush1.bf16.msra.mxu1 %v10263_v27  ;;  %v489_v52 = vld [vmem:[%s10936_s30 + $0x1e0] sm:$0xff]  ;;  %v490_v53 = vld [vmem:[%s10936_s30 + $0x1e8] sm:$0xff]  ;;  %v524_v58 = vpack.c.bf16 %v492_v57, %v491_v56 }
  0x37   : > { %9422 = vmatpush3.bf16.msra.mxu0 %v10256_v14 }
  0x38   : > { %9423 = vmatprep.subr.bf16.mxu0 %v10260_v20 }
  0x3a   : > { %9360 = vmatmul.mubr.msk.bf16.gmra.mxu0 %vm533_vm1, %v500_v39  ;;  %v480_v39 = vld [vmem:[%s10936_s30 + $0x198] sm:$0xff] }
  0x3b   : > { %9363 = vmatprep.mubr.msk.bf16.mxu0 %vm533_vm1, %v501_v41  ;;  %9424 = vmatpush3.bf16.msra.mxu0 %v10260_v20  ;;  %v482_v41 = vld [vmem:[%s10936_s30 + $0x1a8] sm:$0xff]  ;;  %v518_v42 = vpack.c.bf16 %v480_v39, %v479_v38 }
  0x3c   : > { %9425 = vmatprep.subr.bf16.mxu0 %v10264_v28  ;;  %v519_v43 = vpack.c.bf16 %v482_v41, %v481_v40 }
  0x3f   : > { %9426 = vmatpush3.bf16.msra.mxu0 %v10264_v28 }
  0x42   : > { %9364 = vmatmul.mubr.msk.bf16.gmra.mxu0 %vm533_vm1, %v502_v48  ;;  %v520_v48 = vpack.c.bf16 %v484_v45, %v483_v44 }
  0x43   : > { %9367 = vmatprep.mubr.msk.bf16.mxu0 %vm533_vm1, %v503_v49  ;;  %v521_v49 = vpack.c.bf16 %v486_v47, %v485_v46 }
  0x4a   : > { %9368 = vmatmul.mubr.msk.bf16.gmra.mxu0 %vm533_vm1, %v504_v54  ;;  %v522_v54 = vpack.c.bf16 %v488_v51, %v487_v50 }
  0x4b   : > { %9371 = vmatprep.mubr.msk.bf16.mxu0 %vm533_vm1, %v505_v55  ;;  %v523_v55 = vpack.c.bf16 %v490_v53, %v489_v52 }
  0x52   : > { %9372 = vmatmul.mubr.msk.bf16.gmra.mxu0 %vm533_vm1, %v506_v60 }
  0x53   : > { %9375 = vmatprep.mubr.msk.bf16.mxu0 %vm533_vm1, %v507_v61  ;;  %v11095_v61 = vld [vmem:[%s13752_s5] ss:$0 sm:$0xff] }
  0x5a   : > { %9376 = vmatmul.mubr.msk.bf16.gmra.mxu0 %vm533_vm1, %v508_v2 }
  0x5b   : > { %9379 = vmatprep.mubr.msk.bf16.mxu0 %vm533_vm1, %v509_v3 }
  0x62   : > { %9380 = vmatmul.mubr.msk.bf16.gmra.mxu0 %vm533_vm1, %v510_v8 }
  0x63   : > { %9383 = vmatprep.mubr.msk.bf16.mxu0 %vm533_vm1, %v511_v9 }
  0x6a   : > { %9384 = vmatmul.mubr.msk.bf16.gmra.mxu0 %vm533_vm1, %v512_v18 }
  0x6b   : > { %9387 = vmatprep.mubr.msk.bf16.mxu0 %vm533_vm1, %v513_v21 }
  0x72   : > { %9388 = vmatmul.mubr.msk.bf16.gmra.mxu0 %vm533_vm1, %v514_v29 }
  0x73   : > { %9391 = vmatprep.mubr.msk.bf16.mxu0 %vm533_vm1, %v515_v31 }
  0x7a   : > { %9392 = vmatmul.mubr.msk.bf16.gmra.mxu0 %vm533_vm1, %v516_v36 }
  0x7b   : > { %9395 = vmatprep.mubr.msk.bf16.mxu0 %vm533_vm1, %v517_v37 }
  0x82   : > { %9396 = vmatmul.mubr.msk.bf16.gmra.mxu0 %vm533_vm1, %v518_v42 }
  0x83   : > { %9399 = vmatprep.mubr.msk.bf16.mxu0 %vm533_vm1, %v519_v43 }
  0x8a   : > { %9400 = vmatmul.mubr.msk.bf16.gmra.mxu0 %vm533_vm1, %v520_v48 }
  0x8b   : > { %9403 = vmatprep.mubr.msk.bf16.mxu0 %vm533_vm1, %v521_v49 }
  0x92   : > { %9404 = vmatmul.mubr.msk.bf16.gmra.mxu0 %vm533_vm1, %v522_v54 }
  0x93   : > { %9407 = vmatprep.mubr.msk.bf16.mxu0 %vm533_vm1, %v523_v55 }
  0x9a   : > { %9408 = vmatmul.mubr.msk.bf16.gmra.mxu0 %vm533_vm1, %v524_v58 }
  0xe2   : > { %v9349_v59 = vpop.f32.mrf.mxu0 }
  0xe3   : > { %v677_v1 = vadd.f32 %v9349_v59, %v11095_v61 }
  0xe4   : > { %v668_v60 = vpop.f32.mrf.mxu0 }
  0xe5   : > { %v669_v63 = vadd.f32 %v11095_v61, %v668_v60  ;;  %v925_v8 = vmax.f32 %v677_v1, 0.0 }
  0xe6   : > { %v9350_v62 = vpop.f32.mrf.mxu0 }
  0xe7   : > { %v680_v0 = vadd.f32 %v9350_v62, %v11095_v61  ;;  %v923_v6 = vmax.f32 %v669_v63, 0.0 }
  0xe8   : > { %v671_v2 = vpop.f32.mrf.mxu0 }
  0xe9   : > { %v672_v3 = vadd.f32 %v11095_v61, %v671_v2  ;;  %v926_v4 = vmax.f32 %v680_v0, 0.0 }
  0xea   : > { %v9353_v5 = vpop.f32.mrf.mxu0 }
  0xeb   : > { %v924_v7 = vmax.f32 %v672_v3, 0.0  ;;  %v693_v9 = vadd.f32 %v9353_v5, %v11095_v61  ;;  %v1046_v13 = vpack.c.bf16 %v926_v4, %v925_v8 }
  0xec   : > { %v684_v10 = vpop.f32.mrf.mxu0 }
  0xed   : > { %v685_v11 = vadd.f32 %v11095_v61, %v684_v10  ;;  %v1045_v12 = vpack.c.bf16 %v924_v7, %v923_v6  ;;  %v929_v16 = vmax.f32 %v693_v9, 0.0 }
  0xee   : > { %v9354_v14 = vpop.f32.mrf.mxu0 }
  0xef   : > { %v696_v15 = vadd.f32 %v9354_v14, %v11095_v61  ;;  %1254 = vmatmul.mubr.bf16.vlgmr.msra.gmra.mxu1 %v1045_v12  ;;  %9427 = vmatprep.mubr.bf16.mxu0 %v1045_v12  ;;  %v927_v18 = vmax.f32 %v685_v11, 0.0 }
  0xf0   : > { %v687_v17 = vpop.f32.mrf.mxu0  ;;  %9428 = vmatmul.mubr.bf16.vlgmr.msra.gmra.mxu0 %v1046_v13  ;;  %1263 = vmatprep.mubr.bf16.mxu1 %v13760_v30 }
  0xf1   : > { %v930_v19 = vmax.f32 %v696_v15, 0.0  ;;  %v688_v20 = vadd.f32 %v11095_v61, %v687_v17 }
  0xf2   : > { %v9357_v21 = vpop.f32.mrf.mxu0 }
  0xf3   : > { %v928_v22 = vmax.f32 %v688_v20, 0.0  ;;  %v1048_v23 = vpack.c.bf16 %v930_v19, %v929_v16  ;;  %v709_v24 = vadd.f32 %v9357_v21, %v11095_v61 }
  0xf4   : > { %v700_v25 = vpop.f32.mrf.mxu0 }
  0xf5   : > { %v701_v26 = vadd.f32 %v11095_v61, %v700_v25  ;;  %v1047_v27 = vpack.c.bf16 %v928_v22, %v927_v18  ;;  %v933_v31 = vmax.f32 %v709_v24, 0.0 }
  0xf6   : > { %v9358_v28 = vpop.f32.mrf.mxu0 }
  0xf7   : > { %1264 = vmatmul.mubr.bf16.gmra.mxu1 %v1046_v13  ;;  %9431 = vmatprep.mubr.bf16.mxu0 %v1047_v27  ;;  %v712_v29 = vadd.f32 %v9358_v28, %v11095_v61  ;;  %v931_v33 = vmax.f32 %v701_v26, 0.0 }
  0xf8   : > { %9432 = vmatmul.mubr.bf16.gmra.mxu0 %v1048_v23  ;;  %v703_v32 = vpop.f32.mrf.mxu0  ;;  %1273 = vmatprep.mubr.bf16.mxu1 %v13760_v30 }
  0xf9   : > { %v934_v34 = vmax.f32 %v712_v29, 0.0  ;;  %v704_v35 = vadd.f32 %v11095_v61, %v703_v32 }
  0xfa   : > { %v9361_v36 = vpop.f32.mrf.mxu0 }
  0xfb   : > { %v932_v37 = vmax.f32 %v704_v35, 0.0  ;;  %v1050_v38 = vpack.c.bf16 %v934_v34, %v933_v31  ;;  %v725_v39 = vadd.f32 %v9361_v36, %v11095_v61 }
  0xfc   : > { %v716_v40 = vpop.f32.mrf.mxu0 }
  0xfd   : > { %v1049_v41 = vpack.c.bf16 %v932_v37, %v931_v33  ;;  %v717_v42 = vadd.f32 %v11095_v61, %v716_v40  ;;  %v937_v45 = vmax.f32 %v725_v39, 0.0 }
  0xfe   : > { %v9362_v43 = vpop.f32.mrf.mxu0 }
  0xff   : > { %1274 = vmatmul.mubr.bf16.gmra.mxu1 %v1047_v27  ;;  %9435 = vmatprep.mubr.bf16.mxu0 %v1049_v41  ;;  %v728_v44 = vadd.f32 %v9362_v43, %v11095_v61  ;;  %v935_v47 = vmax.f32 %v717_v42, 0.0 }
 0x100   : > { %9436 = vmatmul.mubr.bf16.gmra.mxu0 %v1050_v38  ;;  %1283 = vmatprep.mubr.bf16.mxu1 %v13760_v30  ;;  %v719_v46 = vpop.f32.mrf.mxu0 }
 0x101   : > { %v938_v48 = vmax.f32 %v728_v44, 0.0  ;;  %v720_v49 = vadd.f32 %v11095_v61, %v719_v46 }
 0x102   : > { %v9365_v50 = vpop.f32.mrf.mxu0 }
 0x103   : > { %v936_v51 = vmax.f32 %v720_v49, 0.0  ;;  %v11116_v52 = vpack.c.bf16 %v938_v48, %v937_v45  ;;  %v741_v53 = vadd.f32 %v9365_v50, %v11095_v61 }
 0x104   : > { %v732_v54 = vpop.f32.mrf.mxu0 }
 0x105   : > { %v1051_v55 = vpack.c.bf16 %v936_v51, %v935_v47  ;;  %v733_v56 = vadd.f32 %v11095_v61, %v732_v54  ;;  %v941_v59 = vmax.f32 %v741_v53, 0.0 }
 0x106   : > { %v9366_v57 = vpop.f32.mrf.mxu0 }
 0x107   : > { %1284 = vmatmul.mubr.bf16.gmra.mxu1 %v1048_v23  ;;  %9439 = vmatprep.mubr.bf16.mxu0 %v1051_v55  ;;  %v744_v58 = vadd.f32 %v9366_v57, %v11095_v61  ;;  %v939_v62 = vmax.f32 %v733_v56, 0.0 }
 0x108   : > { %1293 = vmatprep.mubr.bf16.mxu1 %v13760_v30  ;;  %9440 = vmatmul.mubr.bf16.gmra.mxu0 %v11116_v52  ;;  %v735_v60 = vpop.f32.mrf.mxu0 }
 0x109   : > { %v942_v63 = vmax.f32 %v744_v58, 0.0  ;;  %v736_v0 = vadd.f32 %v11095_v61, %v735_v60 }
 0x10a   : > { %v9369_v1 = vpop.f32.mrf.mxu0 }
 0x10b   : > { %v940_v2 = vmax.f32 %v736_v0, 0.0  ;;  %v11124_v3 = vpack.c.bf16 %v942_v63, %v941_v59  ;;  %v757_v4 = vadd.f32 %v9369_v1, %v11095_v61 }
 0x10c   : > { %v748_v5 = vpop.f32.mrf.mxu0 }
 0x10d   : > { %v11127_v6 = vpack.c.bf16 %v940_v2, %v939_v62  ;;  %v749_v7 = vadd.f32 %v11095_v61, %v748_v5  ;;  %v945_v10 = vmax.f32 %v757_v4, 0.0 }
 0x10e   : > { %v9370_v8 = vpop.f32.mrf.mxu0 }
 0x10f   : > { %1294 = vmatmul.mubr.bf16.gmra.mxu1 %v1049_v41  ;;  %v760_v9 = vadd.f32 %v9370_v8, %v11095_v61  ;;  %9443 = vmatprep.mubr.bf16.mxu0 %v11127_v6  ;;  %v943_v12 = vmax.f32 %v749_v7, 0.0 }
 0x110   : > { %1303 = vmatprep.mubr.bf16.mxu1 %v13760_v30  ;;  %v751_v11 = vpop.f32.mrf.mxu0  ;;  %9444 = vmatmul.mubr.bf16.gmra.mxu0 %v11124_v3 }
 0x111   : > { %v946_v13 = vmax.f32 %v760_v9, 0.0  ;;  %v752_v14 = vadd.f32 %v11095_v61, %v751_v11 }
 0x112   : > { %v9373_v15 = vpop.f32.mrf.mxu0 }
 0x113   : > { %v944_v16 = vmax.f32 %v752_v14, 0.0  ;;  %v11135_v17 = vpack.c.bf16 %v946_v13, %v945_v10  ;;  %v773_v18 = vadd.f32 %v9373_v15, %v11095_v61 }
 0x114   : > { %v764_v19 = vpop.f32.mrf.mxu0 }
 0x115   : > { %v11138_v20 = vpack.c.bf16 %v944_v16, %v943_v12  ;;  %v765_v21 = vadd.f32 %v11095_v61, %v764_v19  ;;  %v949_v24 = vmax.f32 %v773_v18, 0.0 }
 0x116   : > { %v9374_v22 = vpop.f32.mrf.mxu0 }
 0x117   : > { %1304 = vmatmul.mubr.bf16.gmra.mxu1 %v1050_v38  ;;  %v776_v23 = vadd.f32 %v9374_v22, %v11095_v61  ;;  %9447 = vmatprep.mubr.bf16.mxu0 %v11138_v20  ;;  %v947_v26 = vmax.f32 %v765_v21, 0.0 }
 0x118   : > { %1313 = vmatprep.mubr.bf16.mxu1 %v13760_v30  ;;  %v767_v25 = vpop.f32.mrf.mxu0  ;;  %9448 = vmatmul.mubr.bf16.gmra.mxu0 %v11135_v17 }
 0x119   : > { %v950_v27 = vmax.f32 %v776_v23, 0.0  ;;  %v768_v28 = vadd.f32 %v11095_v61, %v767_v25 }
 0x11a   : > { %v9377_v29 = vpop.f32.mrf.mxu0 }
 0x11b   : > { %v948_v31 = vmax.f32 %v768_v28, 0.0  ;;  %v11146_v32 = vpack.c.bf16 %v950_v27, %v949_v24  ;;  %v789_v33 = vadd.f32 %v9377_v29, %v11095_v61 }
 0x11c   : > { %v780_v34 = vpop.f32.mrf.mxu0 }
 0x11d   : > { %v11149_v35 = vpack.c.bf16 %v948_v31, %v947_v26  ;;  %v781_v36 = vadd.f32 %v11095_v61, %v780_v34  ;;  %v953_v39 = vmax.f32 %v789_v33, 0.0 }
 0x11e   : > { %v9378_v37 = vpop.f32.mrf.mxu0 }
 0x11f   : > { %1314 = vmatmul.mubr.bf16.gmra.mxu1 %v1051_v55  ;;  %v792_v38 = vadd.f32 %v9378_v37, %v11095_v61  ;;  %9451 = vmatprep.mubr.bf16.mxu0 %v11149_v35  ;;  %v951_v41 = vmax.f32 %v781_v36, 0.0 }
 0x120   : > { %1323 = vmatprep.mubr.bf16.mxu1 %v13760_v30  ;;  %v783_v40 = vpop.f32.mrf.mxu0  ;;  %9452 = vmatmul.mubr.bf16.gmra.mxu0 %v11146_v32 }
 0x121   : > { %v954_v42 = vmax.f32 %v792_v38, 0.0  ;;  %v784_v43 = vadd.f32 %v11095_v61, %v783_v40 }
 0x122   : > { %v9381_v44 = vpop.f32.mrf.mxu0 }
 0x123   : > { %v952_v45 = vmax.f32 %v784_v43, 0.0  ;;  %v11157_v46 = vpack.c.bf16 %v954_v42, %v953_v39  ;;  %v805_v47 = vadd.f32 %v9381_v44, %v11095_v61 }
 0x124   : > { %v796_v48 = vpop.f32.mrf.mxu0 }
 0x125   : > { %v11160_v49 = vpack.c.bf16 %v952_v45, %v951_v41  ;;  %v797_v50 = vadd.f32 %v11095_v61, %v796_v48  ;;  %v957_v54 = vmax.f32 %v805_v47, 0.0 }
 0x126   : > { %v9382_v51 = vpop.f32.mrf.mxu0 }
 0x127   : > { %1324 = vmatmul.mubr.bf16.gmra.mxu1 %v11116_v52  ;;  %v808_v53 = vadd.f32 %v9382_v51, %v11095_v61  ;;  %9455 = vmatprep.mubr.bf16.mxu0 %v11160_v49  ;;  %v955_v56 = vmax.f32 %v797_v50, 0.0 }
 0x128   : > { %1333 = vmatprep.mubr.bf16.mxu1 %v13760_v30  ;;  %v799_v55 = vpop.f32.mrf.mxu0  ;;  %9456 = vmatmul.mubr.bf16.gmra.mxu0 %v11157_v46 }
 0x129   : > { %v958_v57 = vmax.f32 %v808_v53, 0.0  ;;  %v800_v58 = vadd.f32 %v11095_v61, %v799_v55 }
 0x12a   : > { %v9385_v59 = vpop.f32.mrf.mxu0 }
 0x12b   : > { %v956_v60 = vmax.f32 %v800_v58, 0.0  ;;  %v11169_v62 = vpack.c.bf16 %v958_v57, %v957_v54  ;;  %v821_v52 = vadd.f32 %v9385_v59, %v11095_v61 }
 0x12c   : > { %v812_v63 = vpop.f32.mrf.mxu0 }
 0x12d   : > { %v11172_v0 = vpack.c.bf16 %v956_v60, %v955_v56  ;;  %v813_v1 = vadd.f32 %v11095_v61, %v812_v63  ;;  %v961_v5 = vmax.f32 %v821_v52, 0.0 }
 0x12e   : > { %v9386_v2 = vpop.f32.mrf.mxu0 }
 0x12f   : > { %1334 = vmatmul.mubr.bf16.gmra.mxu1 %v11127_v6  ;;  %v824_v4 = vadd.f32 %v9386_v2, %v11095_v61  ;;  %9459 = vmatprep.mubr.bf16.mxu0 %v11172_v0  ;;  %v959_v8 = vmax.f32 %v813_v1, 0.0 }
 0x130   : > { %1343 = vmatprep.mubr.bf16.mxu1 %v13760_v30  ;;  %v815_v7 = vpop.f32.mrf.mxu0  ;;  %9460 = vmatmul.mubr.bf16.gmra.mxu0 %v11169_v62 }
 0x131   : > { %v962_v9 = vmax.f32 %v824_v4, 0.0  ;;  %v816_v10 = vadd.f32 %v11095_v61, %v815_v7 }
 0x132   : > { %v9389_v11 = vpop.f32.mrf.mxu0 }
 0x133   : > { %v960_v12 = vmax.f32 %v816_v10, 0.0  ;;  %v11181_v13 = vpack.c.bf16 %v962_v9, %v961_v5  ;;  %v837_v6 = vadd.f32 %v9389_v11, %v11095_v61 }
 0x134   : > { %v828_v14 = vpop.f32.mrf.mxu0 }
 0x135   : > { %v11184_v15 = vpack.c.bf16 %v960_v12, %v959_v8  ;;  %v829_v16 = vadd.f32 %v11095_v61, %v828_v14  ;;  %v965_v21 = vmax.f32 %v837_v6, 0.0 }
 0x136   : > { %v9390_v18 = vpop.f32.mrf.mxu0 }
 0x137   : > { %1344 = vmatmul.mubr.bf16.gmra.mxu1 %v11124_v3  ;;  %v840_v19 = vadd.f32 %v9390_v18, %v11095_v61  ;;  %9463 = vmatprep.mubr.bf16.mxu0 %v11184_v15  ;;  %v963_v23 = vmax.f32 %v829_v16, 0.0 }
 0x138   : > { %1353 = vmatprep.mubr.bf16.mxu1 %v13760_v30  ;;  %v831_v22 = vpop.f32.mrf.mxu0  ;;  %9464 = vmatmul.mubr.bf16.gmra.mxu0 %v11181_v13 }
 0x139   : > { %v966_v24 = vmax.f32 %v840_v19, 0.0  ;;  %v832_v25 = vadd.f32 %v11095_v61, %v831_v22 }
 0x13a   : > { %v9393_v26 = vpop.f32.mrf.mxu0 }
 0x13b   : > { %v964_v27 = vmax.f32 %v832_v25, 0.0  ;;  %v11193_v28 = vpack.c.bf16 %v966_v24, %v965_v21  ;;  %v853_v3 = vadd.f32 %v9393_v26, %v11095_v61 }
 0x13c   : > { %v844_v29 = vpop.f32.mrf.mxu0 }
 0x13d   : > { %v845_v31 = vadd.f32 %v11095_v61, %v844_v29  ;;  %v11197_v33 = vpack.c.bf16 %v964_v27, %v963_v23  ;;  %v969_v37 = vmax.f32 %v853_v3, 0.0 }
 0x13e   : > { %v9394_v34 = vpop.f32.mrf.mxu0 }
 0x13f   : > { %1354 = vmatmul.mubr.bf16.gmra.mxu1 %v11138_v20  ;;  %v856_v36 = vadd.f32 %v9394_v34, %v11095_v61  ;;  %9467 = vmatprep.mubr.bf16.mxu0 %v11197_v33  ;;  %v967_v39 = vmax.f32 %v845_v31, 0.0 }
 0x140   : > { %1363 = vmatprep.mubr.bf16.mxu1 %v13760_v30  ;;  %v847_v38 = vpop.f32.mrf.mxu0  ;;  %9468 = vmatmul.mubr.bf16.gmra.mxu0 %v11193_v28 }
 0x141   : > { %v970_v40 = vmax.f32 %v856_v36, 0.0  ;;  %v848_v41 = vadd.f32 %v11095_v61, %v847_v38 }
 0x142   : > { %v9397_v42 = vpop.f32.mrf.mxu0 }
 0x143   : > { %v968_v43 = vmax.f32 %v848_v41, 0.0  ;;  %v11205_v44 = vpack.c.bf16 %v970_v40, %v969_v37  ;;  %v869_v20 = vadd.f32 %v9397_v42, %v11095_v61 }
 0x144   : > { %v860_v45 = vpop.f32.mrf.mxu0 }
 0x145   : > { %v861_v47 = vadd.f32 %v11095_v61, %v860_v45  ;;  %v11209_v48 = vpack.c.bf16 %v968_v43, %v967_v39  ;;  %v973_v53 = vmax.f32 %v869_v20, 0.0 }
 0x146   : > { %v9398_v50 = vpop.f32.mrf.mxu0 }
 0x147   : > { %1364 = vmatmul.mubr.bf16.gmra.mxu1 %v11135_v17  ;;  %v872_v51 = vadd.f32 %v9398_v50, %v11095_v61  ;;  %9471 = vmatprep.mubr.bf16.mxu0 %v11209_v48  ;;  %v971_v55 = vmax.f32 %v861_v47, 0.0 }
 0x148   : > { %1373 = vmatprep.mubr.bf16.mxu1 %v13760_v30  ;;  %v863_v54 = vpop.f32.mrf.mxu0  ;;  %9472 = vmatmul.mubr.bf16.gmra.mxu0 %v11205_v44 }
 0x149   : > { %v974_v56 = vmax.f32 %v872_v51, 0.0  ;;  %v864_v57 = vadd.f32 %v11095_v61, %v863_v54 }
 0x14a   : > { %v9401_v58 = vpop.f32.mrf.mxu0 }
 0x14b   : > { %v972_v59 = vmax.f32 %v864_v57, 0.0  ;;  %v11217_v60 = vpack.c.bf16 %v974_v56, %v973_v53  ;;  %v885_v17 = vadd.f32 %v9401_v58, %v11095_v61 }
 0x14c   : > { %v876_v52 = vpop.f32.mrf.mxu0 }
 0x14d   : > { %v877_v63 = vadd.f32 %v11095_v61, %v876_v52  ;;  %v11221_v1 = vpack.c.bf16 %v972_v59, %v971_v55  ;;  %v977_v5 = vmax.f32 %v885_v17, 0.0 }
 0x14e   : > { %v9402_v2 = vpop.f32.mrf.mxu0 }
 0x14f   : > { %1374 = vmatmul.mubr.bf16.gmra.mxu1 %v11149_v35  ;;  %v888_v4 = vadd.f32 %v9402_v2, %v11095_v61  ;;  %9475 = vmatprep.mubr.bf16.mxu0 %v11221_v1  ;;  %v975_v8 = vmax.f32 %v877_v63, 0.0 }
 0x150   : > { %1383 = vmatprep.mubr.bf16.mxu1 %v13760_v30  ;;  %v879_v7 = vpop.f32.mrf.mxu0  ;;  %9476 = vmatmul.mubr.bf16.gmra.mxu0 %v11217_v60 }
 0x151   : > { %v978_v9 = vmax.f32 %v888_v4, 0.0  ;;  %v880_v10 = vadd.f32 %v11095_v61, %v879_v7 }
 0x152   : > { %v9405_v11 = vpop.f32.mrf.mxu0 }
 0x153   : > { %v976_v12 = vmax.f32 %v880_v10, 0.0  ;;  %v11229_v6 = vpack.c.bf16 %v978_v9, %v977_v5  ;;  %v901_v35 = vadd.f32 %v9405_v11, %v11095_v61 }
 0x154   : > { %v892_v14 = vpop.f32.mrf.mxu0 }
 0x155   : > { %v893_v16 = vadd.f32 %v11095_v61, %v892_v14  ;;  %v11233_v18 = vpack.c.bf16 %v976_v12, %v975_v8  ;;  %v981_v22 = vmax.f32 %v901_v35, 0.0 }
 0x156   : > { %v9406_v19 = vpop.f32.mrf.mxu0 }
 0x157   : > { %1384 = vmatmul.mubr.bf16.gmra.mxu1 %v11146_v32  ;;  %v904_v21 = vadd.f32 %v9406_v19, %v11095_v61  ;;  %9479 = vmatprep.mubr.bf16.mxu0 %v11233_v18  ;;  %v979_v24 = vmax.f32 %v893_v16, 0.0 }
 0x158   : > { %1393 = vmatprep.mubr.bf16.mxu1 %v13760_v30  ;;  %v895_v23 = vpop.f32.mrf.mxu0  ;;  %9480 = vmatmul.mubr.bf16.gmra.mxu0 %v11229_v6 }
 0x159   : > { %v982_v25 = vmax.f32 %v904_v21, 0.0  ;;  %v896_v26 = vadd.f32 %v11095_v61, %v895_v23 }
 0x15a   : > { %v9409_v27 = vpop.f32.mrf.mxu0 }
 0x15b   : > { %v980_v3 = vmax.f32 %v896_v26, 0.0  ;;  %v11241_v29 = vpack.c.bf16 %v982_v25, %v981_v22  ;;  %v917_v32 = vadd.f32 %v9409_v27, %v11095_v61 }
 0x15c   : > { %v908_v31 = vpop.f32.mrf.mxu0 }
 0x15d   : > { %v909_v34 = vadd.f32 %v11095_v61, %v908_v31  ;;  %v11245_v36 = vpack.c.bf16 %v980_v3, %v979_v24  ;;  %v985_v39 = vmax.f32 %v917_v32, 0.0 }
 0x15e   : > { %v9410_v37 = vpop.f32.mrf.mxu0 }
 0x15f   : > { %1394 = vmatmul.mubr.bf16.gmra.mxu1 %v11160_v49  ;;  %v920_v38 = vadd.f32 %v9410_v37, %v11095_v61  ;;  %9483 = vmatprep.mubr.bf16.mxu0 %v11245_v36  ;;  %v983_v41 = vmax.f32 %v909_v34, 0.0 }
 0x160   : > { %1403 = vmatprep.mubr.bf16.mxu1 %v13760_v30  ;;  %v911_v40 = vpop.f32.mrf.mxu0  ;;  %9484 = vmatmul.mubr.bf16.gmra.mxu0 %v11241_v29 }
 0x161   : > { %v986_v42 = vmax.f32 %v920_v38, 0.0  ;;  %v912_v43 = vadd.f32 %v11095_v61, %v911_v40  ;;  %v1078_v61 = vlaneseq }
 0x163   : > { %v984_v20 = vmax.f32 %v912_v43, 0.0  ;;  %v11253_v45 = vpack.c.bf16 %v986_v42, %v985_v39 }
 0x165   : > { %v11255_v47 = vpack.c.bf16 %v984_v20, %v983_v41 }
 0x167   : > { %1404 = vmatmul.mubr.bf16.gmra.mxu1 %v11157_v46  ;;  %9487 = vmatprep.mubr.bf16.mxu0 %v11255_v47  ;;  %v11277_v46 = vshrl.u32 %v1078_v61, 7 }
 0x168   : > { %1413 = vmatprep.mubr.bf16.mxu1 %v13760_v30  ;;  %9488 = vmatmul.mubr.bf16.gmra.mxu0 %v11253_v45 }
 0x169   : > { %13808 = vst [vmem:[#allocation6_spill] sm:$0xff] %v11277_v46  ;;  %v11280_v49 = vsub.s32 0, %v11277_v46  ;;  %v11342_v26 = vsub.s32 1, %v11277_v46 }
 0x16b   : > { %13809 = vst [vmem:[#allocation7_spill] sm:$0xff] %v11280_v49  ;;  %13815 = vst [vmem:[#allocation13_spill] sm:$0xff] %v11342_v26 }
 0x16f   : > { %1414 = vmatmul.mubr.bf16.gmra.mxu1 %v11172_v0  ;;  %v11286_v0 = vsub.s32 2, %v11277_v46 }
 0x170   : > { %1423 = vmatprep.mubr.bf16.mxu1 %v13760_v30 }
 0x171   : > { %13810 = vst [vmem:[#allocation8_spill] sm:$0xff] %v11286_v0 }
 0x177   : > { %1424 = vmatmul.mubr.bf16.gmra.mxu1 %v11169_v62  ;;  %v1019_v62 = vld [vmem:[%s13754_s7] sm:$0x7] }
 0x178   : > { %1433 = vmatprep.mubr.bf16.mxu1 %v13760_v30  ;;  %v11351_v37 = vrot.slane %v1019_v62, %v11342_v26 }
 0x17f   : > { %1434 = vmatmul.mubr.bf16.gmra.mxu1 %v11184_v15  ;;  %v11290_v15 = vrot.slane %v1019_v62, %v11280_v49 }
 0x180   : > { %1443 = vmatprep.mubr.bf16.mxu1 %v13760_v30 }
 0x187   : > { %1444 = vmatmul.mubr.bf16.gmra.mxu1 %v11181_v13 }
 0x188   : > { %1453 = vmatprep.mubr.bf16.mxu1 %v13760_v30 }
 0x18f   : > { %1454 = vmatmul.mubr.bf16.gmra.mxu1 %v11197_v33  ;;  %v11294_v33 = vrot.slane %v1019_v62, %v11286_v0 }
 0x190   : > { %1463 = vmatprep.mubr.bf16.mxu1 %v13760_v30 }
 0x191   : > { %13811 = vst [vmem:[#allocation9_spill] sm:$0xff] %v11294_v33 }
 0x197   : > { %1464 = vmatmul.mubr.bf16.gmra.mxu1 %v11193_v28 }
 0x198   : > { %1473 = vmatprep.mubr.bf16.mxu1 %v13760_v30 }
 0x19f   : > { %1474 = vmatmul.mubr.bf16.gmra.mxu1 %v11209_v48 }
 0x1a0   : > { %1483 = vmatprep.mubr.bf16.mxu1 %v13760_v30 }
 0x1a7   : > { %1484 = vmatmul.mubr.bf16.gmra.mxu1 %v11205_v44 }
 0x1a8   : > { %1493 = vmatprep.mubr.bf16.mxu1 %v13760_v30 }
 0x1af   : > { %v1255_v13 = vpop.f32.mrf.mxu1  ;;  %1494 = vmatmul.mubr.bf16.gmra.mxu1 %v11221_v1 }
 0x1b0   : > { %v9429_v28 = vpop.f32.mrf.mxu0  ;;  %1503 = vmatprep.mubr.bf16.mxu1 %v13760_v30  ;;  %v1256_v51 = vadd.f32 %v1255_v13, %v11290_v15 }
 0x1b1   : > { %v11296_v44 = vpop.f32.mrf.mxu1  ;;  %v1617_v55 = vadd.f32 %v9429_v28, %v11294_v33 }
 0x1b2   : > { %v11298_v48 = vpop.f32.mrf.mxu0 }
 0x1b3   : > { %v1259_v50 = vpop.f32.mrf.mxu1 }
 0x1b4   : > { %v1260_v53 = vadd.f32 %v1259_v50, %v11290_v15  ;;  %v9430_v54 = vpop.f32.mrf.mxu0 }
 0x1b5   : > { %v1620_v56 = vadd.f32 %v9430_v54, %v11294_v33  ;;  %v11304_v57 = vpop.f32.mrf.mxu1 }
 0x1b6   : > { %v1863_v58 = vpack.c.bf16 %v1260_v53, %v1256_v51  ;;  %v11306_v59 = vpop.f32.mrf.mxu0 }
 0x1b7   : > { %v11308_v17 = vpack.c.bf16 %v1620_v56, %v1617_v55  ;;  %v11310_v52 = vpop.f32.mrf.mxu1  ;;  %1504 = vmatmul.mubr.bf16.gmra.mxu1 %v11217_v60 }
 0x1b8   : > { %v9433_v63 = vpop.f32.mrf.mxu0  ;;  %9499 = vmatprep.mubr.bf16.mxu0 %v1863_v58  ;;  %1513 = vmatprep.mubr.bf16.mxu1 %v13760_v30 }
 0x1b9   : > { %v1267_v1 = vpop.f32.mrf.mxu1  ;;  %v1633_v7 = vadd.f32 %v9433_v63, %v11294_v33 }
 0x1ba   : > { %v11314_v2 = vpop.f32.mrf.mxu0 }
 0x1bb   : > { %v11316_v4 = vpop.f32.mrf.mxu1 }
 0x1bc   : > { %v9434_v5 = vpop.f32.mrf.mxu0 }
 0x1bd   : > { %v1636_v8 = vadd.f32 %v9434_v5, %v11294_v33  ;;  %v1271_v9 = vpop.f32.mrf.mxu1 }
 0x1be   : > { %v11320_v10 = vpop.f32.mrf.mxu0  ;;  %v1272_v63 = vadd.f32 %v1271_v9, %v11351_v37 }
 0x1bf   : > { %v11322_v11 = vpack.c.bf16 %v1636_v8, %v1633_v7  ;;  %v11324_v60 = vpop.f32.mrf.mxu1  ;;  %1514 = vmatmul.mubr.bf16.gmra.mxu1 %v11233_v18 }
 0x1c0   : > { %v9437_v12 = vpop.f32.mrf.mxu0  ;;  %1523 = vmatprep.mubr.bf16.mxu1 %v13760_v30 }
 0x1c1   : > { %v1277_v35 = vpop.f32.mrf.mxu1  ;;  %v1649_v19 = vadd.f32 %v9437_v12, %v11294_v33  ;;  %v1268_v12 = vadd.f32 %v1267_v1, %v11351_v37  ;;  %v1262_v1 = vadd.f32 %v11304_v57, %v11351_v37 }
 0x1c2   : > { %v11328_v14 = vpop.f32.mrf.mxu0  ;;  %v1278_v62 = vadd.f32 %v1277_v35, %v11351_v37 }
 0x1c3   : > { %13812 = vst [vmem:[#allocation10_spill] sm:$0xff] %v11328_v14  ;;  %v11330_v16 = vpop.f32.mrf.mxu1 }
 0x1c4   : > { %v9438_v21 = vpop.f32.mrf.mxu0 }
 0x1c5   : > { %v1281_v22 = vpop.f32.mrf.mxu1  ;;  %v1652_v23 = vadd.f32 %v9438_v21, %v11294_v33  ;;  %v1896_v21 = vpack.c.bf16 %v1272_v63, %v1268_v12 }
 0x1c6   : > { %v11334_v24 = vpop.f32.mrf.mxu0  ;;  %v1282_v40 = vadd.f32 %v1281_v22, %v11351_v37 }
 0x1c7   : > { %13813 = vst [vmem:[#allocation11_spill] sm:$0xff] %v11334_v24  ;;  %v11336_v25 = vpop.f32.mrf.mxu1  ;;  %1524 = vmatmul.mubr.bf16.gmra.mxu1 %v11229_v6  ;;  %v11339_v18 = vpack.c.bf16 %v1652_v23, %v1649_v19 }
 0x1c8   : > { %1533 = vmatprep.mubr.bf16.mxu1 %v13760_v30  ;;  %v9441_v27 = vpop.f32.mrf.mxu0  ;;  %v1897_v51 = vpack.c.bf16 %v1282_v40, %v1278_v62 }
 0x1c9   : > { %13814 = vst [vmem:[#allocation12_spill] sm:$0xff] %v11339_v18  ;;  %v1287_v3 = vpop.f32.mrf.mxu1  ;;  %v1665_v34 = vadd.f32 %v9441_v27, %v11294_v33 }
 0x1ca   : > { %v11345_v32 = vpop.f32.mrf.mxu0  ;;  %v1288_v41 = vadd.f32 %v1287_v3, %v11351_v37 }
 0x1cb   : > { %13816 = vst [vmem:[#allocation14_spill] sm:$0xff] %v11345_v32  ;;  %v11347_v31 = vpop.f32.mrf.mxu1 }
 0x1cc   : > { %v9442_v38 = vpop.f32.mrf.mxu0 }
 0x1cd   : > { %v1291_v6 = vpop.f32.mrf.mxu1  ;;  %v1668_v39 = vadd.f32 %v9442_v38, %v11294_v33 }
 0x1ce   : > { %v1292_v42 = vadd.f32 %v1291_v6, %v11351_v37  ;;  %v11357_v43 = vpop.f32.mrf.mxu0 }
 0x1cf   : > { %13817 = vst [vmem:[#allocation15_spill] sm:$0xff] %v11357_v43  ;;  %v1295_v20 = vpop.f32.mrf.mxu1  ;;  %1534 = vmatmul.mubr.bf16.gmra.mxu1 %v11245_v36  ;;  %v11360_v61 = vpack.c.bf16 %v1668_v39, %v1665_v34  ;;  %v1258_v39 = vadd.f32 %v11296_v44, %v11351_v37 }
 0x1d0   : > { %v1898_v13 = vpack.c.bf16 %v1292_v42, %v1288_v41  ;;  %1543 = vmatprep.mubr.bf16.mxu1 %v13760_v30  ;;  %v9445_v28 = vpop.f32.mrf.mxu0 }
 0x1d1   : > { %13818 = vst [vmem:[#allocation16_spill] sm:$0xff] %v11360_v61  ;;  %v11364_v50 = vpop.f32.mrf.mxu1  ;;  %v1681_v55 = vadd.f32 %v9445_v28, %v11294_v33  ;;  %v1895_v42 = vpack.c.bf16 %v1262_v1, %v1258_v39  ;;  %v1280_v1 = vadd.f32 %v11330_v16, %v11290_v15 }
 0x1d2   : > { %9491 = vmatprep.subr.bf16.mxu0 %v1898_v13  ;;  %v11366_v53 = vpop.f32.mrf.mxu0 }
 0x1d3   : > { %v1299_v54 = vpop.f32.mrf.mxu1  ;;  %9492 = vmatpush3.bf16.xpose.msra.mxu0 %v1898_v13 }
 0x1d4   : > { %9493 = vmatprep.subr.bf16.mxu0 %v1897_v51  ;;  %v9446_v36 = vpop.f32.mrf.mxu0  ;;  %v1300_v62 = vadd.f32 %v1299_v54, %v11290_v15 }
 0x1d5   : > { %v11369_v56 = vpop.f32.mrf.mxu1  ;;  %v1684_v58 = vadd.f32 %v9446_v36, %v11294_v33 }
 0x1d6   : > { %v11373_v5 = vpop.f32.mrf.mxu0 }
 0x1d7   : > { %v11375_v7 = vpop.f32.mrf.mxu1  ;;  %1544 = vmatmul.mubr.bf16.gmra.mxu1 %v11241_v29  ;;  %v11378_v8 = vpack.c.bf16 %v1684_v58, %v1681_v55 }
 0x1d8   : > { %1553 = vmatprep.mubr.bf16.mxu1 %v13760_v30  ;;  %v9449_v35 = vpop.f32.mrf.mxu0 }
 0x1d9   : > { %v11382_v19 = vpop.f32.mrf.mxu1  ;;  %v1697_v9 = vadd.f32 %v9449_v35, %v11294_v33 }
 0x1da   : > { %v11384_v22 = vpop.f32.mrf.mxu0 }
 0x1db   : > { %v11386_v23 = vpop.f32.mrf.mxu1  ;;  %9494 = vmatpush3.bf16.xpose.msra.mxu0 %v1897_v51 }
 0x1dc   : > { %9495 = vmatprep.subr.bf16.mxu0 %v1896_v21  ;;  %v9450_v27 = vpop.f32.mrf.mxu0 }
 0x1dd   : > { %v11389_v29 = vpop.f32.mrf.mxu1  ;;  %v1700_v3 = vadd.f32 %v9450_v27, %v11294_v33  ;;  %v1270_v27 = vadd.f32 %v11316_v4, %v11290_v15  ;;  %v1276_v4 = vadd.f32 %v11324_v60, %v11290_v15 }
 0x1de   : > { %v11394_v34 = vpop.f32.mrf.mxu0 }
 0x1df   : > { %v11396_v38 = vpop.f32.mrf.mxu1  ;;  %1554 = vmatmul.mubr.bf16.gmra.mxu1 %v11255_v47  ;;  %v11399_v6 = vpack.c.bf16 %v1700_v3, %v1697_v9  ;;  %v1296_v47 = vadd.f32 %v1295_v20, %v11290_v15 }
 0x1e0   : > { %1563 = vmatprep.mubr.bf16.mxu1 %v13760_v30  ;;  %v9453_v40 = vpop.f32.mrf.mxu0 }
 0x1e1   : > { %v1317_v41 = vpop.f32.mrf.mxu1  ;;  %v1713_v28 = vadd.f32 %v9453_v40, %v11294_v33  ;;  %v1867_v36 = vpack.c.bf16 %v1300_v62, %v1296_v47  ;;  %v1266_v40 = vadd.f32 %v11310_v52, %v11290_v15  ;;  %v1865_v52 = vpack.c.bf16 %v1280_v1, %v1276_v4 }
 0x1e2   : > { %v11405_v13 = vpop.f32.mrf.mxu0 }
 0x1e3   : > { %13819 = vst [vmem:[#allocation17_spill] sm:$0xff] %v11405_v13  ;;  %v11407_v57 = vpop.f32.mrf.mxu1  ;;  %9496 = vmatpush3.bf16.xpose.msra.mxu0 %v1896_v21  ;;  %v1864_v16 = vpack.c.bf16 %v1270_v27, %v1266_v40  ;;  %v1286_v40 = vadd.f32 %v11336_v25, %v11290_v15 }
 0x1e4   : > { %9497 = vmatprep.subr.bf16.mxu0 %v1895_v42  ;;  %v9454_v51 = vpop.f32.mrf.mxu0 }
 0x1e5   : > { %v1321_v55 = vpop.f32.mrf.mxu1  ;;  %v1716_v44 = vadd.f32 %v9454_v51, %v11294_v33 }
 0x1e6   : > { %v11412_v58 = vpop.f32.mrf.mxu0  ;;  %v1322_v62 = vadd.f32 %v1321_v55, %v11351_v37 }
 0x1e7   : > { %13820 = vst [vmem:[#allocation18_spill] sm:$0xff] %v11412_v58  ;;  %v11414_v63 = vpop.f32.mrf.mxu1  ;;  %1564 = vmatmul.mubr.bf16.gmra.mxu1 %v11253_v45  ;;  %v11417_v54 = vpack.c.bf16 %v1716_v44, %v1713_v28 }
 0x1e8   : > { %9515 = vmatprep.mubr.bf16.mxu1 %v1867_v36  ;;  %v9457_v12 = vpop.f32.mrf.mxu0  ;;  %v1318_v36 = vadd.f32 %v1317_v41, %v11351_v37 }
 0x1e9   : > { %13821 = vst [vmem:[#allocation19_spill] sm:$0xff] %v11417_v54  ;;  %v1327_v35 = vpop.f32.mrf.mxu1  ;;  %v1729_v9 = vadd.f32 %v9457_v12, %v11294_v33 }
 0x1ea   : > { %v11419_v21 = vpop.f32.mrf.mxu0  ;;  %v1328_v28 = vadd.f32 %v1327_v35, %v11351_v37  ;;  %v1901_v55 = vpack.c.bf16 %v1322_v62, %v1318_v36  ;;  %v1312_v62 = vadd.f32 %v11389_v29, %v11351_v37  ;;  %v1308_v36 = vadd.f32 %v11382_v19, %v11351_v37 }
 0x1eb   : > { %13822 = vst [vmem:[#allocation20_spill] sm:$0xff] %v11419_v21  ;;  %v11421_v20 = vpop.f32.mrf.mxu1  ;;  %9498 = vmatpush3.bf16.xpose.msra.mxu0 %v1895_v42  ;;  %v1302_v19 = vadd.f32 %v11369_v56, %v11351_v37 }
 0x1ec   : > { %v9458_v3 = vpop.f32.mrf.mxu0  ;;  %v1900_v25 = vpack.c.bf16 %v1312_v62, %v1308_v36 }
 0x1ed   : > { %v1331_v45 = vpop.f32.mrf.mxu1  ;;  %v1732_v39 = vadd.f32 %v9458_v3, %v11294_v33 }
 0x1ee   : > { %v1332_v42 = vadd.f32 %v1331_v45, %v11351_v37  ;;  %v11434_v47 = vpop.f32.mrf.mxu0 }
 0x1ef   : > { %13823 = vst [vmem:[#allocation21_spill] sm:$0xff] %v11434_v47  ;;  %v1335_v51 = vpop.f32.mrf.mxu1  ;;  %v11438_v44 = vpack.c.bf16 %v1732_v39, %v1729_v9  ;;  %v1290_v9 = vadd.f32 %v11347_v31, %v11290_v15 }
 0x1f0   : > { %v1902_v12 = vpack.c.bf16 %v1332_v42, %v1328_v28  ;;  %v9461_v3 = vpop.f32.mrf.mxu0  ;;  %v1336_v42 = vadd.f32 %v1335_v51, %v11290_v15 }
 0x1f1   : > { %13824 = vst [vmem:[#allocation22_spill] sm:$0xff] %v11438_v44  ;;  %v11441_v30 = vpop.f32.mrf.mxu1  ;;  %v1745_v60 = vadd.f32 %v9461_v3, %v11294_v33 }
 0x1f2   : > { %9500 = vmatmul.mubr.bf16.vlgmr.msra.gmra.mxu0 %v1864_v16  ;;  %9507 = vmatprep.subr.bf16.mxu1 %v1902_v12  ;;  %v11443_v35 = vpop.f32.mrf.mxu0  ;;  %v1866_v16 = vpack.c.bf16 %v1290_v9, %v1286_v40 }
 0x1f3   : > { %13825 = vst [vmem:[#allocation23_spill] sm:$0xff] %v11443_v35  ;;  %v1339_v45 = vpop.f32.mrf.mxu1  ;;  %9503 = vmatprep.mubr.bf16.mxu0 %v1865_v52  ;;  %9508 = vmatpush3.bf16.xpose.msra.mxu1 %v1902_v12 }
 0x1f4   : > { %9509 = vmatprep.subr.bf16.mxu1 %v1901_v55  ;;  %v9462_v41 = vpop.f32.mrf.mxu0  ;;  %v1340_v27 = vadd.f32 %v1339_v45, %v11290_v15 }
 0x1f5   : > { %v11449_v1 = vpop.f32.mrf.mxu1  ;;  %v1748_v39 = vadd.f32 %v9462_v41, %v11294_v33 }
 0x1f6   : > { %v11456_v28 = vpop.f32.mrf.mxu0  ;;  %v1871_v3 = vpack.c.bf16 %v1340_v27, %v1336_v42 }
 0x1f7   : > { %13826 = vst [vmem:[#allocation24_spill] sm:$0xff] %v11456_v28  ;;  %v11459_v4 = vpop.f32.mrf.mxu1  ;;  %v11461_v31 = vpack.c.bf16 %v1748_v39, %v1745_v60 }
 0x1f8   : > { %v9465_v12 = vpop.f32.mrf.mxu0 }
 0x1f9   : > { %13827 = vst [vmem:[#allocation25_spill] sm:$0xff] %v11461_v31  ;;  %v11465_v52 = vpop.f32.mrf.mxu1  ;;  %v1761_v51 = vadd.f32 %v9465_v12, %v11294_v33 }
 0x1fa   : > { %9504 = vmatmul.mubr.bf16.gmra.mxu0 %v1866_v16  ;;  %v11467_v45 = vpop.f32.mrf.mxu0 }
 0x1fb   : > { %13828 = vst [vmem:[#allocation26_spill] sm:$0xff] %v11467_v45  ;;  %v11469_v29 = vpop.f32.mrf.mxu1  ;;  %9510 = vmatpush3.bf16.xpose.msra.mxu1 %v1901_v55  ;;  %9531 = vmatprep.mubr.bf16.mxu0 %v1871_v3  ;;  %v1298_v55 = vadd.f32 %v11364_v50, %v11351_v37 }
 0x1fc   : > { %9511 = vmatprep.subr.bf16.mxu1 %v1900_v25  ;;  %v9466_v60 = vpop.f32.mrf.mxu0 }
 0x1fd   : > { %v1351_v9 = vpop.f32.mrf.mxu1  ;;  %v1764_v41 = vadd.f32 %v9466_v60, %v11294_v33  ;;  %v1899_v16 = vpack.c.bf16 %v1302_v19, %v1298_v55 }
 0x1fe   : > { %v11475_v27 = vpop.f32.mrf.mxu0 }
 0x1ff   : > { %13829 = vst [vmem:[#allocation27_spill] sm:$0xff] %v11475_v27  ;;  %v11477_v39 = vpop.f32.mrf.mxu1  ;;  %v11479_v40 = vpack.c.bf16 %v1764_v41, %v1761_v51 }
 0x200   : > { %v9469_v62 = vpop.f32.mrf.mxu0 }
 0x201   : > { %13830 = vst [vmem:[#allocation28_spill] sm:$0xff] %v11479_v40  ;;  %v1357_v42 = vpop.f32.mrf.mxu1  ;;  %v1777_v3 = vadd.f32 %v9469_v62, %v11294_v33  ;;  %v1310_v62 = vadd.f32 %v11386_v23, %v11290_v15  ;;  %v1316_v23 = vadd.f32 %v11396_v38, %v11290_v15 }
 0x202   : > { %v11483_v36 = vpop.f32.mrf.mxu0 }
 0x203   : > { %13831 = vst [vmem:[#allocation29_spill] sm:$0xff] %v11483_v36  ;;  %v11485_v12 = vpop.f32.mrf.mxu1  ;;  %9512 = vmatpush3.bf16.xpose.msra.mxu1 %v1900_v25 }
 0x204   : > { %9513 = vmatprep.subr.bf16.mxu1 %v1899_v16  ;;  %v9470_v56 = vpop.f32.mrf.mxu0 }
 0x205   : > { %v1361_v60 = vpop.f32.mrf.mxu1  ;;  %v1780_v0 = vadd.f32 %v9470_v56, %v11294_v33  ;;  %v1320_v56 = vadd.f32 %v11407_v57, %v11290_v15 }
 0x206   : > { %v11489_v51 = vpop.f32.mrf.mxu0 }
 0x207   : > { %13832 = vst [vmem:[#allocation30_spill] sm:$0xff] %v11489_v51  ;;  %v11491_v41 = vpop.f32.mrf.mxu1  ;;  %v11493_v50 = vpack.c.bf16 %v1780_v0, %v1777_v3  ;;  %v1306_v3 = vadd.f32 %v11375_v7, %v11290_v15  ;;  %v1869_v7 = vpack.c.bf16 %v1320_v56, %v1316_v23  ;;  %v1326_v56 = vadd.f32 %v11414_v63, %v11290_v15 }
 0x208   : > { %v9473_v26 = vpop.f32.mrf.mxu0  ;;  %v1348_v23 = vadd.f32 %v11465_v52, %v11351_v37  ;;  %v1342_v52 = vadd.f32 %v11449_v1, %v11351_v37 }
 0x209   : > { %13833 = vst [vmem:[#allocation31_spill] sm:$0xff] %v11493_v50  ;;  %v1367_v19 = vpop.f32.mrf.mxu1  ;;  %v1793_v25 = vadd.f32 %v9473_v26, %v11294_v33  ;;  %v1362_v50 = vadd.f32 %v1361_v60, %v11351_v37  ;;  %v1868_v57 = vpack.c.bf16 %v1310_v62, %v1306_v3 }
 0x20a   : > { %v11495_v55 = vpop.f32.mrf.mxu0  ;;  %v1368_v36 = vadd.f32 %v1367_v19, %v11351_v37 }
 0x20b   : > { %13834 = vst [vmem:[#allocation32_spill] sm:$0xff] %v11495_v55  ;;  %v11497_v49 = vpop.f32.mrf.mxu1  ;;  %9514 = vmatpush3.bf16.xpose.msra.mxu1 %v1899_v16 }
 0x20c   : > { %v9474_v46 = vpop.f32.mrf.mxu0 }
 0x20d   : > { %v1371_v51 = vpop.f32.mrf.mxu1  ;;  %v1796_v0 = vadd.f32 %v9474_v46, %v11294_v33  ;;  %v1358_v46 = vadd.f32 %v1357_v42, %v11351_v37 }
 0x20e   : > { %v1372_v16 = vadd.f32 %v1371_v51, %v11351_v37  ;;  %v11510_v26 = vpop.f32.mrf.mxu0 }
 0x20f   : > { %13835 = vst [vmem:[#allocation33_spill] sm:$0xff] %v11510_v26  ;;  %v1375_v55 = vpop.f32.mrf.mxu1  ;;  %v11514_v31 = vpack.c.bf16 %v1796_v0, %v1793_v25  ;;  %v1905_v60 = vpack.c.bf16 %v1362_v50, %v1358_v46  ;;  %v1330_v25 = vadd.f32 %v11421_v20, %v11290_v15  ;;  %v1352_v0 = vadd.f32 %v1351_v9, %v11351_v37 }
 0x210   : > { %v1906_v28 = vpack.c.bf16 %v1372_v16, %v1368_v36  ;;  %v9477_v35 = vpop.f32.mrf.mxu0 }
 0x211   : > { %13836 = vst [vmem:[#allocation34_spill] sm:$0xff] %v11514_v31  ;;  %v11517_v27 = vpop.f32.mrf.mxu1  ;;  %v1809_v38 = vadd.f32 %v9477_v35, %v11294_v33  ;;  %v1376_v35 = vadd.f32 %v1375_v55, %v11290_v15  ;;  %v1870_v16 = vpack.c.bf16 %v1330_v25, %v1326_v56 }
 0x212   : > { %9516 = vmatmul.mubr.bf16.vlgmr.msra.gmra.mxu1 %v1868_v57  ;;  %9523 = vmatprep.subr.bf16.mxu0 %v1906_v28  ;;  %v11519_v51 = vpop.f32.mrf.mxu0 }
 0x213   : > { %13837 = vst [vmem:[#allocation35_spill] sm:$0xff] %v11519_v51  ;;  %v1379_v19 = vpop.f32.mrf.mxu1  ;;  %9519 = vmatprep.mubr.bf16.mxu1 %v1869_v7  ;;  %9524 = vmatpush3.bf16.xpose.msra.mxu0 %v1906_v28 }
 0x214   : > { %9525 = vmatprep.subr.bf16.mxu0 %v1905_v60  ;;  %v9478_v42 = vpop.f32.mrf.mxu0  ;;  %v1380_v36 = vadd.f32 %v1379_v19, %v11290_v15  ;;  %v1904_v19 = vpack.c.bf16 %v1352_v0, %v1348_v23 }
 0x215   : > { %v11525_v62 = vpop.f32.mrf.mxu1  ;;  %v1812_v50 = vadd.f32 %v9478_v42, %v11294_v33 }
 0x216   : > { %v11531_v3 = vpop.f32.mrf.mxu0  ;;  %v1875_v46 = vpack.c.bf16 %v1380_v36, %v1376_v35 }
 0x217   : > { %13838 = vst [vmem:[#allocation36_spill] sm:$0xff] %v11531_v3  ;;  %v11534_v28 = vpop.f32.mrf.mxu1  ;;  %v11536_v20 = vpack.c.bf16 %v1812_v50, %v1809_v38 }
 0x218   : > { %v9481_v57 = vpop.f32.mrf.mxu0 }
 0x219   : > { %13839 = vst [vmem:[#allocation37_spill] sm:$0xff] %v11536_v20  ;;  %v11540_v7 = vpop.f32.mrf.mxu1  ;;  %v1825_v55 = vadd.f32 %v9481_v57, %v11294_v33 }
 0x21a   : > { %9520 = vmatmul.mubr.bf16.gmra.mxu1 %v1870_v16  ;;  %v11542_v63 = vpop.f32.mrf.mxu0 }
 0x21b   : > { %13840 = vst [vmem:[#allocation38_spill] sm:$0xff] %v11542_v63  ;;  %v11544_v9 = vpop.f32.mrf.mxu1  ;;  %9526 = vmatpush3.bf16.xpose.msra.mxu0 %v1905_v60  ;;  %9547 = vmatprep.mubr.bf16.mxu1 %v1875_v46  ;;  %v1338_v60 = vadd.f32 %v11441_v30, %v11351_v37 }
 0x21c   : > { %9527 = vmatprep.subr.bf16.mxu0 %v1904_v19  ;;  %v9482_v38 = vpop.f32.mrf.mxu0 }
 0x21d   : > { %v1391_v25 = vpop.f32.mrf.mxu1  ;;  %v1828_v42 = vadd.f32 %v9482_v38, %v11294_v33  ;;  %v1903_v16 = vpack.c.bf16 %v1342_v52, %v1338_v60 }
 0x21e   : > { %v11550_v36 = vpop.f32.mrf.mxu0 }
 0x21f   : > { %13841 = vst [vmem:[#allocation39_spill] sm:$0xff] %v11550_v36  ;;  %v11552_v50 = vpop.f32.mrf.mxu1  ;;  %v11554_v56 = vpack.c.bf16 %v1828_v42, %v1825_v55 }
 0x220   : > { %v9485_v0 = vpop.f32.mrf.mxu0 }
 0x221   : > { %13842 = vst [vmem:[#allocation40_spill] sm:$0xff] %v11554_v56  ;;  %v1397_v35 = vpop.f32.mrf.mxu1  ;;  %v1841_v46 = vadd.f32 %v9485_v0, %v11294_v33  ;;  %v1350_v0 = vadd.f32 %v11469_v29, %v11290_v15 }
 0x222   : > { %v11558_v23 = vpop.f32.mrf.mxu0 }
 0x223   : > { %13843 = vst [vmem:[#allocation41_spill] sm:$0xff] %v11558_v23  ;;  %v11560_v57 = vpop.f32.mrf.mxu1  ;;  %9528 = vmatpush3.bf16.xpose.msra.mxu0 %v1904_v19 }
 0x224   : > { %9529 = vmatprep.subr.bf16.mxu0 %v1903_v16  ;;  %v9486_v1 = vpop.f32.mrf.mxu0 }
 0x225   : > { %v1401_v38 = vpop.f32.mrf.mxu1  ;;  %v1844_v20 = vadd.f32 %v9486_v1, %v11294_v33  ;;  %v1360_v1 = vadd.f32 %v11485_v12, %v11290_v15  ;;  %v1398_v12 = vadd.f32 %v1397_v35, %v11351_v37  ;;  %v1366_v35 = vadd.f32 %v11491_v41, %v11290_v15 }
 0x226   : > { %v11564_v55 = vpop.f32.mrf.mxu0 }
 0x227   : > { %13844 = vst [vmem:[#allocation42_spill] sm:$0xff] %v11564_v55  ;;  %v11566_v42 = vpop.f32.mrf.mxu1  ;;  %v11568_v30 = vpack.c.bf16 %v1844_v20, %v1841_v46  ;;  %v1346_v46 = vadd.f32 %v11459_v4, %v11290_v15 }
 0x228   : > { %v9489_v3 = vpop.f32.mrf.mxu0 }
 0x229   : > { %13845 = vst [vmem:[#allocation43_spill] sm:$0xff] %v11568_v30  ;;  %v1407_v52 = vpop.f32.mrf.mxu1  ;;  %v1857_v19 = vadd.f32 %v9489_v3, %v11294_v33  ;;  %v1402_v30 = vadd.f32 %v1401_v38, %v11351_v37  ;;  %v1356_v3 = vadd.f32 %v11477_v39, %v11290_v15  ;;  %v1872_v63 = vpack.c.bf16 %v1350_v0, %v1346_v46 }
 0x22a   : > { %v11570_v60 = vpop.f32.mrf.mxu0 }
 0x22b   : > { %13846 = vst [vmem:[#allocation44_spill] sm:$0xff] %v11570_v60  ;;  %v11572_v23 = vpop.f32.mrf.mxu1  ;;  %9530 = vmatpush3.bf16.xpose.msra.mxu0 %v1903_v16  ;;  %v1408_v60 = vadd.f32 %v1407_v52, %v11351_v37  ;;  %v1909_v4 = vpack.c.bf16 %v1402_v30, %v1398_v12 }
 0x22c   : > { %v9490_v51 = vpop.f32.mrf.mxu0 }
 0x22d   : > { %v1411_v55 = vpop.f32.mrf.mxu1  ;;  %v1860_v20 = vadd.f32 %v9490_v51, %v11294_v33  ;;  %v1873_v51 = vpack.c.bf16 %v1360_v1, %v1356_v3 }
 0x22e   : > { %v1412_v16 = vadd.f32 %v1411_v55, %v11351_v37  ;;  %v1370_v55 = vadd.f32 %v11497_v49, %v11290_v15 }
 0x22f   : > { %v1415_v29 = vpop.f32.mrf.mxu1  ;;  %v11587_v36 = vpack.c.bf16 %v1860_v20, %v1857_v19 }
 0x230   : > { %v1910_v56 = vpack.c.bf16 %v1412_v16, %v1408_v60  ;;  %v1392_v60 = vadd.f32 %v1391_v25, %v11351_v37  ;;  %v1416_v30 = vadd.f32 %v1415_v29, %v11290_v15  ;;  %v1874_v19 = vpack.c.bf16 %v1370_v55, %v1366_v35 }
 0x231   : > { %13847 = vst [vmem:[#allocation45_spill] sm:$0xff] %v11587_v36  ;;  %v11590_v26 = vpop.f32.mrf.mxu1  ;;  %v1382_v25 = vadd.f32 %v11525_v62, %v11351_v37  ;;  %v1378_v16 = vadd.f32 %v11517_v27, %v11351_v37  ;;  %v1390_v62 = vadd.f32 %v11544_v9, %v11290_v15  ;;  %v1400_v55 = vadd.f32 %v11560_v57, %v11290_v15 }
 0x232   : > { %9532 = vmatmul.mubr.bf16.vlgmr.msra.gmra.mxu0 %v1872_v63  ;;  %9539 = vmatprep.subr.bf16.mxu1 %v1910_v56  ;;  %v1386_v27 = vadd.f32 %v11534_v28, %v11290_v15 }
 0x233   : > { %v1419_v38 = vpop.f32.mrf.mxu1  ;;  %9540 = vmatpush3.bf16.xpose.msra.mxu1 %v1910_v56  ;;  %9535 = vmatprep.mubr.bf16.mxu0 %v1873_v51  ;;  %v1388_v56 = vadd.f32 %v11540_v7, %v11351_v37  ;;  %v1907_v7 = vpack.c.bf16 %v1382_v25, %v1378_v16 }
 0x234   : > { %9541 = vmatprep.subr.bf16.mxu1 %v1909_v4  ;;  %v1420_v39 = vadd.f32 %v1419_v38, %v11290_v15 }
 0x235   : > { %v11595_v52 = vpop.f32.mrf.mxu1  ;;  %v1908_v1 = vpack.c.bf16 %v1392_v60, %v1388_v56 }
 0x236   : > { %v1879_v0 = vpack.c.bf16 %v1420_v39, %v1416_v30 }
 0x237   : > { %v11601_v63 = vpop.f32.mrf.mxu1 }
 0x239   : > { %v1427_v49 = vpop.f32.mrf.mxu1 }
 0x23a   : > { %9536 = vmatmul.mubr.bf16.gmra.mxu0 %v1874_v19  ;;  %v1396_v19 = vadd.f32 %v11552_v50, %v11290_v15 }
 0x23b   : > { %v11605_v20 = vpop.f32.mrf.mxu1  ;;  %9542 = vmatpush3.bf16.xpose.msra.mxu1 %v1909_v4  ;;  %9563 = vmatprep.mubr.bf16.mxu0 %v1879_v0  ;;  %v1876_v0 = vpack.c.bf16 %v1390_v62, %v1386_v27  ;;  %v1428_v27 = vadd.f32 %v1427_v49, %v11351_v37 }
 0x23c   : > { %9543 = vmatprep.subr.bf16.mxu1 %v1908_v1  ;;  %v1877_v25 = vpack.c.bf16 %v1400_v55, %v1396_v19 }
 0x23d   : > { %v1431_v41 = vpop.f32.mrf.mxu1 }
 0x23f   : > { %v11609_v46 = vpop.f32.mrf.mxu1 }
 0x241   : > { %v1437_v3 = vpop.f32.mrf.mxu1 }
 0x242   : > { %v1438_v9 = vadd.f32 %v1437_v3, %v11351_v37  ;;  %v1406_v3 = vadd.f32 %v11566_v42, %v11290_v15  ;;  %v1422_v42 = vadd.f32 %v11595_v52, %v11351_v37  ;;  %v1430_v52 = vadd.f32 %v11605_v20, %v11290_v15 }
 0x243   : > { %v1439_v29 = vpop.f32.mrf.mxu1  ;;  %9544 = vmatpush3.bf16.xpose.msra.mxu1 %v1908_v1 }
 0x244   : > { %9545 = vmatprep.subr.bf16.mxu1 %v1907_v7 }
 0x245   : > { %v1441_v12 = vpop.f32.mrf.mxu1 }
 0x246   : > { %v1442_v35 = vadd.f32 %v1441_v12, %v11351_v37 }
 0x247   : > { %v11613_v51 = vpop.f32.mrf.mxu1 }
 0x248   : > { %v1913_v16 = vpack.c.bf16 %v1442_v35, %v1438_v9 }
 0x249   : > { %v1447_v4 = vpop.f32.mrf.mxu1 }
 0x24a   : > { %v1448_v60 = vadd.f32 %v1447_v4, %v11351_v37  ;;  %v1432_v4 = vadd.f32 %v1431_v41, %v11351_v37 }
 0x24b   : > { %v11615_v38 = vpop.f32.mrf.mxu1  ;;  %9546 = vmatpush3.bf16.xpose.msra.mxu1 %v1907_v7  ;;  %v1410_v7 = vadd.f32 %v11572_v23, %v11290_v15 }
 0x24c   : > { %v1912_v23 = vpack.c.bf16 %v1432_v4, %v1428_v27 }
 0x24d   : > { %v1451_v39 = vpop.f32.mrf.mxu1 }
 0x24e   : > { %v1452_v30 = vadd.f32 %v1451_v39, %v11351_v37  ;;  %v1878_v39 = vpack.c.bf16 %v1410_v7, %v1406_v3  ;;  %v1440_v7 = vadd.f32 %v1439_v29, %v11290_v15 }
 0x24f   : > { %v1455_v56 = vpop.f32.mrf.mxu1 }
 0x250   : > { %v1914_v1 = vpack.c.bf16 %v1452_v30, %v1448_v60  ;;  %v1456_v62 = vadd.f32 %v1455_v56, %v11290_v15  ;;  %v1418_v56 = vadd.f32 %v11590_v26, %v11351_v37  ;;  %v1426_v26 = vadd.f32 %v11601_v63, %v11290_v15 }
 0x251   : > { %v11629_v57 = vpop.f32.mrf.mxu1 }
 0x252   : > { %9548 = vmatmul.mubr.bf16.vlgmr.msra.gmra.mxu1 %v1876_v0  ;;  %9555 = vmatprep.subr.bf16.mxu0 %v1914_v1  ;;  %v1911_v49 = vpack.c.bf16 %v1422_v42, %v1418_v56 }
 0x253   : > { %v1459_v28 = vpop.f32.mrf.mxu1  ;;  %9556 = vmatpush3.bf16.xpose.msra.mxu0 %v1914_v1  ;;  %9551 = vmatprep.mubr.bf16.mxu1 %v1877_v25 }
 0x254   : > { %9557 = vmatprep.subr.bf16.mxu0 %v1913_v16  ;;  %v1460_v50 = vadd.f32 %v1459_v28, %v11290_v15 }
 0x255   : > { %v11634_v12 = vpop.f32.mrf.mxu1 }
 0x256   : > { %v1883_v35 = vpack.c.bf16 %v1460_v50, %v1456_v62 }
 0x257   : > { %v11640_v55 = vpop.f32.mrf.mxu1 }
 0x259   : > { %v1467_v60 = vpop.f32.mrf.mxu1 }
 0x25a   : > { %9552 = vmatmul.mubr.bf16.gmra.mxu1 %v1878_v39  ;;  %v1436_v39 = vadd.f32 %v11609_v46, %v11290_v15 }
 0x25b   : > { %v11643_v30 = vpop.f32.mrf.mxu1  ;;  %9558 = vmatpush3.bf16.xpose.msra.mxu0 %v1913_v16  ;;  %9579 = vmatprep.mubr.bf16.mxu1 %v1883_v35  ;;  %v1880_v35 = vpack.c.bf16 %v1430_v52, %v1426_v26  ;;  %v1468_v26 = vadd.f32 %v1467_v60, %v11351_v37 }
 0x25c   : > { %9559 = vmatprep.subr.bf16.mxu0 %v1912_v23  ;;  %v1881_v42 = vpack.c.bf16 %v1440_v7, %v1436_v39 }
 0x25d   : > { %v1471_v19 = vpop.f32.mrf.mxu1 }
 0x25f   : > { %v11647_v41 = vpop.f32.mrf.mxu1 }
 0x261   : > { %v1477_v0 = vpop.f32.mrf.mxu1 }
 0x263   : > { %v1479_v9 = vpop.f32.mrf.mxu1  ;;  %9560 = vmatpush3.bf16.xpose.msra.mxu0 %v1912_v23  ;;  %v1478_v23 = vadd.f32 %v1477_v0, %v11351_v37  ;;  %v1446_v0 = vadd.f32 %v11613_v51, %v11290_v15  ;;  %v1462_v51 = vadd.f32 %v11634_v12, %v11351_v37  ;;  %v1470_v12 = vadd.f32 %v11643_v30, %v11290_v15 }
 0x264   : > { %9561 = vmatprep.subr.bf16.mxu0 %v1911_v49 }
 0x265   : > { %v1481_v1 = vpop.f32.mrf.mxu1 }
 0x266   : > { %v1482_v3 = vadd.f32 %v1481_v1, %v11351_v37 }
 0x267   : > { %v11651_v25 = vpop.f32.mrf.mxu1 }
 0x268   : > { %v1917_v56 = vpack.c.bf16 %v1482_v3, %v1478_v23 }
 0x269   : > { %v1487_v16 = vpop.f32.mrf.mxu1 }
 0x26a   : > { %v1488_v4 = vadd.f32 %v1487_v16, %v11351_v37  ;;  %v1472_v16 = vadd.f32 %v1471_v19, %v11351_v37 }
 0x26b   : > { %v11653_v28 = vpop.f32.mrf.mxu1  ;;  %9562 = vmatpush3.bf16.xpose.msra.mxu0 %v1911_v49  ;;  %v1450_v49 = vadd.f32 %v11615_v38, %v11290_v15 }
 0x26c   : > { %v1916_v38 = vpack.c.bf16 %v1472_v16, %v1468_v26 }
 0x26d   : > { %v1491_v50 = vpop.f32.mrf.mxu1 }
 0x26e   : > { %v1492_v62 = vadd.f32 %v1491_v50, %v11351_v37  ;;  %v1882_v50 = vpack.c.bf16 %v1450_v49, %v1446_v0  ;;  %v1480_v49 = vadd.f32 %v1479_v9, %v11290_v15 }
 0x26f   : > { %v1495_v27 = vpop.f32.mrf.mxu1 }
 0x270   : > { %v1918_v20 = vpack.c.bf16 %v1492_v62, %v1488_v4  ;;  %v1496_v52 = vadd.f32 %v1495_v27, %v11290_v15  ;;  %v1458_v27 = vadd.f32 %v11629_v57, %v11351_v37  ;;  %v1466_v57 = vadd.f32 %v11640_v55, %v11290_v15 }
 0x271   : > { %v11666_v29 = vpop.f32.mrf.mxu1 }
 0x272   : > { %9564 = vmatmul.mubr.bf16.vlgmr.msra.gmra.mxu0 %v1880_v35  ;;  %9571 = vmatprep.subr.bf16.mxu1 %v1918_v20  ;;  %v1915_v60 = vpack.c.bf16 %v1462_v51, %v1458_v27 }
 0x273   : > { %v1499_v63 = vpop.f32.mrf.mxu1  ;;  %9572 = vmatpush3.bf16.xpose.msra.mxu1 %v1918_v20  ;;  %9567 = vmatprep.mubr.bf16.mxu0 %v1881_v42 }
 0x274   : > { %9573 = vmatprep.subr.bf16.mxu1 %v1917_v56  ;;  %v1500_v46 = vadd.f32 %v1499_v63, %v11290_v15 }
 0x275   : > { %v11671_v1 = vpop.f32.mrf.mxu1 }
 0x276   : > { %v1887_v3 = vpack.c.bf16 %v1500_v46, %v1496_v52 }
 0x277   : > { %v11677_v7 = vpop.f32.mrf.mxu1 }
 0x279   : > { %v1507_v4 = vpop.f32.mrf.mxu1 }
 0x27a   : > { %9568 = vmatmul.mubr.bf16.gmra.mxu0 %v1882_v50  ;;  %v1476_v50 = vadd.f32 %v11647_v41, %v11290_v15 }
 0x27b   : > { %v11680_v62 = vpop.f32.mrf.mxu1  ;;  %9574 = vmatpush3.bf16.xpose.msra.mxu1 %v1917_v56  ;;  %9595 = vmatprep.mubr.bf16.mxu0 %v1887_v3  ;;  %v1884_v3 = vpack.c.bf16 %v1470_v12, %v1466_v57  ;;  %v1508_v57 = vadd.f32 %v1507_v4, %v11351_v37 }
 0x27c   : > { %9575 = vmatprep.subr.bf16.mxu1 %v1916_v38  ;;  %v1885_v51 = vpack.c.bf16 %v1480_v49, %v1476_v50 }
 0x27d   : > { %v1511_v39 = vpop.f32.mrf.mxu1 }
 0x27f   : > { %v11684_v19 = vpop.f32.mrf.mxu1 }
 0x281   : > { %v1517_v35 = vpop.f32.mrf.mxu1 }
 0x283   : > { %v11688_v23 = vpop.f32.mrf.mxu1  ;;  %9576 = vmatpush3.bf16.xpose.msra.mxu1 %v1916_v38  ;;  %v1518_v38 = vadd.f32 %v1517_v35, %v11351_v37  ;;  %v1486_v35 = vadd.f32 %v11651_v25, %v11290_v15 }
 0x284   : > { %9577 = vmatprep.subr.bf16.mxu1 %v1915_v60 }
 0x285   : > { %v1521_v20 = vpop.f32.mrf.mxu1 }
 0x286   : > { %v1522_v0 = vadd.f32 %v1521_v20, %v11351_v37 }
 0x287   : > { %v11690_v42 = vpop.f32.mrf.mxu1 }
 0x288   : > { %v1921_v27 = vpack.c.bf16 %v1522_v0, %v1518_v38 }
 0x289   : > { %v1527_v56 = vpop.f32.mrf.mxu1 }
 0x28a   : > { %v1528_v16 = vadd.f32 %v1527_v56, %v11351_v37  ;;  %v1512_v56 = vadd.f32 %v1511_v39, %v11351_v37  ;;  %v1502_v39 = vadd.f32 %v11671_v1, %v11351_v37  ;;  %v1510_v1 = vadd.f32 %v11680_v62, %v11290_v15 }
 0x28b   : > { %v11692_v63 = vpop.f32.mrf.mxu1  ;;  %9578 = vmatpush3.bf16.xpose.msra.mxu1 %v1915_v60  ;;  %v1490_v60 = vadd.f32 %v11653_v28, %v11290_v15  ;;  %v1625_v62 = vadd.f32 %v11314_v2, %v11294_v33 }
 0x28c   : > { %v1920_v28 = vpack.c.bf16 %v1512_v56, %v1508_v57 }
 0x28d   : > { %v1531_v46 = vpop.f32.mrf.mxu1 }
 0x28e   : > { %v1532_v52 = vadd.f32 %v1531_v46, %v11351_v37  ;;  %v1886_v46 = vpack.c.bf16 %v1490_v60, %v1486_v35 }
 0x28f   : > { %v1535_v26 = vpop.f32.mrf.mxu1 }
 0x290   : > { %v1922_v30 = vpack.c.bf16 %v1532_v52, %v1528_v16  ;;  %v1536_v12 = vadd.f32 %v1535_v26, %v11290_v15  ;;  %v1498_v26 = vadd.f32 %v11666_v29, %v11351_v37  ;;  %v1628_v29 = vadd.f32 %v11320_v10, %v11294_v33 }
 0x291   : > { %v11705_v9 = vpop.f32.mrf.mxu1 }
 0x292   : > { %9587 = vmatprep.subr.bf16.mxu0 %v1922_v30  ;;  %9580 = vmatmul.mubr.bf16.vlgmr.msra.gmra.mxu1 %v1884_v3  ;;  %v1919_v3 = vpack.c.bf16 %v1502_v39, %v1498_v26  ;;  %v1929_v39 = vpack.c.bf16 %v1628_v29, %v1625_v62 }
 0x293   : > { %v1539_v55 = vpop.f32.mrf.mxu1  ;;  %9588 = vmatpush3.bf16.xpose.msra.mxu0 %v1922_v30  ;;  %9583 = vmatprep.mubr.bf16.mxu1 %v1885_v51 }
 0x294   : > { %9589 = vmatprep.subr.bf16.mxu0 %v1921_v27  ;;  %v1540_v41 = vadd.f32 %v1539_v55, %v11290_v15 }
 0x295   : > { %v11710_v20 = vpop.f32.mrf.mxu1 }
 0x296   : > { %v1891_v0 = vpack.c.bf16 %v1540_v41, %v1536_v12  ;;  %v1506_v41 = vadd.f32 %v11677_v7, %v11290_v15  ;;  %v1516_v7 = vadd.f32 %v11684_v19, %v11290_v15  ;;  %v11765_v19 = vld [vmem:[%s13749_s2] sm:$0xff] }
 0x297   : > { %v11716_v49 = vpop.f32.mrf.mxu1 }
 0x298   : > { %v1888_v57 = vpack.c.bf16 %v1510_v1, %v1506_v41  ;;  %v11777_v41 = vld [vmem:[%s13749_s2 + $0x18] sm:$0xff] }
 0x299   : > { %v11719_v16 = vpop.f32.mrf.mxu1 }
 0x29a   : > { %9584 = vmatmul.mubr.bf16.gmra.mxu1 %v1886_v46  ;;  %v1520_v46 = vadd.f32 %v11688_v23, %v11290_v15  ;;  %v11757_v23 = vld [vmem:[%s13749_s2 + $0x10] sm:$0xff] }
 0x29b   : > { %v11721_v52 = vpop.f32.mrf.mxu1  ;;  %9590 = vmatpush3.bf16.xpose.msra.mxu0 %v1921_v27  ;;  %9611 = vmatprep.mubr.bf16.mxu1 %v1891_v0 }
 0x29c   : > { %9591 = vmatprep.subr.bf16.mxu0 %v1920_v28  ;;  %v1889_v2 = vpack.c.bf16 %v1520_v46, %v1516_v7 }
 0x29d   : > { %v1551_v25 = vpop.f32.mrf.mxu1 }
 0x29f   : > { %v11725_v50 = vpop.f32.mrf.mxu1 }
 0x2a1   : > { %v1557_v4 = vpop.f32.mrf.mxu1 }
 0x2a2   : > { %v1558_v0 = vadd.f32 %v1557_v4, %v11351_v37  ;;  %v1530_v4 = vadd.f32 %v11692_v63, %v11290_v15  ;;  %v1526_v63 = vadd.f32 %v11690_v42, %v11290_v15 }
 0x2a3   : > { %v11729_v38 = vpop.f32.mrf.mxu1  ;;  %9592 = vmatpush3.bf16.xpose.msra.mxu0 %v1920_v28  ;;  %v11750_v28 = vpop.f32.mrf.mxu0 }
 0x2a4   : > { %9593 = vmatprep.subr.bf16.mxu0 %v1919_v3  ;;  %13848 = vst [vmem:[#allocation46_spill] sm:$0xff] %v11750_v28  ;;  %v1890_v42 = vpack.c.bf16 %v1530_v4, %v1526_v63 }
 0x2a5   : > { %v1561_v30 = vpop.f32.mrf.mxu1 }
 0x2a6   : > { %v1562_v35 = vadd.f32 %v1561_v30, %v11351_v37 }
 0x2a7   : > { %v11731_v51 = vpop.f32.mrf.mxu1 }
 0x2a8   : > { %v1925_v26 = vpack.c.bf16 %v1562_v35, %v1558_v0  ;;  %v1552_v35 = vadd.f32 %v1551_v25, %v11351_v37  ;;  %v11791_v25 = vld [vmem:[%s13749_s2 + $0x8] sm:$0xff] }
 0x2a9   : > { %v1567_v27 = vpop.f32.mrf.mxu1 }
 0x2aa   : > { %v1568_v56 = vadd.f32 %v1567_v27, %v11351_v37 }
 0x2ab   : > { %v11733_v55 = vpop.f32.mrf.mxu1  ;;  %9594 = vmatpush3.bf16.xpose.msra.mxu0 %v1919_v3 }
 0x2ac   : > { %9619 = vmatprep.subr.bf16.mxu0 %v11322_v11 }
 0x2ad   : > { %v1571_v60 = vpop.f32.mrf.mxu1 }
 0x2ae   : > { %v1572_v12 = vadd.f32 %v1571_v60, %v11351_v37 }
 0x2b0   : > { %v1926_v10 = vpack.c.bf16 %v1572_v12, %v1568_v56 }
 0x2b2   : > { %v9501_v3 = vpop.f32.mrf.mxu0  ;;  %9603 = vmatprep.subr.bf16.mxu1 %v1926_v10  ;;  %9596 = vmatmul.mubr.bf16.vlgmr.msra.gmra.mxu0 %v1888_v57  ;;  %v1548_v57 = vadd.f32 %v11719_v16, %v11351_v37 }
 0x2b3   : > { %v2481_v30 = vmul.f32 0.17677669, %v9501_v3  ;;  %9604 = vmatpush3.bf16.xpose.msra.mxu1 %v1926_v10  ;;  %9620 = vmatpush3.bf16.msra.mxu0 %v11322_v11  ;;  %v1612_v11 = vadd.f32 %v11306_v59, %v11294_v33  ;;  %v1609_v59 = vadd.f32 %v11298_v48, %v11294_v33  ;;  %v11803_v3 = vld [vmem:[%s13749_s2 + $0x30] sm:$0xff] }
 0x2b4   : > { %v1993_v27 = vpop.f32.mrf.mxu0  ;;  %9621 = vmatprep.subr.bf16.mxu0 %v1929_v39  ;;  %9605 = vmatprep.subr.bf16.mxu1 %v1925_v26 }
 0x2b5   : > { %v2479_v1 = vmul.f32 0.17677669, %v1993_v27  ;;  %v11768_v29 = vadd.f32 %v2481_v30, %v11757_v23  ;;  %9599 = vmatprep.mubr.bf16.mxu0 %v1889_v2  ;;  %v1927_v48 = vpack.c.bf16 %v1612_v11, %v1609_v59  ;;  %v1924_v2 = vpack.c.bf16 %v1552_v35, %v1548_v57  ;;  %v11826_v35 = vld [vmem:[%s13749_s2 + $0x20] sm:$0xff] }
 0x2b6   : > { %v9502_v60 = vpop.f32.mrf.mxu0 }
 0x2b7   : > { %v2482_v56 = vmul.f32 0.17677669, %v9502_v60  ;;  %9622 = vmatpush3.bf16.msra.mxu0 %v1929_v39  ;;  %v2614_v12 = vsel %vm2607_vm2, %v11768_v29, -inf  ;;  %v11783_v46 = vadd.f32 %v2479_v1, %v11765_v19  ;;  %v11821_v60 = vld [vmem:[%s13749_s2 + $0x38] sm:$0xff] }
 0x2b8   : > { %9623 = vmatprep.subr.bf16.mxu0 %v11308_v17  ;;  %2615 = vmax.xlane.f32.xlu1 %v2614_v12  ;;  %v1996_v62 = vpop.f32.mrf.mxu0  ;;  %v1538_v12 = vadd.f32 %v11705_v9, %v11351_v37 }
 0x2b9   : > { %v2480_v0 = vmul.f32 0.17677669, %v1996_v62  ;;  %v2608_v10 = vsel %vm2607_vm2, %v11783_v46, -inf  ;;  %v11798_v7 = vadd.f32 %v2482_v56, %v11777_v41 }
 0x2ba   : > { %2609 = vmax.xlane.f32.xlu0 %v2608_v10  ;;  %v9505_v39 = vpop.f32.mrf.mxu0  ;;  %9600 = vmatmul.mubr.bf16.gmra.mxu0 %v1890_v42 }
 0x2bb   : > { %v2485_v30 = vmul.f32 0.17677669, %v9505_v39  ;;  %9606 = vmatpush3.bf16.xpose.msra.mxu1 %v1925_v26  ;;  %9624 = vmatpush3.bf16.msra.mxu0 %v11308_v17  ;;  %v2617_v16 = vsel %vm2607_vm2, %v11798_v7, -inf  ;;  %v11809_v4 = vadd.f32 %v2480_v0, %v11791_v25  ;;  %v1542_v17 = vadd.f32 %v11710_v20, %v11351_v37  ;;  %v11834_v20 = vld [vmem:[%s13749_s2 + $0x28] sm:$0xff] }
 0x2bc   : > { %9625 = vmatprep.subr.bf16.mxu0 %v1927_v48  ;;  %2618 = vmax.xlane.f32.xlu1 %v2617_v16  ;;  %v2009_v27 = vpop.f32.mrf.mxu0  ;;  %v1689_v16 = vadd.f32 %v11384_v22, %v11294_v33  ;;  %v1570_v22 = vadd.f32 %v11733_v55, %v11290_v15 }
 0x2bd   : > { %v2483_v1 = vmul.f32 0.17677669, %v2009_v27  ;;  %v2611_v11 = vsel %vm2607_vm2, %v11809_v4, -inf  ;;  %9607 = vmatprep.subr.bf16.mxu1 %v1924_v2  ;;  %v11814_v63 = vadd.f32 %v2485_v30, %v11803_v3  ;;  %v1923_v10 = vpack.c.bf16 %v1542_v17, %v1538_v12 }
 0x2be   : > { %2612 = vmax.xlane.f32.xlu0 %v2611_v11  ;;  %v9506_v26 = vpop.f32.mrf.mxu0  ;;  %v1560_v30 = vadd.f32 %v11729_v38, %v11290_v15  ;;  %v1692_v27 = vadd.f32 %v11394_v34, %v11294_v33  ;;  %v1556_v11 = vadd.f32 %v11725_v50, %v11290_v15  ;;  %v1673_v50 = vadd.f32 %v11366_v53, %v11294_v33 }
 0x2bf   : > { %v2486_v56 = vmul.f32 0.17677669, %v9506_v26  ;;  %9626 = vmatpush3.bf16.msra.mxu0 %v1927_v48  ;;  %v2626_v62 = vsel %vm2607_vm2, %v11814_v63, -inf  ;;  %v11842_v0 = vadd.f32 %v2483_v1, %v11826_v35  ;;  %v1546_v1 = vadd.f32 %v11716_v49, %v11290_v15 }
 0x2c0   : > { %v2012_v59 = vpop.f32.mrf.mxu0  ;;  %9635 = vmatprep.subr.bf16.mxu0 %v11360_v61  ;;  %v1893_v26 = vpack.c.bf16 %v1560_v30, %v1556_v11 }
 0x2c1   : > { %v2484_v42 = vmul.f32 0.17677669, %v2012_v59  ;;  %v11839_v57 = vadd.f32 %v2486_v56, %v11821_v60  ;;  %v2620_v48 = vsel %vm2607_vm2, %v11842_v0, -inf  ;;  %v1676_v59 = vadd.f32 %v11373_v5, %v11294_v33 }
 0x2c2   : > { %2627 = vmax.xlane.f32.xlu0 %v2626_v62 }
 0x2c3   : > { %9608 = vmatpush3.bf16.xpose.msra.mxu1 %v1924_v2  ;;  %v2629_v37 = vsel %vm2607_vm2, %v11839_v57, -inf  ;;  %v11847_v9 = vadd.f32 %v2484_v42, %v11834_v20  ;;  %v1550_v2 = vadd.f32 %v11721_v52, %v11290_v15  ;;  %v1937_v52 = vpack.c.bf16 %v1692_v27, %v1689_v16 }
 0x2c4   : > { %2630 = vmax.xlane.f32.xlu1 %v2629_v37  ;;  %9609 = vmatprep.subr.bf16.mxu1 %v1923_v10  ;;  %v1566_v42 = vadd.f32 %v11731_v51, %v11290_v15 }
 0x2c5   : > { %v2623_v39 = vsel %vm2607_vm2, %v11847_v9, -inf  ;;  %v1892_v17 = vpack.c.bf16 %v1550_v2, %v1546_v1 }
 0x2c6   : > { %2621 = vmax.xlane.f32.xlu0 %v2620_v48  ;;  %v1894_v37 = vpack.c.bf16 %v1570_v22, %v1566_v42 }
 0x2c8   : > { %2624 = vmax.xlane.f32.xlu1 %v2623_v39  ;;  %v1935_v39 = vpack.c.bf16 %v1676_v59, %v1673_v50 }
 0x2cb   : > { %9610 = vmatpush3.bf16.xpose.msra.mxu1 %v1923_v10 }
 0x2cc   : > { %9651 = vmatprep.subr.bf16.mxu1 %v11399_v6 }
 0x2d2   : > { %v9517_v56 = vpop.f32.mrf.mxu1  ;;  %9612 = vmatmul.mubr.bf16.vlgmr.msra.gmra.mxu1 %v1892_v17 }
 0x2d3   : > { %v2489_v12 = vmul.f32 0.17677669, %v9517_v56  ;;  %9652 = vmatpush3.bf16.msra.mxu1 %v11399_v6  ;;  %9615 = vmatprep.mubr.bf16.mxu1 %v1893_v26 }
 0x2d4   : > { %v2058_v38 = vpop.f32.mrf.mxu1  ;;  %9653 = vmatprep.subr.bf16.mxu1 %v1937_v52 }
 0x2d5   : > { %v2487_v34 = vmul.f32 0.17677669, %v2058_v38  ;;  %v11870_v49 = vadd.f32 %v2489_v12, %v11757_v23 }
 0x2d6   : > { %v9518_v6 = vpop.f32.mrf.mxu1 }
 0x2d7   : > { %v2490_v62 = vmul.f32 0.17677669, %v9518_v6  ;;  %9654 = vmatpush3.bf16.msra.mxu1 %v1937_v52  ;;  %v2638_v55 = vsel %vm2607_vm2, %v11870_v49, -inf  ;;  %v11881_v10 = vadd.f32 %v2487_v34, %v11765_v19 }
 0x2d8   : > { %v2061_v48 = vpop.f32.mrf.mxu1  ;;  %9655 = vmatprep.subr.bf16.mxu1 %v11378_v8  ;;  %2639 = vmax.xlane.f32.xlu0 %v2638_v55 }
 0x2d9   : > { %v2488_v53 = vmul.f32 0.17677669, %v2061_v48  ;;  %v11885_v5 = vadd.f32 %v2490_v62, %v11777_v41  ;;  %v2632_v2 = vsel %vm2607_vm2, %v11881_v10, -inf }
 0x2da   : > { %v9521_v15 = vpop.f32.mrf.mxu1  ;;  %9616 = vmatmul.mubr.bf16.gmra.mxu1 %v1894_v37 }
 0x2db   : > { %v2493_v51 = vmul.f32 0.17677669, %v9521_v15  ;;  %9656 = vmatpush3.bf16.msra.mxu1 %v11378_v8  ;;  %v2641_v30 = vsel %vm2607_vm2, %v11885_v5, -inf  ;;  %v11893_v27 = vadd.f32 %v2488_v53, %v11791_v25 }
 0x2dc   : > { %v2074_v16 = vpop.f32.mrf.mxu1  ;;  %9657 = vmatprep.subr.bf16.mxu1 %v1935_v39  ;;  %2633 = vmax.xlane.f32.xlu0 %v2632_v2 }
 0x2dd   : > { %v2491_v1 = vmul.f32 0.17677669, %v2074_v16  ;;  %2642 = vmax.xlane.f32.xlu1 %v2641_v30  ;;  %v11896_v11 = vadd.f32 %v2493_v51, %v11803_v3  ;;  %v2635_v12 = vsel %vm2607_vm2, %v11893_v27, -inf }
 0x2de   : > { %v9522_v17 = vpop.f32.mrf.mxu1 }
 0x2df   : > { %v2494_v26 = vmul.f32 0.17677669, %v9522_v17  ;;  %9658 = vmatpush3.bf16.msra.mxu1 %v1935_v39  ;;  %v2650_v8 = vsel %vm2607_vm2, %v11896_v11, -inf  ;;  %v11901_v52 = vadd.f32 %v2491_v1, %v11826_v35 }
 0x2e0   : > { %v2077_v56 = vpop.f32.mrf.mxu1  ;;  %2651 = vmax.xlane.f32.xlu0 %v2650_v8  ;;  %9683 = vmatprep.subr.bf16.mxu1 %v11479_v40 }
 0x2e1   : > { %v2492_v22 = vmul.f32 0.17677669, %v2077_v56  ;;  %2636 = vmax.xlane.f32.xlu1 %v2635_v12  ;;  %v11907_v38 = vadd.f32 %v2494_v26, %v11821_v60  ;;  %v2644_v34 = vsel %vm2607_vm2, %v11901_v52, -inf }
 0x2e3   : > { %v2653_v50 = vsel %vm2607_vm2, %v11907_v38, -inf  ;;  %v11914_v59 = vadd.f32 %v2492_v22, %v11834_v20 }
 0x2e4   : > { %2645 = vmax.xlane.f32.xlu0 %v2644_v34 }
 0x2e5   : > { %2654 = vmax.xlane.f32.xlu1 %v2653_v50  ;;  %v2647_v42 = vsel %vm2607_vm2, %v11914_v59, -inf }
 0x2e9   : > { %2648 = vmax.xlane.f32.xlu1 %v2647_v42 }
 0x2f2   : > { %v9533_v6 = vpop.f32.mrf.mxu0 }
 0x2f3   : > { %v2497_v62 = vmul.f32 0.17677669, %v9533_v6 }
 0x2f4   : > { %v2123_v55 = vpop.f32.mrf.mxu0 }
 0x2f5   : > { %v2495_v37 = vmul.f32 0.17677669, %v2123_v55  ;;  %v11919_v48 = vadd.f32 %v2497_v62, %v11757_v23 }
 0x2f6   : > { %v9534_v53 = vpop.f32.mrf.mxu0 }
 0x2f7   : > { %v2498_v39 = vmul.f32 0.17677669, %v9534_v53  ;;  %v2662_v15 = vsel %vm2607_vm2, %v11919_v48, -inf  ;;  %v11924_v51 = vadd.f32 %v2495_v37, %v11765_v19 }
 0x2f8   : > { %2663 = vmax.xlane.f32.xlu0 %v2662_v15  ;;  %v2126_v2 = vpop.f32.mrf.mxu0 }
 0x2f9   : > { %v2496_v30 = vmul.f32 0.17677669, %v2126_v2  ;;  %v11927_v16 = vadd.f32 %v2498_v39, %v11777_v41  ;;  %v2656_v26 = vsel %vm2607_vm2, %v11924_v51, -inf }
 0x2fa   : > { %v9537_v1 = vpop.f32.mrf.mxu0 }
 0x2fb   : > { %v2501_v17 = vmul.f32 0.17677669, %v9537_v1  ;;  %v2665_v8 = vsel %vm2607_vm2, %v11927_v16, -inf  ;;  %v11934_v56 = vadd.f32 %v2496_v30, %v11791_v25 }
 0x2fc   : > { %2657 = vmax.xlane.f32.xlu0 %v2656_v26  ;;  %2666 = vmax.xlane.f32.xlu1 %v2665_v8  ;;  %v2139_v12 = vpop.f32.mrf.mxu0 }
 0x2fd   : > { %v2499_v22 = vmul.f32 0.17677669, %v2139_v12  ;;  %v11937_v34 = vadd.f32 %v2501_v17, %v11803_v3  ;;  %v2659_v6 = vsel %vm2607_vm2, %v11934_v56, -inf }
 0x2fe   : > { %v9538_v50 = vpop.f32.mrf.mxu0 }
 0x2ff   : > { %v2502_v42 = vmul.f32 0.17677669, %v9538_v50  ;;  %v2674_v62 = vsel %vm2607_vm2, %v11937_v34, -inf  ;;  %v11944_v55 = vadd.f32 %v2499_v22, %v11826_v35 }
 0x300   : > { %2660 = vmax.xlane.f32.xlu1 %v2659_v6  ;;  %2675 = vmax.xlane.f32.xlu0 %v2674_v62  ;;  %v2142_v37 = vpop.f32.mrf.mxu0 }
 0x301   : > { %v2500_v53 = vmul.f32 0.17677669, %v2142_v37  ;;  %v11947_v39 = vadd.f32 %v2502_v42, %v11821_v60  ;;  %v2668_v15 = vsel %vm2607_vm2, %v11944_v55, -inf }
 0x303   : > { %v2677_v2 = vsel %vm2607_vm2, %v11947_v39, -inf  ;;  %v11954_v30 = vadd.f32 %v2500_v53, %v11834_v20 }
 0x304   : > { %2669 = vmax.xlane.f32.xlu0 %v2668_v15  ;;  %2678 = vmax.xlane.f32.xlu1 %v2677_v2 }
 0x305   : > { %v2671_v1 = vsel %vm2607_vm2, %v11954_v30, -inf }
 0x308   : > { %2672 = vmax.xlane.f32.xlu1 %v2671_v1 }
 0x312   : > { %v9549_v17 = vpop.f32.mrf.mxu1 }
 0x313   : > { %v2505_v26 = vmul.f32 0.17677669, %v9549_v17 }
 0x314   : > { %v2188_v8 = vpop.f32.mrf.mxu1 }
 0x315   : > { %v2503_v12 = vmul.f32 0.17677669, %v2188_v8  ;;  %v11959_v22 = vadd.f32 %v2505_v26, %v11757_v23 }
 0x316   : > { %v9550_v50 = vpop.f32.mrf.mxu1 }
 0x317   : > { %v2506_v42 = vmul.f32 0.17677669, %v9550_v50  ;;  %v2686_v6 = vsel %vm2607_vm2, %v11959_v22, -inf  ;;  %v11964_v62 = vadd.f32 %v2503_v12, %v11765_v19 }
 0x318   : > { %v2191_v37 = vpop.f32.mrf.mxu1  ;;  %2687 = vmax.xlane.f32.xlu0 %v2686_v6 }
 0x319   : > { %v2504_v53 = vmul.f32 0.17677669, %v2191_v37  ;;  %v11967_v15 = vadd.f32 %v2506_v42, %v11777_v41  ;;  %v2680_v17 = vsel %vm2607_vm2, %v11964_v62, -inf }
 0x31a   : > { %v9553_v2 = vpop.f32.mrf.mxu1 }
 0x31b   : > { %v2509_v1 = vmul.f32 0.17677669, %v9553_v2  ;;  %v2689_v26 = vsel %vm2607_vm2, %v11967_v15, -inf  ;;  %v11974_v8 = vadd.f32 %v2504_v53, %v11791_v25 }
 0x31c   : > { %v2204_v50 = vpop.f32.mrf.mxu1  ;;  %2681 = vmax.xlane.f32.xlu0 %v2680_v17  ;;  %2690 = vmax.xlane.f32.xlu1 %v2689_v26 }
 0x31d   : > { %v2507_v12 = vmul.f32 0.17677669, %v2204_v50  ;;  %v11977_v6 = vadd.f32 %v2509_v1, %v11803_v3  ;;  %v2683_v28 = vsel %vm2607_vm2, %v11974_v8, -inf }
 0x31e   : > { %v9554_v42 = vpop.f32.mrf.mxu1 }
 0x31f   : > { %v2510_v37 = vmul.f32 0.17677669, %v9554_v42  ;;  %v2698_v2 = vsel %vm2607_vm2, %v11977_v6, -inf  ;;  %v11984_v36 = vadd.f32 %v2507_v12, %v11826_v35 }
 0x320   : > { %2699 = vmax.xlane.f32.xlu0 %v2698_v2  ;;  %2684 = vmax.xlane.f32.xlu1 %v2683_v28  ;;  %v2207_v53 = vpop.f32.mrf.mxu1 }
 0x321   : > { %v2508_v17 = vmul.f32 0.17677669, %v2207_v53  ;;  %v11987_v26 = vadd.f32 %v2510_v37, %v11821_v60  ;;  %v2692_v1 = vsel %vm2607_vm2, %v11984_v36, -inf }
 0x323   : > { %v2701_v50 = vsel %vm2607_vm2, %v11987_v26, -inf  ;;  %v11994_v42 = vadd.f32 %v2508_v17, %v11834_v20 }
 0x324   : > { %2693 = vmax.xlane.f32.xlu0 %v2692_v1  ;;  %2702 = vmax.xlane.f32.xlu1 %v2701_v50 }
 0x325   : > { %v2695_v12 = vsel %vm2607_vm2, %v11994_v42, -inf }
 0x328   : > { %2696 = vmax.xlane.f32.xlu1 %v2695_v12 }
 0x332   : > { %v9565_v28 = vpop.f32.mrf.mxu0 }
 0x333   : > { %v2513_v2 = vmul.f32 0.17677669, %v9565_v28 }
 0x334   : > { %v2253_v53 = vpop.f32.mrf.mxu0 }
 0x335   : > { %v2511_v37 = vmul.f32 0.17677669, %v2253_v53  ;;  %v11999_v40 = vadd.f32 %v2513_v2, %v11757_v23 }
 0x336   : > { %v9566_v45 = vpop.f32.mrf.mxu0 }
 0x337   : > { %v2514_v31 = vmul.f32 0.17677669, %v9566_v45  ;;  %v2710_v54 = vsel %vm2607_vm2, %v11999_v40, -inf  ;;  %v12004_v17 = vadd.f32 %v2511_v37, %v11765_v19 }
 0x338   : > { %2711 = vmax.xlane.f32.xlu0 %v2710_v54  ;;  %v2256_v1 = vpop.f32.mrf.mxu0 }
 0x339   : > { %v2512_v50 = vmul.f32 0.17677669, %v2256_v1  ;;  %v12007_v12 = vadd.f32 %v2514_v31, %v11777_v41  ;;  %v2704_v2 = vsel %vm2607_vm2, %v12004_v17, -inf }
 0x33a   : > { %v9569_v28 = vpop.f32.mrf.mxu0 }
 0x33b   : > { %v2517_v58 = vmul.f32 0.17677669, %v9569_v28  ;;  %v2713_v45 = vsel %vm2607_vm2, %v12007_v12, -inf  ;;  %v12014_v53 = vadd.f32 %v2512_v50, %v11791_v25 }
 0x33c   : > { %2705 = vmax.xlane.f32.xlu0 %v2704_v2  ;;  %2714 = vmax.xlane.f32.xlu1 %v2713_v45  ;;  %v2269_v37 = vpop.f32.mrf.mxu0 }
 0x33d   : > { %v2515_v54 = vmul.f32 0.17677669, %v2269_v37  ;;  %v12017_v1 = vadd.f32 %v2517_v58, %v11803_v3  ;;  %v2707_v28 = vsel %vm2607_vm2, %v12014_v53, -inf }
 0x33e   : > { %v9570_v31 = vpop.f32.mrf.mxu0 }
 0x33f   : > { %v2518_v13 = vmul.f32 0.17677669, %v9570_v31  ;;  %v2722_v47 = vsel %vm2607_vm2, %v12017_v1, -inf  ;;  %v12024_v21 = vadd.f32 %v2515_v54, %v11826_v35 }
 0x340   : > { %2708 = vmax.xlane.f32.xlu1 %v2707_v28  ;;  %2723 = vmax.xlane.f32.xlu0 %v2722_v47  ;;  %v2272_v50 = vpop.f32.mrf.mxu0 }
 0x341   : > { %v2616_v2 = vpop.xlane.xlu1 %2615  ;;  %v2516_v45 = vmul.f32 0.17677669, %v2272_v50  ;;  %v12027_v37 = vadd.f32 %v2518_v13, %v11821_v60  ;;  %v2716_v44 = vsel %vm2607_vm2, %v12024_v21, -inf }
 0x342   : > { %v2802_v58 = vsub.f32 %v11768_v29, %v2616_v2 }
 0x343   : > { %v2610_v31 = vpop.xlane.xlu0 %2609  ;;  %v2725_v18 = vsel %vm2607_vm2, %v12027_v37, -inf  ;;  %v12035_v54 = vadd.f32 %v2516_v45, %v11834_v20 }
 0x344   : > { %v2868_v28 = vmul.f32 1.442695, %v2802_v58  ;;  %v2800_v47 = vsub.f32 %v11783_v46, %v2610_v31  ;;  %2717 = vmax.xlane.f32.xlu0 %v2716_v44  ;;  %2726 = vmax.xlane.f32.xlu1 %v2725_v18 }
 0x345   : > { %v2619_v50 = vpop.xlane.xlu1 %2618  ;;  %v2719_v24 = vsel %vm2607_vm2, %v12035_v54, -inf }
 0x346   : > { %10402 = vpow2.f32 %v2868_v28  ;;  %v2864_v13 = vmul.f32 1.442695, %v2800_v47  ;;  %v2803_v29 = vsub.f32 %v11798_v7, %v2619_v50 }
 0x347   : > { %v2613_v2 = vpop.xlane.xlu0 %2612 }
 0x348   : > { %10404 = vpow2.f32 %v2864_v13  ;;  %v2870_v14 = vmul.f32 1.442695, %v2803_v29  ;;  %v2801_v61 = vsub.f32 %v11809_v4, %v2613_v2  ;;  %2720 = vmax.xlane.f32.xlu1 %v2719_v24 }
 0x34a   : > { %10406 = vpow2.f32 %v2870_v14  ;;  %v2866_v45 = vmul.f32 1.442695, %v2801_v61 }
 0x34b   : > { %v2628_v58 = vpop.xlane.xlu0 %2627 }
 0x34c   : > { %10408 = vpow2.f32 %v2866_v45  ;;  %v2806_v18 = vsub.f32 %v11814_v63, %v2628_v58 }
 0x34d   : > { %v2631_v44 = vpop.xlane.xlu1 %2630 }
 0x34e   : > { %v2807_v46 = vsub.f32 %v11839_v57, %v2631_v44  ;;  %v2876_v7 = vmul.f32 1.442695, %v2806_v18 }
 0x34f   : > { %v2622_v31 = vpop.xlane.xlu0 %2621 }
 0x350   : > { %v2804_v28 = vsub.f32 %v11842_v0, %v2622_v31  ;;  %v2878_v50 = vmul.f32 1.442695, %v2807_v46  ;;  %10410 = vpow2.f32 %v2876_v7 }
 0x351   : > { %v2625_v47 = vpop.xlane.xlu1 %2624 }
 0x352   : > { %v9581_v13 = vpop.f32.mrf.mxu1  ;;  %v2872_v4 = vmul.f32 1.442695, %v2804_v28  ;;  %v2805_v14 = vsub.f32 %v11847_v9, %v2625_v47  ;;  %10412 = vpow2.f32 %v2878_v50 }
 0x353   : > { %v12045_v29 = vpop.eup %10402  ;;  %v2521_v24 = vmul.f32 0.17677669, %v9581_v13 }
 0x354   : > { %13849 = vst [vmem:[#allocation47_spill] sm:$0xff] %v12045_v29  ;;  %v2998_v61 = vsel %vm2607_vm2, %v12045_v29, 0.0  ;;  %v2318_v63 = vpop.f32.mrf.mxu1  ;;  %10414 = vpow2.f32 %v2872_v4  ;;  %v2874_v45 = vmul.f32 1.442695, %v2805_v14 }
 0x355   : > { %v12050_v2 = vpop.eup %10404  ;;  %2999 = vadd.xlane.f32.xlu0 %v2998_v61  ;;  %v12055_v58 = vadd.f32 %v2521_v24, %v11757_v23  ;;  %v2519_v18 = vmul.f32 0.17677669, %v2318_v63 }
 0x356   : > { %v9582_v57 = vpop.f32.mrf.mxu1  ;;  %v2992_v9 = vsel %vm2607_vm2, %v12050_v2, 0.0  ;;  %10416 = vpow2.f32 %v2874_v45 }
 0x357   : > { %v12052_v0 = vpop.eup %10406  ;;  %v2522_v46 = vmul.f32 0.17677669, %v9582_v57  ;;  %v2734_v28 = vsel %vm2607_vm2, %v12055_v58, -inf  ;;  %v12068_v13 = vadd.f32 %v2519_v18, %v11765_v19 }
 0x358   : > { %v3001_v44 = vsel %vm2607_vm2, %v12052_v0, 0.0  ;;  %v2321_v31 = vpop.f32.mrf.mxu1 }
 0x359   : > { %v12061_v7 = vpop.eup %10408  ;;  %2993 = vadd.xlane.f32.xlu0 %v2992_v9  ;;  %3002 = vadd.xlane.f32.xlu1 %v3001_v44  ;;  %v2520_v50 = vmul.f32 0.17677669, %v2321_v31  ;;  %v12071_v4 = vadd.f32 %v2522_v46, %v11777_v41  ;;  %v2728_v24 = vsel %vm2607_vm2, %v12068_v13, -inf }
 0x35a   : > { %v2995_v47 = vsel %vm2607_vm2, %v12061_v7, 0.0  ;;  %v9585_v14 = vpop.f32.mrf.mxu1 }
 0x35b   : > { %v2737_v61 = vsel %vm2607_vm2, %v12071_v4, -inf  ;;  %v12078_v63 = vadd.f32 %v2520_v50, %v11791_v25  ;;  %v2525_v46 = vmul.f32 0.17677669, %v9585_v14 }
 0x35c   : > { %v2334_v57 = vpop.f32.mrf.mxu1 }
 0x35d   : > { %2735 = vmax.xlane.f32.xlu0 %v2734_v28  ;;  %2996 = vadd.xlane.f32.xlu1 %v2995_v47  ;;  %v12080_v45 = vpop.eup %10410  ;;  %v2731_v50 = vsel %vm2607_vm2, %v12078_v63, -inf  ;;  %v2523_v14 = vmul.f32 0.17677669, %v2334_v57 }
 0x35e   : > { %13850 = vst [vmem:[#allocation48_spill] sm:$0xff] %v12080_v45  ;;  %v3010_v47 = vsel %vm2607_vm2, %v12080_v45, 0.0  ;;  %v9586_v29 = vpop.f32.mrf.mxu1 }
 0x35f   : > { %v12083_v44 = vpop.eup %10412 }
 0x361   : > { %v2640_v18 = vpop.xlane.xlu0 %2639  ;;  %2729 = vmax.xlane.f32.xlu0 %v2728_v24  ;;  %2738 = vmax.xlane.f32.xlu1 %v2737_v61  ;;  %v12085_v31 = vpop.eup %10414 }
 0x362   : > { %v2810_v9 = vsub.f32 %v11870_v49, %v2640_v18  ;;  %v12094_v18 = vadd.f32 %v2525_v46, %v11803_v3  ;;  %v3004_v32 = vsel %vm2607_vm2, %v12085_v31, 0.0 }
 0x364   : > { %v2884_v28 = vmul.f32 1.442695, %v2810_v9  ;;  %v12096_v9 = vpop.eup %10416  ;;  %v2746_v57 = vsel %vm2607_vm2, %v12094_v18, -inf }
 0x365   : > { %v2634_v43 = vpop.xlane.xlu0 %2633  ;;  %3011 = vadd.xlane.f32.xlu0 %v3010_v47  ;;  %2732 = vmax.xlane.f32.xlu1 %v2731_v50  ;;  %v3013_v47 = vsel %vm2607_vm2, %v12083_v44, 0.0  ;;  %v2526_v50 = vmul.f32 0.17677669, %v9586_v29  ;;  %v12109_v29 = vadd.f32 %v2523_v14, %v11826_v35 }
 0x366   : > { %10418 = vpow2.f32 %v2884_v28  ;;  %v2808_v24 = vsub.f32 %v11881_v10, %v2634_v43  ;;  %v2643_v49 = vpop.xlane.xlu1 %2642  ;;  %v2337_v28 = vpop.f32.mrf.mxu1 }
 0x367   : > { %v2811_v61 = vsub.f32 %v11885_v5, %v2643_v49  ;;  %v2524_v46 = vmul.f32 0.17677669, %v2337_v28  ;;  %v3007_v49 = vsel %vm2607_vm2, %v12096_v9, 0.0  ;;  %v2740_v28 = vsel %vm2607_vm2, %v12109_v29, -inf }
 0x368   : > { %v2880_v45 = vmul.f32 1.442695, %v2808_v24 }
 0x369   : > { %v2886_v33 = vmul.f32 1.442695, %v2811_v61  ;;  %v2652_v43 = vpop.xlane.xlu0 %2651  ;;  %3005 = vadd.xlane.f32.xlu0 %v3004_v32  ;;  %3014 = vadd.xlane.f32.xlu1 %v3013_v47  ;;  %v12112_v32 = vadd.f32 %v2526_v50, %v11821_v60 }
 0x36a   : > { %10420 = vpow2.f32 %v2880_v45  ;;  %v2637_v10 = vpop.xlane.xlu1 %2636  ;;  %v2814_v24 = vsub.f32 %v11896_v11, %v2652_v43 }
 0x36b   : > { %10422 = vpow2.f32 %v2886_v33  ;;  %v2809_v5 = vsub.f32 %v11893_v27, %v2637_v10  ;;  %v12115_v27 = vadd.f32 %v2524_v46, %v11834_v20  ;;  %v2749_v14 = vsel %vm2607_vm2, %v12112_v32, -inf }
 0x36c   : > { %v2892_v47 = vmul.f32 1.442695, %v2814_v24 }
 0x36d   : > { %v2882_v45 = vmul.f32 1.442695, %v2809_v5  ;;  %v2646_v61 = vpop.xlane.xlu0 %2645  ;;  %2747 = vmax.xlane.f32.xlu0 %v2746_v57  ;;  %3008 = vadd.xlane.f32.xlu1 %v3007_v49  ;;  %v2743_v57 = vsel %vm2607_vm2, %v12115_v27, -inf }
 0x36e   : > { %v2655_v33 = vpop.xlane.xlu1 %2654  ;;  %v2812_v11 = vsub.f32 %v11901_v52, %v2646_v61 }
 0x36f   : > { %10424 = vpow2.f32 %v2882_v45  ;;  %v2815_v50 = vsub.f32 %v11907_v38, %v2655_v33 }
 0x370   : > { %10426 = vpow2.f32 %v2892_v47  ;;  %v2888_v46 = vmul.f32 1.442695, %v2812_v11 }
 0x371   : > { %2741 = vmax.xlane.f32.xlu0 %v2740_v28  ;;  %2750 = vmax.xlane.f32.xlu1 %v2749_v14  ;;  %v2894_v45 = vmul.f32 1.442695, %v2815_v50 }
 0x372   : > { %v2649_v43 = vpop.xlane.xlu1 %2648  ;;  %v9597_v10 = vpop.f32.mrf.mxu0  ;;  %10428 = vpow2.f32 %v2888_v46 }
 0x373   : > { %v12123_v5 = vpop.eup %10418  ;;  %v2529_v24 = vmul.f32 0.17677669, %v9597_v10  ;;  %v2813_v61 = vsub.f32 %v11914_v59, %v2649_v43  ;;  %10430 = vpow2.f32 %v2894_v45 }
 0x374   : > { %13851 = vst [vmem:[#allocation49_spill] sm:$0xff] %v12123_v5  ;;  %v3022_v52 = vsel %vm2607_vm2, %v12123_v5, 0.0  ;;  %v2383_v49 = vpop.f32.mrf.mxu0 }
 0x375   : > { %3023 = vadd.xlane.f32.xlu0 %v3022_v52  ;;  %2744 = vmax.xlane.f32.xlu1 %v2743_v57  ;;  %v2527_v11 = vmul.f32 0.17677669, %v2383_v49  ;;  %v12137_v14 = vadd.f32 %v2529_v24, %v11757_v23  ;;  %v2890_v10 = vmul.f32 1.442695, %v2813_v61 }
 0x376   : > { %v9598_v38 = vpop.f32.mrf.mxu0 }
 0x377   : > { %v12130_v33 = vpop.eup %10420  ;;  %13854 = vst [vmem:[#allocation52_spill] sm:$0xff] %v12137_v14  ;;  %v2530_v50 = vmul.f32 0.17677669, %v9598_v38  ;;  %v2758_v46 = vsel %vm2607_vm2, %v12137_v14, -inf  ;;  %v12146_v52 = vadd.f32 %v2527_v11, %v11765_v19  ;;  %10432 = vpow2.f32 %v2890_v10 }
 0x378   : > { %13852 = vst [vmem:[#allocation50_spill] sm:$0xff] %v12130_v33  ;;  %v12132_v28 = vpop.eup %10422  ;;  %v3016_v47 = vsel %vm2607_vm2, %v12130_v33, 0.0  ;;  %v2386_v43 = vpop.f32.mrf.mxu0 }
 0x379   : > { %13853 = vst [vmem:[#allocation51_spill] sm:$0xff] %v12132_v28  ;;  %3017 = vadd.xlane.f32.xlu0 %v3016_v47  ;;  %v3025_v59 = vsel %vm2607_vm2, %v12132_v28, 0.0  ;;  %13856 = vst [vmem:[#allocation54_spill] sm:$0xff] %v12146_v52  ;;  %v2528_v49 = vmul.f32 0.17677669, %v2386_v43  ;;  %v12151_v45 = vadd.f32 %v2530_v50, %v11777_v41  ;;  %v2752_v38 = vsel %vm2607_vm2, %v12146_v52, -inf }
 0x37a   : > { %3026 = vadd.xlane.f32.xlu1 %v3025_v59  ;;  %v9601_v61 = vpop.f32.mrf.mxu0 }
 0x37b   : > { %13857 = vst [vmem:[#allocation55_spill] sm:$0xff] %v12151_v45  ;;  %v2761_v11 = vsel %vm2607_vm2, %v12151_v45, -inf  ;;  %v12160_v10 = vadd.f32 %v2528_v49, %v11791_v25 }
 0x37c   : > { %v12141_v57 = vpop.eup %10424  ;;  %v2399_v43 = vpop.f32.mrf.mxu0 }
 0x37d   : > { %13855 = vst [vmem:[#allocation53_spill] sm:$0xff] %v12141_v57  ;;  %v3019_v24 = vsel %vm2607_vm2, %v12141_v57, 0.0  ;;  %2759 = vmax.xlane.f32.xlu0 %v2758_v46  ;;  %v12155_v47 = vpop.eup %10426  ;;  %13859 = vst [vmem:[#allocation57_spill] sm:$0xff] %v12160_v10  ;;  %v2533_v46 = vmul.f32 0.17677669, %v9601_v61 }
 0x37e   : > { %3020 = vadd.xlane.f32.xlu1 %v3019_v24  ;;  %13858 = vst [vmem:[#allocation56_spill] sm:$0xff] %v12155_v47  ;;  %v3034_v50 = vsel %vm2607_vm2, %v12155_v47, 0.0  ;;  %v9602_v49 = vpop.f32.mrf.mxu0  ;;  %v2531_v47 = vmul.f32 0.17677669, %v2399_v43 }
 0x37f   : > { %v12164_v24 = vpop.eup %10428  ;;  %v12174_v61 = vadd.f32 %v2533_v46, %v11803_v3 }
 0x380   : > { %13860 = vst [vmem:[#allocation58_spill] sm:$0xff] %v12164_v24  ;;  %v12168_v33 = vpop.eup %10430  ;;  %v3028_v45 = vsel %vm2607_vm2, %v12164_v24, 0.0  ;;  %v12184_v46 = vadd.f32 %v2531_v47, %v11826_v35 }
 0x381   : > { %v2664_v59 = vpop.xlane.xlu0 %2663  ;;  %2753 = vmax.xlane.f32.xlu0 %v2752_v38  ;;  %v2755_v38 = vsel %vm2607_vm2, %v12160_v10, -inf  ;;  %13861 = vst [vmem:[#allocation59_spill] sm:$0xff] %v12168_v33  ;;  %v2534_v10 = vmul.f32 0.17677669, %v9602_v49  ;;  %v2770_v43 = vsel %vm2607_vm2, %v12174_v61, -inf }
 0x382   : > { %2762 = vmax.xlane.f32.xlu1 %v2761_v11  ;;  %13863 = vst [vmem:[#allocation61_spill] sm:$0xff] %v12184_v46 }
 0x383   : > { %v12189_v49 = vadd.f32 %v2534_v10, %v11821_v60 }
 0x384   : > { %v12178_v14 = vpop.eup %10432 }
 0x385   : > { %v2658_v5 = vpop.xlane.xlu0 %2657  ;;  %v2667_v57 = vpop.xlane.xlu1 %2666  ;;  %3035 = vadd.xlane.f32.xlu0 %v3034_v50  ;;  %v3037_v50 = vsel %vm2607_vm2, %v12168_v33, 0.0  ;;  %13862 = vst [vmem:[#allocation60_spill] sm:$0xff] %v12178_v14  ;;  %13864 = vst [vmem:[#allocation62_spill] sm:$0xff] %v12189_v49 }
 0x386   : > { %v2816_v28 = vsub.f32 %v11924_v51, %v2658_v5  ;;  %2756 = vmax.xlane.f32.xlu1 %v2755_v38  ;;  %v2402_v5 = vpop.f32.mrf.mxu0 }
 0x387   : > { %v2532_v38 = vmul.f32 0.17677669, %v2402_v5 }
 0x388   : > { %v2896_v11 = vmul.f32 1.442695, %v2816_v28 }
 0x389   : > { %v2661_v52 = vpop.xlane.xlu1 %2660  ;;  %3029 = vadd.xlane.f32.xlu0 %v3028_v45  ;;  %v3031_v45 = vsel %vm2607_vm2, %v12178_v14, 0.0  ;;  %v12196_v47 = vadd.f32 %v2532_v38, %v11834_v20 }
 0x38a   : > { %10434 = vpow2.f32 %v2896_v11  ;;  %v2817_v51 = vsub.f32 %v11934_v56, %v2661_v52  ;;  %3038 = vadd.xlane.f32.xlu1 %v3037_v50  ;;  %v2676_v11 = vpop.xlane.xlu0 %2675  ;;  %v2764_v56 = vsel %vm2607_vm2, %v12184_v46, -inf  ;;  %v2773_v52 = vsel %vm2607_vm2, %v12189_v49, -inf }
 0x38b   : > { %13865 = vst [vmem:[#allocation63_spill] sm:$0xff] %v12196_v47  ;;  %v2818_v50 = vsub.f32 %v11919_v48, %v2664_v59 }
 0x38c   : > { %v2898_v28 = vmul.f32 1.442695, %v2817_v51 }
 0x38d   : > { %2771 = vmax.xlane.f32.xlu0 %v2770_v43  ;;  %v2679_v51 = vpop.xlane.xlu1 %2678  ;;  %v2900_v14 = vmul.f32 1.442695, %v2818_v50 }
 0x38e   : > { %10436 = vpow2.f32 %v2898_v28  ;;  %3032 = vadd.xlane.f32.xlu1 %v3031_v45  ;;  %v2670_v43 = vpop.xlane.xlu0 %2669  ;;  %v2767_v45 = vsel %vm2607_vm2, %v12196_v47, -inf }
 0x38f   : > { %v2820_v38 = vsub.f32 %v11944_v55, %v2670_v43  ;;  %10438 = vpow2.f32 %v2900_v14 }
 0x391   : > { %2765 = vmax.xlane.f32.xlu0 %v2764_v56  ;;  %v2819_v56 = vsub.f32 %v11927_v16, %v2667_v57  ;;  %v2673_v59 = vpop.xlane.xlu1 %2672  ;;  %v2822_v16 = vsub.f32 %v11937_v34, %v2676_v11  ;;  %v2904_v47 = vmul.f32 1.442695, %v2820_v38 }
 0x392   : > { %2774 = vmax.xlane.f32.xlu1 %v2773_v52  ;;  %v9613_v5 = vpop.f32.mrf.mxu1  ;;  %v2821_v55 = vsub.f32 %v11954_v30, %v2673_v59  ;;  %v2823_v30 = vsub.f32 %v11947_v39, %v2679_v51 }
 0x393   : > { %v2537_v10 = vmul.f32 0.17677669, %v9613_v5  ;;  %v2902_v50 = vmul.f32 1.442695, %v2819_v56  ;;  %v2908_v11 = vmul.f32 1.442695, %v2822_v16 }
 0x394   : > { %v2448_v28 = vpop.f32.mrf.mxu1  ;;  %v2906_v56 = vmul.f32 1.442695, %v2821_v55 }
 0x395   : > { %v12206_v48 = vadd.f32 %v2537_v10, %v11757_v23  ;;  %v2535_v52 = vmul.f32 0.17677669, %v2448_v28  ;;  %10440 = vpow2.f32 %v2902_v50 }
 0x396   : > { %2768 = vmax.xlane.f32.xlu1 %v2767_v45  ;;  %v9614_v24 = vpop.f32.mrf.mxu1  ;;  %10442 = vpow2.f32 %v2904_v47  ;;  %v2910_v47 = vmul.f32 1.442695, %v2823_v30 }
 0x397   : > { %v12202_v33 = vpop.eup %10434  ;;  %v2538_v49 = vmul.f32 0.17677669, %v9614_v24  ;;  %v2782_v10 = vsel %vm2607_vm2, %v12206_v48, -inf  ;;  %v12219_v14 = vadd.f32 %v2535_v52, %v11765_v19  ;;  %10444 = vpow2.f32 %v2908_v11 }
 0x398   : > { %v3040_v5 = vsel %vm2607_vm2, %v12202_v33, 0.0  ;;  %v2451_v46 = vpop.f32.mrf.mxu1  ;;  %10446 = vpow2.f32 %v2906_v56 }
 0x399   : > { %3041 = vadd.xlane.f32.xlu0 %v3040_v5  ;;  %v2536_v23 = vmul.f32 0.17677669, %v2451_v46  ;;  %v12222_v34 = vadd.f32 %v2538_v49, %v11777_v41  ;;  %v2776_v19 = vsel %vm2607_vm2, %v12219_v14, -inf  ;;  %10448 = vpow2.f32 %v2910_v47 }
 0x39a   : > { %v9617_v57 = vpop.f32.mrf.mxu1 }
 0x39b   : > { %v12211_v45 = vpop.eup %10436  ;;  %v2541_v24 = vmul.f32 0.17677669, %v9617_v57  ;;  %v12226_v59 = vadd.f32 %v2536_v23, %v11791_v25  ;;  %v2785_v41 = vsel %vm2607_vm2, %v12222_v34, -inf }
 0x39c   : > { %v3043_v43 = vsel %vm2607_vm2, %v12211_v45, 0.0  ;;  %v2464_v28 = vpop.f32.mrf.mxu1 }
 0x39d   : > { %2783 = vmax.xlane.f32.xlu0 %v2782_v10  ;;  %3044 = vadd.xlane.f32.xlu1 %v3043_v43  ;;  %v2539_v38 = vmul.f32 0.17677669, %v2464_v28  ;;  %v12233_v52 = vadd.f32 %v2541_v24, %v11803_v3  ;;  %v2779_v25 = vsel %vm2607_vm2, %v12226_v59, -inf  ;;  %v12247_v43 = vpop.eup %10438 }
 0x39e   : > { %v9618_v46 = vpop.f32.mrf.mxu1 }
 0x39f   : > { %v2542_v49 = vmul.f32 0.17677669, %v9618_v46  ;;  %v12238_v51 = vadd.f32 %v2539_v38, %v11826_v35  ;;  %v2794_v16 = vsel %vm2607_vm2, %v12233_v52, -inf  ;;  %v3046_v38 = vsel %vm2607_vm2, %v12247_v43, 0.0 }
 0x3a0   : > { %v2467_v39 = vpop.f32.mrf.mxu1 }
 0x3a1   : > { %v2688_v5 = vpop.xlane.xlu0 %2687  ;;  %2777 = vmax.xlane.f32.xlu0 %v2776_v19  ;;  %2786 = vmax.xlane.f32.xlu1 %v2785_v41  ;;  %v2540_v3 = vmul.f32 0.17677669, %v2467_v39  ;;  %v12244_v57 = vadd.f32 %v2542_v49, %v11821_v60  ;;  %v2788_v35 = vsel %vm2607_vm2, %v12238_v51, -inf }
 0x3a2   : > { %v2826_v50 = vsub.f32 %v11959_v22, %v2688_v5  ;;  %v12258_v56 = vpop.eup %10440 }
 0x3a3   : > { %v2797_v28 = vsel %vm2607_vm2, %v12244_v57, -inf  ;;  %v12254_v60 = vadd.f32 %v2540_v3, %v11834_v20  ;;  %v12262_v19 = vpop.eup %10442  ;;  %v3049_v3 = vsel %vm2607_vm2, %v12258_v56, 0.0 }
 0x3a4   : > { %v2916_v22 = vmul.f32 1.442695, %v2826_v50  ;;  %v12268_v47 = vpop.eup %10444 }
 0x3a5   : > { %v2682_v55 = vpop.xlane.xlu0 %2681  ;;  %v2691_v23 = vpop.xlane.xlu1 %2690  ;;  %2795 = vmax.xlane.f32.xlu0 %v2794_v16  ;;  %2780 = vmax.xlane.f32.xlu1 %v2779_v25 }
 0x3a6   : > { %v2824_v10 = vsub.f32 %v11964_v62, %v2682_v55  ;;  %v2827_v11 = vsub.f32 %v11967_v15, %v2691_v23  ;;  %v2791_v15 = vsel %vm2607_vm2, %v12254_v60, -inf  ;;  %v12270_v25 = vpop.eup %10446 }
 0x3a8   : > { %v2912_v24 = vmul.f32 1.442695, %v2824_v10  ;;  %v2918_v49 = vmul.f32 1.442695, %v2827_v11  ;;  %v12278_v10 = vpop.eup %10448 }
 0x3a9   : > { %v2700_v30 = vpop.xlane.xlu0 %2699  ;;  %v2685_v46 = vpop.xlane.xlu1 %2684  ;;  %2789 = vmax.xlane.f32.xlu0 %v2788_v35  ;;  %2798 = vmax.xlane.f32.xlu1 %v2797_v28 }
 0x3aa   : > { %10450 = vpow2.f32 %v2912_v24  ;;  %v2825_v62 = vsub.f32 %v11974_v8, %v2685_v46  ;;  %v2830_v20 = vsub.f32 %v11977_v6, %v2700_v30  ;;  %v3052_v6 = vsel %vm2607_vm2, %v12262_v19, 0.0 }
 0x3ab   : > { %10452 = vpow2.f32 %v2916_v22  ;;  %v3058_v22 = vsel %vm2607_vm2, %v12268_v47, 0.0  ;;  %v3055_v24 = vsel %vm2607_vm2, %v12270_v25, 0.0 }
 0x3ac   : > { %v2914_v41 = vmul.f32 1.442695, %v2825_v62  ;;  %v2924_v50 = vmul.f32 1.442695, %v2830_v20 }
 0x3ad   : > { %v2694_v5 = vpop.xlane.xlu0 %2693  ;;  %v2703_v39 = vpop.xlane.xlu1 %2702  ;;  %3047 = vadd.xlane.f32.xlu0 %v3046_v38  ;;  %2792 = vmax.xlane.f32.xlu1 %v2791_v15 }
 0x3ae   : > { %v2828_v8 = vsub.f32 %v11984_v36, %v2694_v5  ;;  %10454 = vpow2.f32 %v2914_v41  ;;  %v2831_v55 = vsub.f32 %v11987_v26, %v2703_v39 }
 0x3af   : > { %10456 = vpow2.f32 %v2918_v49 }
 0x3b0   : > { %v2920_v16 = vmul.f32 1.442695, %v2828_v8  ;;  %v2926_v28 = vmul.f32 1.442695, %v2831_v55 }
 0x3b1   : > { %v2697_v23 = vpop.xlane.xlu1 %2696  ;;  %3053 = vadd.xlane.f32.xlu0 %v3052_v6  ;;  %3050 = vadd.xlane.f32.xlu1 %v3049_v3 }
 0x3b2   : > { %10458 = vpow2.f32 %v2920_v16  ;;  %v2829_v36 = vsub.f32 %v11994_v42, %v2697_v23  ;;  %v3061_v42 = vsel %vm2607_vm2, %v12278_v10, 0.0 }
 0x3b3   : > { %10460 = vpow2.f32 %v2924_v50 }
 0x3b4   : > { %v2922_v35 = vmul.f32 1.442695, %v2829_v36 }
 0x3b5   : > { %3059 = vadd.xlane.f32.xlu0 %v3058_v22  ;;  %3056 = vadd.xlane.f32.xlu1 %v3055_v24 }
 0x3b6   : > { %10462 = vpow2.f32 %v2922_v35 }
 0x3b7   : > { %v12284_v26 = vpop.eup %10450  ;;  %10464 = vpow2.f32 %v2926_v28 }
 0x3b8   : > { %v3064_v11 = vsel %vm2607_vm2, %v12284_v26, 0.0  ;;  %v12290_v30 = vpop.eup %10452 }
 0x3b9   : > { %3065 = vadd.xlane.f32.xlu0 %v3064_v11  ;;  %3062 = vadd.xlane.f32.xlu1 %v3061_v42  ;;  %v3070_v62 = vsel %vm2607_vm2, %v12290_v30, 0.0 }
 0x3bb   : > { %v12292_v46 = vpop.eup %10454 }
 0x3bc   : > { %v3067_v38 = vsel %vm2607_vm2, %v12292_v46, 0.0  ;;  %v12298_v20 = vpop.eup %10456 }
 0x3bd   : > { %3071 = vadd.xlane.f32.xlu0 %v3070_v62  ;;  %3068 = vadd.xlane.f32.xlu1 %v3067_v38  ;;  %v3073_v39 = vsel %vm2607_vm2, %v12298_v20, 0.0 }
 0x3bf   : > { %v12300_v41 = vpop.eup %10458 }
 0x3c0   : > { %v3076_v15 = vsel %vm2607_vm2, %v12300_v41, 0.0  ;;  %v12304_v49 = vpop.eup %10460 }
 0x3c1   : > { %v2712_v5 = vpop.xlane.xlu0 %2711  ;;  %3077 = vadd.xlane.f32.xlu0 %v3076_v15  ;;  %3074 = vadd.xlane.f32.xlu1 %v3073_v39  ;;  %v3082_v16 = vsel %vm2607_vm2, %v12304_v49, 0.0 }
 0x3c2   : > { %v2834_v50 = vsub.f32 %v11999_v40, %v2712_v5 }
 0x3c3   : > { %v12308_v8 = vpop.eup %10462 }
 0x3c4   : > { %v3079_v6 = vsel %vm2607_vm2, %v12308_v8, 0.0  ;;  %v12315_v23 = vpop.eup %10464  ;;  %v2932_v35 = vmul.f32 1.442695, %v2834_v50 }
 0x3c5   : > { %v2706_v3 = vpop.xlane.xlu0 %2705  ;;  %v2715_v55 = vpop.xlane.xlu1 %2714  ;;  %3083 = vadd.xlane.f32.xlu0 %v3082_v16  ;;  %3080 = vadd.xlane.f32.xlu1 %v3079_v6  ;;  %v3085_v11 = vsel %vm2607_vm2, %v12315_v23, 0.0 }
 0x3c6   : > { %v2832_v36 = vsub.f32 %v12004_v17, %v2706_v3  ;;  %v2835_v24 = vsub.f32 %v12007_v12, %v2715_v55 }
 0x3c8   : > { %v2928_v22 = vmul.f32 1.442695, %v2832_v36  ;;  %v2934_v62 = vmul.f32 1.442695, %v2835_v24 }
 0x3c9   : > { %v2709_v28 = vpop.xlane.xlu1 %2708  ;;  %v2724_v40 = vpop.xlane.xlu0 %2723  ;;  %3086 = vadd.xlane.f32.xlu1 %v3085_v11 }
 0x3ca   : > { %10466 = vpow2.f32 %v2928_v22  ;;  %v2833_v42 = vsub.f32 %v12014_v53, %v2709_v28  ;;  %v2838_v15 = vsub.f32 %v12017_v1, %v2724_v40 }
 0x3cb   : > { %10468 = vpow2.f32 %v2932_v35 }
 0x3cc   : > { %v2930_v38 = vmul.f32 1.442695, %v2833_v42  ;;  %v2940_v12 = vmul.f32 1.442695, %v2838_v15 }
 0x3cd   : > { %v2718_v17 = vpop.xlane.xlu0 %2717  ;;  %v2727_v5 = vpop.xlane.xlu1 %2726 }
 0x3ce   : > { %10470 = vpow2.f32 %v2930_v38  ;;  %v2836_v39 = vsub.f32 %v12024_v21, %v2718_v17  ;;  %v2839_v16 = vsub.f32 %v12027_v37, %v2727_v5 }
 0x3cf   : > { %10472 = vpow2.f32 %v2934_v62 }
 0x3d0   : > { %v2936_v50 = vmul.f32 1.442695, %v2836_v39  ;;  %v2942_v3 = vmul.f32 1.442695, %v2839_v16 }
 0x3d1   : > { %v2721_v6 = vpop.xlane.xlu1 %2720 }
 0x3d2   : > { %10474 = vpow2.f32 %v2936_v50  ;;  %v2837_v53 = vsub.f32 %v12035_v54, %v2721_v6 }
 0x3d3   : > { %10476 = vpow2.f32 %v2940_v12 }
 0x3d4   : > { %v2938_v55 = vmul.f32 1.442695, %v2837_v53 }
 0x3d6   : > { %10478 = vpow2.f32 %v2938_v55 }
 0x3d7   : > { %v12326_v36 = vpop.eup %10466  ;;  %10480 = vpow2.f32 %v2942_v3 }
 0x3d8   : > { %v3088_v1 = vsel %vm2607_vm2, %v12326_v36, 0.0  ;;  %v12330_v21 = vpop.eup %10468 }
 0x3d9   : > { %3089 = vadd.xlane.f32.xlu0 %v3088_v1  ;;  %v3094_v37 = vsel %vm2607_vm2, %v12330_v21, 0.0 }
 0x3db   : > { %v12332_v35 = vpop.eup %10470 }
 0x3dc   : > { %v3091_v54 = vsel %vm2607_vm2, %v12332_v35, 0.0  ;;  %v12338_v22 = vpop.eup %10472 }
 0x3dd   : > { %3095 = vadd.xlane.f32.xlu0 %v3094_v37  ;;  %3092 = vadd.xlane.f32.xlu1 %v3091_v54  ;;  %v3097_v11 = vsel %vm2607_vm2, %v12338_v22, 0.0 }
 0x3de   : > { %v3000_v24 = vpop.xlane.xlu0 %2999 }
 0x3df   : > { %v12340_v28 = vpop.eup %10474 }
 0x3e0   : > { %v3100_v40 = vsel %vm2607_vm2, %v12340_v28, 0.0  ;;  %v12346_v42 = vpop.eup %10476 }
 0x3e1   : > { %3101 = vadd.xlane.f32.xlu0 %v3100_v40  ;;  %3098 = vadd.xlane.f32.xlu1 %v3097_v11  ;;  %v3106_v17 = vsel %vm2607_vm2, %v12346_v42, 0.0 }
 0x3e2   : > { %v2994_v62 = vpop.xlane.xlu0 %2993  ;;  %v3003_v38 = vpop.xlane.xlu1 %3002 }
 0x3e3   : > { %v12348_v15 = vpop.eup %10478  ;;  %10482 = vrcp.f32 %v3003_v38 }
 0x3e4   : > { %v3103_v5 = vsel %vm2607_vm2, %v12348_v15, 0.0  ;;  %v12354_v39 = vpop.eup %10480  ;;  %10484 = vrcp.f32 %v2994_v62 }
 0x3e5   : > { %3107 = vadd.xlane.f32.xlu0 %v3106_v17  ;;  %3104 = vadd.xlane.f32.xlu1 %v3103_v5  ;;  %10486 = vrcp.f32 %v3000_v24  ;;  %v3109_v16 = vsel %vm2607_vm2, %v12354_v39, 0.0 }
 0x3e6   : > { %v2736_v12 = vpop.xlane.xlu0 %2735  ;;  %v2997_v50 = vpop.xlane.xlu1 %2996 }
 0x3e7   : > { %10488 = vrcp.f32 %v2997_v50  ;;  %v2842_v6 = vsub.f32 %v12055_v58, %v2736_v12 }
 0x3e9   : > { %3110 = vadd.xlane.f32.xlu1 %v3109_v16  ;;  %v2948_v37 = vmul.f32 1.442695, %v2842_v6 }
 0x3ea   : > { %v2730_v53 = vpop.xlane.xlu0 %2729  ;;  %v2739_v3 = vpop.xlane.xlu1 %2738 }
 0x3eb   : > { %v2840_v55 = vsub.f32 %v12068_v13, %v2730_v53  ;;  %v2843_v1 = vsub.f32 %v12071_v4, %v2739_v3  ;;  %v13866_v53 = vld [vmem:[#allocation9_spill] sm:$0xff] }
 0x3ed   : > { %v2944_v54 = vmul.f32 1.442695, %v2840_v55  ;;  %v2950_v40 = vmul.f32 1.442695, %v2843_v1  ;;  %v13868_v55 = vld [vmem:[#allocation15_spill] sm:$0xff] }
 0x3ee   : > { %v3012_v11 = vpop.xlane.xlu0 %3011  ;;  %v2733_v24 = vpop.xlane.xlu1 %2732  ;;  %v1660_v1 = vadd.f32 %v13868_v55, %v13866_v53 }
 0x3ef   : > { %10490 = vpow2.f32 %v2944_v54  ;;  %v2841_v62 = vsub.f32 %v12078_v63, %v2733_v24  ;;  %v13867_v63 = vld [vmem:[#allocation14_spill] sm:$0xff] }
 0x3f0   : > { %v10483_v38 = vpop.eup %10482  ;;  %10492 = vpow2.f32 %v2948_v37  ;;  %v1657_v3 = vadd.f32 %v13867_v63, %v13866_v53  ;;  %v13869_v37 = vld [vmem:[#allocation47_spill] sm:$0xff] }
 0x3f1   : > { %v2946_v17 = vmul.f32 1.442695, %v2841_v62  ;;  %v10485_v5 = vpop.eup %10484  ;;  %10494 = vpow2.f32 %v2950_v40  ;;  %v3191_v4 = vmul.f32 %v10483_v38, %v12052_v0  ;;  %v13872_v63 = vld [vmem:[#allocation11_spill] sm:$0xff] }
 0x3f2   : > { %v3006_v58 = vpop.xlane.xlu0 %3005  ;;  %v3015_v12 = vpop.xlane.xlu1 %3014  ;;  %v3185_v16 = vmul.f32 %v10485_v5, %v12050_v2  ;;  %v1933_v2 = vpack.c.bf16 %v1660_v1, %v1657_v3 }
 0x3f3   : > { %v10487_v50 = vpop.eup %10486  ;;  %10496 = vpow2.f32 %v2946_v17 }
 0x3f4   : > { %v10489_v13 = vpop.eup %10488  ;;  %10498 = vrcp.f32 %v3006_v58  ;;  %v3189_v54 = vmul.f32 %v10487_v50, %v13869_v37  ;;  %v13870_v58 = vld [vmem:[#allocation16_spill] sm:$0xff] }
 0x3f5   : > { %10500 = vrcp.f32 %v3015_v12  ;;  %v3187_v6 = vmul.f32 %v10489_v13, %v12061_v7 }
 0x3f6   : > { %10502 = vrcp.f32 %v3012_v11  ;;  %v2748_v40 = vpop.xlane.xlu0 %2747  ;;  %v3009_v24 = vpop.xlane.xlu1 %3008  ;;  %v3313_v0 = vpack.c.bf16 %v3191_v4, %v3189_v54 }
 0x3f7   : > { %10504 = vrcp.f32 %v3009_v24  ;;  %v3312_v62 = vpack.c.bf16 %v3187_v6, %v3185_v16  ;;  %v2846_v38 = vsub.f32 %v12094_v18, %v2748_v40  ;;  %v13871_v16 = vld [vmem:[#allocation10_spill] sm:$0xff]  ;;  %v13873_v40 = vld [vmem:[#allocation12_spill] sm:$0xff] }
 0x3f8   : > { %v1641_v6 = vadd.f32 %v13871_v16, %v13866_v53 }
 0x3f9   : > { %9627 = vmatprep.mubr.msk.bf16.mxu0 %vm2607_vm2, %v3312_v62  ;;  %v2956_v50 = vmul.f32 1.442695, %v2846_v38 }
 0x3fa   : > { %v2742_v7 = vpop.xlane.xlu0 %2741  ;;  %9628 = vmatmul.mubr.msk.bf16.vlgmr.msra.gmra.mxu0 %vm2607_vm2, %v3313_v0  ;;  %v2751_v17 = vpop.xlane.xlu1 %2750 }
 0x3fb   : > { %v2844_v5 = vsub.f32 %v12109_v29, %v2742_v7  ;;  %9636 = vmatpush3.bf16.msra.mxu0 %v13870_v58  ;;  %v2847_v11 = vsub.f32 %v12112_v32, %v2751_v17  ;;  %v1644_v29 = vadd.f32 %v13872_v63, %v13866_v53 }
 0x3fc   : > { %v12375_v12 = vpop.eup %10490  ;;  %9637 = vmatprep.subr.bf16.mxu0 %v1933_v2 }
 0x3fd   : > { %v2952_v13 = vmul.f32 1.442695, %v2844_v5  ;;  %v3112_v18 = vsel %vm2607_vm2, %v12375_v12, 0.0  ;;  %v12380_v4 = vpop.eup %10492  ;;  %v2958_v54 = vmul.f32 1.442695, %v2847_v11  ;;  %v1931_v17 = vpack.c.bf16 %v1644_v29, %v1641_v6  ;;  %v13874_v6 = vld [vmem:[#allocation48_spill] sm:$0xff] }
 0x3fe   : > { %v3024_v3 = vpop.xlane.xlu0 %3023  ;;  %v2745_v55 = vpop.xlane.xlu1 %2744  ;;  %3113 = vadd.xlane.f32.xlu0 %v3112_v18  ;;  %v3118_v0 = vsel %vm2607_vm2, %v12380_v4, 0.0 }
 0x3ff   : > { %v12386_v1 = vpop.eup %10494  ;;  %10506 = vpow2.f32 %v2952_v13  ;;  %9638 = vmatpush3.bf16.msra.mxu0 %v1933_v2  ;;  %v2845_v32 = vsub.f32 %v12115_v27, %v2745_v55 }
 0x400   : > { %v12389_v37 = vpop.eup %10496  ;;  %9639 = vmatprep.subr.bf16.mxu0 %v13873_v40  ;;  %10508 = vpow2.f32 %v2956_v50  ;;  %v3121_v50 = vsel %vm2607_vm2, %v12386_v1, 0.0 }
 0x401   : > { %v10499_v24 = vpop.eup %10498  ;;  %v2954_v62 = vmul.f32 1.442695, %v2845_v32  ;;  %v3115_v38 = vsel %vm2607_vm2, %v12389_v37, 0.0  ;;  %v13875_v32 = vld [vmem:[#allocation22_spill] sm:$0xff] }
 0x402   : > { %v10501_v7 = vpop.eup %10500  ;;  %v3018_v5 = vpop.xlane.xlu0 %3017  ;;  %3119 = vadd.xlane.f32.xlu0 %v3118_v0  ;;  %3116 = vadd.xlane.f32.xlu1 %v3115_v38  ;;  %v3193_v13 = vmul.f32 %v10499_v24, %v12085_v31 }
 0x403   : > { %v10503_v27 = vpop.eup %10502  ;;  %10510 = vpow2.f32 %v2954_v62  ;;  %9640 = vmatpush3.bf16.msra.mxu0 %v13873_v40  ;;  %v3027_v2 = vpop.xlane.xlu1 %3026  ;;  %v3199_v11 = vmul.f32 %v10501_v7, %v12083_v44 }
 0x404   : > { %v10505_v58 = vpop.eup %10504  ;;  %10512 = vpow2.f32 %v2958_v54  ;;  %9641 = vmatprep.subr.bf16.mxu0 %v1931_v17  ;;  %v3197_v63 = vmul.f32 %v10503_v27, %v13874_v6  ;;  %v13876_v54 = vld [vmem:[#allocation52_spill] sm:$0xff] }
 0x405   : > { %10514 = vrcp.f32 %v3027_v2  ;;  %v3195_v18 = vmul.f32 %v10505_v58, %v12096_v9  ;;  %v13877_v9 = vld [vmem:[#allocation54_spill] sm:$0xff] }
 0x406   : > { %10516 = vrcp.f32 %v3018_v5  ;;  %v2760_v16 = vpop.xlane.xlu0 %2759  ;;  %3122 = vadd.xlane.f32.xlu1 %v3121_v50  ;;  %v3315_v44 = vpack.c.bf16 %v3199_v11, %v3197_v63 }
 0x407   : > { %10518 = vrcp.f32 %v3024_v3  ;;  %9642 = vmatpush3.bf16.msra.mxu0 %v1931_v17  ;;  %v3021_v29 = vpop.xlane.xlu1 %3020  ;;  %v3314_v55 = vpack.c.bf16 %v3195_v18, %v3193_v13  ;;  %v2850_v40 = vsub.f32 %v13876_v54, %v2760_v16  ;;  %v13878_v3 = vld [vmem:[#allocation55_spill] sm:$0xff]  ;;  %v13879_v13 = vld [vmem:[#allocation57_spill] sm:$0xff] }
 0x408   : > { %10520 = vrcp.f32 %v3021_v29  ;;  %9667 = vmatprep.subr.bf16.mxu0 %v13875_v32 }
 0x409   : > { %9631 = vmatprep.mubr.msk.bf16.mxu0 %vm2607_vm2, %v3314_v55  ;;  %v2964_v7 = vmul.f32 1.442695, %v2850_v40 }
 0x40a   : > { %9632 = vmatmul.mubr.msk.bf16.gmra.mxu0 %vm2607_vm2, %v3315_v44  ;;  %v2754_v31 = vpop.xlane.xlu0 %2753 }
 0x40b   : > { %v2848_v24 = vsub.f32 %v13877_v9, %v2754_v31  ;;  %v2763_v62 = vpop.xlane.xlu1 %2762 }
 0x40c   : > { %v12408_v0 = vpop.eup %10506  ;;  %v2851_v38 = vsub.f32 %v13878_v3, %v2763_v62 }
 0x40d   : > { %v2960_v17 = vmul.f32 1.442695, %v2848_v24  ;;  %v3124_v5 = vsel %vm2607_vm2, %v12408_v0, 0.0  ;;  %v12413_v27 = vpop.eup %10508  ;;  %v13880_v24 = vld [vmem:[#allocation51_spill] sm:$0xff] }
 0x40e   : > { %v3036_v2 = vpop.xlane.xlu0 %3035  ;;  %3125 = vadd.xlane.f32.xlu0 %v3124_v5  ;;  %v2966_v58 = vmul.f32 1.442695, %v2851_v38  ;;  %v3130_v6 = vsel %vm2607_vm2, %v12413_v27, 0.0  ;;  %v13882_v5 = vld [vmem:[#allocation53_spill] sm:$0xff] }
 0x40f   : > { %10522 = vpow2.f32 %v2960_v17  ;;  %v2757_v11 = vpop.xlane.xlu1 %2756 }
 0x410   : > { %v12415_v50 = vpop.eup %10510  ;;  %v2849_v18 = vsub.f32 %v13879_v13, %v2757_v11  ;;  %10524 = vpow2.f32 %v2964_v7  ;;  %v13881_v7 = vld [vmem:[#allocation50_spill] sm:$0xff]  ;;  %v13883_v13 = vld [vmem:[#allocation20_spill] sm:$0xff] }
 0x411   : > { %v12418_v16 = vpop.eup %10512  ;;  %v3127_v63 = vsel %vm2607_vm2, %v12415_v50, 0.0  ;;  %10526 = vpow2.f32 %v2966_v58  ;;  %v1721_v58 = vadd.f32 %v13883_v13, %v13866_v53 }
 0x412   : > { %v10515_v29 = vpop.eup %10514  ;;  %v2962_v55 = vmul.f32 1.442695, %v2849_v18  ;;  %v3030_v44 = vpop.xlane.xlu0 %3029  ;;  %3131 = vadd.xlane.f32.xlu0 %v3130_v6  ;;  %3128 = vadd.xlane.f32.xlu1 %v3127_v63  ;;  %v3133_v3 = vsel %vm2607_vm2, %v12418_v16, 0.0  ;;  %v13884_v18 = vld [vmem:[#allocation21_spill] sm:$0xff] }
 0x413   : > { %v10517_v54 = vpop.eup %10516  ;;  %v3039_v40 = vpop.xlane.xlu1 %3038  ;;  %v3207_v62 = vmul.f32 %v10515_v29, %v13880_v24  ;;  %v1724_v6 = vadd.f32 %v13884_v18, %v13866_v53  ;;  %v13885_v63 = vld [vmem:[#allocation49_spill] sm:$0xff]  ;;  %v13890_v18 = vld [vmem:[#allocation18_spill] sm:$0xff] }
 0x414   : > { %v10519_v31 = vpop.eup %10518  ;;  %10528 = vpow2.f32 %v2962_v55  ;;  %v3201_v17 = vmul.f32 %v10517_v54, %v13881_v7 }
 0x415   : > { %v10521_v9 = vpop.eup %10520  ;;  %10530 = vrcp.f32 %v3039_v40  ;;  %v3205_v55 = vmul.f32 %v10519_v31, %v13885_v63 }
 0x416   : > { %10532 = vrcp.f32 %v3030_v44  ;;  %v2772_v38 = vpop.xlane.xlu0 %2771  ;;  %3134 = vadd.xlane.f32.xlu1 %v3133_v3  ;;  %v3203_v11 = vmul.f32 %v10521_v9, %v13882_v5  ;;  %v1941_v3 = vpack.c.bf16 %v1724_v6, %v1721_v58  ;;  %v13886_v9 = vld [vmem:[#allocation61_spill] sm:$0xff]  ;;  %v1708_v6 = vadd.f32 %v13890_v18, %v13866_v53 }
 0x417   : > { %10534 = vrcp.f32 %v3036_v2  ;;  %v3033_v29 = vpop.xlane.xlu1 %3032  ;;  %v3317_v24 = vpack.c.bf16 %v3207_v62, %v3205_v55  ;;  %v2854_v44 = vsub.f32 %v12174_v61, %v2772_v38  ;;  %v13888_v38 = vld [vmem:[#allocation62_spill] sm:$0xff]  ;;  %v13891_v55 = vld [vmem:[#allocation63_spill] sm:$0xff] }
 0x418   : > { %10536 = vrcp.f32 %v3033_v29  ;;  %v3316_v40 = vpack.c.bf16 %v3203_v11, %v3201_v17  ;;  %v13889_v11 = vld [vmem:[#allocation17_spill] sm:$0xff] }
 0x419   : > { %v2972_v2 = vmul.f32 1.442695, %v2854_v44  ;;  %v1705_v58 = vadd.f32 %v13889_v11, %v13866_v53  ;;  %v13893_v11 = vld [vmem:[#allocation59_spill] sm:$0xff] }
 0x41a   : > { %9643 = vmatprep.mubr.msk.bf16.mxu0 %vm2607_vm2, %v3316_v40  ;;  %v2766_v54 = vpop.xlane.xlu0 %2765 }
 0x41b   : > { %9644 = vmatmul.mubr.msk.bf16.vlgmr.msra.gmra.mxu0 %vm2607_vm2, %v3317_v24  ;;  %v2852_v7 = vsub.f32 %v13886_v9, %v2766_v54  ;;  %v2775_v5 = vpop.xlane.xlu1 %2774  ;;  %v13892_v24 = vld [vmem:[#allocation19_spill] sm:$0xff] }
 0x41c   : > { %v12438_v13 = vpop.eup %10522  ;;  %9668 = vmatpush3.bf16.msra.mxu0 %v13875_v32  ;;  %v2855_v17 = vsub.f32 %v13888_v38, %v2775_v5 }
 0x41d   : > { %v2968_v31 = vmul.f32 1.442695, %v2852_v7  ;;  %9669 = vmatprep.subr.bf16.mxu0 %v1941_v3  ;;  %v3136_v62 = vsel %vm2607_vm2, %v12438_v13, 0.0  ;;  %v12443_v61 = vpop.eup %10524 }
 0x41e   : > { %13887 = vst [vmem:[#allocation9_spill] sm:$0xff] %v12443_v61  ;;  %3137 = vadd.xlane.f32.xlu0 %v3136_v62  ;;  %v12450_v32 = vpop.eup %10526  ;;  %v3142_v44 = vsel %vm2607_vm2, %v12443_v61, 0.0  ;;  %v2974_v9 = vmul.f32 1.442695, %v2855_v17  ;;  %v13895_v61 = vld [vmem:[#allocation60_spill] sm:$0xff] }
 0x41f   : > { %10538 = vpow2.f32 %v2968_v31  ;;  %v2769_v63 = vpop.xlane.xlu1 %2768 }
 0x420   : > { %9670 = vmatpush3.bf16.msra.mxu0 %v1941_v3  ;;  %v2853_v29 = vsub.f32 %v13891_v55, %v2769_v63  ;;  %10540 = vpow2.f32 %v2972_v2  ;;  %v1939_v3 = vpack.c.bf16 %v1708_v6, %v1705_v58  ;;  %v3145_v63 = vsel %vm2607_vm2, %v12450_v32, 0.0  ;;  %v13896_v6 = vld [vmem:[#allocation56_spill] sm:$0xff] }
 0x421   : > { %v12453_v40 = vpop.eup %10528  ;;  %9671 = vmatprep.subr.bf16.mxu0 %v13892_v24 }
 0x422   : > { %v10531_v54 = vpop.eup %10530  ;;  %v2970_v7 = vmul.f32 1.442695, %v2853_v29  ;;  %3143 = vadd.xlane.f32.xlu0 %v3142_v44  ;;  %v3042_v5 = vpop.xlane.xlu0 %3041  ;;  %v3139_v31 = vsel %vm2607_vm2, %v12453_v40, 0.0  ;;  %v13894_v29 = vld [vmem:[#allocation58_spill] sm:$0xff] }
 0x423   : > { %v10533_v62 = vpop.eup %10532  ;;  %3140 = vadd.xlane.f32.xlu1 %v3139_v31  ;;  %v3215_v18 = vmul.f32 %v10531_v54, %v13893_v11  ;;  %v13897_v31 = vld [vmem:[#allocation34_spill] sm:$0xff] }
 0x424   : > { %v10535_v38 = vpop.eup %10534  ;;  %10542 = vpow2.f32 %v2970_v7  ;;  %9672 = vmatpush3.bf16.msra.mxu0 %v13892_v24  ;;  %v3209_v44 = vmul.f32 %v10533_v62, %v13894_v29 }
 0x425   : > { %v10537_v2 = vpop.eup %10536  ;;  %10544 = vrcp.f32 %v3042_v5  ;;  %9673 = vmatprep.subr.bf16.mxu0 %v1939_v3  ;;  %v3213_v7 = vmul.f32 %v10535_v38, %v13896_v6 }
 0x426   : > { %10546 = vpow2.f32 %v2974_v9  ;;  %v2784_v17 = vpop.xlane.xlu0 %2783  ;;  %v3045_v55 = vpop.xlane.xlu1 %3044  ;;  %v3211_v58 = vmul.f32 %v10537_v2, %v13895_v61 }
 0x427   : > { %3146 = vadd.xlane.f32.xlu1 %v3145_v63  ;;  %10548 = vrcp.f32 %v3045_v55  ;;  %v2858_v5 = vsub.f32 %v12206_v48, %v2784_v17  ;;  %v3319_v54 = vpack.c.bf16 %v3215_v18, %v3213_v7 }
 0x428   : > { %9674 = vmatpush3.bf16.msra.mxu0 %v1939_v3  ;;  %v3318_v24 = vpack.c.bf16 %v3211_v58, %v3209_v44 }
 0x429   : > { %9699 = vmatprep.subr.bf16.mxu0 %v13897_v31  ;;  %v2980_v2 = vmul.f32 1.442695, %v2858_v5 }
 0x42a   : > { %9647 = vmatprep.mubr.msk.bf16.mxu0 %vm2607_vm2, %v3318_v24  ;;  %v2778_v9 = vpop.xlane.xlu0 %2777  ;;  %v2787_v11 = vpop.xlane.xlu1 %2786 }
 0x42b   : > { %9648 = vmatmul.mubr.msk.bf16.gmra.mxu0 %vm2607_vm2, %v3319_v54  ;;  %v2856_v62 = vsub.f32 %v12219_v14, %v2778_v9  ;;  %v2859_v48 = vsub.f32 %v12222_v34, %v2787_v11 }
 0x42c   : > { %v12472_v61 = vpop.eup %10538 }
 0x42d   : > { %v2976_v63 = vmul.f32 1.442695, %v2856_v62  ;;  %v3148_v3 = vsel %vm2607_vm2, %v12472_v61, 0.0  ;;  %v12476_v38 = vpop.eup %10540  ;;  %v2982_v7 = vmul.f32 1.442695, %v2859_v48 }
 0x42e   : > { %3149 = vadd.xlane.f32.xlu0 %v3148_v3  ;;  %v2796_v18 = vpop.xlane.xlu0 %2795  ;;  %v2781_v17 = vpop.xlane.xlu1 %2780  ;;  %v3154_v58 = vsel %vm2607_vm2, %v12476_v38, 0.0 }
 0x42f   : > { %10550 = vpow2.f32 %v2976_v63  ;;  %v2857_v55 = vsub.f32 %v12226_v59, %v2781_v17  ;;  %v2862_v14 = vsub.f32 %v12233_v52, %v2796_v18 }
 0x430   : > { %10552 = vpow2.f32 %v2980_v2 }
 0x431   : > { %v12480_v29 = vpop.eup %10542  ;;  %v2978_v44 = vmul.f32 1.442695, %v2857_v55  ;;  %v2988_v11 = vmul.f32 1.442695, %v2862_v14 }
 0x432   : > { %v10545_v6 = vpop.eup %10544  ;;  %3155 = vadd.xlane.f32.xlu0 %v3154_v58  ;;  %v2790_v24 = vpop.xlane.xlu0 %2789  ;;  %v3151_v34 = vsel %vm2607_vm2, %v12480_v29, 0.0 }
 0x433   : > { %v2799_v5 = vpop.xlane.xlu1 %2798  ;;  %v12487_v54 = vpop.eup %10546  ;;  %v2860_v59 = vsub.f32 %v12238_v51, %v2790_v24  ;;  %3152 = vadd.xlane.f32.xlu1 %v3151_v34  ;;  %10554 = vpow2.f32 %v2978_v44  ;;  %v3217_v2 = vmul.f32 %v10545_v6, %v12202_v33 }
 0x434   : > { %v10549_v9 = vpop.eup %10548  ;;  %v2863_v52 = vsub.f32 %v12244_v57, %v2799_v5  ;;  %10556 = vpow2.f32 %v2982_v7  ;;  %v3157_v48 = vsel %vm2607_vm2, %v12487_v54, 0.0 }
 0x435   : > { %v2984_v62 = vmul.f32 1.442695, %v2860_v59  ;;  %v3219_v63 = vmul.f32 %v10549_v9, %v12211_v45 }
 0x436   : > { %v3048_v3 = vpop.xlane.xlu0 %3047  ;;  %v2990_v55 = vmul.f32 1.442695, %v2863_v52 }
 0x437   : > { %v2793_v18 = vpop.xlane.xlu1 %2792  ;;  %10558 = vpow2.f32 %v2984_v62  ;;  %3158 = vadd.xlane.f32.xlu1 %v3157_v48  ;;  %v3320_v17 = vpack.c.bf16 %v3219_v63, %v3217_v2 }
 0x438   : > { %v2861_v51 = vsub.f32 %v12254_v60, %v2793_v18  ;;  %10560 = vpow2.f32 %v2988_v11 }
 0x439   : > { %9659 = vmatprep.mubr.msk.bf16.mxu1 %vm2607_vm2, %v3320_v17  ;;  %10562 = vrcp.f32 %v3048_v3 }
 0x43a   : > { %v2986_v57 = vmul.f32 1.442695, %v2861_v51  ;;  %v3054_v33 = vpop.xlane.xlu0 %3053 }
 0x43b   : > { %v3051_v14 = vpop.xlane.xlu1 %3050 }
 0x43c   : > { %10564 = vpow2.f32 %v2986_v57  ;;  %v12497_v45 = vpop.eup %10550 }
 0x43d   : > { %10566 = vpow2.f32 %v2990_v55  ;;  %v3160_v44 = vsel %vm2607_vm2, %v12497_v45, 0.0  ;;  %v12501_v58 = vpop.eup %10552 }
 0x43e   : > { %10568 = vrcp.f32 %v3051_v14  ;;  %3161 = vadd.xlane.f32.xlu0 %v3160_v44  ;;  %v3060_v60 = vpop.xlane.xlu0 %3059  ;;  %v3166_v24 = vsel %vm2607_vm2, %v12501_v58, 0.0  ;;  %v13899_v44 = vld [vmem:[#allocation26_spill] sm:$0xff] }
 0x43f   : > { %10570 = vrcp.f32 %v3054_v33  ;;  %v3057_v6 = vpop.xlane.xlu1 %3056 }
 0x440   : > { %10572 = vrcp.f32 %v3057_v6  ;;  %v12503_v7 = vpop.eup %10554  ;;  %v13900_v6 = vld [vmem:[#allocation27_spill] sm:$0xff] }
 0x441   : > { %10574 = vrcp.f32 %v3060_v60  ;;  %v3163_v5 = vsel %vm2607_vm2, %v12503_v7, 0.0  ;;  %v12509_v9 = vpop.eup %10556  ;;  %v1753_v60 = vadd.f32 %v13899_v44, %v13866_v53 }
 0x442   : > { %3167 = vadd.xlane.f32.xlu0 %v3166_v24  ;;  %v3066_v34 = vpop.xlane.xlu0 %3065  ;;  %3164 = vadd.xlane.f32.xlu1 %v3163_v5  ;;  %v3169_v63 = vsel %vm2607_vm2, %v12509_v9, 0.0  ;;  %v1756_v24 = vadd.f32 %v13900_v6, %v13866_v53  ;;  %v13903_v6 = vld [vmem:[#allocation24_spill] sm:$0xff] }
 0x443   : > { %v3063_v59 = vpop.xlane.xlu1 %3062 }
 0x444   : > { %v12511_v52 = vpop.eup %10558  ;;  %10576 = vrcp.f32 %v3063_v59 }
 0x445   : > { %v3172_v11 = vsel %vm2607_vm2, %v12511_v52, 0.0  ;;  %v12515_v62 = vpop.eup %10560  ;;  %10578 = vrcp.f32 %v3066_v34 }
 0x446   : > { %13898 = vst [vmem:[#allocation14_spill] sm:$0xff] %v12515_v62  ;;  %3173 = vadd.xlane.f32.xlu0 %v3172_v11  ;;  %v3072_v2 = vpop.xlane.xlu0 %3071  ;;  %v10563_v3 = vpop.eup %10562  ;;  %3170 = vadd.xlane.f32.xlu1 %v3169_v63  ;;  %v3178_v17 = vsel %vm2607_vm2, %v12515_v62, 0.0  ;;  %v1945_v62 = vpack.c.bf16 %v1756_v24, %v1753_v60  ;;  %v1740_v24 = vadd.f32 %v13903_v6, %v13866_v53  ;;  %v13908_v6 = vld [vmem:[#allocation29_spill] sm:$0xff] }
 0x447   : > { %v3069_v48 = vpop.xlane.xlu1 %3068  ;;  %v3221_v34 = vmul.f32 %v10563_v3, %v12247_v43  ;;  %v13901_v3 = vld [vmem:[#allocation28_spill] sm:$0xff] }
 0x448   : > { %10580 = vrcp.f32 %v3069_v48 }
 0x449   : > { %v12519_v18 = vpop.eup %10564  ;;  %10582 = vrcp.f32 %v3072_v2 }
 0x44a   : > { %v12521_v51 = vpop.eup %10566  ;;  %v3175_v55 = vsel %vm2607_vm2, %v12519_v18, 0.0  ;;  %3179 = vadd.xlane.f32.xlu0 %v3178_v17  ;;  %v3078_v33 = vpop.xlane.xlu0 %3077 }
 0x44b   : > { %v10569_v57 = vpop.eup %10568  ;;  %3176 = vadd.xlane.f32.xlu1 %v3175_v55  ;;  %v3075_v59 = vpop.xlane.xlu1 %3074  ;;  %v3181_v2 = vsel %vm2607_vm2, %v12521_v51, 0.0 }
 0x44c   : > { %v10571_v14 = vpop.eup %10570  ;;  %v3223_v5 = vmul.f32 %v10569_v57, %v12258_v56  ;;  %10584 = vrcp.f32 %v3075_v59 }
 0x44d   : > { %v10573_v11 = vpop.eup %10572  ;;  %10586 = vrcp.f32 %v3078_v33  ;;  %v3225_v48 = vmul.f32 %v10571_v14, %v12262_v19  ;;  %v13902_v14 = vld [vmem:[#allocation23_spill] sm:$0xff] }
 0x44e   : > { %v3321_v63 = vpack.c.bf16 %v3223_v5, %v3221_v34  ;;  %v3227_v17 = vmul.f32 %v10573_v11, %v12270_v25  ;;  %v10575_v44 = vpop.eup %10574  ;;  %v3084_v43 = vpop.xlane.xlu0 %3083  ;;  %v1737_v60 = vadd.f32 %v13902_v14, %v13866_v53  ;;  %v13904_v11 = vld [vmem:[#allocation25_spill] sm:$0xff] }
 0x44f   : > { %3182 = vadd.xlane.f32.xlu1 %v3181_v2  ;;  %v3081_v56 = vpop.xlane.xlu1 %3080  ;;  %v3229_v19 = vmul.f32 %v10575_v44, %v12268_v47 }
 0x450   : > { %9660 = vmatmul.mubr.msk.bf16.vlgmr.msra.gmra.mxu1 %vm2607_vm2, %v3321_v63  ;;  %10588 = vrcp.f32 %v3081_v56  ;;  %v3322_v55 = vpack.c.bf16 %v3227_v17, %v3225_v48 }
 0x451   : > { %9684 = vmatpush3.bf16.msra.mxu1 %v13901_v3  ;;  %v10577_v57 = vpop.eup %10576  ;;  %10590 = vrcp.f32 %v3084_v43  ;;  %v13906_v43 = vld [vmem:[#allocation33_spill] sm:$0xff] }
 0x452   : > { %9685 = vmatprep.subr.bf16.mxu1 %v1945_v62  ;;  %9663 = vmatprep.mubr.msk.bf16.mxu1 %vm2607_vm2, %v3322_v55  ;;  %v3231_v25 = vmul.f32 %v10577_v57, %v12278_v10  ;;  %v10579_v33 = vpop.eup %10578  ;;  %v1943_v10 = vpack.c.bf16 %v1740_v24, %v1737_v60  ;;  %v1788_v56 = vadd.f32 %v13906_v43, %v13866_v53 }
 0x453   : > { %v3087_v34 = vpop.xlane.xlu1 %3086  ;;  %v3233_v63 = vmul.f32 %v10579_v33, %v12284_v26  ;;  %v1769_v24 = vadd.f32 %v13908_v6, %v13866_v53 }
 0x454   : > { %10592 = vrcp.f32 %v3087_v34  ;;  %v3323_v5 = vpack.c.bf16 %v3231_v25, %v3229_v19  ;;  %v13907_v19 = vld [vmem:[#allocation40_spill] sm:$0xff]  ;;  %v13909_v34 = vld [vmem:[#allocation30_spill] sm:$0xff] }
 0x455   : > { %9686 = vmatpush3.bf16.msra.mxu1 %v1945_v62  ;;  %v10581_v59 = vpop.eup %10580  ;;  %v13905_v62 = vld [vmem:[#allocation32_spill] sm:$0xff] }
 0x456   : > { %9687 = vmatprep.subr.bf16.mxu1 %v13904_v11  ;;  %v3235_v47 = vmul.f32 %v10581_v59, %v12292_v46  ;;  %v10583_v2 = vpop.eup %10582  ;;  %v1785_v44 = vadd.f32 %v13905_v62, %v13866_v53 }
 0x457   : > { %v3237_v3 = vmul.f32 %v10583_v2, %v12290_v30 }
 0x458   : > { %9664 = vmatmul.mubr.msk.bf16.gmra.mxu1 %vm2607_vm2, %v3323_v5  ;;  %v3324_v48 = vpack.c.bf16 %v3235_v47, %v3233_v63  ;;  %v1949_v25 = vpack.c.bf16 %v1788_v56, %v1785_v44  ;;  %v1772_v5 = vadd.f32 %v13909_v34, %v13866_v53 }
 0x459   : > { %9688 = vmatpush3.bf16.msra.mxu1 %v13904_v11  ;;  %v10585_v17 = vpop.eup %10584 }
 0x45a   : > { %9689 = vmatprep.subr.bf16.mxu1 %v1943_v10  ;;  %v3239_v26 = vmul.f32 %v10585_v17, %v12298_v20  ;;  %9675 = vmatprep.mubr.msk.bf16.mxu0 %vm2607_vm2, %v3324_v48  ;;  %v10587_v46 = vpop.eup %10586  ;;  %v1947_v63 = vpack.c.bf16 %v1772_v5, %v1769_v24 }
 0x45b   : > { %v3241_v33 = vmul.f32 %v10587_v46, %v12300_v41 }
 0x45c   : > { %v3325_v55 = vpack.c.bf16 %v3239_v26, %v3237_v3 }
 0x45d   : > { %9690 = vmatpush3.bf16.msra.mxu1 %v1943_v10  ;;  %v10589_v57 = vpop.eup %10588 }
 0x45e   : > { %9715 = vmatprep.subr.bf16.mxu1 %v13907_v19  ;;  %9676 = vmatmul.mubr.msk.bf16.vlgmr.msra.gmra.mxu0 %vm2607_vm2, %v3325_v55  ;;  %v3243_v14 = vmul.f32 %v10589_v57, %v12308_v8  ;;  %v10591_v60 = vpop.eup %10590  ;;  %v13910_v8 = vld [vmem:[#allocation31_spill] sm:$0xff]  ;;  %v13912_v57 = vld [vmem:[#allocation38_spill] sm:$0xff] }
 0x45f   : > { %9700 = vmatpush3.bf16.msra.mxu0 %v13897_v31  ;;  %v3245_v11 = vmul.f32 %v10591_v60, %v12304_v49  ;;  %v13911_v49 = vld [vmem:[#allocation45_spill] sm:$0xff] }
 0x460   : > { %9701 = vmatprep.subr.bf16.mxu0 %v1949_v25  ;;  %v3326_v30 = vpack.c.bf16 %v3243_v14, %v3241_v33  ;;  %v13913_v33 = vld [vmem:[#allocation39_spill] sm:$0xff] }
 0x461   : > { %v10593_v20 = vpop.eup %10592  ;;  %v1820_v14 = vadd.f32 %v13913_v33, %v13866_v53 }
 0x462   : > { %9679 = vmatprep.mubr.msk.bf16.mxu0 %vm2607_vm2, %v3326_v30  ;;  %v3090_v59 = vpop.xlane.xlu0 %3089  ;;  %v3247_v41 = vmul.f32 %v10593_v20, %v12315_v23 }
 0x463   : > { %9702 = vmatpush3.bf16.msra.mxu0 %v1949_v25  ;;  %10594 = vrcp.f32 %v3090_v59  ;;  %v1817_v25 = vadd.f32 %v13912_v57, %v13866_v53 }
 0x464   : > { %9703 = vmatprep.subr.bf16.mxu0 %v13910_v8  ;;  %v3327_v31 = vpack.c.bf16 %v3247_v41, %v3245_v11  ;;  %v13914_v41 = vld [vmem:[#allocation35_spill] sm:$0xff] }
 0x466   : > { %9680 = vmatmul.mubr.msk.bf16.gmra.mxu0 %vm2607_vm2, %v3327_v31  ;;  %v3096_v47 = vpop.xlane.xlu0 %3095  ;;  %v3093_v2 = vpop.xlane.xlu1 %3092  ;;  %v13915_v31 = vld [vmem:[#allocation36_spill] sm:$0xff] }
 0x467   : > { %9704 = vmatpush3.bf16.msra.mxu0 %v13910_v8  ;;  %10596 = vrcp.f32 %v3093_v2  ;;  %v1801_v8 = vadd.f32 %v13914_v41, %v13866_v53 }
 0x468   : > { %9705 = vmatprep.subr.bf16.mxu0 %v1947_v63  ;;  %10598 = vrcp.f32 %v3096_v47 }
 0x46a   : > { %v3102_v10 = vpop.xlane.xlu0 %3101  ;;  %v3099_v48 = vpop.xlane.xlu1 %3098 }
 0x46b   : > { %9706 = vmatpush3.bf16.msra.mxu0 %v1947_v63  ;;  %10600 = vrcp.f32 %v3099_v48  ;;  %v1804_v63 = vadd.f32 %v13915_v31, %v13866_v53 }
 0x46c   : > { %9731 = vmatprep.subr.bf16.mxu0 %v13911_v49  ;;  %10602 = vrcp.f32 %v3102_v10 }
 0x46e   : > { %v3108_v23 = vpop.xlane.xlu0 %3107  ;;  %v3105_v17 = vpop.xlane.xlu1 %3104 }
 0x46f   : > { %10604 = vrcp.f32 %v3105_v17 }
 0x470   : > { %10606 = vrcp.f32 %v3108_v23  ;;  %v10595_v44 = vpop.eup %10594 }
 0x471   : > { %v3249_v56 = vmul.f32 %v10595_v44, %v12326_v36 }
 0x472   : > { %v3111_v62 = vpop.xlane.xlu1 %3110 }
 0x473   : > { %10608 = vrcp.f32 %v3111_v62 }
 0x474   : > { %v10597_v43 = vpop.eup %10596 }
 0x475   : > { %v3251_v3 = vmul.f32 %v10597_v43, %v12332_v35  ;;  %v10599_v26 = vpop.eup %10598  ;;  %v1953_v35 = vpack.c.bf16 %v1820_v14, %v1817_v25  ;;  %v13918_v25 = vld [vmem:[#allocation46_spill] sm:$0xff] }
 0x476   : > { %v3253_v60 = vmul.f32 %v10599_v26, %v12330_v21  ;;  %v1852_v33 = vadd.f32 %v13918_v25, %v13866_v53 }
 0x477   : > { %v3328_v46 = vpack.c.bf16 %v3251_v3, %v3249_v56 }
 0x478   : > { %v10601_v55 = vpop.eup %10600 }
 0x479   : > { %v3255_v30 = vmul.f32 %v10601_v55, %v12338_v22  ;;  %9691 = vmatprep.mubr.msk.bf16.mxu1 %vm2607_vm2, %v3328_v46  ;;  %v10603_v20 = vpop.eup %10602  ;;  %v13917_v46 = vld [vmem:[#allocation44_spill] sm:$0xff] }
 0x47a   : > { %v3257_v34 = vmul.f32 %v10603_v20, %v12340_v28  ;;  %v1849_v55 = vadd.f32 %v13917_v46, %v13866_v53  ;;  %v13919_v20 = vld [vmem:[#allocation41_spill] sm:$0xff] }
 0x47b   : > { %v3329_v6 = vpack.c.bf16 %v3255_v30, %v3253_v60  ;;  %v10268_v46 = vld [vmem:[%s13755_s8 + $0x20] sm:$0xff]  }
 0x47c   : > { %v10605_v36 = vpop.eup %10604 }
 0x47d   : > { %v10607_v24 = vpop.eup %10606  ;;  %9692 = vmatmul.mubr.msk.bf16.vlgmr.msra.gmra.mxu1 %vm2607_vm2, %v3329_v6  ;;  %v3259_v5 = vmul.f32 %v10605_v36, %v12348_v15  ;;  %v13916_v15 = vld [vmem:[#allocation37_spill] sm:$0xff]  ;;  %v1833_v6 = vadd.f32 %v13919_v20, %v13866_v53  ;;  %v13920_v36 = vld [vmem:[#allocation42_spill] sm:$0xff] }
 0x47e   : > { %9716 = vmatpush3.bf16.msra.mxu1 %v13907_v19  ;;  %v3261_v22 = vmul.f32 %v10607_v24, %v12346_v42  ;;  %v1951_v19 = vpack.c.bf16 %v1804_v63, %v1801_v8 }
 0x47f   : > { %9717 = vmatprep.subr.bf16.mxu1 %v1953_v35  ;;  %v3330_v21 = vpack.c.bf16 %v3259_v5, %v3257_v34 }
 0x480   : > { %v10609_v59 = vpop.eup %10608 }
 0x481   : > { %v3263_v11 = vmul.f32 %v10609_v59, %v12354_v39  ;;  %9695 = vmatprep.mubr.msk.bf16.mxu1 %vm2607_vm2, %v3330_v21  ;;  %v12600_v39 = vld [vmem:[%s13755_s8 + $0x38] sm:$0xff]  }
 0x482   : > { %9718 = vmatpush3.bf16.msra.mxu1 %v1953_v35  ;;  %v13921_v35 = vld [vmem:[#allocation43_spill] sm:$0xff] }
 0x483   : > { %v3331_v28 = vpack.c.bf16 %v3263_v11, %v3261_v22  ;;  %9719 = vmatprep.subr.bf16.mxu1 %v13916_v15 }
 0x485   : > { %9696 = vmatmul.mubr.msk.bf16.gmra.mxu1 %vm2607_vm2, %v3331_v28 }
 0x486   : > { %9720 = vmatpush3.bf16.msra.mxu1 %v13916_v15 }
 0x487   : > { %v3114_v42 = vpop.xlane.xlu0 %3113  ;;  %9721 = vmatprep.subr.bf16.mxu1 %v1951_v19 }
 0x488   : > { %10610 = vrcp.f32 %v3114_v42 }
 0x48a   : > { %9722 = vmatpush3.bf16.msra.mxu1 %v1951_v19 }
 0x48b   : > { %v3120_v47 = vpop.xlane.xlu0 %3119  ;;  %v3117_v2 = vpop.xlane.xlu1 %3116  ;;  %9747 = vmatprep.subr.bf16.mxu1 %v12600_v39 }
 0x48c   : > { %10612 = vrcp.f32 %v3117_v2 }
 0x48d   : > { %10614 = vrcp.f32 %v3120_v47 }
 0x48f   : > { %v3123_v10 = vpop.xlane.xlu1 %3122 }
 0x490   : > { %10616 = vrcp.f32 %v3123_v10 }
 0x495   : > { %v10611_v23 = vpop.eup %10610 }
 0x496   : > { %v3265_v56 = vmul.f32 %v10611_v23, %v12375_v12 }
 0x497   : > { %v3126_v48 = vpop.xlane.xlu0 %3125 }
 0x498   : > { %10618 = vrcp.f32 %v3126_v48  ;;  %v13922_v48 = vld [vmem:[#allocation9_spill] sm:$0xff] }
 0x499   : > { %v10613_v17 = vpop.eup %10612 }
 0x49a   : > { %v10615_v62 = vpop.eup %10614  ;;  %v3267_v3 = vmul.f32 %v10613_v17, %v12389_v37  ;;  %v1957_v37 = vpack.c.bf16 %v1852_v33, %v1849_v55 }
 0x49b   : > { %v3132_v44 = vpop.xlane.xlu0 %3131  ;;  %v3129_v43 = vpop.xlane.xlu1 %3128  ;;  %v3269_v14 = vmul.f32 %v10615_v62, %v12380_v4  ;;  %v1836_v4 = vadd.f32 %v13920_v36, %v13866_v53 }
 0x49c   : > { %10620 = vrcp.f32 %v3129_v43  ;;  %v3332_v57 = vpack.c.bf16 %v3267_v3, %v3265_v56 }
 0x49d   : > { %v10617_v26 = vpop.eup %10616  ;;  %10622 = vrcp.f32 %v3132_v44  ;;  %v1955_v5 = vpack.c.bf16 %v1836_v4, %v1833_v6 }
 0x49e   : > { %v3271_v60 = vmul.f32 %v10617_v26, %v12386_v1  ;;  %9707 = vmatprep.mubr.msk.bf16.mxu0 %vm2607_vm2, %v3332_v57 }
 0x49f   : > { %v3135_v30 = vpop.xlane.xlu1 %3134 }
 0x4a0   : > { %v3333_v12 = vpack.c.bf16 %v3271_v60, %v3269_v14  ;;  %10624 = vrcp.f32 %v3135_v30 }
 0x4a2   : > { %9708 = vmatmul.mubr.msk.bf16.vlgmr.msra.gmra.mxu0 %vm2607_vm2, %v3333_v12 }
 0x4a3   : > { %9732 = vmatpush3.bf16.msra.mxu0 %v13911_v49 }
 0x4a4   : > { %9733 = vmatprep.subr.bf16.mxu0 %v1957_v37 }
 0x4a5   : > { %v10619_v24 = vpop.eup %10618 }
 0x4a6   : > { %v3273_v49 = vmul.f32 %v10619_v24, %v12408_v0  ;;  %v10270_v24 = vld [vmem:[%s13755_s8 + $0x10] sm:$0xff]  }
 0x4a7   : > { %9734 = vmatpush3.bf16.msra.mxu0 %v1957_v37  ;;  %v3138_v1 = vpop.xlane.xlu0 %3137  ;;  %v10269_v37 = vld [vmem:[%s13755_s8 + $0x18] sm:$0xff]  }
 0x4a8   : > { %9735 = vmatprep.subr.bf16.mxu0 %v13921_v35  ;;  %10626 = vrcp.f32 %v3138_v1 }
 0x4a9   : > { %v10621_v34 = vpop.eup %10620 }
 0x4aa   : > { %v10623_v59 = vpop.eup %10622  ;;  %v3275_v21 = vmul.f32 %v10621_v34, %v12415_v50 }
 0x4ab   : > { %9736 = vmatpush3.bf16.msra.mxu0 %v13921_v35  ;;  %v3144_v22 = vpop.xlane.xlu0 %3143  ;;  %v3277_v8 = vmul.f32 %v10623_v59, %v12413_v27 }
 0x4ac   : > { %9737 = vmatprep.subr.bf16.mxu0 %v1955_v5  ;;  %v3141_v11 = vpop.xlane.xlu1 %3140  ;;  %v3334_v53 = vpack.c.bf16 %v3275_v21, %v3273_v49 }
 0x4ad   : > { %v10625_v41 = vpop.eup %10624  ;;  %10628 = vrcp.f32 %v3141_v11 }
 0x4ae   : > { %v3279_v31 = vmul.f32 %v10625_v41, %v12418_v16  ;;  %10630 = vrcp.f32 %v3144_v22  ;;  %9711 = vmatprep.mubr.msk.bf16.mxu0 %vm2607_vm2, %v3334_v53  ;;  %v10272_v22 = vld [vmem:[%s13755_s8] sm:$0xff]  }
 0x4af   : > { %9738 = vmatpush3.bf16.msra.mxu0 %v1955_v5 }
 0x4b0   : > { %v3147_v63 = vpop.xlane.xlu1 %3146  ;;  %v3335_v28 = vpack.c.bf16 %v3279_v31, %v3277_v8 }
 0x4b1   : > { %10632 = vrcp.f32 %v3147_v63 }
 0x4b2   : > { %9712 = vmatmul.mubr.msk.bf16.gmra.mxu0 %vm2607_vm2, %v3335_v28 }
 0x4b5   : > { %v10627_v50 = vpop.eup %10626 }
 0x4b6   : > { %v3281_v19 = vmul.f32 %v10627_v50, %v12438_v13  ;;  %v10266_v13 = vld [vmem:[%s13755_s8 + $0x30] sm:$0xff]  }
 0x4b7   : > { %v3150_v0 = vpop.xlane.xlu0 %3149 }
 0x4b8   : > { %10634 = vrcp.f32 %v3150_v0 }
 0x4ba   : > { %v10629_v15 = vpop.eup %10628  ;;  %v12630_v62 = vpop.f32.mrf.mxu0 }
 0x4bb   : > { %v3283_v42 = vmul.f32 %v10629_v15, %v12453_v40  ;;  %v10631_v27 = vpop.eup %10630  ;;  %v3156_v47 = vpop.xlane.xlu0 %3155 }
 0x4bc   : > { %v3153_v16 = vpop.xlane.xlu1 %3152  ;;  %v3285_v23 = vmul.f32 %v10631_v27, %v13922_v48  ;;  %v3390_v40 = vpop.f32.mrf.mxu0 }
 0x4bd   : > { %10636 = vrcp.f32 %v3153_v16  ;;  %v3336_v2 = vpack.c.bf16 %v3283_v42, %v3281_v19 }
 0x4be   : > { %v10633_v10 = vpop.eup %10632  ;;  %10638 = vrcp.f32 %v3156_v47  ;;  %v12641_v56 = vpop.f32.mrf.mxu0 }
 0x4bf   : > { %v3287_v17 = vmul.f32 %v10633_v10, %v12450_v32  ;;  %9723 = vmatprep.mubr.msk.bf16.mxu1 %vm2607_vm2, %v3336_v2  ;;  %v10267_v32 = vld [vmem:[%s13755_s8 + $0x28] sm:$0xff]   ;;  %v3961_v42 = vpack.c.bf16 %v12641_v56, %v12630_v62 }
 0x4c0   : > { %v3159_v44 = vpop.xlane.xlu1 %3158  ;;  %v3393_v57 = vpop.f32.mrf.mxu0 }
 0x4c1   : > { %v3337_v43 = vpack.c.bf16 %v3287_v17, %v3285_v23  ;;  %10640 = vrcp.f32 %v3159_v44  ;;  %v3960_v35 = vpack.c.bf16 %v3393_v57, %v3390_v40  ;;  %v13923_v23 = vld [vmem:[#allocation14_spill] sm:$0xff] }
 0x4c3   : > { %9724 = vmatmul.mubr.msk.bf16.vlgmr.msra.gmra.mxu1 %vm2607_vm2, %v3337_v43 }
 0x4c4   : > { %9748 = vmatpush3.bf16.msra.mxu1 %v12600_v39 }
 0x4c5   : > { %9749 = vmatprep.subr.bf16.mxu1 %v10266_v13  ;;  %v10635_v26 = vpop.eup %10634 }
 0x4c6   : > { %v3289_v39 = vmul.f32 %v10635_v26, %v12472_v61 }
 0x4c7   : > { %v3162_v3 = vpop.xlane.xlu0 %3161 }
 0x4c8   : > { %9750 = vmatpush3.bf16.msra.mxu1 %v10266_v13  ;;  %10642 = vrcp.f32 %v3162_v3 }
 0x4c9   : > { %9751 = vmatprep.subr.bf16.mxu1 %v10267_v32 }
 0x4ca   : > { %v10637_v55 = vpop.eup %10636  ;;  %v12648_v30 = vpop.f32.mrf.mxu0 }
 0x4cb   : > { %v3168_v25 = vpop.xlane.xlu0 %3167  ;;  %v3291_v33 = vmul.f32 %v10637_v55, %v12480_v29  ;;  %v10639_v14 = vpop.eup %10638 }
 0x4cc   : > { %9752 = vmatpush3.bf16.msra.mxu1 %v10267_v32  ;;  %v3165_v60 = vpop.xlane.xlu1 %3164  ;;  %v3293_v61 = vmul.f32 %v10639_v14, %v12476_v38  ;;  %v3406_v4 = vpop.f32.mrf.mxu0 }
 0x4cd   : > { %10644 = vrcp.f32 %v3165_v60  ;;  %9753 = vmatprep.subr.bf16.mxu1 %v10268_v46  ;;  %v3338_v12 = vpack.c.bf16 %v3291_v33, %v3289_v39 }
 0x4ce   : > { %v10641_v20 = vpop.eup %10640  ;;  %10646 = vrcp.f32 %v3168_v25  ;;  %v9634_v5 = vpop.f32.mrf.mxu0 }
 0x4cf   : > { %9727 = vmatprep.mubr.msk.bf16.mxu1 %vm2607_vm2, %v3338_v12  ;;  %v3174_v6 = vpop.xlane.xlu0 %3173  ;;  %v3295_v29 = vmul.f32 %v10641_v20, %v12487_v54  ;;  %v10271_v54 = vld [vmem:[%s13755_s8 + $0x8] sm:$0xff]   ;;  %v3963_v44 = vpack.c.bf16 %v9634_v5, %v12648_v30 }
 0x4d0   : > { %9754 = vmatpush3.bf16.msra.mxu1 %v10268_v46  ;;  %v3171_v36 = vpop.xlane.xlu1 %3170  ;;  %v3409_v21 = vpop.f32.mrf.mxu0 }
 0x4d1   : > { %10648 = vrcp.f32 %v3171_v36  ;;  %9755 = vmatprep.subr.bf16.mxu1 %v10269_v37  ;;  %v3339_v1 = vpack.c.bf16 %v3295_v29, %v3293_v61 }
 0x4d2   : > { %10650 = vrcp.f32 %v3174_v6 }
 0x4d3   : > { %9728 = vmatmul.mubr.msk.bf16.gmra.mxu1 %vm2607_vm2, %v3339_v1  ;;  %v3180_v34 = vpop.xlane.xlu0 %3179 }
 0x4d4   : > { %9756 = vmatpush3.bf16.msra.mxu1 %v10269_v37  ;;  %9763 = vmatprep.mubr.bf16.mxu1 %v3960_v35  ;;  %v3177_v38 = vpop.xlane.xlu1 %3176 }
 0x4d5   : > { %10652 = vrcp.f32 %v3177_v38  ;;  %9757 = vmatprep.subr.bf16.mxu1 %v10270_v24  ;;  %v10643_v59 = vpop.eup %10642 }
 0x4d6   : > { %10654 = vrcp.f32 %v3180_v34  ;;  %v3297_v53 = vmul.f32 %v10643_v59, %v12497_v45  ;;  %v10275_v59 = vld [vmem:[%s13753_s6 + $0x16c] ss:$12 sps:$4 sm:$0xff]  }
 0x4d7   : > { %5225 = vmatprep.subr.bf16.mxu0 %v10275_v59 }
 0x4d8   : > { %9758 = vmatpush3.bf16.msra.mxu1 %v10270_v24  ;;  %v3183_v49 = vpop.xlane.xlu1 %3182 }
 0x4d9   : > { %10656 = vrcp.f32 %v3183_v49  ;;  %9759 = vmatprep.subr.bf16.mxu1 %v10271_v54  ;;  %v10273_v49 = vld [vmem:[%s13753_s6 + $0x168] ss:$12 sps:$4 sm:$0xff]  }
 0x4da   : > { %v10645_v11 = vpop.eup %10644 }
 0x4db   : > { %v9645_v41 = vpop.f32.mrf.mxu0  ;;  %v3299_v8 = vmul.f32 %v10645_v11, %v12503_v7  ;;  %v10647_v31 = vpop.eup %10646  ;;  %v3962_v7 = vpack.c.bf16 %v3409_v21, %v3406_v4  ;;  %v10278_v21 = vld [vmem:[%s13753_s6 + $0x154] ss:$12 sps:$4 sm:$0xff]   ;;  %v10276_v11 = vld [vmem:[%s13753_s6 + $0x150] ss:$12 sps:$4 sm:$0xff]  }
 0x4dc   : > { %9760 = vmatpush3.bf16.msra.mxu1 %v10271_v54  ;;  %v3301_v0 = vmul.f32 %v10647_v31, %v12501_v58  ;;  %v10279_v31 = vld [vmem:[%s13753_s6 + $0x138] ss:$12 sps:$4 sm:$0xff]  }
 0x4dd   : > { %9761 = vmatprep.subr.bf16.mxu1 %v10272_v22  ;;  %v3340_v63 = vpack.c.bf16 %v3299_v8, %v3297_v53  ;;  %v3467_v15 = vpop.f32.mrf.mxu0  ;;  %v10281_v53 = vld [vmem:[%s13753_s6 + $0x13c] ss:$12 sps:$4 sm:$0xff]  }
 0x4de   : > { %v10649_v28 = vpop.eup %10648 }
 0x4df   : > { %v3303_v50 = vmul.f32 %v10649_v28, %v12509_v9  ;;  %9739 = vmatprep.mubr.msk.bf16.mxu0 %vm2607_vm2, %v3340_v63  ;;  %v10651_v19 = vpop.eup %10650  ;;  %v9646_v47 = vpop.f32.mrf.mxu0 }
 0x4e0   : > { %9762 = vmatpush3.bf16.msra.mxu1 %v10272_v22  ;;  %v3305_v16 = vmul.f32 %v10651_v19, %v12511_v52  ;;  %v13924_v52 = vmov 0   ;;  %v3965_v56 = vpack.c.bf16 %v9646_v47, %v9645_v41  ;;  %v10282_v19 = vld [vmem:[%s13753_s6 + $0x120] ss:$12 sps:$4 sm:$0xff]  }
 0x4e1   : > { %v3341_v45 = vpack.c.bf16 %v3303_v50, %v3301_v0  ;;  %v3470_v48 = vpop.f32.mrf.mxu0 }
 0x4e2   : > { %v10653_v27 = vpop.eup %10652  ;;  %v3964_v13 = vpack.c.bf16 %v3470_v48, %v3467_v15  ;;  %v10284_v15 = vld [vmem:[%s13753_s6 + $0x124] ss:$12 sps:$4 sm:$0xff]  }
 0x4e3   : > { %9764 = vmatmul.mubr.bf16.vlgmr.msra.gmra.mxu1 %v3961_v42  ;;  %9740 = vmatmul.mubr.msk.bf16.vlgmr.msra.gmra.mxu0 %vm2607_vm2, %v3341_v45  ;;  %v3307_v58 = vmul.f32 %v10653_v27, %v12519_v18  ;;  %v10655_v9 = vpop.eup %10654  ;;  %v10287_v27 = vld [vmem:[%s13753_s6 + $0x10c] ss:$12 sps:$4 sm:$0xff]  }
 0x4e4   : > { %9767 = vmatprep.mubr.bf16.mxu1 %v3962_v7  ;;  %v3309_v17 = vmul.f32 %v10655_v9, %v13923_v23  ;;  %5226 = vmatpush1.bf16.msra.mxu0 %v10273_v49  ;;  %v10285_v7 = vld [vmem:[%s13753_s6 + $0x108] ss:$12 sps:$4 sm:$0xff]   ;;  %v10291_v48 = vld [vmem:[%s13753_s6 + $0xd8] ss:$12 sps:$4 sm:$0xff]  }
 0x4e5   : > { %v3342_v2 = vpack.c.bf16 %v3307_v58, %v3305_v16  ;;  %5227 = vmatprep.subr.bf16.mxu0 %v10278_v21  ;;  %v10290_v9 = vld [vmem:[%s13753_s6 + $0xf4] ss:$12 sps:$4 sm:$0xff]   ;;  %v10296_v23 = vld [vmem:[%s13753_s6 + $0xc4] ss:$12 sps:$4 sm:$0xff]  }
 0x4e6   : > { %v10657_v10 = vpop.eup %10656 }
 0x4e7   : > { %9743 = vmatprep.mubr.msk.bf16.mxu0 %vm2607_vm2, %v3342_v2  ;;  %v3311_v62 = vmul.f32 %v10657_v10, %v12521_v51  ;;  %v10288_v2 = vld [vmem:[%s13753_s6 + $0xf0] ss:$12 sps:$4 sm:$0xff]  }
 0x4e8   : > { %5228 = vmatpush1.bf16.msra.mxu0 %v10276_v11  ;;  %v10293_v10 = vld [vmem:[%s13753_s6 + $0xdc] ss:$12 sps:$4 sm:$0xff]  }
 0x4e9   : > { %v3343_v43 = vpack.c.bf16 %v3311_v62, %v3309_v17  ;;  %5229 = vmatprep.subr.bf16.mxu0 %v10281_v53  ;;  %v10294_v17 = vld [vmem:[%s13753_s6 + $0xc0] ss:$12 sps:$4 sm:$0xff]  }
 0x4eb   : > { %9768 = vmatmul.mubr.bf16.gmra.mxu1 %v3963_v44  ;;  %v9649_v40 = vpop.f32.mrf.mxu0  ;;  %9744 = vmatmul.mubr.msk.bf16.gmra.mxu0 %vm2607_vm2, %v3343_v43 }
 0x4ec   : > { %9771 = vmatprep.mubr.bf16.mxu1 %v3964_v13  ;;  %5257 = vmatprep.mubr.bf16.mxu0 %v13924_v52 }
 0x4ed   : > { %v3483_v18 = vpop.f32.mrf.mxu0  ;;  %5230 = vmatpush1.bf16.msra.mxu0 %v10279_v31 }
 0x4ee   : > { %5231 = vmatprep.subr.bf16.mxu0 %v10284_v15  ;;  %v10791_v15 = vmov 1966171168  }
 0x4ef   : > { %v9650_v32 = vpop.f32.mrf.mxu0 }
 0x4f0   : > { %v3967_v46 = vpack.c.bf16 %v9650_v32, %v9649_v40 }
 0x4f1   : > { %v3486_v3 = vpop.f32.mrf.mxu0  ;;  %5232 = vmatpush1.bf16.msra.mxu0 %v10282_v19  ;;  %v4791_v19 = vunpack.c.l.s4 %v10791_v15 }
 0x4f2   : > { %v3966_v26 = vpack.c.bf16 %v3486_v3, %v3483_v18  ;;  %5233 = vmatprep.subr.bf16.mxu0 %v10287_v27 }
 0x4f3   : > { %9772 = vmatmul.mubr.bf16.gmra.mxu1 %v3965_v56 }
 0x4f4   : > { %9775 = vmatprep.mubr.bf16.mxu1 %v3966_v26 }
 0x4f5   : > { %5234 = vmatpush1.bf16.msra.mxu0 %v10285_v7 }
 0x4f6   : > { %5235 = vmatprep.subr.bf16.mxu0 %v10290_v9 }
 0x4f9   : > { %5236 = vmatpush1.bf16.msra.mxu0 %v10288_v2 }
 0x4fa   : > { %5237 = vmatprep.subr.bf16.mxu0 %v10293_v10 }
 0x4fb   : > { %9776 = vmatmul.mubr.bf16.gmra.mxu1 %v3967_v46 }
 0x4fd   : > { %5238 = vmatpush1.bf16.msra.mxu0 %v10291_v48 }
 0x4fe   : > { %5239 = vmatprep.subr.bf16.mxu0 %v10296_v23  ;;  %v4792_v23 = vunpack.c.0.s8 %v4791_v19 }
 0x501   : > { %5240 = vmatpush1.bf16.msra.mxu0 %v10294_v17 }
 0x510   : > { %v9661_v51 = vpop.f32.mrf.mxu1 }
 0x512   : > { %v3544_v55 = vpop.f32.mrf.mxu1 }
 0x514   : > { %v9662_v57 = vpop.f32.mrf.mxu1 }
 0x515   : > { %v3969_v33 = vpack.c.bf16 %v9662_v57, %v9661_v51 }
 0x516   : > { %v3547_v25 = vpop.f32.mrf.mxu1 }
 0x517   : > { %v3968_v39 = vpack.c.bf16 %v3547_v25, %v3544_v55 }
 0x518   : > { %v9665_v14 = vpop.f32.mrf.mxu1 }
 0x519   : > { %9779 = vmatprep.mubr.bf16.mxu1 %v3968_v39 }
 0x51a   : > { %v3560_v60 = vpop.f32.mrf.mxu1  ;;  %9780 = vmatmul.mubr.bf16.gmra.mxu1 %v3969_v33 }
 0x51c   : > { %v9666_v30 = vpop.f32.mrf.mxu1 }
 0x51d   : > { %v3971_v6 = vpack.c.bf16 %v9666_v30, %v9665_v14 }
 0x51e   : > { %v3563_v12 = vpop.f32.mrf.mxu1  ;;  %v9677_v20 = vpop.f32.mrf.mxu0 }
 0x51f   : > { %v3970_v37 = vpack.c.bf16 %v3563_v12, %v3560_v60 }
 0x520   : > { %v3621_v61 = vpop.f32.mrf.mxu0 }
 0x521   : > { %9783 = vmatprep.mubr.bf16.mxu1 %v3970_v37 }
 0x522   : > { %9784 = vmatmul.mubr.bf16.gmra.mxu1 %v3971_v6  ;;  %v9678_v29 = vpop.f32.mrf.mxu0 }
 0x523   : > { %v3973_v24 = vpack.c.bf16 %v9678_v29, %v9677_v20 }
 0x524   : > { %v3624_v36 = vpop.f32.mrf.mxu0 }
 0x525   : > { %v3972_v4 = vpack.c.bf16 %v3624_v36, %v3621_v61  ;;  %v12733_v61 = vld [vmem:[%s13756_s9] ss:$0 sm:$0xff] }
 0x526   : > { %v9681_v1 = vpop.f32.mrf.mxu0 }
 0x527   : > { %9787 = vmatprep.mubr.bf16.mxu1 %v3972_v4 }
 0x528   : > { %v3637_v35 = vpop.f32.mrf.mxu0 }
 0x52a   : > { %9788 = vmatmul.mubr.bf16.gmra.mxu1 %v3973_v24  ;;  %v9682_v34 = vpop.f32.mrf.mxu0 }
 0x52b   : > { %v3975_v54 = vpack.c.bf16 %v9682_v34, %v9681_v1 }
 0x52c   : > { %v3640_v38 = vpop.f32.mrf.mxu0 }
 0x52d   : > { %v3974_v5 = vpack.c.bf16 %v3640_v38, %v3637_v35 }
 0x52f   : > { %9791 = vmatprep.mubr.bf16.mxu1 %v3974_v5 }
 0x532   : > { %9792 = vmatmul.mubr.bf16.gmra.mxu1 %v3975_v54 }
 0x53d   : > { %v9693_v22 = vpop.f32.mrf.mxu1 }
 0x53f   : > { %v3698_v41 = vpop.f32.mrf.mxu1 }
 0x541   : > { %v9694_v8 = vpop.f32.mrf.mxu1 }
 0x542   : > { %v3977_v0 = vpack.c.bf16 %v9694_v8, %v9693_v22 }
 0x543   : > { %v3701_v63 = vpop.f32.mrf.mxu1 }
 0x544   : > { %v3976_v28 = vpack.c.bf16 %v3701_v63, %v3698_v41 }
 0x545   : > { %v9697_v50 = vpop.f32.mrf.mxu1 }
 0x546   : > { %9795 = vmatprep.mubr.bf16.mxu1 %v3976_v28 }
 0x547   : > { %v3714_v42 = vpop.f32.mrf.mxu1  ;;  %9796 = vmatmul.mubr.bf16.gmra.mxu1 %v3977_v0 }
 0x549   : > { %v9698_v45 = vpop.f32.mrf.mxu1 }
 0x54a   : > { %v3979_v58 = vpack.c.bf16 %v9698_v45, %v9697_v50 }
 0x54b   : > { %v3717_v47 = vpop.f32.mrf.mxu1 }
 0x54c   : > { %v3978_v16 = vpack.c.bf16 %v3717_v47, %v3714_v42 }
 0x54e   : > { %9799 = vmatprep.mubr.bf16.mxu1 %v3978_v16 }
 0x54f   : > { %9800 = vmatmul.mubr.bf16.gmra.mxu1 %v3979_v58 }
 0x562   : > { %v9709_v62 = vpop.f32.mrf.mxu0 }
 0x564   : > { %v3775_v44 = vpop.f32.mrf.mxu0 }
 0x566   : > { %v9710_v43 = vpop.f32.mrf.mxu0 }
 0x567   : > { %v3981_v18 = vpack.c.bf16 %v9710_v43, %v9709_v62 }
 0x568   : > { %v3778_v13 = vpop.f32.mrf.mxu0 }
 0x569   : > { %v3980_v40 = vpack.c.bf16 %v3778_v13, %v3775_v44 }
 0x56b   : > { %9803 = vmatprep.mubr.bf16.mxu1 %v3980_v40 }
 0x56c   : > { %9804 = vmatmul.mubr.bf16.gmra.mxu1 %v3981_v18 }
 0x572   : > { %v9713_v32 = vpop.f32.mrf.mxu0 }
 0x574   : > { %v3791_v56 = vpop.f32.mrf.mxu0 }
 0x576   : > { %v9714_v3 = vpop.f32.mrf.mxu0 }
 0x577   : > { %v3983_v51 = vpack.c.bf16 %v9714_v3, %v9713_v32 }
 0x578   : > { %v3794_v26 = vpop.f32.mrf.mxu0 }
 0x579   : > { %v3982_v46 = vpack.c.bf16 %v3794_v26, %v3791_v56 }
 0x57b   : > { %9807 = vmatprep.mubr.bf16.mxu1 %v3982_v46  ;;  %v13925_v46 = vld [vmem:[#allocation6_spill] sm:$0xff] }
 0x57c   : > { %9808 = vmatmul.mubr.bf16.gmra.mxu1 %v3983_v51  ;;  %v12747_v51 = vsub.s32 %v4792_v23, %v13925_v46  ;;  %vm4787_vm10 = vcmp.eq.s32.totalorder %v13925_v46, 0  ;;  %vm6318_vm14 = vcmp.lt.s32.totalorder %v13925_v46, 7 }
 0x583   : > { %v9725_v55 = vpop.f32.mrf.mxu1 }
 0x585   : > { %v3852_v57 = vpop.f32.mrf.mxu1 }
 0x587   : > { %v9726_v25 = vpop.f32.mrf.mxu1 }
 0x588   : > { %v3985_v14 = vpack.c.bf16 %v9726_v25, %v9725_v55 }
 0x589   : > { %v3855_v39 = vpop.f32.mrf.mxu1 }
 0x58a   : > { %v3984_v33 = vpack.c.bf16 %v3855_v39, %v3852_v57 }
 0x58c   : > { %9811 = vmatprep.mubr.bf16.mxu1 %v3984_v33 }
 0x58d   : > { %9812 = vmatmul.mubr.bf16.gmra.mxu1 %v3985_v14 }
 0x593   : > { %v9729_v60 = vpop.f32.mrf.mxu1 }
 0x595   : > { %v3868_v30 = vpop.f32.mrf.mxu1 }
 0x597   : > { %v9730_v12 = vpop.f32.mrf.mxu1 }
 0x598   : > { %v3987_v6 = vpack.c.bf16 %v9730_v12, %v9729_v60  ;;  %v12752_v12 = vld [vmem:[%s427_s16] sm:$0xff]  ;;  %s8957_s16 = sshll.u32 %s10883_s25, 4  ;;  %s10796_s25 = smov [#allocation2]  }
 0x599   : > { %v3871_v37 = vpop.f32.mrf.mxu1  ;;  %s13706_s20 = scalar_lea.hbm %s13759_s12, %s8957_s16  ;;  %s10732_s15 = sshll.u32 %s10796_s25, 4  ;;  %s10733_s15 = int_to_ptr.vmem [resolvable:$false] %s10732_s15 }
 0x59a   : > { %v3986_v20 = vpack.c.bf16 %v3871_v37, %v3868_v30  ;;  %s10734_s30 = scalar_lea.vmem %s10733_s15, 32  ;;  %p10735_p0 = scmp.lt.s32.totalorder %s13708_s17, %s10733_s15 }
 0x59b   : > { %p10736_p1 = scmp.lt.s32.totalorder %s10734_s30, %s10728_s28 }
 0x59c   : > { %9815 = vmatprep.mubr.bf16.mxu1 %v3986_v20 }
 0x59d   : > { %9816 = vmatmul.mubr.bf16.gmra.mxu1 %v3987_v6  ;;  %p10737_p2 = por %p10736_p1, %p10735_p0 }
 0x59f   : > { %p10738_p3 = pnand %p10737_p2, %p10731_p13 }
 0x5a3   : > { %v9765_v29 = vpop.f32.mrf.mxu1  ;;  %v9741_v36 = vpop.f32.mrf.mxu0 }
 0x5a4   : > { %v4089_v4 = vadd.f32 %v9765_v29, %v12733_v61 }
 0x5a5   : > { %v4080_v1 = vpop.f32.mrf.mxu1  ;;  %v3929_v24 = vpop.f32.mrf.mxu0 }
 0x5a6   : > { %v4347_v35 = vrot.slane %v4089_v4, 4  ;;  %v4081_v34 = vadd.f32 %v12733_v61, %v4080_v1 }
 0x5a7   : > { %v9766_v38 = vpop.f32.mrf.mxu1  ;;  %v9742_v5 = vpop.f32.mrf.mxu0 }
 0x5a8   : > { %v4348_v54 = vadd.f32 %v4347_v35, %v4089_v4  ;;  %v4335_v59 = vrot.slane %v4081_v34, 4  ;;  %v4092_v49 = vadd.f32 %v9766_v38, %v12733_v61  ;;  %v3989_v0 = vpack.c.bf16 %v9742_v5, %v9741_v36 }
 0x5a9   : > { %v4083_v21 = vpop.f32.mrf.mxu1  ;;  %v3932_v22 = vpop.f32.mrf.mxu0 }
 0x5aa   : > { %v4084_v11 = vadd.f32 %v12733_v61, %v4083_v21  ;;  %v4336_v41 = vadd.f32 %v4335_v59, %v4081_v34  ;;  %v4353_v53 = vrot.slane %v4092_v49, 4  ;;  %v3988_v8 = vpack.c.bf16 %v3932_v22, %v3929_v24 }
 0x5ab   : > { %v9769_v31 = vpop.f32.mrf.mxu1  ;;  %v9745_v63 = vpop.f32.mrf.mxu0  ;;  %v4349_v28 = vrot.slane %v4348_v54, 2 }
 0x5ac   : > { %v4341_v50 = vrot.slane %v4084_v11, 4  ;;  %9819 = vmatprep.mubr.bf16.mxu1 %v3988_v8  ;;  %v4337_v7 = vrot.slane %v4336_v41, 2  ;;  %v4354_v47 = vadd.f32 %v4353_v53, %v4092_v49  ;;  %v4105_v16 = vadd.f32 %v9769_v31, %v12733_v61 }
 0x5ad   : > { %v4096_v42 = vpop.f32.mrf.mxu1  ;;  %v3945_v45 = vpop.f32.mrf.mxu0  ;;  %9820 = vmatmul.mubr.bf16.gmra.mxu1 %v3989_v0  ;;  %v4350_v10 = vadd.f32 %v4349_v28, %v4348_v54  ;;  %v12757_v54 = vrot.slane %v12752_v12, %v12747_v51 }
 0x5ae   : > { %v4342_v27 = vadd.f32 %v4341_v50, %v4084_v11  ;;  %v4097_v58 = vadd.f32 %v12733_v61, %v4096_v42  ;;  %v4338_v13 = vadd.f32 %v4337_v7, %v4336_v41  ;;  %v4355_v40 = vrot.slane %v4354_v47, 2 }
 0x5af   : > { %v9770_v9 = vpop.f32.mrf.mxu1  ;;  %v9746_v2 = vpop.f32.mrf.mxu0  ;;  %v4371_v18 = vrot.slane %v4105_v16, 4  ;;  %v4351_v3 = vrot.slane %v4350_v10, 1  ;;  %v4804_v28 = vcombine.high %v12757_v54, %v12757_v54 }
 0x5b0   : > { %v4343_v48 = vrot.slane %v4342_v27, 2  ;;  %v4359_v17 = vrot.slane %v4097_v58, 4  ;;  %v4108_v57 = vadd.f32 %v9770_v9, %v12733_v61  ;;  %v3991_v25 = vpack.c.bf16 %v9746_v2, %v9745_v63 }
 0x5b1   : > { %v4099_v62 = vpop.f32.mrf.mxu1  ;;  %v3948_v44 = vpop.f32.mrf.mxu0  ;;  %v4339_v37 = vrot.slane %v4338_v13, 1  ;;  %v4356_v20 = vadd.f32 %v4355_v40, %v4354_v47  ;;  %v4372_v6 = vadd.f32 %v4371_v18, %v4105_v16  ;;  %v4352_v35 = vadd.f32 %v4351_v3, %v4350_v10 }
 0x5b2   : > { %v4344_v43 = vadd.f32 %v4343_v48, %v4342_v27  ;;  %v4100_v32 = vadd.f32 %v12733_v61, %v4099_v62  ;;  %v3990_v26 = vpack.c.bf16 %v3948_v44, %v3945_v45  ;;  %v4360_v55 = vadd.f32 %v4359_v17, %v4097_v58 }
 0x5b3   : > { %v9773_v56 = vpop.f32.mrf.mxu1  ;;  %v4377_v38 = vrot.slane %v4108_v57, 4  ;;  %v4340_v11 = vadd.f32 %v4339_v37, %v4338_v13  ;;  %v4357_v41 = vrot.slane %v4356_v20, 1  ;;  %v4373_v8 = vrot.slane %v4372_v6, 2 }
 0x5b4   : > { %v4365_v39 = vrot.slane %v4100_v32, 4  ;;  %v4345_v14 = vrot.slane %v4344_v43, 1  ;;  %v4121_v60 = vadd.f32 %v9773_v56, %v12733_v61  ;;  %9823 = vmatprep.mubr.bf16.mxu1 %v3990_v26  ;;  %v4361_v34 = vrot.slane %v4360_v55, 2 }
 0x5b5   : > { %v4112_v33 = vpop.f32.mrf.mxu1  ;;  %9824 = vmatmul.mubr.bf16.gmra.mxu1 %v3991_v25  ;;  %v4721_v0 = vmul.f32 0.125, %v4352_v35  ;;  %v4378_v7 = vadd.f32 %v4377_v38, %v4108_v57  ;;  %v4719_v16 = vmul.f32 0.125, %v4340_v11  ;;  %v4358_v58 = vadd.f32 %v4357_v41, %v4356_v20 }
 0x5b6   : > { %v4113_v30 = vadd.f32 %v12733_v61, %v4112_v33  ;;  %v4366_v36 = vadd.f32 %v4365_v39, %v4100_v32  ;;  %v4395_v4 = vrot.slane %v4121_v60, 4  ;;  %v4346_v59 = vadd.f32 %v4345_v14, %v4344_v43 }
 0x5b7   : > { %v9774_v29 = vpop.f32.mrf.mxu1  ;;  %v4362_v27 = vadd.f32 %v4361_v34, %v4360_v55  ;;  %v4374_v48 = vadd.f32 %v4373_v8, %v4372_v6  ;;  %v4379_v56 = vrot.slane %v4378_v7, 2  ;;  %v4722_v33 = vmul.f32 0.125, %v4358_v58 }
 0x5b8   : > { %v4383_v1 = vrot.slane %v4113_v30, 4  ;;  %v4124_v24 = vadd.f32 %v9774_v29, %v12733_v61  ;;  %v4396_v49 = vadd.f32 %v4395_v4, %v4121_v60  ;;  %v4367_v31 = vrot.slane %v4366_v36, 2 }
 0x5b9   : > { %v4115_v5 = vpop.f32.mrf.mxu1  ;;  %v4720_v45 = vmul.f32 0.125, %v4346_v59  ;;  %v4363_v32 = vrot.slane %v4362_v27, 1  ;;  %v4375_v14 = vrot.slane %v4374_v48, 1  ;;  %v4380_v4 = vadd.f32 %v4379_v56, %v4378_v7 }
 0x5ba   : > { %v4384_v21 = vadd.f32 %v4383_v1, %v4113_v30  ;;  %v4401_v22 = vrot.slane %v4124_v24, 4  ;;  %v4397_v50 = vrot.slane %v4396_v49, 2  ;;  %v4116_v19 = vadd.f32 %v12733_v61, %v4115_v5 }
 0x5bb   : > { %v9777_v53 = vpop.f32.mrf.mxu1  ;;  %v4368_v23 = vadd.f32 %v4367_v31, %v4366_v36  ;;  %v4945_v18 = vsel %vm4944_vm3, %v4720_v45, %v4719_v16  ;;  %v4364_v35 = vadd.f32 %v4363_v32, %v4362_v27  ;;  %v4376_v31 = vadd.f32 %v4375_v14, %v4374_v48 }
 0x5bc   : > { %v4385_v63 = vrot.slane %v4384_v21, 2  ;;  %v4402_v15 = vadd.f32 %v4401_v22, %v4124_v24  ;;  %v4137_v47 = vadd.f32 %v9777_v53, %v12733_v61  ;;  %v4389_v2 = vrot.slane %v4116_v19, 4 }
 0x5bd   : > { %v4128_v42 = vpop.f32.mrf.mxu1  ;;  %v4398_v44 = vadd.f32 %v4397_v50, %v4396_v49  ;;  %v4369_v60 = vrot.slane %v4368_v23, 1  ;;  %v4947_v36 = vsel %vm4946_vm4, %v4721_v0, %v4945_v18  ;;  %v4725_v32 = vmul.f32 0.125, %v4376_v31 }
 0x5be   : > { %v4386_v9 = vadd.f32 %v4385_v63, %v4384_v21  ;;  %v4403_v17 = vrot.slane %v4402_v15, 2  ;;  %v4419_v62 = vrot.slane %v4137_v47, 4  ;;  %v4390_v43 = vadd.f32 %v4389_v2, %v4116_v19 }
 0x5bf   : > { %v9778_v10 = vpop.f32.mrf.mxu1  ;;  %v4129_v13 = vadd.f32 %v12733_v61, %v4128_v42  ;;  %v4399_v37 = vrot.slane %v4398_v44, 1  ;;  %v4370_v59 = vadd.f32 %v4369_v60, %v4368_v23  ;;  %v4381_v63 = vrot.slane %v4380_v4, 1 }
 0x5c0   : > { %v4140_v40 = vadd.f32 %v9778_v10, %v12733_v61  ;;  %v4420_v3 = vadd.f32 %v4419_v62, %v4137_v47  ;;  %v4387_v26 = vrot.slane %v4386_v9, 1  ;;  %v4391_v55 = vrot.slane %v4390_v43, 2 }
 0x5c1   : > { %v4407_v57 = vrot.slane %v4129_v13, 4  ;;  %v4131_v39 = vpop.f32.mrf.mxu1  ;;  %v4404_v30 = vadd.f32 %v4403_v17, %v4402_v15  ;;  %v4400_v11 = vadd.f32 %v4399_v37, %v4398_v44  ;;  %v4723_v15 = vmul.f32 0.125, %v4364_v35  ;;  %v13926_v37 = vld [vmem:[#allocation7_spill] sm:$0xff] }
 0x5c2   : > { %v4425_v25 = vrot.slane %v4140_v40, 4  ;;  %v4392_v20 = vadd.f32 %v4391_v55, %v4390_v43  ;;  %v4421_v6 = vrot.slane %v4420_v3, 2  ;;  %v4132_v24 = vadd.f32 %v12733_v61, %v4131_v39 }
 0x5c3   : > { %v4408_v29 = vadd.f32 %v4407_v57, %v4129_v13  ;;  %v4388_v34 = vadd.f32 %v4387_v26, %v4386_v9  ;;  %v4405_v49 = vrot.slane %v4404_v30, 1  ;;  %v4949_v27 = vsel %vm4948_vm5, %v4722_v33, %v4947_v36 }
 0x5c4   : > { %v4426_v1 = vadd.f32 %v4425_v25, %v4140_v40  ;;  %v4393_v38 = vrot.slane %v4392_v20, 1  ;;  %v4413_v22 = vrot.slane %v4132_v24, 4  ;;  %v4422_v53 = vadd.f32 %v4421_v6, %v4420_v3 }
 0x5c5   : > { %v4409_v5 = vrot.slane %v4408_v29, 2  ;;  %v4727_v19 = vmul.f32 0.125, %v4388_v34  ;;  %v4724_v7 = vmul.f32 0.125, %v4370_v59  ;;  %v4406_v47 = vadd.f32 %v4405_v49, %v4404_v30 }
 0x5c6   : > { %v4427_v21 = vrot.slane %v4426_v1, 2  ;;  %v4394_v41 = vadd.f32 %v4393_v38, %v4392_v20  ;;  %v4414_v0 = vadd.f32 %v4413_v22, %v4132_v24  ;;  %v4729_v58 = vmul.f32 0.125, %v4400_v11 }
 0x5c7   : > { %v4410_v8 = vadd.f32 %v4409_v5, %v4408_v29  ;;  %v4423_v2 = vrot.slane %v4422_v53, 1  ;;  %v4951_v48 = vsel %vm4950_vm6, %v4723_v15, %v4949_v27  ;;  %v12774_v44 = vrot.slane %v12757_v54, %v12747_v51 }
 0x5c8   : > { %v4428_v50 = vadd.f32 %v4427_v21, %v4426_v1  ;;  %v4728_v42 = vmul.f32 0.125, %v4394_v41  ;;  %v4415_v16 = vrot.slane %v4414_v0, 2  ;;  %v4382_v43 = vadd.f32 %v4381_v63, %v4380_v4 }
 0x5c9   : > { %v4411_v45 = vrot.slane %v4410_v8, 1  ;;  %v4953_v13 = vsel %vm4952_vm7, %v4724_v7, %v4951_v48  ;;  %v4730_v40 = vmul.f32 0.125, %v4406_v47  ;;  %v4424_v56 = vadd.f32 %v4423_v2, %v4422_v53 }
 0x5ca   : > { %v4958_v9 = vsel %vm4944_vm3, %v4728_v42, %v4727_v19  ;;  %v4429_v23 = vrot.slane %v4428_v50, 1  ;;  %v4416_v17 = vadd.f32 %v4415_v16, %v4414_v0  ;;  %v12781_v26 = vrot.slane %v4804_v28, %v12747_v51 }
 0x5cb   : > { %v4412_v10 = vadd.f32 %v4411_v45, %v4410_v8  ;;  %v4959_v62 = vsel %vm4946_vm4, %v4729_v58, %v4958_v9  ;;  %v4955_v39 = vsel %vm4954_vm8, %v4725_v32, %v4953_v13  ;;  %v4726_v33 = vmul.f32 0.125, %v4382_v43 }
 0x5cc   : > { %v4417_v18 = vrot.slane %v4416_v17, 1  ;;  %v4960_v55 = vsel %vm4948_vm5, %v4730_v40, %v4959_v62  ;;  %v4430_v57 = vadd.f32 %v4429_v23, %v4428_v50  ;;  %v4733_v60 = vmul.f32 0.125, %v4424_v56 }
 0x5cd   : > { %v4731_v3 = vmul.f32 0.125, %v4412_v10  ;;  %v4843_v20 = vrot.slane %v12774_v44, %v13926_v37  ;;  %v4847_v54 = vrot.slane %v12781_v26, %v13926_v37  ;;  %v12791_v28 = vsel %vm4956_vm9, %v4726_v33, %v4955_v39 }
 0x5ce   : > { %v4418_v25 = vadd.f32 %v4417_v18, %v4416_v17  ;;  %v4734_v6 = vmul.f32 0.125, %v4430_v57 }
 0x5cf   : > { %v4961_v30 = vsel %vm4950_vm6, %v4731_v3, %v4960_v55  ;;  %v5015_v1 = vsel %vm4787_vm10, %v4843_v20, %v12791_v28 }
 0x5d0   : > { %v4732_v14 = vmul.f32 0.125, %v4418_v25 }
 0x5d2   : > { %v4962_v29 = vsel %vm4952_vm7, %v4732_v14, %v4961_v30 }
 0x5d3   : > { %v4963_v36 = vsel %vm4954_vm8, %v4733_v60, %v4962_v29 }
 0x5d4   : > { %v12797_v4 = vsel %vm4956_vm9, %v4734_v6, %v4963_v36 }
 0x5d5   : > { %v5016_v24 = vsel %vm4787_vm10, %v4847_v54, %v12797_v4 }
 0x5d6   : > { %v12805_v34 = vpack.c.bf16 %v5016_v24, %v5015_v1 }
 0x5d8   : > { %5258 = vmatmul.mubr.bf16.vlgmr.msra.gmra.mxu0 %v12805_v34 }
 0x5d9   : > { %5267 = vmatprep.mubr.bf16.mxu0 %v13924_v52 }
 0x5da   : > { %v9781_v35 = vpop.f32.mrf.mxu1 }
 0x5db   : > { %v4153_v38 = vadd.f32 %v9781_v35, %v12733_v61 }
 0x5dc   : > { %v4144_v5 = vpop.f32.mrf.mxu1 }
 0x5dd   : > { %v4443_v59 = vrot.slane %v4153_v38, 4  ;;  %v4145_v49 = vadd.f32 %v12733_v61, %v4144_v5 }
 0x5de   : > { %v9782_v21 = vpop.f32.mrf.mxu1 }
 0x5df   : > { %v4431_v22 = vrot.slane %v4145_v49, 4  ;;  %v4156_v11 = vadd.f32 %v9782_v21, %v12733_v61  ;;  %v4444_v41 = vadd.f32 %v4443_v59, %v4153_v38 }
 0x5e0   : > { %v4147_v53 = vpop.f32.mrf.mxu1 }
 0x5e1   : > { %v4432_v8 = vadd.f32 %v4431_v22, %v4145_v49  ;;  %v4449_v31 = vrot.slane %v4156_v11, 4  ;;  %v4148_v63 = vadd.f32 %v12733_v61, %v4147_v53  ;;  %v4445_v19 = vrot.slane %v4444_v41, 2 }
 0x5e2   : > { %v9785_v50 = vpop.f32.mrf.mxu1 }
 0x5e3   : > { %v4450_v0 = vadd.f32 %v4449_v31, %v4156_v11  ;;  %v4437_v15 = vrot.slane %v4148_v63, 4  ;;  %v4169_v42 = vadd.f32 %v9785_v50, %v12733_v61  ;;  %v4433_v27 = vrot.slane %v4432_v8, 2 }
 0x5e4   : > { %v4160_v45 = vpop.f32.mrf.mxu1  ;;  %v4446_v10 = vadd.f32 %v4445_v19, %v4444_v41 }
 0x5e5   : > { %v4438_v7 = vadd.f32 %v4437_v15, %v4148_v63  ;;  %v4451_v47 = vrot.slane %v4450_v0, 2  ;;  %v4467_v16 = vrot.slane %v4169_v42, 4  ;;  %v4161_v58 = vadd.f32 %v12733_v61, %v4160_v45 }
 0x5e6   : > { %v9786_v9 = vpop.f32.mrf.mxu1  ;;  %v4434_v48 = vadd.f32 %v4433_v27, %v4432_v8  ;;  %v4447_v55 = vrot.slane %v4446_v10, 1 }
 0x5e7   : > { %v4439_v2 = vrot.slane %v4438_v7, 2  ;;  %v4455_v23 = vrot.slane %v4161_v58, 4  ;;  %v4452_v43 = vadd.f32 %v4451_v47, %v4450_v0  ;;  %v4468_v13 = vadd.f32 %v4467_v16, %v4169_v42 }
 0x5e8   : > { %v4163_v17 = vpop.f32.mrf.mxu1  ;;  %v4172_v40 = vadd.f32 %v9786_v9, %v12733_v61  ;;  %v4435_v33 = vrot.slane %v4434_v48, 1  ;;  %v4448_v38 = vadd.f32 %v4447_v55, %v4446_v10 }
 0x5e9   : > { %v4440_v62 = vadd.f32 %v4439_v2, %v4438_v7  ;;  %v4164_v18 = vadd.f32 %v12733_v61, %v4163_v17  ;;  %v4456_v56 = vadd.f32 %v4455_v23, %v4161_v58  ;;  %v4453_v30 = vrot.slane %v4452_v43, 1 }
 0x5ea   : > { %v9789_v32 = vpop.f32.mrf.mxu1  ;;  %v4469_v20 = vrot.slane %v4468_v13, 2  ;;  %v4473_v54 = vrot.slane %v4172_v40, 4  ;;  %v4436_v49 = vadd.f32 %v4435_v33, %v4434_v48  ;;  %v4737_v15 = vmul.f32 0.125, %v4448_v38 }
 0x5eb   : > { %v4185_v3 = vadd.f32 %v9789_v32, %v12733_v61  ;;  %v4441_v57 = vrot.slane %v4440_v62, 1  ;;  %v4461_v25 = vrot.slane %v4164_v18, 4  ;;  %v4457_v36 = vrot.slane %v4456_v56, 2 }
 0x5ec   : > { %v4176_v39 = vpop.f32.mrf.mxu1  ;;  %v4454_v41 = vadd.f32 %v4453_v30, %v4452_v43  ;;  %v4474_v53 = vadd.f32 %v4473_v54, %v4172_v40  ;;  %v4470_v31 = vadd.f32 %v4469_v20, %v4468_v13  ;;  %v4735_v7 = vmul.f32 0.125, %v4436_v49 }
 0x5ed   : > { %v4491_v14 = vrot.slane %v4185_v3, 4  ;;  %v4177_v60 = vadd.f32 %v12733_v61, %v4176_v39  ;;  %v4462_v6 = vadd.f32 %v4461_v25, %v4164_v18  ;;  %v4442_v5 = vadd.f32 %v4441_v57, %v4440_v62 }
 0x5ee   : > { %v9790_v29 = vpop.f32.mrf.mxu1  ;;  %v4458_v63 = vadd.f32 %v4457_v36, %v4456_v56  ;;  %v4738_v9 = vmul.f32 0.125, %v4454_v41  ;;  %v4475_v2 = vrot.slane %v4474_v53, 2  ;;  %v4471_v48 = vrot.slane %v4470_v31, 1 }
 0x5ef   : > { %v4492_v1 = vadd.f32 %v4491_v14, %v4185_v3  ;;  %v4479_v24 = vrot.slane %v4177_v60, 4  ;;  %v4188_v35 = vadd.f32 %v9790_v29, %v12733_v61  ;;  %v4463_v21 = vrot.slane %v4462_v6, 2 }
 0x5f0   : > { %v4179_v59 = vpop.f32.mrf.mxu1  ;;  %v4736_v19 = vmul.f32 0.125, %v4442_v5  ;;  %v4459_v62 = vrot.slane %v4458_v63, 1  ;;  %v4476_v33 = vadd.f32 %v4475_v2, %v4474_v53  ;;  %v10298_v53 = vld [vmem:[%s13753_s6 + $0x170] ss:$12 sps:$4 sm:$0xff]  }
 0x5f1   : > { %v4480_v22 = vadd.f32 %v4479_v24, %v4177_v60  ;;  %v4497_v11 = vrot.slane %v4188_v35, 4  ;;  %v4493_v50 = vrot.slane %v4492_v1, 2  ;;  %v4180_v45 = vadd.f32 %v12733_v61, %v4179_v59  ;;  %9827 = vmatprep.subr.bf16.mxu0 %v10298_v53 }
 0x5f2   : > { %v9793_v8 = vpop.f32.mrf.mxu1  ;;  %v4464_v47 = vadd.f32 %v4463_v21, %v4462_v6  ;;  %v4965_v40 = vsel %vm4944_vm3, %v4736_v19, %v4735_v7  ;;  %v4460_v36 = vadd.f32 %v4459_v62, %v4458_v63  ;;  %9828 = vmatpush3.bf16.msra.mxu0 %v10298_v53 }
 0x5f3   : > { %v4481_v0 = vrot.slane %v4480_v22, 2  ;;  %v4498_v42 = vadd.f32 %v4497_v11, %v4188_v35  ;;  %v4201_v58 = vadd.f32 %v9793_v8, %v12733_v61  ;;  %v4485_v23 = vrot.slane %v4180_v45, 4 }
 0x5f4   : > { %v4192_v27 = vpop.f32.mrf.mxu1  ;;  %v4494_v43 = vadd.f32 %v4493_v50, %v4492_v1  ;;  %v4465_v55 = vrot.slane %v4464_v47, 1  ;;  %v4966_v20 = vsel %vm4946_vm4, %v4737_v15, %v4965_v40  ;;  %v4472_v8 = vadd.f32 %v4471_v48, %v4470_v31  ;;  %v10299_v31 = vld [vmem:[%s13753_s6 + $0x158] ss:$12 sps:$4 sm:$0xff]  }
 0x5f5   : > { %v4482_v16 = vadd.f32 %v4481_v0, %v4480_v22  ;;  %v4499_v10 = vrot.slane %v4498_v42, 2  ;;  %v4515_v13 = vrot.slane %v4201_v58, 4  ;;  %v4486_v18 = vadd.f32 %v4485_v23, %v4180_v45  ;;  %9829 = vmatprep.subr.bf16.mxu0 %v10299_v31 }
 0x5f6   : > { %v9794_v17 = vpop.f32.mrf.mxu1  ;;  %v4193_v32 = vadd.f32 %v12733_v61, %v4192_v27  ;;  %v4495_v54 = vrot.slane %v4494_v43, 1  ;;  %v4466_v38 = vadd.f32 %v4465_v55, %v4464_v47  ;;  %v4477_v50 = vrot.slane %v4476_v33, 1  ;;  %9830 = vmatpush3.bf16.msra.mxu0 %v10299_v31 }
 0x5f7   : > { %v4204_v56 = vadd.f32 %v9794_v17, %v12733_v61  ;;  %v4483_v57 = vrot.slane %v4482_v16, 1  ;;  %v4500_v25 = vadd.f32 %v4499_v10, %v4498_v42  ;;  %v4516_v39 = vadd.f32 %v4515_v13, %v4201_v58 }
 0x5f8   : > { %v4195_v3 = vpop.f32.mrf.mxu1  ;;  %v4487_v14 = vrot.slane %v4486_v18, 2  ;;  %v4503_v60 = vrot.slane %v4193_v32, 4  ;;  %v4496_v0 = vadd.f32 %v4495_v54, %v4494_v43  ;;  %v4739_v63 = vmul.f32 0.125, %v4460_v36 }
 0x5f9   : > { %v4521_v30 = vrot.slane %v4204_v56, 4  ;;  %v4517_v6 = vrot.slane %v4516_v39, 2  ;;  %v4196_v29 = vadd.f32 %v12733_v61, %v4195_v3  ;;  %v4484_v5 = vadd.f32 %v4483_v57, %v4482_v16 }
 0x5fa   : > { %v4488_v1 = vadd.f32 %v4487_v14, %v4486_v18  ;;  %v4504_v24 = vadd.f32 %v4503_v60, %v4193_v32  ;;  %v4501_v59 = vrot.slane %v4500_v25, 1  ;;  %v4967_v27 = vsel %vm4948_vm5, %v4738_v9, %v4966_v20 }
 0x5fb   : > { %v4522_v35 = vadd.f32 %v4521_v30, %v4204_v56  ;;  %v4509_v49 = vrot.slane %v4196_v29, 4  ;;  %v4518_v22 = vadd.f32 %v4517_v6, %v4516_v39  ;;  %v4740_v7 = vmul.f32 0.125, %v4466_v38 }
 0x5fc   : > { %v4489_v21 = vrot.slane %v4488_v1, 1  ;;  %v4505_v11 = vrot.slane %v4504_v24, 2  ;;  %v4502_v47 = vadd.f32 %v4501_v59, %v4500_v25  ;;  %v4743_v58 = vmul.f32 0.125, %v4484_v5 }
 0x5fd   : > { %v4523_v41 = vrot.slane %v4522_v35, 2  ;;  %v4510_v15 = vadd.f32 %v4509_v49, %v4196_v29  ;;  %v4519_v10 = vrot.slane %v4518_v22, 1  ;;  %v4745_v17 = vmul.f32 0.125, %v4496_v0  ;;  %v10304_v0 = vld [vmem:[%s13753_s6 + $0xe0] ss:$12 sps:$4 sm:$0xff]  }
 0x5fe   : > { %v4490_v19 = vadd.f32 %v4489_v21, %v4488_v1  ;;  %v4506_v42 = vadd.f32 %v4505_v11, %v4504_v24  ;;  %v4834_v43 = vcombine.high %v12774_v44, %v12774_v44  ;;  %v4968_v9 = vsel %vm4950_vm6, %v4739_v63, %v4967_v27  ;;  %v10301_v24 = vld [vmem:[%s13753_s6 + $0x128] ss:$12 sps:$4 sm:$0xff]   ;;  %v10302_v11 = vld [vmem:[%s13753_s6 + $0x110] ss:$12 sps:$4 sm:$0xff]  }
 0x5ff   : > { %v4524_v45 = vadd.f32 %v4523_v41, %v4522_v35  ;;  %v4511_v16 = vrot.slane %v4510_v15, 2  ;;  %v4478_v13 = vadd.f32 %v4477_v50, %v4476_v33  ;;  %v4969_v32 = vsel %vm4952_vm7, %v4740_v7, %v4968_v9  ;;  %v10300_v33 = vld [vmem:[%s13753_s6 + $0x140] ss:$12 sps:$4 sm:$0xff]   ;;  %v10305_v63 = vld [vmem:[%s13753_s6 + $0xc8] ss:$12 sps:$4 sm:$0xff]  }
 0x600   : > { %v4744_v2 = vmul.f32 0.125, %v4490_v19  ;;  %v4507_v23 = vrot.slane %v4506_v42, 1  ;;  %v4746_v56 = vmul.f32 0.125, %v4502_v47  ;;  %v4741_v57 = vmul.f32 0.125, %v4472_v8  ;;  %9831 = vmatprep.subr.bf16.mxu0 %v10300_v33  ;;  %v10303_v8 = vld [vmem:[%s13753_s6 + $0xf8] ss:$12 sps:$4 sm:$0xff]  }
 0x601   : > { %v4525_v48 = vrot.slane %v4524_v45, 1  ;;  %v4512_v62 = vadd.f32 %v4511_v16, %v4510_v15  ;;  %v4520_v25 = vadd.f32 %v4519_v10, %v4518_v22  ;;  %v4836_v44 = vcombine.high %v12781_v26, %v12781_v26  ;;  %9832 = vmatpush3.bf16.msra.mxu0 %v10300_v33 }
 0x602   : > { %v4972_v40 = vsel %vm4944_vm3, %v4744_v2, %v4743_v58  ;;  %v4508_v18 = vadd.f32 %v4507_v23, %v4506_v42  ;;  %v4970_v20 = vsel %vm4954_vm8, %v4741_v57, %v4969_v32  ;;  %v4742_v54 = vmul.f32 0.125, %v4478_v13  ;;  %9833 = vmatprep.subr.bf16.mxu0 %v10301_v24 }
 0x603   : > { %v4973_v3 = vsel %vm4946_vm4, %v4745_v17, %v4972_v40  ;;  %v4513_v55 = vrot.slane %v4512_v62, 1  ;;  %v4526_v60 = vadd.f32 %v4525_v48, %v4524_v45  ;;  %v4749_v29 = vmul.f32 0.125, %v4520_v25 }
 0x604   : > { %v4747_v39 = vmul.f32 0.125, %v4508_v18  ;;  %v4974_v14 = vsel %vm4948_vm5, %v4746_v56, %v4973_v3  ;;  %v4851_v1 = vrot.slane %v4834_v43, %v13926_v37  ;;  %v4855_v26 = vrot.slane %v4836_v44, %v13926_v37 }
 0x605   : > { %v4514_v30 = vadd.f32 %v4513_v55, %v4512_v62  ;;  %v4750_v35 = vmul.f32 0.125, %v4526_v60  ;;  %v12855_v5 = vsel %vm4956_vm9, %v4742_v54, %v4970_v20  ;;  %9834 = vmatpush3.bf16.msra.mxu0 %v10301_v24  ;;  %v10792_v7 = vmov 0.0  }
 0x606   : > { %v4975_v36 = vsel %vm4950_vm6, %v4747_v39, %v4974_v14  ;;  %v5017_v21 = vsel %vm4787_vm10, %v4851_v1, %v12855_v5  ;;  %9835 = vmatprep.subr.bf16.mxu0 %v10302_v11  ;;  %9923 = vmatprep.subr.bf16.mxu1 %v10792_v7 }
 0x607   : > { %v4748_v6 = vmul.f32 0.125, %v4514_v30  ;;  %v9797_v41 = vpop.f32.mrf.mxu1  ;;  %9925 = vmatprep.mubr.msk.bf16.mxu1 %vm10793_vm11, %v10792_v7 }
 0x608   : > { %v4217_v45 = vadd.f32 %v9797_v41, %v12733_v61 }
 0x609   : > { %v4976_v38 = vsel %vm4952_vm7, %v4748_v6, %v4975_v36  ;;  %9836 = vmatpush3.bf16.msra.mxu0 %v10302_v11  ;;  %v4208_v50 = vpop.f32.mrf.mxu1 }
 0x60a   : > { %v4977_v59 = vsel %vm4954_vm8, %v4749_v29, %v4976_v38  ;;  %9837 = vmatprep.subr.bf16.mxu0 %v10303_v8  ;;  %v4209_v47 = vadd.f32 %v12733_v61, %v4208_v50  ;;  %v4539_v58 = vrot.slane %v4217_v45, 4 }
 0x60b   : > { %v12859_v49 = vsel %vm4956_vm9, %v4750_v35, %v4977_v59  ;;  %v9798_v15 = vpop.f32.mrf.mxu1 }
 0x60c   : > { %v5018_v22 = vsel %vm4787_vm10, %v4855_v26, %v12859_v49  ;;  %v4220_v2 = vadd.f32 %v9798_v15, %v12733_v61  ;;  %v4527_v23 = vrot.slane %v4209_v47, 4  ;;  %v4540_v17 = vadd.f32 %v4539_v58, %v4217_v45 }
 0x60d   : > { %v12870_v53 = vpack.c.bf16 %v5018_v22, %v5017_v21  ;;  %9838 = vmatpush3.bf16.msra.mxu0 %v10303_v8  ;;  %v4211_v19 = vpop.f32.mrf.mxu1 }
 0x60e   : > { %9839 = vmatprep.subr.bf16.mxu0 %v10304_v0  ;;  %v4212_v16 = vadd.f32 %v12733_v61, %v4211_v19  ;;  %v4545_v48 = vrot.slane %v4220_v2, 4  ;;  %v4528_v43 = vadd.f32 %v4527_v23, %v4209_v47  ;;  %v4541_v18 = vrot.slane %v4540_v17, 2 }
 0x60f   : > { %5268 = vmatmul.mubr.bf16.gmra.mxu0 %v12870_v53  ;;  %v9801_v42 = vpop.f32.mrf.mxu1 }
 0x610   : > { %5277 = vmatprep.mubr.bf16.mxu0 %v13924_v52  ;;  %v4533_v31 = vrot.slane %v4212_v16, 4  ;;  %v4546_v32 = vadd.f32 %v4545_v48, %v4220_v2  ;;  %v4529_v55 = vrot.slane %v4528_v43, 2  ;;  %v4542_v33 = vadd.f32 %v4541_v18, %v4540_v17 }
 0x611   : > { %9840 = vmatpush3.bf16.msra.mxu0 %v10304_v0  ;;  %v4224_v27 = vpop.f32.mrf.mxu1  ;;  %v4233_v30 = vadd.f32 %v9801_v42, %v12733_v61 }
 0x612   : > { %9841 = vmatprep.subr.bf16.mxu0 %v10305_v63  ;;  %v4534_v9 = vadd.f32 %v4533_v31, %v4212_v16  ;;  %v4225_v13 = vadd.f32 %v12733_v61, %v4224_v27  ;;  %v4547_v60 = vrot.slane %v4546_v32, 2  ;;  %v4530_v29 = vadd.f32 %v4529_v55, %v4528_v43 }
 0x613   : > { %v9802_v10 = vpop.f32.mrf.mxu1  ;;  %v4543_v38 = vrot.slane %v4542_v33, 1  ;;  %v4563_v11 = vrot.slane %v4233_v30, 4 }
 0x614   : > { %v4535_v25 = vrot.slane %v4534_v9, 2  ;;  %v4551_v39 = vrot.slane %v4225_v13, 4  ;;  %v4236_v36 = vadd.f32 %v9802_v10, %v12733_v61  ;;  %v4548_v22 = vadd.f32 %v4547_v60, %v4546_v32 }
 0x615   : > { %9842 = vmatpush3.bf16.msra.mxu0 %v10305_v63  ;;  %v4227_v62 = vpop.f32.mrf.mxu1  ;;  %v4531_v50 = vrot.slane %v4530_v29, 1  ;;  %v4789_v63 = vcombine.high %v12752_v12, %v12752_v12  ;;  %v4544_v27 = vadd.f32 %v4543_v38, %v4542_v33  ;;  %v4564_v2 = vadd.f32 %v4563_v11, %v4233_v30 }
 0x616   : > { %9851 = vmatprep.subr.bf16.mxu0 %v10792_v7  ;;  %v4228_v56 = vadd.f32 %v12733_v61, %v4227_v62  ;;  %v4536_v26 = vadd.f32 %v4535_v25, %v4534_v9  ;;  %v4552_v24 = vadd.f32 %v4551_v39, %v4225_v13  ;;  %v4569_v0 = vrot.slane %v4236_v36, 4 }
 0x617   : > { %v4549_v58 = vrot.slane %v4548_v22, 1  ;;  %v4532_v31 = vadd.f32 %v4531_v50, %v4530_v29  ;;  %v12902_v48 = vrot.slane %v4789_v63, %v12747_v51  ;;  %v4565_v55 = vrot.slane %v4564_v2, 2 }
 0x618   : > { %v4557_v20 = vrot.slane %v4228_v56, 4  ;;  %v4537_v19 = vrot.slane %v4536_v26, 1  ;;  %v4553_v42 = vrot.slane %v4552_v24, 2  ;;  %v4570_v17 = vadd.f32 %v4569_v0, %v4236_v36 }
 0x619   : > { %v4566_v38 = vadd.f32 %v4565_v55, %v4564_v2 }
 0x61a   : > { %v4558_v41 = vadd.f32 %v4557_v20, %v4228_v56  ;;  %v4538_v62 = vadd.f32 %v4537_v19, %v4536_v26  ;;  %v4554_v43 = vadd.f32 %v4553_v42, %v4552_v24  ;;  %v4805_v56 = vcombine.high %v12902_v48, %v12902_v48 }
 0x61b   : > { %v4571_v33 = vrot.slane %v4570_v17, 2 }
 0x61c   : > { %v4559_v10 = vrot.slane %v4558_v41, 2  ;;  %v4752_v30 = vmul.f32 0.125, %v4538_v62  ;;  %v4555_v20 = vrot.slane %v4554_v43, 1 }
 0x61d   : > { %v4572_v11 = vadd.f32 %v4571_v33, %v4570_v17 }
 0x61e   : > { %v4556_v42 = vadd.f32 %v4555_v20, %v4554_v43 }
 0x62c   : > { %v9805_v40 = vpop.f32.mrf.mxu1 }
 0x62d   : > { %v4249_v14 = vadd.f32 %v9805_v40, %v12733_v61  ;;  %v4753_v40 = vmul.f32 0.125, %v4544_v27 }
 0x62e   : > { %v4240_v3 = vpop.f32.mrf.mxu1 }
 0x62f   : > { %v4241_v57 = vadd.f32 %v12733_v61, %v4240_v3  ;;  %v4587_v59 = vrot.slane %v4249_v14, 4  ;;  %v4550_v3 = vadd.f32 %v4549_v58, %v4548_v22 }
 0x630   : > { %v9806_v44 = vpop.f32.mrf.mxu1 }
 0x631   : > { %v4575_v54 = vrot.slane %v4241_v57, 4  ;;  %v4252_v35 = vadd.f32 %v9806_v44, %v12733_v61  ;;  %v4588_v47 = vadd.f32 %v4587_v59, %v4249_v14  ;;  %v4751_v44 = vmul.f32 0.125, %v4532_v31 }
 0x632   : > { %v4243_v6 = vpop.f32.mrf.mxu1 }
 0x633   : > { %v4244_v1 = vadd.f32 %v12733_v61, %v4243_v6  ;;  %v4576_v8 = vadd.f32 %v4575_v54, %v4241_v57  ;;  %v4593_v45 = vrot.slane %v4252_v35, 4  ;;  %v4589_v18 = vrot.slane %v4588_v47, 2 }
 0x634   : > { %v4560_v57 = vadd.f32 %v4559_v10, %v4558_v41  ;;  %v4979_v0 = vsel %vm4944_vm3, %v4752_v30, %v4751_v44 }
 0x635   : > { %v4581_v21 = vrot.slane %v4244_v1, 4  ;;  %v4577_v23 = vrot.slane %v4576_v8, 2  ;;  %v4594_v9 = vadd.f32 %v4593_v45, %v4252_v35  ;;  %v4590_v36 = vadd.f32 %v4589_v18, %v4588_v47 }
 0x636   : > { %v4754_v35 = vmul.f32 0.125, %v4550_v3  ;;  %v4561_v59 = vrot.slane %v4560_v57, 1 }
 0x637   : > { %v4582_v15 = vadd.f32 %v4581_v21, %v4244_v1  ;;  %v4578_v25 = vadd.f32 %v4577_v23, %v4576_v8  ;;  %v4595_v54 = vrot.slane %v4594_v9, 2  ;;  %v4591_v45 = vrot.slane %v4590_v36, 1 }
 0x638   : > { %v4562_v58 = vadd.f32 %v4561_v59, %v4560_v57  ;;  %v4980_v23 = vsel %vm4946_vm4, %v4753_v40, %v4979_v0 }
 0x639   : > { %v4583_v16 = vrot.slane %v4582_v15, 2  ;;  %v4579_v21 = vrot.slane %v4578_v25, 1  ;;  %v4592_v3 = vadd.f32 %v4591_v45, %v4590_v36  ;;  %v4981_v55 = vsel %vm4948_vm5, %v4754_v35, %v4980_v23 }
 0x63a   : > { %v12917_v36 = vrot.slane %v12902_v48, %v12747_v51  ;;  %v12924_v35 = vrot.slane %v4805_v56, %v12747_v51 }
 0x63b   : > { %v4584_v13 = vadd.f32 %v4583_v16, %v4582_v15  ;;  %v4596_v15 = vadd.f32 %v4595_v54, %v4594_v9  ;;  %v4567_v16 = vrot.slane %v4566_v38, 1  ;;  %v4580_v2 = vadd.f32 %v4579_v21, %v4578_v25 }
 0x63c   : > { %v9809_v12 = vpop.f32.mrf.mxu1  ;;  %v4859_v51 = vrot.slane %v12917_v36, %v13926_v37  ;;  %v4863_v56 = vrot.slane %v12924_v35, %v13926_v37 }
 0x63d   : > { %v4265_v32 = vadd.f32 %v9809_v12, %v12733_v61  ;;  %v4585_v6 = vrot.slane %v4584_v13, 1  ;;  %v4573_v12 = vrot.slane %v4572_v11, 1  ;;  %v4597_v18 = vrot.slane %v4596_v15, 1 }
 0x63e   : > { %v4256_v39 = vpop.f32.mrf.mxu1  ;;  %v4759_v44 = vmul.f32 0.125, %v4580_v2  ;;  %v4568_v25 = vadd.f32 %v4567_v16, %v4566_v38 }
 0x63f   : > { %v4611_v14 = vrot.slane %v4265_v32, 4  ;;  %v4257_v60 = vadd.f32 %v12733_v61, %v4256_v39  ;;  %v4586_v63 = vadd.f32 %v4585_v6, %v4584_v13  ;;  %v4755_v13 = vmul.f32 0.125, %v4556_v42 }
 0x640   : > { %v9810_v29 = vpop.f32.mrf.mxu1  ;;  %v4756_v39 = vmul.f32 0.125, %v4562_v58  ;;  %v4598_v40 = vadd.f32 %v4597_v18, %v4596_v15  ;;  %v4761_v6 = vmul.f32 0.125, %v4592_v3  ;;  %v4757_v38 = vmul.f32 0.125, %v4568_v25 }
 0x641   : > { %v4612_v1 = vadd.f32 %v4611_v14, %v4265_v32  ;;  %v4599_v26 = vrot.slane %v4257_v60, 4  ;;  %v4268_v24 = vadd.f32 %v9810_v29, %v12733_v61  ;;  %v4760_v32 = vmul.f32 0.125, %v4586_v63 }
 0x642   : > { %v4259_v22 = vpop.f32.mrf.mxu1  ;;  %v4982_v54 = vsel %vm4950_vm6, %v4755_v13, %v4981_v55 }
 0x643   : > { %v4613_v41 = vrot.slane %v4612_v1, 2  ;;  %v4600_v8 = vadd.f32 %v4599_v26, %v4257_v60  ;;  %v4617_v50 = vrot.slane %v4268_v24, 4  ;;  %v4260_v19 = vadd.f32 %v12733_v61, %v4259_v22 }
 0x644   : > { %v4986_v60 = vsel %vm4944_vm3, %v4760_v32, %v4759_v44  ;;  %v4983_v26 = vsel %vm4952_vm7, %v4756_v39, %v4982_v54 }
 0x645   : > { %v4601_v27 = vrot.slane %v4600_v8, 2  ;;  %v4618_v47 = vadd.f32 %v4617_v50, %v4268_v24  ;;  %v4605_v10 = vrot.slane %v4260_v19, 4  ;;  %v4614_v31 = vadd.f32 %v4613_v41, %v4612_v1 }
 0x646   : > { %v4574_v1 = vadd.f32 %v4573_v12, %v4572_v11  ;;  %v4987_v59 = vsel %vm4946_vm4, %v4761_v6, %v4986_v60  ;;  %v4762_v41 = vmul.f32 0.125, %v4598_v40  ;;  %v4984_v11 = vsel %vm4954_vm8, %v4757_v38, %v4983_v26 }
 0x647   : > { %v4602_v17 = vadd.f32 %v4601_v27, %v4600_v8  ;;  %v4619_v62 = vrot.slane %v4618_v47, 2  ;;  %v4606_v9 = vadd.f32 %v4605_v10, %v4260_v19  ;;  %v4615_v33 = vrot.slane %v4614_v31, 1 }
 0x648   : > { %v4758_v15 = vmul.f32 0.125, %v4574_v1  ;;  %v4988_v63 = vsel %vm4948_vm5, %v4762_v41, %v4987_v59 }
 0x649   : > { %v4603_v61 = vrot.slane %v4602_v17, 1  ;;  %v4620_v43 = vadd.f32 %v4619_v62, %v4618_v47  ;;  %v4607_v57 = vrot.slane %v4606_v9, 2  ;;  %v4616_v21 = vadd.f32 %v4615_v33, %v4614_v31  ;;  %v12953_v62 = vld [vmem:[%s13756_s9] ss:$0 sm:$0xff] }
 0x64a   : > { %v12936_v47 = vsel %vm4956_vm9, %v4758_v15, %v4984_v11 }
 0x64b   : > { %v4604_v14 = vadd.f32 %v4603_v61, %v4602_v17  ;;  %v4621_v30 = vrot.slane %v4620_v43, 1  ;;  %v4608_v20 = vadd.f32 %v4607_v57, %v4606_v9  ;;  %v4765_v42 = vmul.f32 0.125, %v4616_v21 }
 0x64c   : > { %v5019_v10 = vsel %vm4787_vm10, %v4859_v51, %v12936_v47 }
 0x64d   : > { %v9813_v29 = vpop.f32.mrf.mxu1  ;;  %v4609_v24 = vrot.slane %v4608_v20, 1  ;;  %v4763_v22 = vmul.f32 0.125, %v4604_v14  ;;  %v4622_v8 = vadd.f32 %v4621_v30, %v4620_v43 }
 0x64e   : > { %v4281_v12 = vadd.f32 %v12953_v62, %v9813_v29 }
 0x64f   : > { %v4610_v50 = vadd.f32 %v4609_v24, %v4608_v20  ;;  %v4272_v0 = vpop.f32.mrf.mxu1  ;;  %v4989_v48 = vsel %vm4950_vm6, %v4763_v22, %v4988_v63  ;;  %v4766_v45 = vmul.f32 0.125, %v4622_v8 }
 0x650   : > { %v4273_v18 = vadd.f32 %v12953_v62, %v4272_v0  ;;  %v4635_v13 = vrot.slane %v4281_v12, 4 }
 0x651   : > { %v4764_v19 = vmul.f32 0.125, %v4610_v50  ;;  %v9814_v16 = vpop.f32.mrf.mxu1 }
 0x652   : > { %v4284_v3 = vadd.f32 %v12953_v62, %v9814_v16  ;;  %v4623_v43 = vrot.slane %v4273_v18, 4  ;;  %v4636_v39 = vadd.f32 %v4635_v13, %v4281_v12 }
 0x653   : > { %v4990_v27 = vsel %vm4952_vm7, %v4764_v19, %v4989_v48  ;;  %v4275_v17 = vpop.f32.mrf.mxu1 }
 0x654   : > { %v4991_v58 = vsel %vm4954_vm8, %v4765_v42, %v4990_v27  ;;  %v4276_v32 = vadd.f32 %v12953_v62, %v4275_v17  ;;  %v4641_v44 = vrot.slane %v4284_v3, 4  ;;  %v4624_v25 = vadd.f32 %v4623_v43, %v4273_v18 }
 0x655   : > { %v12940_v2 = vsel %vm4956_vm9, %v4766_v45, %v4991_v58  ;;  %v4637_v14 = vrot.slane %v4636_v39, 2 }
 0x656   : > { %v5020_v23 = vsel %vm4787_vm10, %v4863_v56, %v12940_v2  ;;  %v4629_v55 = vrot.slane %v4276_v32, 4  ;;  %v4642_v40 = vadd.f32 %v4641_v44, %v4284_v3  ;;  %v4625_v20 = vrot.slane %v4624_v25, 2 }
 0x657   : > { %v12948_v31 = vpack.c.bf16 %v5020_v23, %v5019_v10  ;;  %v4638_v29 = vadd.f32 %v4637_v14, %v4636_v39 }
 0x658   : > { %v4630_v33 = vadd.f32 %v4629_v55, %v4276_v32  ;;  %v4643_v1 = vrot.slane %v4642_v40, 2  ;;  %v4626_v38 = vadd.f32 %v4625_v20, %v4624_v25 }
 0x659   : > { %5278 = vmatmul.mubr.bf16.gmra.mxu0 %v12948_v31  ;;  %v4639_v22 = vrot.slane %v4638_v29, 1 }
 0x65a   : > { %5287 = vmatprep.mubr.bf16.mxu0 %v13924_v52  ;;  %v4631_v54 = vrot.slane %v4630_v33, 2  ;;  %v4644_v41 = vadd.f32 %v4643_v1, %v4642_v40  ;;  %v4627_v63 = vrot.slane %v4626_v38, 1 }
 0x65b   : > { %v4640_v45 = vadd.f32 %v4639_v22, %v4638_v29 }
 0x65c   : > { %v4632_v59 = vadd.f32 %v4631_v54, %v4630_v33  ;;  %v4645_v27 = vrot.slane %v4644_v41, 1  ;;  %v4628_v32 = vadd.f32 %v4627_v63, %v4626_v38 }
 0x65d   : > { %v9817_v9 = vpop.f32.mrf.mxu1  ;;  %v4769_v39 = vmul.f32 0.125, %v4640_v45 }
 0x65e   : > { %v4297_v26 = vadd.f32 %v12953_v62, %v9817_v9  ;;  %v4633_v19 = vrot.slane %v4632_v59, 1  ;;  %v4646_v44 = vadd.f32 %v4645_v27, %v4644_v41  ;;  %v4767_v20 = vmul.f32 0.125, %v4628_v32 }
 0x65f   : > { %v4288_v61 = vpop.f32.mrf.mxu1 }
 0x660   : > { %v4289_v30 = vadd.f32 %v12953_v62, %v4288_v61  ;;  %v4659_v8 = vrot.slane %v4297_v26, 4  ;;  %v4634_v9 = vadd.f32 %v4633_v19, %v4632_v59 }
 0x661   : > { %v9818_v57 = vpop.f32.mrf.mxu1 }
 0x662   : > { %v4647_v24 = vrot.slane %v4289_v30, 4  ;;  %v4300_v50 = vadd.f32 %v12953_v62, %v9818_v57  ;;  %v4660_v16 = vadd.f32 %v4659_v8, %v4297_v26  ;;  %v4768_v54 = vmul.f32 0.125, %v4634_v9 }
 0x663   : > { %v4291_v60 = vpop.f32.mrf.mxu1 }
 0x664   : > { %v4292_v6 = vadd.f32 %v12953_v62, %v4291_v60  ;;  %v4648_v11 = vadd.f32 %v4647_v24, %v4289_v30  ;;  %v4665_v58 = vrot.slane %v4300_v50, 4  ;;  %v4661_v57 = vrot.slane %v4660_v16, 2 }
 0x666   : > { %v4653_v21 = vrot.slane %v4292_v6, 4  ;;  %v4649_v23 = vrot.slane %v4648_v11, 2  ;;  %v4666_v14 = vadd.f32 %v4665_v58, %v4300_v50 }
 0x668   : > { %v4654_v48 = vadd.f32 %v4653_v21, %v4292_v6  ;;  %v4650_v33 = vadd.f32 %v4649_v23, %v4648_v11  ;;  %v4770_v21 = vmul.f32 0.125, %v4646_v44  ;;  %v4667_v11 = vrot.slane %v4666_v14, 2 }
 0x66a   : > { %v4655_v3 = vrot.slane %v4654_v48, 2  ;;  %v4651_v50 = vrot.slane %v4650_v33, 1  ;;  %v4668_v9 = vadd.f32 %v4667_v11, %v4666_v14 }
 0x66c   : > { %v4656_v1 = vadd.f32 %v4655_v3, %v4654_v48  ;;  %v4993_v48 = vsel %vm4944_vm3, %v4768_v54, %v4767_v20  ;;  %v4652_v32 = vadd.f32 %v4651_v50, %v4650_v33 }
 0x66d   : > { %v9821_v0 = vpop.f32.mrf.mxu1 }
 0x66e   : > { %v4313_v15 = vadd.f32 %v12953_v62, %v9821_v0  ;;  %v4662_v0 = vadd.f32 %v4661_v57, %v4660_v16  ;;  %v4657_v45 = vrot.slane %v4656_v1, 1 }
 0x66f   : > { %v4304_v42 = vpop.f32.mrf.mxu1 }
 0x670   : > { %v4683_v51 = vrot.slane %v4313_v15, 4  ;;  %v4305_v56 = vadd.f32 %v12953_v62, %v4304_v42  ;;  %v4663_v16 = vrot.slane %v4662_v0, 1  ;;  %v4658_v44 = vadd.f32 %v4657_v45, %v4656_v1 }
 0x671   : > { %v9822_v10 = vpop.f32.mrf.mxu1 }
 0x672   : > { %v4684_v17 = vadd.f32 %v4683_v51, %v4313_v15  ;;  %v4671_v12 = vrot.slane %v4305_v56, 4  ;;  %v4316_v18 = vadd.f32 %v12953_v62, %v9822_v10 }
 0x673   : > { %v4307_v13 = vpop.f32.mrf.mxu1 }
 0x674   : > { %v4685_v61 = vrot.slane %v4684_v17, 2  ;;  %v4672_v43 = vadd.f32 %v4671_v12, %v4305_v56  ;;  %v4689_v55 = vrot.slane %v4316_v18, 4  ;;  %v4308_v25 = vadd.f32 %v12953_v62, %v4307_v13 }
 0x675   : > { %v9825_v30 = vpop.f32.mrf.mxu1 }
 0x676   : > { %v4673_v40 = vrot.slane %v4672_v43, 2  ;;  %v4690_v60 = vadd.f32 %v4689_v55, %v4316_v18  ;;  %v4677_v6 = vrot.slane %v4308_v25, 4  ;;  %v4329_v29 = vadd.f32 %v12953_v62, %v9825_v30 }
 0x677   : > { %v4686_v26 = vadd.f32 %v4685_v61, %v4684_v17  ;;  %v4320_v59 = vpop.f32.mrf.mxu1 }
 0x678   : > { %v4674_v24 = vadd.f32 %v4673_v40, %v4672_v43  ;;  %v4691_v38 = vrot.slane %v4690_v60, 2  ;;  %v4678_v22 = vadd.f32 %v4677_v6, %v4308_v25  ;;  %v4707_v41 = vrot.slane %v4329_v29, 4 }
 0x679   : > { %v4321_v8 = vadd.f32 %v12953_v62, %v4320_v59  ;;  %v9826_v63 = vpop.f32.mrf.mxu1  ;;  %v4687_v27 = vrot.slane %v4686_v26, 1  ;;  %v4994_v6 = vsel %vm4946_vm4, %v4769_v39, %v4993_v48 }
 0x67a   : > { %v4675_v15 = vrot.slane %v4674_v24, 1  ;;  %v4679_v19 = vrot.slane %v4678_v22, 2  ;;  %v4708_v42 = vadd.f32 %v4707_v41, %v4329_v29  ;;  %v4332_v56 = vadd.f32 %v12953_v62, %v9826_v63 }
 0x67b   : > { %v4695_v51 = vrot.slane %v4321_v8, 4  ;;  %v4692_v58 = vadd.f32 %v4691_v38, %v4690_v60  ;;  %v4323_v10 = vpop.f32.mrf.mxu1  ;;  %v4688_v57 = vadd.f32 %v4687_v27, %v4686_v26  ;;  %v4664_v29 = vadd.f32 %v4663_v16, %v4662_v0 }
 0x67c   : > { %v4680_v23 = vadd.f32 %v4679_v19, %v4678_v22  ;;  %v4709_v17 = vrot.slane %v4708_v42, 2  ;;  %v4713_v18 = vrot.slane %v4332_v56, 4  ;;  %v4324_v13 = vadd.f32 %v12953_v62, %v4323_v10 }
 0x67d   : > { %v4696_v12 = vadd.f32 %v4695_v51, %v4321_v8  ;;  %v4676_v3 = vadd.f32 %v4675_v15, %v4674_v24  ;;  %v4693_v25 = vrot.slane %v4692_v58, 1  ;;  %v4771_v38 = vmul.f32 0.125, %v4652_v32 }
 0x67e   : > { %v4681_v61 = vrot.slane %v4680_v23, 1  ;;  %v4714_v55 = vadd.f32 %v4713_v18, %v4332_v56  ;;  %v4701_v40 = vrot.slane %v4324_v13, 4  ;;  %v4710_v60 = vadd.f32 %v4709_v17, %v4708_v42 }
 0x67f   : > { %v4697_v43 = vrot.slane %v4696_v12, 2  ;;  %v4775_v14 = vmul.f32 0.125, %v4676_v3  ;;  %v4669_v22 = vrot.slane %v4668_v9, 1  ;;  %v4772_v41 = vmul.f32 0.125, %v4658_v44 }
 0x680   : > { %v4682_v30 = vadd.f32 %v4681_v61, %v4680_v23  ;;  %v4715_v54 = vrot.slane %v4714_v55, 2  ;;  %v4702_v33 = vadd.f32 %v4701_v40, %v4324_v13  ;;  %v4694_v8 = vadd.f32 %v4693_v25, %v4692_v58 }
 0x681   : > { %v4698_v20 = vadd.f32 %v4697_v43, %v4696_v12  ;;  %v4777_v26 = vmul.f32 0.125, %v4688_v57  ;;  %v4711_v11 = vrot.slane %v4710_v60, 1  ;;  %v4995_v63 = vsel %vm4948_vm5, %v4770_v21, %v4994_v6 }
 0x682   : > { %v4776_v59 = vmul.f32 0.125, %v4682_v30  ;;  %v4716_v24 = vadd.f32 %v4715_v54, %v4714_v55  ;;  %v4703_v1 = vrot.slane %v4702_v33, 2  ;;  %v4996_v0 = vsel %vm4950_vm6, %v4771_v38, %v4995_v63 }
 0x683   : > { %v4699_v62 = vrot.slane %v4698_v20, 1  ;;  %v4835_v51 = vcombine.high %v12917_v36, %v12917_v36  ;;  %v4670_v56 = vadd.f32 %v4669_v22, %v4668_v9  ;;  %v4997_v48 = vsel %vm4952_vm7, %v4772_v41, %v4996_v0 }
 0x684   : > { %v5000_v50 = vsel %vm4944_vm3, %v4776_v59, %v4775_v14  ;;  %v4717_v19 = vrot.slane %v4716_v24, 1  ;;  %v4704_v39 = vadd.f32 %v4703_v1, %v4702_v33  ;;  %v4778_v45 = vmul.f32 0.125, %v4694_v8 }
 0x685   : > { %v4700_v15 = vadd.f32 %v4699_v62, %v4698_v20  ;;  %v5001_v42 = vsel %vm4946_vm4, %v4777_v26, %v5000_v50  ;;  %v4773_v58 = vmul.f32 0.125, %v4664_v29  ;;  %v4712_v10 = vadd.f32 %v4711_v11, %v4710_v60  ;;  %v13007_v60 = vld [vmem:[%s13754_s7 + $0x3] sm:$0x7]  ;;  %v13927_v20 = vld [vmem:[#allocation13_spill] sm:$0xff] }
 0x686   : > { %v4705_v27 = vrot.slane %v4704_v39, 1  ;;  %v4837_v21 = vcombine.high %v12924_v35, %v12924_v35  ;;  %v5002_v17 = vsel %vm4948_vm5, %v4778_v45, %v5001_v42  ;;  %v4718_v12 = vadd.f32 %v4717_v19, %v4716_v24 }
 0x687   : > { %v4779_v23 = vmul.f32 0.125, %v4700_v15  ;;  %v4998_v16 = vsel %vm4954_vm8, %v4773_v58, %v4997_v48  ;;  %v4774_v32 = vmul.f32 0.125, %v4670_v56  ;;  %v4781_v36 = vmul.f32 0.125, %v4712_v10 }
 0x688   : > { %v4706_v18 = vadd.f32 %v4705_v27, %v4704_v39  ;;  %v4867_v3 = vrot.slane %v4835_v51, %v13926_v37  ;;  %v4871_v61 = vrot.slane %v4837_v21, %v13926_v37  ;;  %v4782_v43 = vmul.f32 0.125, %v4718_v12 }
 0x689   : > { %v5003_v9 = vsel %vm4950_vm6, %v4779_v23, %v5002_v17  ;;  %v12991_v35 = vsel %vm4956_vm9, %v4774_v32, %v4998_v16  ;;  %v13011_v54 = vrot.slane %v13007_v60, %v13927_v20 }
 0x68a   : > { %v4780_v13 = vmul.f32 0.125, %v4706_v18  ;;  %v5021_v25 = vsel %vm4787_vm10, %v4867_v3, %v12991_v35 }
 0x68c   : > { %v5004_v55 = vsel %vm4952_vm7, %v4780_v13, %v5003_v9 }
 0x68d   : > { %v5005_v44 = vsel %vm4954_vm8, %v4781_v36, %v5004_v55 }
 0x68e   : > { %v12995_v57 = vsel %vm4956_vm9, %v4782_v43, %v5005_v44 }
 0x68f   : > { %v5022_v40 = vsel %vm4787_vm10, %v4871_v61, %v12995_v57  ;;  %v13928_v61 = vld [vmem:[#allocation8_spill] sm:$0xff] }
 0x690   : > { %v5080_v30 = vpack.c.bf16 %v5022_v40, %v5021_v25  ;;  %v13054_v43 = vrot.slane %v13007_v60, %v13928_v61 }
 0x692   : > { %5288 = vmatmul.mubr.bf16.gmra.mxu0 %v5080_v30 }
 0x693   : > { %9843 = vmatprep.mubr.bf16.mxu0 %v12805_v34  ;;  %v13018_v34 = vrot.slane %v13007_v60, %v13926_v37 }
 0x698   : > { %v5259_v6 = vpop.f32.mrf.mxu0 }
 0x69a   : > { %9844 = vmatmul.mubr.bf16.vlgmr.msra.gmra.mxu0 %v12870_v53  ;;  %v5261_v29 = vpop.f32.mrf.mxu0  ;;  %v5260_v53 = vadd.f32 %v5259_v6, %v13018_v34 }
 0x69b   : > { %9847 = vmatprep.mubr.bf16.mxu0 %v12948_v31  ;;  %v5262_v38 = vadd.f32 %v5261_v29, %v13011_v54 }
 0x69c   : > { %v5263_v14 = vpop.f32.mrf.mxu0  ;;  %v5363_v62 = vpack.c.bf16 %v5260_v53, %v5260_v53 }
 0x69d   : > { %v5371_v33 = vpack.c.bf16 %v5262_v38, %v5262_v38  ;;  %v5264_v22 = vadd.f32 %v5263_v14, %v13018_v34 }
 0x69e   : > { %v5265_v59 = vpop.f32.mrf.mxu0 }
 0x69f   : > { %9852 = vmatpush3.bf16.xpose.msra.mxu0 %v5371_v33  ;;  %v5266_v31 = vadd.f32 %v5265_v59, %v13011_v54  ;;  %v5364_v41 = vpack.c.bf16 %v5264_v22, %v5264_v22 }
 0x6a0   : > { %9857 = vmatprep.subr.bf16.mxu0 %v10792_v7 }
 0x6a1   : > { %v5372_v24 = vpack.c.bf16 %v5266_v31, %v5266_v31 }
 0x6a2   : > { %9848 = vmatmul.mubr.bf16.gmra.mxu0 %v5080_v30 }
 0x6a3   : > { %9853 = vmatprep.mubr.msk.bf16.mxu0 %vm10793_vm11, %v10792_v7 }
 0x6aa   : > { %9854 = vmatmul.mubr.bf16.vlgmr.msra.gmra.mxu0 %v5363_v62 }
 0x6ab   : > { %9858 = vmatpush3.bf16.xpose.msra.mxu0 %v5372_v24  ;;  %9859 = vmatprep.mubr.msk.bf16.mxu0 %vm10793_vm11, %v10792_v7 }
 0x6ac   : > { %9863 = vmatprep.subr.bf16.mxu0 %v10792_v7 }
 0x6b2   : > { %9860 = vmatmul.mubr.bf16.vlgmr.msra.gmra.mxu0 %v5364_v41 }
 0x6b3   : > { %9865 = vmatprep.mubr.msk.bf16.mxu0 %vm10793_vm11, %v10792_v7 }
 0x6cf   : > { %v5269_v8 = vpop.f32.mrf.mxu0 }
 0x6d0   : > { %v5270_v63 = vadd.f32 %v5269_v8, %v13018_v34 }
 0x6d1   : > { %v5271_v1 = vpop.f32.mrf.mxu0 }
 0x6d2   : > { %v5272_v26 = vadd.f32 %v5271_v1, %v13011_v54  ;;  %v5365_v39 = vpack.c.bf16 %v5270_v63, %v5270_v63 }
 0x6d3   : > { %v5273_v50 = vpop.f32.mrf.mxu0 }
 0x6d4   : > { %v5373_v11 = vpack.c.bf16 %v5272_v26, %v5272_v26  ;;  %v5274_v42 = vadd.f32 %v5273_v50, %v13018_v34 }
 0x6d5   : > { %v5275_v15 = vpop.f32.mrf.mxu0 }
 0x6d6   : > { %9864 = vmatpush3.bf16.xpose.msra.mxu0 %v5373_v11  ;;  %v5276_v19 = vadd.f32 %v5275_v15, %v13011_v54  ;;  %v5366_v51 = vpack.c.bf16 %v5274_v42, %v5274_v42  ;;  %v13088_v15 = vld [vmem:[%s13750_s3] ss:$0 sm:$0xff] }
 0x6d7   : > { %9869 = vmatprep.subr.bf16.mxu0 %v10792_v7 }
 0x6d8   : > { %v5374_v0 = vpack.c.bf16 %v5276_v19, %v5276_v19 }
 0x6dd   : > { %9866 = vmatmul.mubr.bf16.vlgmr.msra.gmra.mxu0 %v5365_v39 }
 0x6de   : > { %9870 = vmatpush3.bf16.xpose.msra.mxu0 %v5374_v0  ;;  %9871 = vmatprep.mubr.msk.bf16.mxu0 %vm10793_vm11, %v10792_v7 }
 0x6df   : > { %9875 = vmatprep.subr.bf16.mxu0 %v10792_v7 }
 0x6e5   : > { %9872 = vmatmul.mubr.bf16.vlgmr.msra.gmra.mxu0 %v5366_v51 }
 0x6e6   : > { %9877 = vmatprep.mubr.msk.bf16.mxu0 %vm10793_vm11, %v10792_v7 }
 0x719   : > { %v5279_v56 = vpop.f32.mrf.mxu0 }
 0x71a   : > { %v5280_v23 = vadd.f32 %v5279_v56, %v13018_v34 }
 0x71b   : > { %v5281_v48 = vpop.f32.mrf.mxu0 }
 0x71c   : > { %v5282_v45 = vadd.f32 %v5281_v48, %v13011_v54  ;;  %v5367_v17 = vpack.c.bf16 %v5280_v23, %v5280_v23 }
 0x71d   : > { %v5283_v27 = vpop.f32.mrf.mxu0 }
 0x71e   : > { %v5375_v58 = vpack.c.bf16 %v5282_v45, %v5282_v45  ;;  %v5284_v18 = vadd.f32 %v5283_v27, %v13018_v34 }
 0x71f   : > { %v5285_v10 = vpop.f32.mrf.mxu0 }
 0x720   : > { %9876 = vmatpush3.bf16.xpose.msra.mxu0 %v5375_v58  ;;  %v5286_v21 = vadd.f32 %v5285_v10, %v13011_v54  ;;  %v5368_v16 = vpack.c.bf16 %v5284_v18, %v5284_v18 }
 0x721   : > { %9881 = vmatprep.subr.bf16.mxu0 %v10792_v7 }
 0x722   : > { %v5376_v12 = vpack.c.bf16 %v5286_v21, %v5286_v21 }
 0x727   : > { %9878 = vmatmul.mubr.bf16.vlgmr.msra.gmra.mxu0 %v5367_v17 }
 0x728   : > { %9882 = vmatpush3.bf16.xpose.msra.mxu0 %v5376_v12  ;;  %9883 = vmatprep.mubr.msk.bf16.mxu0 %vm10793_vm11, %v10792_v7 }
 0x729   : > { %9887 = vmatprep.subr.bf16.mxu0 %v10792_v7 }
 0x72f   : > { %9884 = vmatmul.mubr.bf16.vlgmr.msra.gmra.mxu0 %v5368_v16 }
 0x730   : > { %9889 = vmatprep.mubr.msk.bf16.mxu0 %vm10793_vm11, %v10792_v7 }
 0x752   : > { %v5289_v32 = vpop.f32.mrf.mxu0 }
 0x753   : > { %v5290_v44 = vadd.f32 %v5289_v32, %v13018_v34 }
 0x754   : > { %v5291_v13 = vpop.f32.mrf.mxu0 }
 0x755   : > { %v5292_v36 = vadd.f32 %v5291_v13, %v13011_v54  ;;  %v5369_v29 = vpack.c.bf16 %v5290_v44, %v5290_v44 }
 0x756   : > { %v5293_v9 = vpop.f32.mrf.mxu0 }
 0x757   : > { %v5377_v3 = vpack.c.bf16 %v5292_v36, %v5292_v36 }
 0x758   : > { %v5295_v55 = vpop.f32.mrf.mxu0 }
 0x759   : > { %9888 = vmatpush3.bf16.xpose.msra.mxu0 %v5377_v3  ;;  %v5296_v40 = vadd.f32 %v5295_v55, %v13011_v54  ;;  %v5294_v54 = vadd.f32 %v5293_v9, %v13018_v34 }
 0x75a   : > { %v9845_v25 = vpop.f32.mrf.mxu0  ;;  %9893 = vmatprep.subr.bf16.mxu0 %v10792_v7 }
 0x75b   : > { %v13060_v30 = vadd.f32 %v9845_v25, %v13054_v43  ;;  %v5378_v33 = vpack.c.bf16 %v5296_v40, %v5296_v40  ;;  %v5370_v41 = vpack.c.bf16 %v5294_v54, %v5294_v54 }
 0x75c   : > { %v5332_v6 = vpop.f32.mrf.mxu0 }
 0x75d   : > { %v5333_v60 = vadd.f32 %v5332_v6, %v13054_v43 }
 0x75e   : > { %v9846_v38 = vpop.f32.mrf.mxu0 }
 0x75f   : > { %v13063_v14 = vadd.f32 %v9846_v38, %v13054_v43  ;;  %v5379_v62 = vpack.c.bf16 %v5333_v60, %v5333_v60 }
 0x760   : > { %v13066_v59 = vpop.f32.mrf.mxu0  ;;  %9890 = vmatmul.mubr.bf16.vlgmr.msra.gmra.mxu0 %v5369_v29 }
 0x761   : > { %9894 = vmatpush3.bf16.xpose.msra.mxu0 %v5378_v33  ;;  %9895 = vmatprep.mubr.msk.bf16.mxu0 %vm10793_vm11, %v10792_v7  ;;  %v5831_v50 = vsel %vm5829_vm12, %v5379_v62, 0 }
 0x762   : > { %v9849_v53 = vpop.f32.mrf.mxu0  ;;  %9899 = vmatprep.subr.bf16.mxu0 %v10792_v7 }
 0x763   : > { %v13073_v31 = vadd.f32 %v9849_v53, %v13054_v43 }
 0x764   : > { %v5348_v24 = vpop.f32.mrf.mxu0 }
 0x765   : > { %v5349_v22 = vadd.f32 %v5348_v24, %v13054_v43 }
 0x766   : > { %v9850_v8 = vpop.f32.mrf.mxu0 }
 0x767   : > { %v5383_v1 = vpack.c.bf16 %v5349_v22, %v5349_v22  ;;  %v13077_v26 = vadd.f32 %v9850_v8, %v13054_v43 }
 0x768   : > { %v13080_v34 = vpop.f32.mrf.mxu0  ;;  %9896 = vmatmul.mubr.bf16.vlgmr.msra.gmra.mxu0 %v5370_v41 }
 0x769   : > { %v6015_v11 = vsel %vm5829_vm12, %v5383_v1, 0  ;;  %9900 = vmatpush3.bf16.msra.mxu0 %v5831_v50  ;;  %9901 = vmatprep.mubr.msk.bf16.mxu0 %vm10793_vm11, %v10792_v7 }
 0x76a   : > { %v5421_v63 = vpop.f32.mrf.mxu0  ;;  %9924 = vmatpush3.bf16.msra.mxu1 %v6015_v11  ;;  %9905 = vmatprep.subr.bf16.mxu0 %v10792_v7 }
 0x76b   : > { %v5707_v19 = vmul.f32 0.17677669, %v5421_v63  ;;  %9935 = vmatprep.subr.bf16.mxu1 %v10792_v7 }
 0x76c   : > { %v9855_v39 = vpop.f32.mrf.mxu0 }
 0x76d   : > { %v5721_v0 = vadd.f32 %v13088_v15, %v5707_v19 }
 0x76e   : > { %v5424_v42 = vpop.f32.mrf.mxu0 }
 0x76f   : > { %v5730_v51 = vsel %vm5729_vm13, %v5721_v0, -inf }
 0x770   : > { %5731 = vmax.xlane.f32.xlu0 %v5730_v51  ;;  %v9856_v56 = vpop.f32.mrf.mxu0 }
 0x772   : > { %v5461_v48 = vpop.f32.mrf.mxu0 }
 0x773   : > { %v5708_v45 = vmul.f32 0.17677669, %v5461_v48 }
 0x774   : > { %v9861_v27 = vpop.f32.mrf.mxu0 }
 0x775   : > { %v5722_v58 = vadd.f32 %v13088_v15, %v5708_v45 }
 0x776   : > { %v5464_v10 = vpop.f32.mrf.mxu0 }
 0x777   : > { %v5733_v23 = vsel %vm5729_vm13, %v5722_v58, -inf }
 0x778   : > { %5734 = vmax.xlane.f32.xlu1 %v5733_v23  ;;  %v9862_v21 = vpop.f32.mrf.mxu0 }
 0x79d   : > { %v5501_v17 = vpop.f32.mrf.mxu0 }
 0x79e   : > { %v5709_v12 = vmul.f32 0.17677669, %v5501_v17 }
 0x79f   : > { %v9867_v18 = vpop.f32.mrf.mxu0 }
 0x7a0   : > { %v5723_v16 = vadd.f32 %v13088_v15, %v5709_v12 }
 0x7a1   : > { %v5504_v32 = vpop.f32.mrf.mxu0 }
 0x7a2   : > { %v5736_v13 = vsel %vm5729_vm13, %v5723_v16, -inf }
 0x7a3   : > { %5737 = vmax.xlane.f32.xlu0 %v5736_v13  ;;  %v9868_v36 = vpop.f32.mrf.mxu0 }
 0x7a5   : > { %v5541_v9 = vpop.f32.mrf.mxu0 }
 0x7a6   : > { %v5710_v3 = vmul.f32 0.17677669, %v5541_v9 }
 0x7a7   : > { %v9873_v55 = vpop.f32.mrf.mxu0 }
 0x7a8   : > { %v5724_v44 = vadd.f32 %v13088_v15, %v5710_v3 }
 0x7a9   : > { %v5544_v25 = vpop.f32.mrf.mxu0 }
 0x7aa   : > { %v5739_v40 = vsel %vm5729_vm13, %v5724_v44, -inf }
 0x7ab   : > { %5740 = vmax.xlane.f32.xlu1 %v5739_v40  ;;  %v9874_v6 = vpop.f32.mrf.mxu0 }
 0x7e7   : > { %v5581_v29 = vpop.f32.mrf.mxu0 }
 0x7e8   : > { %v5711_v38 = vmul.f32 0.17677669, %v5581_v29 }
 0x7e9   : > { %v9879_v33 = vpop.f32.mrf.mxu0 }
 0x7ea   : > { %v5725_v60 = vadd.f32 %v13088_v15, %v5711_v38 }
 0x7eb   : > { %v5584_v54 = vpop.f32.mrf.mxu0 }
 0x7ec   : > { %v5742_v53 = vsel %vm5729_vm13, %v5725_v60, -inf }
 0x7ed   : > { %5743 = vmax.xlane.f32.xlu0 %v5742_v53  ;;  %v9880_v62 = vpop.f32.mrf.mxu0 }
 0x7ef   : > { %v5621_v24 = vpop.f32.mrf.mxu0 }
 0x7f0   : > { %v5712_v22 = vmul.f32 0.17677669, %v5621_v24 }
 0x7f1   : > { %v9885_v41 = vpop.f32.mrf.mxu0 }
 0x7f2   : > { %v5726_v8 = vadd.f32 %v13088_v15, %v5712_v22 }
 0x7f3   : > { %v5624_v1 = vpop.f32.mrf.mxu0 }
 0x7f4   : > { %v5745_v50 = vsel %vm5729_vm13, %v5726_v8, -inf }
 0x7f5   : > { %5746 = vmax.xlane.f32.xlu1 %v5745_v50  ;;  %v9886_v11 = vpop.f32.mrf.mxu0 }
 0x7f9   : > { %v5732_v63 = vpop.xlane.xlu0 %5731 }
 0x7fa   : > { %v5754_v19 = vsub.f32 %v5721_v0, %v5732_v63 }
 0x7fc   : > { %v5762_v39 = vmul.f32 1.442695, %v5754_v19 }
 0x7fe   : > { %10658 = vpow2.f32 %v5762_v39 }
 0x801   : > { %v5735_v42 = vpop.xlane.xlu1 %5734 }
 0x802   : > { %v5755_v51 = vsub.f32 %v5722_v58, %v5735_v42 }
 0x804   : > { %v5764_v56 = vmul.f32 1.442695, %v5755_v51 }
 0x806   : > { %10660 = vpow2.f32 %v5764_v56 }
 0x80b   : > { %v10659_v17 = vpop.eup %10658 }
 0x80c   : > { %v5778_v0 = vsel %vm5729_vm13, %v10659_v17, 0.0 }
 0x813   : > { %v10661_v40 = vpop.eup %10660 }
 0x814   : > { %v5781_v29 = vsel %vm5729_vm13, %v10661_v40, 0.0 }
 0x820   : > { %v5661_v48 = vpop.f32.mrf.mxu0 }
 0x821   : > { %v5713_v45 = vmul.f32 0.17677669, %v5661_v48 }
 0x822   : > { %v9891_v27 = vpop.f32.mrf.mxu0 }
 0x823   : > { %v5727_v10 = vadd.f32 %v13088_v15, %v5713_v45 }
 0x824   : > { %v5664_v23 = vpop.f32.mrf.mxu0 }
 0x825   : > { %v5748_v21 = vsel %vm5729_vm13, %v5727_v10, -inf  ;;  %v5336_v23 = vadd.f32 %v13066_v59, %v13054_v43 }
 0x826   : > { %5749 = vmax.xlane.f32.xlu0 %v5748_v21  ;;  %v9892_v12 = vpop.f32.mrf.mxu0 }
 0x828   : > { %v5701_v18 = vpop.f32.mrf.mxu0 }
 0x829   : > { %v5714_v32 = vmul.f32 0.17677669, %v5701_v18 }
 0x82a   : > { %5779 = vadd.xlane.f32.xlu0 %v5778_v0  ;;  %v9897_v58 = vpop.f32.mrf.mxu0 }
 0x82b   : > { %v5728_v36 = vadd.f32 %v13088_v15, %v5714_v32 }
 0x82c   : > { %v5738_v13 = vpop.xlane.xlu0 %5737  ;;  %v5704_v3 = vpop.f32.mrf.mxu0 }
 0x82d   : > { %v5756_v9 = vsub.f32 %v5723_v16, %v5738_v13  ;;  %v5751_v25 = vsel %vm5729_vm13, %v5728_v36, -inf }
 0x82e   : > { %5752 = vmax.xlane.f32.xlu1 %v5751_v25  ;;  %v9898_v6 = vpop.f32.mrf.mxu0 }
 0x82f   : > { %v5766_v55 = vmul.f32 1.442695, %v5756_v9  ;;  %v5381_v9 = vpack.c.bf16 %v13060_v30, %v13060_v30 }
 0x831   : > { %10662 = vpow2.f32 %v5766_v55  ;;  %v5923_v25 = vsel %vm5829_vm12, %v5381_v9, 0 }
 0x832   : > { %5782 = vadd.xlane.f32.xlu1 %v5781_v29 }
 0x834   : > { %v5741_v38 = vpop.xlane.xlu1 %5740 }
 0x835   : > { %v5757_v33 = vsub.f32 %v5724_v44, %v5741_v38  ;;  %v5382_v38 = vpack.c.bf16 %v13063_v14, %v13063_v14 }
 0x837   : > { %v5768_v54 = vmul.f32 1.442695, %v5757_v33  ;;  %v5969_v33 = vsel %vm5829_vm12, %v5382_v38, 0 }
 0x839   : > { %10664 = vpow2.f32 %v5768_v54  ;;  %v5352_v54 = vadd.f32 %v13080_v34, %v13054_v43 }
 0x83e   : > { %v13110_v53 = vpop.eup %10662 }
 0x83f   : > { %v5784_v15 = vsel %vm5729_vm13, %v13110_v53, 0.0 }
 0x840   : > { %5785 = vadd.xlane.f32.xlu0 %v5784_v15 }
 0x846   : > { %v13114_v16 = vpop.eup %10664 }
 0x847   : > { %v5787_v62 = vsel %vm5729_vm13, %v13114_v16, 0.0 }
 0x848   : > { %5788 = vadd.xlane.f32.xlu1 %v5787_v62  ;;  %v5384_v62 = vpack.c.bf16 %v5352_v54, %v5352_v54 }
 0x876   : > { %v5744_v24 = vpop.xlane.xlu0 %5743 }
 0x877   : > { %v5758_v22 = vsub.f32 %v5725_v60, %v5744_v24 }
 0x879   : > { %v5770_v41 = vmul.f32 1.442695, %v5758_v22 }
 0x87b   : > { %10666 = vpow2.f32 %v5770_v41  ;;  %v5385_v41 = vpack.c.bf16 %v13073_v31, %v13073_v31  ;;  %v5386_v31 = vpack.c.bf16 %v13077_v26, %v13077_v26  ;;  %v10307_v26 = vld [vmem:[%s13755_s8 + $0x70] sm:$0xff]  }
 0x87e   : > { %v5747_v1 = vpop.xlane.xlu1 %5746 }
 0x87f   : > { %v5759_v44 = vsub.f32 %v5726_v8, %v5747_v1 }
 0x881   : > { %v5772_v50 = vmul.f32 1.442695, %v5759_v44  ;;  %v10306_v44 = vld [vmem:[%s13755_s8 + $0x78] sm:$0xff]  }
 0x883   : > { %10668 = vpow2.f32 %v5772_v50  ;;  %v6107_v50 = vsel %vm5829_vm12, %v5385_v41, 0 }
 0x888   : > { %v13118_v11 = vpop.eup %10666 }
 0x889   : > { %v5790_v63 = vsel %vm5729_vm13, %v13118_v11, 0.0 }
 0x88a   : > { %5791 = vadd.xlane.f32.xlu0 %v5790_v63 }
 0x890   : > { %v13122_v19 = vpop.eup %10668 }
 0x891   : > { %v5793_v39 = vsel %vm5729_vm13, %v13122_v19, 0.0 }
 0x892   : > { %5794 = vadd.xlane.f32.xlu1 %v5793_v39 }
 0x8af   : > { %v5750_v42 = vpop.xlane.xlu0 %5749 }
 0x8b0   : > { %v5760_v60 = vsub.f32 %v5727_v10, %v5750_v42  ;;  %v5380_v10 = vpack.c.bf16 %v5336_v23, %v5336_v23  ;;  %v6153_v42 = vsel %vm5829_vm12, %v5386_v31, 0 }
 0x8b2   : > { %v5774_v51 = vmul.f32 1.442695, %v5760_v60  ;;  %v5877_v13 = vsel %vm5829_vm12, %v5380_v10, 0  ;;  %v10312_v10 = vld [vmem:[%s13755_s8 + $0x48] sm:$0xff]  }
 0x8b3   : > { %v5780_v56 = vpop.xlane.xlu0 %5779 }
 0x8b4   : > { %10670 = vpow2.f32 %v5774_v51 }
 0x8b5   : > { %10672 = vrcp.f32 %v5780_v56 }
 0x8b7   : > { %v5753_v8 = vpop.xlane.xlu1 %5752 }
 0x8b8   : > { %v5761_v48 = vsub.f32 %v5728_v36, %v5753_v8 }
 0x8ba   : > { %v5776_v45 = vmul.f32 1.442695, %v5761_v48 }
 0x8bb   : > { %v5783_v27 = vpop.xlane.xlu1 %5782 }
 0x8bc   : > { %10674 = vpow2.f32 %v5776_v45 }
 0x8bd   : > { %10676 = vrcp.f32 %v5783_v27 }
 0x8c1   : > { %v13128_v21 = vpop.eup %10670 }
 0x8c2   : > { %v10673_v12 = vpop.eup %10672  ;;  %v5796_v18 = vsel %vm5729_vm13, %v13128_v21, 0.0 }
 0x8c3   : > { %v5803_v32 = vmul.f32 %v10673_v12, %v10659_v17  ;;  %5797 = vadd.xlane.f32.xlu0 %v5796_v18  ;;  %v10310_v12 = vld [vmem:[%s13755_s8 + $0x58] sm:$0xff]   ;;  %v10311_v18 = vld [vmem:[%s13755_s8 + $0x50] sm:$0xff]  }
 0x8c5   : > { %v5818_v0 = vpack.c.bf16 %v5803_v32, %v5803_v32  ;;  %v10313_v32 = vld [vmem:[%s13755_s8 + $0x40] sm:$0xff]  }
 0x8c7   : > { %9902 = vmatmul.mubr.msk.bf16.vlgmr.msra.gmra.mxu0 %vm5729_vm13, %v5818_v0 }
 0x8c8   : > { %9906 = vmatpush3.bf16.msra.mxu0 %v5877_v13  ;;  %9907 = vmatprep.mubr.msk.bf16.mxu0 %vm10793_vm11, %v10792_v7 }
 0x8c9   : > { %v5786_v58 = vpop.xlane.xlu0 %5785  ;;  %v13136_v59 = vpop.eup %10674  ;;  %9911 = vmatprep.subr.bf16.mxu0 %v10792_v7 }
 0x8ca   : > { %10678 = vrcp.f32 %v5786_v58  ;;  %v10677_v36 = vpop.eup %10676  ;;  %v5799_v17 = vsel %vm5729_vm13, %v13136_v59, 0.0 }
 0x8cb   : > { %v5805_v3 = vmul.f32 %v10677_v36, %v10661_v40  ;;  %5800 = vadd.xlane.f32.xlu1 %v5799_v17 }
 0x8cd   : > { %v5819_v55 = vpack.c.bf16 %v5805_v3, %v5805_v3 }
 0x8cf   : > { %9908 = vmatmul.mubr.msk.bf16.vlgmr.msra.gmra.mxu0 %vm5729_vm13, %v5819_v55 }
 0x8d0   : > { %9912 = vmatpush3.bf16.msra.mxu0 %v5923_v25  ;;  %9913 = vmatprep.mubr.msk.bf16.mxu0 %vm10793_vm11, %v10792_v7 }
 0x8d1   : > { %v5789_v6 = vpop.xlane.xlu1 %5788  ;;  %9917 = vmatprep.subr.bf16.mxu0 %v10792_v7 }
 0x8d2   : > { %10680 = vrcp.f32 %v5789_v6 }
 0x8d7   : > { %v10679_v29 = vpop.eup %10678 }
 0x8d8   : > { %v5807_v30 = vmul.f32 %v10679_v29, %v13110_v53  ;;  %v6061_v53 = vsel %vm5829_vm12, %v5384_v62, 0 }
 0x8da   : > { %v5820_v40 = vpack.c.bf16 %v5807_v30, %v5807_v30 }
 0x8dc   : > { %9914 = vmatmul.mubr.msk.bf16.vlgmr.msra.gmra.mxu0 %vm5729_vm13, %v5820_v40 }
 0x8dd   : > { %9918 = vmatpush3.bf16.msra.mxu0 %v5969_v33  ;;  %9919 = vmatprep.mubr.msk.bf16.mxu0 %vm10793_vm11, %v10792_v7 }
 0x8de   : > { %9929 = vmatprep.subr.bf16.mxu0 %v10792_v7 }
 0x8df   : > { %v10681_v15 = vpop.eup %10680 }
 0x8e0   : > { %v5809_v14 = vmul.f32 %v10681_v15, %v13114_v16 }
 0x8e2   : > { %v5821_v24 = vpack.c.bf16 %v5809_v14, %v5809_v14 }
 0x8e4   : > { %9920 = vmatmul.mubr.msk.bf16.vlgmr.msra.gmra.mxu0 %vm5729_vm13, %v5821_v24 }
 0x8e5   : > { %9930 = vmatpush3.bf16.msra.mxu0 %v6061_v53  ;;  %9931 = vmatprep.mubr.msk.bf16.mxu0 %vm10793_vm11, %v10792_v7 }
 0x8e6   : > { %9941 = vmatprep.subr.bf16.mxu0 %v10792_v7 }
 0x913   : > { %v5792_v43 = vpop.xlane.xlu0 %5791 }
 0x914   : > { %10682 = vrcp.f32 %v5792_v43 }
 0x91b   : > { %v5795_v34 = vpop.xlane.xlu1 %5794 }
 0x91c   : > { %10684 = vrcp.f32 %v5795_v34 }
 0x921   : > { %v10683_v22 = vpop.eup %10682 }
 0x922   : > { %v5811_v16 = vmul.f32 %v10683_v22, %v13118_v11 }
 0x924   : > { %v5822_v1 = vpack.c.bf16 %v5811_v16, %v5811_v16 }
 0x926   : > { %9926 = vmatmul.mubr.msk.bf16.vlgmr.msra.gmra.mxu1 %vm5729_vm13, %v5822_v1 }
 0x927   : > { %9936 = vmatpush3.bf16.msra.mxu1 %v6107_v50  ;;  %9937 = vmatprep.mubr.msk.bf16.mxu1 %vm10793_vm11, %v10792_v7 }
 0x928   : > { %9947 = vmatprep.subr.bf16.mxu1 %v10306_v44 }
 0x929   : > { %v10685_v63 = vpop.eup %10684 }
 0x92a   : > { %v5813_v11 = vmul.f32 %v10685_v63, %v13122_v19  ;;  %v10308_v19 = vld [vmem:[%s13755_s8 + $0x68] sm:$0xff]  }
 0x92c   : > { %v5823_v39 = vpack.c.bf16 %v5813_v11, %v5813_v11 }
 0x92e   : > { %9932 = vmatmul.mubr.msk.bf16.vlgmr.msra.gmra.mxu0 %vm5729_vm13, %v5823_v39 }
 0x92f   : > { %9942 = vmatpush3.bf16.msra.mxu0 %v6153_v42  ;;  %9943 = vmatprep.mubr.msk.bf16.mxu0 %vm10793_vm11, %v10792_v7 }
 0x94c   : > { %v5798_v60 = vpop.xlane.xlu0 %5797 }
 0x94d   : > { %10686 = vrcp.f32 %v5798_v60 }
 0x954   : > { %v5801_v51 = vpop.xlane.xlu1 %5800 }
 0x955   : > { %10688 = vrcp.f32 %v5801_v51  ;;  %v10316_v51 = vld [vmem:[%s13753_s6 + $0x22c] ss:$12 sps:$4 sm:$0xff]  }
 0x956   : > { %6731 = vmatprep.subr.bf16.mxu0 %v10316_v51 }
 0x95a   : > { %v10687_v56 = vpop.eup %10686 }
 0x95b   : > { %v5815_v8 = vmul.f32 %v10687_v56, %v13128_v21  ;;  %v10309_v21 = vld [vmem:[%s13755_s8 + $0x60] sm:$0xff]   ;;  %v10314_v56 = vld [vmem:[%s13753_s6 + $0x228] ss:$12 sps:$4 sm:$0xff]  }
 0x95d   : > { %v5824_v48 = vpack.c.bf16 %v5815_v8, %v5815_v8  ;;  %v10317_v8 = vld [vmem:[%s13753_s6 + $0x230] ss:$12 sps:$4 sm:$0xff]  }
 0x95f   : > { %9938 = vmatmul.mubr.msk.bf16.vlgmr.msra.gmra.mxu1 %vm5729_vm13, %v5824_v48  ;;  %v10320_v48 = vld [vmem:[%s13753_s6 + $0x214] ss:$12 sps:$4 sm:$0xff]  }
 0x960   : > { %9948 = vmatpush3.bf16.msra.mxu1 %v10306_v44 }
 0x961   : > { %9949 = vmatprep.subr.bf16.mxu1 %v10307_v26 }
 0x962   : > { %v10689_v45 = vpop.eup %10688 }
 0x963   : > { %v5817_v27 = vmul.f32 %v10689_v45, %v13136_v59  ;;  %v10324_v45 = vld [vmem:[%s13753_s6 + $0x1fc] ss:$12 sps:$4 sm:$0xff]  }
 0x964   : > { %9950 = vmatpush3.bf16.msra.mxu1 %v10307_v26  ;;  %v10318_v26 = vld [vmem:[%s13753_s6 + $0x210] ss:$12 sps:$4 sm:$0xff]  }
 0x965   : > { %v5825_v23 = vpack.c.bf16 %v5817_v27, %v5817_v27  ;;  %9951 = vmatprep.subr.bf16.mxu1 %v10308_v19  ;;  %v10322_v27 = vld [vmem:[%s13753_s6 + $0x1f8] ss:$12 sps:$4 sm:$0xff]  }
 0x967   : > { %9944 = vmatmul.mubr.msk.bf16.vlgmr.msra.gmra.mxu0 %vm5729_vm13, %v5825_v23  ;;  %v10325_v23 = vld [vmem:[%s13753_s6 + $0x200] ss:$12 sps:$4 sm:$0xff]  }
 0x968   : > { %9952 = vmatpush3.bf16.msra.mxu1 %v10308_v19  ;;  %6763 = vmatprep.mubr.bf16.mxu0 %v13924_v52  ;;  %v10321_v19 = vld [vmem:[%s13753_s6 + $0x218] ss:$12 sps:$4 sm:$0xff]  }
 0x969   : > { %9953 = vmatprep.subr.bf16.mxu1 %v10309_v21  ;;  %6732 = vmatpush1.bf16.msra.mxu0 %v10314_v56 }
 0x96a   : > { %6733 = vmatprep.subr.bf16.mxu0 %v10320_v48 }
 0x96c   : > { %9954 = vmatpush3.bf16.msra.mxu1 %v10309_v21  ;;  %v10328_v21 = vld [vmem:[%s13753_s6 + $0x1e4] ss:$12 sps:$4 sm:$0xff]  }
 0x96d   : > { %9955 = vmatprep.subr.bf16.mxu1 %v10310_v12  ;;  %6734 = vmatpush1.bf16.msra.mxu0 %v10318_v26 }
 0x96e   : > { %6735 = vmatprep.subr.bf16.mxu0 %v10324_v45 }
 0x970   : > { %9956 = vmatpush3.bf16.msra.mxu1 %v10310_v12  ;;  %v10326_v12 = vld [vmem:[%s13753_s6 + $0x1e0] ss:$12 sps:$4 sm:$0xff]  }
 0x971   : > { %9957 = vmatprep.subr.bf16.mxu1 %v10311_v18  ;;  %6736 = vmatpush1.bf16.msra.mxu0 %v10322_v27 }
 0x972   : > { %6737 = vmatprep.subr.bf16.mxu0 %v10328_v21 }
 0x974   : > { %9958 = vmatpush3.bf16.msra.mxu1 %v10311_v18  ;;  %v10329_v18 = vld [vmem:[%s13753_s6 + $0x1e8] ss:$12 sps:$4 sm:$0xff]  }
 0x975   : > { %9959 = vmatprep.subr.bf16.mxu1 %v10312_v10  ;;  %6738 = vmatpush1.bf16.msra.mxu0 %v10326_v12 }
 0x978   : > { %9960 = vmatpush3.bf16.msra.mxu1 %v10312_v10  ;;  %v10332_v10 = vld [vmem:[%s13753_s6 + $0x1cc] ss:$12 sps:$4 sm:$0xff]  }
 0x979   : > { %9961 = vmatprep.subr.bf16.mxu1 %v10313_v32  ;;  %6739 = vmatprep.subr.bf16.mxu0 %v10332_v10 }
 0x97c   : > { %9962 = vmatpush3.bf16.msra.mxu1 %v10313_v32  ;;  %v10330_v32 = vld [vmem:[%s13753_s6 + $0x1c8] ss:$12 sps:$4 sm:$0xff]  }
 0x97d   : > { %9971 = vmatprep.subr.bf16.mxu1 %v10317_v8  ;;  %6740 = vmatpush1.bf16.msra.mxu0 %v10330_v32 }
 0x987   : > { %v5867_v0 = vpop.f32.mrf.mxu0 }
 0x989   : > { %v9903_v13 = vpop.f32.mrf.mxu0 }
 0x98a   : > { %v10336_v13 = vld [vmem:[%s13753_s6 + $0x1b4] ss:$12 sps:$4 sm:$0xff]  }
 0x98b   : > { %v5870_v58 = vpop.f32.mrf.mxu0  ;;  %6741 = vmatprep.subr.bf16.mxu0 %v10336_v13 }
 0x98c   : > { %v10334_v58 = vld [vmem:[%s13753_s6 + $0x1b0] ss:$12 sps:$4 sm:$0xff]  }
 0x98d   : > { %v9904_v59 = vpop.f32.mrf.mxu0  ;;  %6742 = vmatpush1.bf16.msra.mxu0 %v10334_v58 }
 0x98e   : > { %v10337_v59 = vld [vmem:[%s13753_s6 + $0x1b8] ss:$12 sps:$4 sm:$0xff]  }
 0x98f   : > { %v5913_v36 = vpop.f32.mrf.mxu0 }
 0x990   : > { %v6195_v17 = vpack.c.bf16 %v5913_v36, %v5867_v0  ;;  %v10333_v0 = vld [vmem:[%s13753_s6 + $0x1d0] ss:$12 sps:$4 sm:$0xff]  }
 0x991   : > { %v9909_v9 = vpop.f32.mrf.mxu0  ;;  %v10340_v36 = vld [vmem:[%s13753_s6 + $0x19c] ss:$12 sps:$4 sm:$0xff]  }
 0x992   : > { %9963 = vmatprep.mubr.bf16.mxu1 %v6195_v17  ;;  %v10338_v17 = vld [vmem:[%s13753_s6 + $0x198] ss:$12 sps:$4 sm:$0xff]   ;;  %v10341_v9 = vld [vmem:[%s13753_s6 + $0x1a0] ss:$12 sps:$4 sm:$0xff]   ;;  %6743 = vmatprep.subr.bf16.mxu0 %v10340_v36 }
 0x993   : > { %v5916_v3 = vpop.f32.mrf.mxu0  ;;  %6744 = vmatpush1.bf16.msra.mxu0 %v10338_v17 }
 0x994   : > { %v10344_v3 = vld [vmem:[%s13753_s6 + $0x184] ss:$12 sps:$4 sm:$0xff]  }
 0x995   : > { %v9910_v55 = vpop.f32.mrf.mxu0  ;;  %6745 = vmatprep.subr.bf16.mxu0 %v10344_v3 }
 0x996   : > { %v10345_v55 = vld [vmem:[%s13753_s6 + $0x188] ss:$12 sps:$4 sm:$0xff]  }
 0x99c   : > { %v5959_v25 = vpop.f32.mrf.mxu0 }
 0x99e   : > { %v9915_v6 = vpop.f32.mrf.mxu0 }
 0x9a0   : > { %v5962_v29 = vpop.f32.mrf.mxu0 }
 0x9a2   : > { %v9916_v38 = vpop.f32.mrf.mxu0 }
 0x9a4   : > { %v6005_v30 = vpop.f32.mrf.mxu0 }
 0x9a5   : > { %v6196_v40 = vpack.c.bf16 %v6005_v30, %v5959_v25  ;;  %v10342_v25 = vld [vmem:[%s13753_s6 + $0x180] ss:$12 sps:$4 sm:$0xff]  }
 0x9a6   : > { %v9921_v33 = vpop.f32.mrf.mxu0  ;;  %6746 = vmatpush1.bf16.msra.mxu0 %v10342_v25 }
 0x9a7   : > { %9964 = vmatmul.mubr.bf16.vlgmr.msra.gmra.mxu1 %v6196_v40  ;;  %9995 = vmatprep.subr.bf16.mxu0 %v10792_v7  ;;  %v8765_v40 = vld [vmem:[%s13756_s9 + $0x1] ss:$0 sm:$0xff] }
 0x9a8   : > { %v6008_v54 = vpop.f32.mrf.mxu0  ;;  %9972 = vmatpush3.bf16.msra.mxu1 %v10317_v8 }
 0x9a9   : > { %9973 = vmatprep.subr.bf16.mxu1 %v10321_v19 }
 0x9aa   : > { %v9922_v15 = vpop.f32.mrf.mxu0 }
 0x9ac   : > { %9974 = vmatpush3.bf16.msra.mxu1 %v10321_v19 }
 0x9ad   : > { %9975 = vmatprep.subr.bf16.mxu1 %v10325_v23 }
 0x9b0   : > { %9976 = vmatpush3.bf16.msra.mxu1 %v10325_v23 }
 0x9b1   : > { %9977 = vmatprep.subr.bf16.mxu1 %v10329_v18 }
 0x9b4   : > { %9978 = vmatpush3.bf16.msra.mxu1 %v10329_v18 }
 0x9b5   : > { %9979 = vmatprep.subr.bf16.mxu1 %v10333_v0 }
 0x9b8   : > { %9980 = vmatpush3.bf16.msra.mxu1 %v10333_v0 }
 0x9b9   : > { %9981 = vmatprep.subr.bf16.mxu1 %v10337_v59 }
 0x9bc   : > { %9982 = vmatpush3.bf16.msra.mxu1 %v10337_v59 }
 0x9bd   : > { %9983 = vmatprep.subr.bf16.mxu1 %v10341_v9 }
 0x9c0   : > { %9984 = vmatpush3.bf16.msra.mxu1 %v10341_v9 }
 0x9c1   : > { %9985 = vmatprep.subr.bf16.mxu1 %v10345_v55 }
 0x9c4   : > { %9986 = vmatpush3.bf16.msra.mxu1 %v10345_v55 }
 0x9c5   : > { %10007 = vmatprep.subr.bf16.mxu1 %v10792_v7 }
 0x9e6   : > { %v6051_v62 = vpop.f32.mrf.mxu1 }
 0x9e8   : > { %v9927_v14 = vpop.f32.mrf.mxu1 }
 0x9ea   : > { %v6054_v24 = vpop.f32.mrf.mxu1 }
 0x9ec   : > { %v9928_v53 = vpop.f32.mrf.mxu1 }
 0x9ee   : > { %v6097_v43 = vpop.f32.mrf.mxu0 }
 0x9ef   : > { %v6197_v34 = vpack.c.bf16 %v6097_v43, %v6051_v62 }
 0x9f0   : > { %v9933_v22 = vpop.f32.mrf.mxu0 }
 0x9f1   : > { %9967 = vmatprep.mubr.bf16.mxu1 %v6197_v34 }
 0x9f2   : > { %v6100_v41 = vpop.f32.mrf.mxu0 }
 0x9f4   : > { %v9934_v16 = vpop.f32.mrf.mxu0 }
 0xa1f   : > { %v6143_v1 = vpop.f32.mrf.mxu1 }
 0xa21   : > { %v9939_v44 = vpop.f32.mrf.mxu1 }
 0xa23   : > { %v6146_v50 = vpop.f32.mrf.mxu1 }
 0xa25   : > { %v9940_v63 = vpop.f32.mrf.mxu1 }
 0xa27   : > { %v6189_v31 = vpop.f32.mrf.mxu0 }
 0xa28   : > { %v6198_v11 = vpack.c.bf16 %v6189_v31, %v6143_v1 }
 0xa29   : > { %v9945_v39 = vpop.f32.mrf.mxu0 }
 0xa2a   : > { %9968 = vmatmul.mubr.bf16.gmra.mxu1 %v6198_v11 }
 0xa2b   : > { %v6192_v42 = vpop.f32.mrf.mxu0 }
 0xa2d   : > { %v9946_v60 = vpop.f32.mrf.mxu0 }
 0xa67   : > { %v9965_v6 = vpop.f32.mrf.mxu1 }
 0xa68   : > { %v6296_v62 = vadd.f32 %v9965_v6, %v8765_v40 }
 0xa69   : > { %v6287_v29 = vpop.f32.mrf.mxu1 }
 0xa6a   : > { %v6288_v54 = vadd.f32 %v8765_v40, %v6287_v29  ;;  %v6323_v34 = vsel %vm6318_vm14, %v6296_v62, 0.0 }
 0xa6b   : > { %v9966_v38 = vpop.f32.mrf.mxu1  ;;  %v6341_v16 = vrot.slane %v6323_v34, 4 }
 0xa6c   : > { %v6299_v15 = vadd.f32 %v9966_v38, %v8765_v40  ;;  %v6321_v24 = vsel %vm6318_vm14, %v6288_v54, 0.0 }
 0xa6d   : > { %v6290_v30 = vpop.f32.mrf.mxu1  ;;  %v6329_v22 = vrot.slane %v6321_v24, 4  ;;  %v6342_v63 = vadd.f32 %v6341_v16, %v6323_v34 }
 0xa6e   : > { %v6291_v33 = vadd.f32 %v8765_v40, %v6290_v30  ;;  %v6324_v53 = vsel %vm6318_vm14, %v6299_v15, 0.0 }
 0xa6f   : > { %v6347_v41 = vrot.slane %v6324_v53, 4  ;;  %v6330_v44 = vadd.f32 %v6329_v22, %v6321_v24  ;;  %v6343_v42 = vrot.slane %v6342_v63, 2 }
 0xa70   : > { %v6322_v14 = vsel %vm6318_vm14, %v6291_v33, 0.0 }
 0xa71   : > { %v6335_v43 = vrot.slane %v6322_v14, 4  ;;  %v6348_v50 = vadd.f32 %v6347_v41, %v6324_v53  ;;  %v6331_v11 = vrot.slane %v6330_v44, 2  ;;  %v6344_v48 = vadd.f32 %v6343_v42, %v6342_v63 }
 0xa73   : > { %v6336_v1 = vadd.f32 %v6335_v43, %v6322_v14  ;;  %v6349_v39 = vrot.slane %v6348_v50, 2  ;;  %v6332_v51 = vadd.f32 %v6331_v11, %v6330_v44  ;;  %v6345_v32 = vrot.slane %v6344_v48, 1 }
 0xa74   : > { %v10794_v43 = vmov 1983009808  }
 0xa75   : > { %v6337_v31 = vrot.slane %v6336_v1, 2  ;;  %v6350_v56 = vadd.f32 %v6349_v39, %v6348_v50  ;;  %v6333_v27 = vrot.slane %v6332_v51, 1  ;;  %v6346_v30 = vadd.f32 %v6345_v32, %v6344_v48 }
 0xa76   : > { %v6396_v34 = vunpack.c.l.s4 %v10794_v43 }
 0xa77   : > { %v6338_v60 = vadd.f32 %v6337_v31, %v6336_v1  ;;  %v6351_v23 = vrot.slane %v6350_v56, 1  ;;  %v6334_v9 = vadd.f32 %v6333_v27, %v6332_v51  ;;  %v6379_v44 = vmul.f32 0.14285715, %v6346_v30 }
 0xa79   : > { %v6339_v26 = vrot.slane %v6338_v60, 1  ;;  %v6352_v3 = vadd.f32 %v6351_v23, %v6350_v56  ;;  %v6377_v53 = vmul.f32 0.14285715, %v6334_v9 }
 0xa7b   : > { %v6340_v0 = vadd.f32 %v6339_v26, %v6338_v60  ;;  %v6380_v22 = vmul.f32 0.14285715, %v6352_v3  ;;  %v6385_v42 = vsel %vm4787_vm10, %v6377_v53, %v12791_v28  ;;  %v6397_v60 = vunpack.c.0.s8 %v6396_v34 }
 0xa7d   : > { %v6378_v33 = vmul.f32 0.14285715, %v6340_v0  ;;  %v6388_v51 = vsel %vm4787_vm10, %v6380_v22, %v12859_v49 }
 0xa7f   : > { %v6386_v50 = vsel %vm4787_vm10, %v6378_v33, %v12797_v4  ;;  %v6387_v4 = vsel %vm4787_vm10, %v6379_v44, %v12855_v5 }
 0xa80   : > { %v6409_v26 = vcombine.low %v6386_v50, %v6388_v51  ;;  %v6393_v28 = vcombine.low %v6385_v42, %v6387_v4 }
 0xaea   : > { %v9969_v8 = vpop.f32.mrf.mxu1 }
 0xaeb   : > { %v6312_v19 = vadd.f32 %v9969_v8, %v8765_v40 }
 0xaec   : > { %v6303_v45 = vpop.f32.mrf.mxu1 }
 0xaed   : > { %v6327_v21 = vsel %vm6318_vm14, %v6312_v19, 0.0  ;;  %v6304_v12 = vadd.f32 %v8765_v40, %v6303_v45  ;;  %v10795_v19 = vmov 1934713408  }
 0xaee   : > { %v6365_v18 = vrot.slane %v6327_v21, 4  ;;  %v9970_v10 = vpop.f32.mrf.mxu1  ;;  %v6460_v45 = vunpack.c.l.s4 %v10795_v19 }
 0xaef   : > { %v6325_v13 = vsel %vm6318_vm14, %v6304_v12, 0.0  ;;  %v6315_v58 = vadd.f32 %v9970_v10, %v8765_v40  ;;  %v6410_v10 = vcombine.high %v6386_v50, %v6388_v51 }
 0xaf0   : > { %v6366_v59 = vadd.f32 %v6365_v18, %v6327_v21  ;;  %v6353_v36 = vrot.slane %v6325_v13, 4  ;;  %v6306_v17 = vpop.f32.mrf.mxu1  ;;  %v6400_v18 = vsub.s32 %v6397_v60, %v13925_v46 }
 0xaf1   : > { %v6328_v55 = vsel %vm6318_vm14, %v6315_v58, 0.0  ;;  %v6307_v25 = vadd.f32 %v8765_v40, %v6306_v17  ;;  %v6394_v58 = vcombine.high %v6385_v42, %v6387_v4 }
 0xaf2   : > { %v6367_v6 = vrot.slane %v6366_v59, 2  ;;  %v6354_v29 = vadd.f32 %v6353_v36, %v6325_v13  ;;  %v6371_v38 = vrot.slane %v6328_v55, 4  ;;  %v6461_v13 = vunpack.c.0.s8 %v6460_v45  ;;  %v8806_v45 = vld [vmem:[%s13754_s7 + $0x6] sm:$0x7] }
 0xaf3   : > { %v6326_v54 = vsel %vm6318_vm14, %v6307_v25, 0.0  ;;  %v6417_v5 = vrot.slane %v6409_v26, %v6400_v18  ;;  %v6401_v3 = vrot.slane %v6393_v28, %v6400_v18  ;;  %v6424_v25 = vrot.slane %v6410_v10, %v6400_v18 }
 0xaf4   : > { %v6368_v15 = vadd.f32 %v6367_v6, %v6366_v59  ;;  %v6355_v62 = vrot.slane %v6354_v29, 2  ;;  %v6372_v14 = vadd.f32 %v6371_v38, %v6328_v55  ;;  %v6359_v24 = vrot.slane %v6326_v54, 4 }
 0xaf5   : > { %v6457_v38 = vcombine.low %v6401_v3, %v6417_v5  ;;  %v6458_v30 = vcombine.high %v6401_v3, %v6417_v5  ;;  %v6464_v33 = vsub.s32 %v6461_v13, %v13925_v46 }
 0xaf6   : > { %v6369_v41 = vrot.slane %v6368_v15, 1  ;;  %v6356_v16 = vadd.f32 %v6355_v62, %v6354_v29  ;;  %v6373_v1 = vrot.slane %v6372_v14, 2  ;;  %v6360_v40 = vadd.f32 %v6359_v24, %v6326_v54 }
 0xaf7   : > { %v6472_v34 = vrot.slane %v6458_v30, %v6464_v33 }
 0xaf8   : > { %v6370_v63 = vadd.f32 %v6369_v41, %v6368_v15  ;;  %v6357_v31 = vrot.slane %v6356_v16, 1  ;;  %v6374_v11 = vadd.f32 %v6373_v1, %v6372_v14  ;;  %v6361_v39 = vrot.slane %v6360_v40, 2 }
 0xaf9   : > { %v6465_v41 = vrot.slane %v6457_v38, %v6464_v33 }
 0xafa   : > { %v6358_v56 = vadd.f32 %v6357_v31, %v6356_v16  ;;  %v6375_v8 = vrot.slane %v6374_v11, 1  ;;  %v6362_v48 = vadd.f32 %v6361_v39, %v6360_v40  ;;  %v6383_v27 = vmul.f32 0.14285715, %v6370_v63 }
 0xafc   : > { %v6381_v23 = vmul.f32 0.14285715, %v6358_v56  ;;  %v6376_v21 = vadd.f32 %v6375_v8, %v6374_v11  ;;  %v6363_v12 = vrot.slane %v6362_v48, 1  ;;  %v6391_v59 = vsel %vm4787_vm10, %v6383_v27, %v12991_v35 }
 0xafd   : > { %v6408_v35 = vrot.slane %v6394_v58, %v6400_v18  ;;  %v13338_v27 = vrot.slane %v8806_v45, %v13928_v61 }
 0xafe   : > { %v6389_v49 = vsel %vm4787_vm10, %v6381_v23, %v12936_v47  ;;  %v6384_v32 = vmul.f32 0.14285715, %v6376_v21  ;;  %v6364_v0 = vadd.f32 %v6363_v12, %v6362_v48  ;;  %v13341_v23 = vrot.slane %v8806_v45, %v13927_v20 }
 0xaff   : > { %v6425_v17 = vcombine.low %v6389_v49, %v6391_v59  ;;  %v6426_v9 = vcombine.high %v6389_v49, %v6391_v59  ;;  %v6473_v24 = vcombine.low %v6408_v35, %v6424_v25  ;;  %v6474_v42 = vcombine.high %v6408_v35, %v6424_v25 }
 0xb00   : > { %v6382_v36 = vmul.f32 0.14285715, %v6364_v0  ;;  %v6392_v55 = vsel %vm4787_vm10, %v6384_v32, %v12995_v57  ;;  %v13350_v32 = vrot.slane %v8806_v45, %v13926_v37 }
 0xb01   : > { %v6433_v54 = vrot.slane %v6425_v17, %v6400_v18  ;;  %v6440_v62 = vrot.slane %v6426_v9, %v6400_v18  ;;  %v6481_v1 = vrot.slane %v6473_v24, %v6464_v33  ;;  %v6488_v48 = vrot.slane %v6474_v42, %v6464_v33 }
 0xb02   : > { %v6390_v47 = vsel %vm4787_vm10, %v6382_v36, %v12940_v2 }
 0xb03   : > { %v6441_v6 = vcombine.low %v6390_v47, %v6392_v55  ;;  %v6442_v29 = vcombine.high %v6390_v47, %v6392_v55 }
 0xb05   : > { %v6449_v15 = vrot.slane %v6441_v6, %v6400_v18  ;;  %v6456_v14 = vrot.slane %v6442_v29, %v6400_v18 }
 0xb07   : > { %v6489_v53 = vcombine.low %v6433_v54, %v6449_v15  ;;  %v6490_v43 = vcombine.high %v6433_v54, %v6449_v15  ;;  %v6505_v57 = vcombine.low %v6440_v62, %v6456_v14  ;;  %v6506_v40 = vcombine.high %v6440_v62, %v6456_v14 }
 0xb09   : > { %v6504_v22 = vrot.slane %v6490_v43, %v6464_v33  ;;  %v6497_v2 = vrot.slane %v6489_v53, %v6464_v33  ;;  %v6513_v16 = vrot.slane %v6505_v57, %v6464_v33  ;;  %v6520_v56 = vrot.slane %v6506_v40, %v6464_v33 }
 0xb0b   : > { %v6521_v44 = vcombine.low %v6465_v41, %v6497_v2  ;;  %v6522_v50 = vcombine.high %v6465_v41, %v6497_v2  ;;  %v6523_v63 = vcombine.low %v6472_v34, %v6504_v22  ;;  %v6524_v31 = vcombine.high %v6472_v34, %v6504_v22 }
 0xb0c   : > { %v6525_v11 = vcombine.low %v6481_v1, %v6513_v16  ;;  %v6526_v39 = vcombine.high %v6481_v1, %v6513_v16  ;;  %v6527_v4 = vcombine.low %v6488_v48, %v6520_v56  ;;  %v6528_v26 = vcombine.high %v6488_v48, %v6520_v56 }
 0xb0d   : > { %v6583_v60 = vpack.c.bf16 %v6522_v50, %v6521_v44  ;;  %v6584_v51 = vpack.c.bf16 %v6524_v31, %v6523_v63 }
 0xb0e   : > { %v6585_v8 = vpack.c.bf16 %v6526_v39, %v6525_v11  ;;  %v6586_v19 = vpack.c.bf16 %v6528_v26, %v6527_v4 }
 0xb0f   : > { %6764 = vmatmul.mubr.bf16.vlgmr.msra.gmra.mxu0 %v6583_v60  ;;  %9987 = vmatprep.mubr.bf16.mxu1 %v6583_v60 }
 0xb10   : > { %9988 = vmatmul.mubr.bf16.vlgmr.msra.gmra.mxu1 %v6584_v51  ;;  %6773 = vmatprep.mubr.bf16.mxu0 %v13924_v52 }
 0xb11   : > { %9991 = vmatprep.mubr.bf16.mxu1 %v6585_v8 }
 0xb17   : > { %6774 = vmatmul.mubr.bf16.gmra.mxu0 %v6584_v51 }
 0xb18   : > { %9992 = vmatmul.mubr.bf16.gmra.mxu1 %v6586_v19  ;;  %6783 = vmatprep.mubr.bf16.mxu0 %v13924_v52 }
 0xb19   : > { %10009 = vmatprep.mubr.msk.bf16.mxu1 %vm10793_vm11, %v10792_v7 }
 0xb1f   : > { %6784 = vmatmul.mubr.bf16.gmra.mxu0 %v6585_v8 }
 0xb20   : > { %6793 = vmatprep.mubr.bf16.mxu0 %v13924_v52 }
 0xb27   : > { %6794 = vmatmul.mubr.bf16.gmra.mxu0 %v6586_v19 }
 0xb28   : > { %9997 = vmatprep.mubr.msk.bf16.mxu0 %vm10793_vm11, %v10792_v7 }
 0xbcf   : > { %v6765_v21 = vpop.f32.mrf.mxu0 }
 0xbd0   : > { %v9989_v12 = vpop.f32.mrf.mxu1  ;;  %v6766_v17 = vadd.f32 %v6765_v21, %v13350_v32 }
 0xbd1   : > { %v13344_v28 = vadd.f32 %v9989_v12, %v13338_v27  ;;  %v6767_v18 = vpop.f32.mrf.mxu0 }
 0xbd2   : > { %v6768_v10 = vadd.f32 %v6767_v18, %v13341_v23  ;;  %v13347_v49 = vpop.f32.mrf.mxu1  ;;  %v6869_v38 = vpack.c.bf16 %v6766_v17, %v6766_v17 }
 0xbd3   : > { %v6769_v0 = vpop.f32.mrf.mxu0  ;;  %v6839_v4 = vadd.f32 %v13347_v49, %v13338_v27 }
 0xbd4   : > { %v6877_v13 = vpack.c.bf16 %v6768_v10, %v6768_v10  ;;  %v9990_v58 = vpop.f32.mrf.mxu1  ;;  %v6770_v24 = vadd.f32 %v6769_v0, %v13350_v32 }
 0xbd5   : > { %v13353_v5 = vadd.f32 %v9990_v58, %v13338_v27  ;;  %v6771_v59 = vpop.f32.mrf.mxu0  ;;  %v6885_v12 = vpack.c.bf16 %v6839_v4, %v6839_v4 }
 0xbd6   : > { %v13355_v36 = vpop.f32.mrf.mxu1  ;;  %9996 = vmatpush3.bf16.xpose.msra.mxu0 %v6877_v13  ;;  %v6772_v3 = vadd.f32 %v6771_v59, %v13341_v23  ;;  %v6870_v41 = vpack.c.bf16 %v6770_v24, %v6770_v24 }
 0xbd7   : > { %v6775_v9 = vpop.f32.mrf.mxu0  ;;  %10001 = vmatprep.subr.bf16.mxu0 %v10792_v7  ;;  %v7329_v0 = vsel %vm5829_vm12, %v6885_v12, 0  ;;  %v6842_v13 = vadd.f32 %v13355_v36, %v13338_v27 }
 0xbd8   : > { %v9993_v55 = vpop.f32.mrf.mxu1  ;;  %v6878_v35 = vpack.c.bf16 %v6772_v3, %v6772_v3  ;;  %v6776_v53 = vadd.f32 %v6775_v9, %v13350_v32 }
 0xbd9   : > { %v13361_v47 = vadd.f32 %v9993_v55, %v13338_v27  ;;  %v6777_v25 = vpop.f32.mrf.mxu0 }
 0xbda   : > { %v6778_v6 = vadd.f32 %v6777_v25, %v13341_v23  ;;  %v6854_v29 = vpop.f32.mrf.mxu1  ;;  %v6871_v2 = vpack.c.bf16 %v6776_v53, %v6776_v53 }
 0xbdb   : > { %v13365_v30 = vadd.f32 %v6854_v29, %v13338_v27  ;;  %v6779_v33 = vpop.f32.mrf.mxu0 }
 0xbdc   : > { %v6879_v54 = vpack.c.bf16 %v6778_v6, %v6778_v6  ;;  %v9994_v15 = vpop.f32.mrf.mxu1  ;;  %v6780_v50 = vadd.f32 %v6779_v33, %v13350_v32 }
 0xbdd   : > { %v13368_v62 = vadd.f32 %v9994_v15, %v13338_v27  ;;  %v6781_v14 = vpop.f32.mrf.mxu0  ;;  %9998 = vmatmul.mubr.bf16.vlgmr.msra.gmra.mxu0 %v6869_v38 }
 0xbde   : > { %10002 = vmatpush3.bf16.xpose.msra.mxu0 %v6878_v35  ;;  %10008 = vmatpush3.bf16.xpose.msra.mxu1 %v6879_v54  ;;  %v6782_v57 = vadd.f32 %v6781_v14, %v13341_v23  ;;  %v6872_v60 = vpack.c.bf16 %v6780_v50, %v6780_v50  ;;  %v13414_v25 = vpop.f32.mrf.mxu1 }
 0xbdf   : > { %v6785_v43 = vpop.f32.mrf.mxu0  ;;  %10003 = vmatprep.mubr.msk.bf16.mxu0 %vm10793_vm11, %v10792_v7  ;;  %10013 = vmatprep.subr.bf16.mxu0 %v10792_v7 }
 0xbe0   : > { %10019 = vmatprep.subr.bf16.mxu1 %v10792_v7  ;;  %v6880_v1 = vpack.c.bf16 %v6782_v57, %v6782_v57  ;;  %v6786_v63 = vadd.f32 %v6785_v43, %v13350_v32 }
 0xbe1   : > { %v6787_v34 = vpop.f32.mrf.mxu0 }
 0xbe2   : > { %v6788_v22 = vadd.f32 %v6787_v34, %v13341_v23  ;;  %v6873_v51 = vpack.c.bf16 %v6786_v63, %v6786_v63 }
 0xbe3   : > { %v6789_v16 = vpop.f32.mrf.mxu0 }
 0xbe4   : > { %v6881_v40 = vpack.c.bf16 %v6788_v22, %v6788_v22  ;;  %v6790_v19 = vadd.f32 %v6789_v16, %v13350_v32 }
 0xbe5   : > { %v6791_v44 = vpop.f32.mrf.mxu0  ;;  %10004 = vmatmul.mubr.bf16.vlgmr.msra.gmra.mxu0 %v6870_v41  ;;  %10010 = vmatmul.mubr.bf16.vlgmr.msra.gmra.mxu1 %v6871_v2 }
 0xbe6   : > { %10014 = vmatpush3.bf16.xpose.msra.mxu0 %v6880_v1  ;;  %10020 = vmatpush3.bf16.xpose.msra.mxu1 %v6881_v40  ;;  %v6792_v11 = vadd.f32 %v6791_v44, %v13341_v23  ;;  %v6874_v18 = vpack.c.bf16 %v6790_v19, %v6790_v19 }
 0xbe7   : > { %v6795_v31 = vpop.f32.mrf.mxu0  ;;  %10015 = vmatprep.mubr.msk.bf16.mxu0 %vm10793_vm11, %v10792_v7  ;;  %10021 = vmatprep.mubr.msk.bf16.mxu1 %vm10793_vm11, %v10792_v7 }
 0xbe8   : > { %10025 = vmatprep.subr.bf16.mxu0 %v10792_v7  ;;  %10031 = vmatprep.subr.bf16.mxu1 %v10792_v7  ;;  %v6882_v8 = vpack.c.bf16 %v6792_v11, %v6792_v11  ;;  %v6796_v45 = vadd.f32 %v6795_v31, %v13350_v32 }
 0xbe9   : > { %v6797_v39 = vpop.f32.mrf.mxu0 }
 0xbea   : > { %v6798_v42 = vadd.f32 %v6797_v39, %v13341_v23  ;;  %v6875_v10 = vpack.c.bf16 %v6796_v45, %v6796_v45 }
 0xbeb   : > { %v6799_v56 = vpop.f32.mrf.mxu0 }
 0xbec   : > { %v6883_v48 = vpack.c.bf16 %v6798_v42, %v6798_v42  ;;  %v6800_v58 = vadd.f32 %v6799_v56, %v13350_v32 }
 0xbed   : > { %v6801_v26 = vpop.f32.mrf.mxu0  ;;  %10016 = vmatmul.mubr.bf16.vlgmr.msra.gmra.mxu0 %v6872_v60  ;;  %10022 = vmatmul.mubr.bf16.vlgmr.msra.gmra.mxu1 %v6873_v51 }
 0xbee   : > { %10026 = vmatpush3.bf16.xpose.msra.mxu0 %v6882_v8  ;;  %10032 = vmatpush3.bf16.xpose.msra.mxu1 %v6883_v48  ;;  %v6802_v21 = vadd.f32 %v6801_v26, %v13341_v23  ;;  %v6886_v23 = vpack.c.bf16 %v6842_v13, %v6842_v13  ;;  %v6876_v59 = vpack.c.bf16 %v6800_v58, %v6800_v58 }
 0xbef   : > { %10027 = vmatprep.mubr.msk.bf16.mxu0 %vm10793_vm11, %v10792_v7  ;;  %10033 = vmatprep.mubr.msk.bf16.mxu1 %vm10793_vm11, %v10792_v7 }
 0xbf0   : > { %10037 = vmatprep.subr.bf16.mxu0 %v10792_v7  ;;  %10043 = vmatprep.subr.bf16.mxu1 %v10792_v7  ;;  %v6884_v49 = vpack.c.bf16 %v6802_v21, %v6802_v21  ;;  %v7375_v36 = vsel %vm5829_vm12, %v6886_v23, 0 }
 0xbf5   : > { %10028 = vmatmul.mubr.bf16.vlgmr.msra.gmra.mxu0 %v6874_v18  ;;  %10034 = vmatmul.mubr.bf16.vlgmr.msra.gmra.mxu1 %v6875_v10 }
 0xbf6   : > { %10038 = vmatpush3.bf16.xpose.msra.mxu0 %v6884_v49  ;;  %10044 = vmatpush3.bf16.msra.mxu1 %v7329_v0 }
 0xbf7   : > { %10039 = vmatprep.mubr.msk.bf16.mxu0 %vm10793_vm11, %v10792_v7  ;;  %10049 = vmatprep.subr.bf16.mxu0 %v10792_v7 }
 0xbf8   : > { %10045 = vmatprep.mubr.msk.bf16.mxu1 %vm10793_vm11, %v10792_v7  ;;  %10055 = vmatprep.subr.bf16.mxu1 %v10792_v7 }
 0xbfd   : > { %10040 = vmatmul.mubr.bf16.vlgmr.msra.gmra.mxu0 %v6876_v59 }
 0xbfe   : > { %10050 = vmatpush3.bf16.msra.mxu0 %v7375_v36  ;;  %10051 = vmatprep.mubr.msk.bf16.mxu0 %vm10793_vm11, %v10792_v7 }
 0xbff   : > { %10061 = vmatprep.subr.bf16.mxu0 %v10792_v7 }
 0xc9d   : > { %v6927_v32 = vpop.f32.mrf.mxu0 }
 0xc9e   : > { %v7213_v17 = vmul.f32 0.17677669, %v6927_v32 }
 0xc9f   : > { %v9999_v9 = vpop.f32.mrf.mxu0 }
 0xca0   : > { %v7229_v3 = vsel %vm5729_vm13, %v7213_v17, -inf }
 0xca1   : > { %7230 = vmax.xlane.f32.xlu0 %v7229_v3  ;;  %v6930_v55 = vpop.f32.mrf.mxu0 }
 0xca3   : > { %v10000_v6 = vpop.f32.mrf.mxu0 }
 0xca5   : > { %v6967_v29 = vpop.f32.mrf.mxu0  ;;  %v7007_v38 = vpop.f32.mrf.mxu1 }
 0xca6   : > { %v7214_v33 = vmul.f32 0.17677669, %v6967_v29  ;;  %v7215_v35 = vmul.f32 0.17677669, %v7007_v38 }
 0xca7   : > { %v10005_v54 = vpop.f32.mrf.mxu0  ;;  %v10011_v15 = vpop.f32.mrf.mxu1 }
 0xca8   : > { %v7235_v14 = vsel %vm5729_vm13, %v7215_v35, -inf  ;;  %v7232_v24 = vsel %vm5729_vm13, %v7214_v33, -inf }
 0xca9   : > { %v7010_v53 = vpop.f32.mrf.mxu1  ;;  %7236 = vmax.xlane.f32.xlu0 %v7235_v14  ;;  %7233 = vmax.xlane.f32.xlu1 %v7232_v24  ;;  %v6970_v43 = vpop.f32.mrf.mxu0 }
 0xcab   : > { %v10006_v57 = vpop.f32.mrf.mxu0  ;;  %v10012_v34 = vpop.f32.mrf.mxu1 }
 0xcad   : > { %v7047_v22 = vpop.f32.mrf.mxu0  ;;  %v7087_v41 = vpop.f32.mrf.mxu1 }
 0xcae   : > { %v7216_v2 = vmul.f32 0.17677669, %v7047_v22  ;;  %v7217_v16 = vmul.f32 0.17677669, %v7087_v41 }
 0xcaf   : > { %v10017_v1 = vpop.f32.mrf.mxu0  ;;  %v10023_v40 = vpop.f32.mrf.mxu1 }
 0xcb0   : > { %v7241_v44 = vsel %vm5729_vm13, %v7217_v16, -inf  ;;  %v7238_v50 = vsel %vm5729_vm13, %v7216_v2, -inf }
 0xcb1   : > { %v7090_v63 = vpop.f32.mrf.mxu1  ;;  %7242 = vmax.xlane.f32.xlu0 %v7241_v44  ;;  %7239 = vmax.xlane.f32.xlu1 %v7238_v50  ;;  %v7050_v31 = vpop.f32.mrf.mxu0 }
 0xcb3   : > { %v10018_v11 = vpop.f32.mrf.mxu0  ;;  %v10024_v39 = vpop.f32.mrf.mxu1 }
 0xcb5   : > { %v7127_v42 = vpop.f32.mrf.mxu0  ;;  %v7167_v60 = vpop.f32.mrf.mxu1 }
 0xcb6   : > { %v7218_v51 = vmul.f32 0.17677669, %v7127_v42  ;;  %v7219_v56 = vmul.f32 0.17677669, %v7167_v60 }
 0xcb7   : > { %v10029_v8 = vpop.f32.mrf.mxu0  ;;  %v10035_v48 = vpop.f32.mrf.mxu1 }
 0xcb8   : > { %v7247_v4 = vsel %vm5729_vm13, %v7219_v56, -inf  ;;  %v7244_v26 = vsel %vm5729_vm13, %v7218_v51, -inf }
 0xcb9   : > { %v7170_v19 = vpop.f32.mrf.mxu1  ;;  %7248 = vmax.xlane.f32.xlu0 %v7247_v4  ;;  %7245 = vmax.xlane.f32.xlu1 %v7244_v26  ;;  %v7130_v45 = vpop.f32.mrf.mxu0 }
 0xcbb   : > { %v10030_v21 = vpop.f32.mrf.mxu0  ;;  %v10036_v12 = vpop.f32.mrf.mxu1 }
 0xcbc   : > { %v6887_v12 = vpack.c.bf16 %v13344_v28, %v13344_v28  ;;  %v6889_v28 = vpack.c.bf16 %v13365_v30, %v13365_v30  ;;  %v6858_v30 = vadd.f32 %v13414_v25, %v13338_v27 }
 0xcbd   : > { %v7207_v18 = vpop.f32.mrf.mxu0 }
 0xcbe   : > { %v7220_v10 = vmul.f32 0.17677669, %v7207_v18  ;;  %v6890_v27 = vpack.c.bf16 %v6858_v30, %v6858_v30 }
 0xcbf   : > { %v10041_v49 = vpop.f32.mrf.mxu0 }
 0xcc0   : > { %v7250_v0 = vsel %vm5729_vm13, %v7220_v10, -inf }
 0xcc1   : > { %7251 = vmax.xlane.f32.xlu1 %v7250_v0  ;;  %v7210_v13 = vpop.f32.mrf.mxu0 }
 0xcc2   : > { %v7421_v13 = vsel %vm5829_vm12, %v6887_v12, 0 }
 0xcc3   : > { %v10042_v58 = vpop.f32.mrf.mxu0 }
 0xd2a   : > { %v7231_v23 = vpop.xlane.xlu0 %7230 }
 0xd2b   : > { %v7253_v59 = vsub.f32 %v7213_v17, %v7231_v23 }
 0xd2d   : > { %v7261_v36 = vmul.f32 1.442695, %v7253_v59 }
 0xd2f   : > { %10690 = vpow2.f32 %v7261_v36  ;;  %v6888_v36 = vpack.c.bf16 %v13353_v5, %v13353_v5 }
 0xd32   : > { %v7237_v32 = vpop.xlane.xlu0 %7236  ;;  %v7234_v9 = vpop.xlane.xlu1 %7233 }
 0xd33   : > { %v7255_v3 = vsub.f32 %v7215_v35, %v7237_v32  ;;  %v7254_v55 = vsub.f32 %v7214_v33, %v7234_v9 }
 0xd35   : > { %v7265_v6 = vmul.f32 1.442695, %v7255_v3  ;;  %v7263_v29 = vmul.f32 1.442695, %v7254_v55 }
 0xd37   : > { %10692 = vpow2.f32 %v7265_v6 }
 0xd38   : > { %10694 = vpow2.f32 %v7263_v29  ;;  %v7513_v29 = vsel %vm5829_vm12, %v6889_v28, 0 }
 0xd3a   : > { %v7243_v38 = vpop.xlane.xlu0 %7242  ;;  %v7240_v54 = vpop.xlane.xlu1 %7239 }
 0xd3b   : > { %v7257_v15 = vsub.f32 %v7217_v16, %v7243_v38  ;;  %v7256_v14 = vsub.f32 %v7216_v2, %v7240_v54  ;;  %v7467_v38 = vsel %vm5829_vm12, %v6888_v36, 0 }
 0xd3c   : > { %v10691_v24 = vpop.eup %10690 }
 0xd3d   : > { %v7269_v53 = vmul.f32 1.442695, %v7257_v15  ;;  %v7267_v43 = vmul.f32 1.442695, %v7256_v14  ;;  %v7277_v57 = vsel %vm5729_vm13, %v10691_v24, 0.0  ;;  %v6891_v15 = vpack.c.bf16 %v13361_v47, %v13361_v47 }
 0xd3e   : > { %7278 = vadd.xlane.f32.xlu0 %v7277_v57  ;;  %v7559_v47 = vsel %vm5829_vm12, %v6890_v27, 0 }
 0xd3f   : > { %10696 = vpow2.f32 %v7269_v53  ;;  %v7605_v57 = vsel %vm5829_vm12, %v6891_v15, 0 }
 0xd40   : > { %10698 = vpow2.f32 %v7267_v43 }
 0xd42   : > { %v7249_v17 = vpop.xlane.xlu0 %7248  ;;  %v7246_v34 = vpop.xlane.xlu1 %7245 }
 0xd43   : > { %v7259_v35 = vsub.f32 %v7219_v56, %v7249_v17  ;;  %v7258_v33 = vsub.f32 %v7218_v51, %v7246_v34  ;;  %v10346_v17 = vld [vmem:[%s13755_s8 + $0xb8] sm:$0xff]  }
 0xd44   : > { %v10693_v22 = vpop.eup %10692 }
 0xd45   : > { %v10695_v41 = vpop.eup %10694  ;;  %v7273_v1 = vmul.f32 1.442695, %v7259_v35  ;;  %v7271_v40 = vmul.f32 1.442695, %v7258_v33  ;;  %v7283_v44 = vsel %vm5729_vm13, %v10693_v22, 0.0 }
 0xd46   : > { %7284 = vadd.xlane.f32.xlu0 %v7283_v44  ;;  %v7280_v2 = vsel %vm5729_vm13, %v10695_v41, 0.0  ;;  %v10347_v44 = vld [vmem:[%s13755_s8 + $0xb0] sm:$0xff]  }
 0xd47   : > { %10700 = vpow2.f32 %v7273_v1  ;;  %7281 = vadd.xlane.f32.xlu1 %v7280_v2 }
 0xd48   : > { %10702 = vpow2.f32 %v7271_v40 }
 0xd4a   : > { %v7252_v16 = vpop.xlane.xlu1 %7251 }
 0xd4b   : > { %v7260_v50 = vsub.f32 %v7220_v10, %v7252_v16 }
 0xd4c   : > { %v10697_v63 = vpop.eup %10696 }
 0xd4d   : > { %v13426_v31 = vpop.eup %10698  ;;  %v7275_v11 = vmul.f32 1.442695, %v7260_v50  ;;  %v7289_v39 = vsel %vm5729_vm13, %v10697_v63, 0.0 }
 0xd4e   : > { %7290 = vadd.xlane.f32.xlu0 %v7289_v39  ;;  %v7286_v42 = vsel %vm5729_vm13, %v13426_v31, 0.0  ;;  %v10351_v39 = vld [vmem:[%s13755_s8 + $0x90] sm:$0xff]  }
 0xd4f   : > { %10704 = vpow2.f32 %v7275_v11  ;;  %7287 = vadd.xlane.f32.xlu1 %v7286_v42  ;;  %v10350_v11 = vld [vmem:[%s13755_s8 + $0x98] sm:$0xff]   ;;  %v10352_v42 = vld [vmem:[%s13755_s8 + $0x88] sm:$0xff]  }
 0xd54   : > { %v13431_v60 = vpop.eup %10700 }
 0xd55   : > { %v13433_v51 = vpop.eup %10702  ;;  %v7295_v56 = vsel %vm5729_vm13, %v13431_v60, 0.0 }
 0xd56   : > { %7296 = vadd.xlane.f32.xlu0 %v7295_v56  ;;  %v7292_v8 = vsel %vm5729_vm13, %v13433_v51, 0.0 }
 0xd57   : > { %7293 = vadd.xlane.f32.xlu1 %v7292_v8 }
 0xd5c   : > { %v13439_v48 = vpop.eup %10704 }
 0xd5d   : > { %v7298_v4 = vsel %vm5729_vm13, %v13439_v48, 0.0 }
 0xd5e   : > { %7299 = vadd.xlane.f32.xlu1 %v7298_v4 }
 0xdc7   : > { %v7279_v26 = vpop.xlane.xlu0 %7278 }
 0xdc8   : > { %10706 = vrcp.f32 %v7279_v26 }
 0xdcf   : > { %v7285_v19 = vpop.xlane.xlu0 %7284 }
 0xdd0   : > { %10708 = vrcp.f32 %v7285_v19  ;;  %v7282_v45 = vpop.xlane.xlu1 %7281 }
 0xdd1   : > { %10710 = vrcp.f32 %v7282_v45 }
 0xdd5   : > { %v10707_v21 = vpop.eup %10706 }
 0xdd6   : > { %v7302_v18 = vmul.f32 %v10707_v21, %v10691_v24 }
 0xdd7   : > { %v7291_v10 = vpop.xlane.xlu0 %7290 }
 0xdd8   : > { %v7317_v49 = vpack.c.bf16 %v7302_v18, %v7302_v18  ;;  %10712 = vrcp.f32 %v7291_v10  ;;  %v7288_v0 = vpop.xlane.xlu1 %7287 }
 0xdd9   : > { %10714 = vrcp.f32 %v7288_v0 }
 0xdda   : > { %10046 = vmatmul.mubr.msk.bf16.vlgmr.msra.gmra.mxu1 %vm5729_vm13, %v7317_v49 }
 0xddb   : > { %10056 = vmatpush3.bf16.msra.mxu1 %v7421_v13  ;;  %10057 = vmatprep.mubr.msk.bf16.mxu1 %vm10793_vm11, %v10792_v7 }
 0xddc   : > { %10067 = vmatprep.subr.bf16.mxu1 %v10792_v7 }
 0xddd   : > { %v10709_v58 = vpop.eup %10708 }
 0xdde   : > { %v10711_v23 = vpop.eup %10710  ;;  %v7306_v59 = vmul.f32 %v10709_v58, %v10693_v22  ;;  %v6892_v22 = vpack.c.bf16 %v13368_v62, %v13368_v62  ;;  %v10348_v62 = vld [vmem:[%s13755_s8 + $0xa8] sm:$0xff]  }
 0xddf   : > { %v7304_v32 = vmul.f32 %v10711_v23, %v10695_v41  ;;  %v7297_v9 = vpop.xlane.xlu0 %7296 }
 0xde0   : > { %v7319_v3 = vpack.c.bf16 %v7306_v59, %v7306_v59  ;;  %10716 = vrcp.f32 %v7297_v9  ;;  %v7294_v55 = vpop.xlane.xlu1 %7293  ;;  %v7651_v2 = vsel %vm5829_vm12, %v6892_v22, 0  ;;  %v10365_v22 = vld [vmem:[%s13753_s6 + $0x2c0] ss:$12 sps:$4 sm:$0xff]  }
 0xde1   : > { %v7318_v6 = vpack.c.bf16 %v7304_v32, %v7304_v32  ;;  %10718 = vrcp.f32 %v7294_v55 }
 0xde2   : > { %10058 = vmatmul.mubr.msk.bf16.vlgmr.msra.gmra.mxu1 %vm5729_vm13, %v7319_v3 }
 0xde3   : > { %10052 = vmatmul.mubr.msk.bf16.vlgmr.msra.gmra.mxu0 %vm5729_vm13, %v7318_v6  ;;  %10068 = vmatpush3.bf16.msra.mxu1 %v7513_v29 }
 0xde4   : > { %10062 = vmatpush3.bf16.msra.mxu0 %v7467_v38  ;;  %10063 = vmatprep.mubr.msk.bf16.mxu0 %vm10793_vm11, %v10792_v7 }
 0xde5   : > { %v10713_v5 = vpop.eup %10712  ;;  %10069 = vmatprep.mubr.msk.bf16.mxu1 %vm10793_vm11, %v10792_v7  ;;  %10073 = vmatprep.subr.bf16.mxu0 %v10792_v7 }
 0xde6   : > { %v10715_v54 = vpop.eup %10714  ;;  %v7310_v14 = vmul.f32 %v10713_v5, %v10697_v63  ;;  %10079 = vmatprep.subr.bf16.mxu1 %v10792_v7 }
 0xde7   : > { %v7308_v25 = vmul.f32 %v10715_v54, %v13426_v31  ;;  %v7300_v24 = vpop.xlane.xlu1 %7299  ;;  %v10349_v31 = vld [vmem:[%s13755_s8 + $0xa0] sm:$0xff]  }
 0xde8   : > { %v7321_v53 = vpack.c.bf16 %v7310_v14, %v7310_v14  ;;  %10720 = vrcp.f32 %v7300_v24 }
 0xde9   : > { %v7320_v43 = vpack.c.bf16 %v7308_v25, %v7308_v25 }
 0xdea   : > { %10070 = vmatmul.mubr.msk.bf16.vlgmr.msra.gmra.mxu1 %vm5729_vm13, %v7321_v53  ;;  %v10356_v53 = vld [vmem:[%s13753_s6 + $0x2ec] ss:$12 sps:$4 sm:$0xff]  }
 0xdeb   : > { %10064 = vmatmul.mubr.msk.bf16.vlgmr.msra.gmra.mxu0 %vm5729_vm13, %v7320_v43  ;;  %10080 = vmatpush3.bf16.msra.mxu1 %v7605_v57  ;;  %v10354_v43 = vld [vmem:[%s13753_s6 + $0x2e8] ss:$12 sps:$4 sm:$0xff]   ;;  %v10357_v57 = vld [vmem:[%s13753_s6 + $0x2f0] ss:$12 sps:$4 sm:$0xff]  }
 0xdec   : > { %10074 = vmatpush3.bf16.msra.mxu0 %v7559_v47  ;;  %10075 = vmatprep.mubr.msk.bf16.mxu0 %vm10793_vm11, %v10792_v7  ;;  %v10358_v47 = vld [vmem:[%s13753_s6 + $0x2d0] ss:$12 sps:$4 sm:$0xff]  }
 0xded   : > { %v10717_v34 = vpop.eup %10716  ;;  %10081 = vmatprep.mubr.msk.bf16.mxu1 %vm10793_vm11, %v10792_v7  ;;  %10085 = vmatprep.subr.bf16.mxu0 %v10792_v7 }
 0xdee   : > { %v10719_v35 = vpop.eup %10718  ;;  %v7314_v33 = vmul.f32 %v10717_v34, %v13431_v60  ;;  %10091 = vmatprep.subr.bf16.mxu1 %v10346_v17  ;;  %v10361_v34 = vld [vmem:[%s13753_s6 + $0x2d8] ss:$12 sps:$4 sm:$0xff]  }
 0xdef   : > { %v7312_v41 = vmul.f32 %v10719_v35, %v13433_v51  ;;  %v10364_v35 = vld [vmem:[%s13753_s6 + $0x2bc] ss:$12 sps:$4 sm:$0xff]  }
 0xdf0   : > { %v7323_v1 = vpack.c.bf16 %v7314_v33, %v7314_v33  ;;  %v10362_v33 = vld [vmem:[%s13753_s6 + $0x2b8] ss:$12 sps:$4 sm:$0xff]  }
 0xdf1   : > { %v7322_v40 = vpack.c.bf16 %v7312_v41, %v7312_v41  ;;  %v10368_v41 = vld [vmem:[%s13753_s6 + $0x2a4] ss:$12 sps:$4 sm:$0xff]  }
 0xdf2   : > { %10082 = vmatmul.mubr.msk.bf16.vlgmr.msra.gmra.mxu1 %vm5729_vm13, %v7323_v1  ;;  %v10366_v1 = vld [vmem:[%s13753_s6 + $0x2a0] ss:$12 sps:$4 sm:$0xff]  }
 0xdf3   : > { %10076 = vmatmul.mubr.msk.bf16.vlgmr.msra.gmra.mxu0 %vm5729_vm13, %v7322_v40  ;;  %10092 = vmatpush3.bf16.msra.mxu1 %v10346_v17  ;;  %v10360_v17 = vld [vmem:[%s13753_s6 + $0x2d4] ss:$12 sps:$4 sm:$0xff]  }
 0xdf4   : > { %10086 = vmatpush3.bf16.msra.mxu0 %v7651_v2  ;;  %10087 = vmatprep.mubr.msk.bf16.mxu0 %vm10793_vm11, %v10792_v7  ;;  %v10369_v40 = vld [vmem:[%s13753_s6 + $0x2a8] ss:$12 sps:$4 sm:$0xff]  }
 0xdf5   : > { %v10721_v16 = vpop.eup %10720  ;;  %10093 = vmatprep.subr.bf16.mxu1 %v10347_v44  ;;  %8103 = vmatprep.subr.bf16.mxu0 %v10356_v53  ;;  %v10370_v2 = vld [vmem:[%s13753_s6 + $0x288] ss:$12 sps:$4 sm:$0xff]  }
 0xdf6   : > { %v7316_v50 = vmul.f32 %v10721_v16, %v13439_v48  ;;  %v10376_v16 = vld [vmem:[%s13753_s6 + $0x274] ss:$12 sps:$4 sm:$0xff]  }
 0xdf7   : > { %10094 = vmatpush3.bf16.msra.mxu1 %v10347_v44  ;;  %v10372_v44 = vld [vmem:[%s13753_s6 + $0x28c] ss:$12 sps:$4 sm:$0xff]  }
 0xdf8   : > { %v7324_v63 = vpack.c.bf16 %v7316_v50, %v7316_v50  ;;  %10095 = vmatprep.subr.bf16.mxu1 %v10348_v62  ;;  %v10374_v50 = vld [vmem:[%s13753_s6 + $0x270] ss:$12 sps:$4 sm:$0xff]  }
 0xdfb   : > { %10088 = vmatmul.mubr.msk.bf16.vlgmr.msra.gmra.mxu0 %vm5729_vm13, %v7324_v63  ;;  %10096 = vmatpush3.bf16.msra.mxu1 %v10348_v62  ;;  %v10373_v62 = vld [vmem:[%s13753_s6 + $0x290] ss:$12 sps:$4 sm:$0xff]   ;;  %v10377_v63 = vld [vmem:[%s13753_s6 + $0x278] ss:$12 sps:$4 sm:$0xff]  }
 0xdfc   : > { %10097 = vmatprep.subr.bf16.mxu1 %v10349_v31  ;;  %8135 = vmatprep.mubr.bf16.mxu0 %v13924_v52  ;;  %v10353_v52 = vld [vmem:[%s13755_s8 + $0x80] sm:$0xff]  }
 0xdfd   : > { %8104 = vmatpush1.bf16.msra.mxu0 %v10354_v43 }
 0xdfe   : > { %8105 = vmatprep.subr.bf16.mxu0 %v10360_v17 }
 0xdff   : > { %10098 = vmatpush3.bf16.msra.mxu1 %v10349_v31  ;;  %v10380_v31 = vld [vmem:[%s13753_s6 + $0x25c] ss:$12 sps:$4 sm:$0xff]  }
 0xe00   : > { %10099 = vmatprep.subr.bf16.mxu1 %v10350_v11 }
 0xe01   : > { %8106 = vmatpush1.bf16.msra.mxu0 %v10358_v47 }
 0xe02   : > { %8107 = vmatprep.subr.bf16.mxu0 %v10364_v35 }
 0xe03   : > { %10100 = vmatpush3.bf16.msra.mxu1 %v10350_v11  ;;  %v10378_v11 = vld [vmem:[%s13753_s6 + $0x258] ss:$12 sps:$4 sm:$0xff]  }
 0xe04   : > { %10101 = vmatprep.subr.bf16.mxu1 %v10351_v39 }
 0xe05   : > { %8108 = vmatpush1.bf16.msra.mxu0 %v10362_v33 }
 0xe06   : > { %8109 = vmatprep.subr.bf16.mxu0 %v10368_v41 }
 0xe07   : > { %10102 = vmatpush3.bf16.msra.mxu1 %v10351_v39  ;;  %v10381_v39 = vld [vmem:[%s13753_s6 + $0x260] ss:$12 sps:$4 sm:$0xff]  }
 0xe08   : > { %10103 = vmatprep.subr.bf16.mxu1 %v10352_v42 }
 0xe09   : > { %8110 = vmatpush1.bf16.msra.mxu0 %v10366_v1 }
 0xe0a   : > { %8111 = vmatprep.subr.bf16.mxu0 %v10372_v44 }
 0xe0b   : > { %10104 = vmatpush3.bf16.msra.mxu1 %v10352_v42  ;;  %v10382_v42 = vld [vmem:[%s13753_s6 + $0x240] ss:$12 sps:$4 sm:$0xff]  }
 0xe0c   : > { %10105 = vmatprep.subr.bf16.mxu1 %v10353_v52 }
 0xe0d   : > { %8112 = vmatpush1.bf16.msra.mxu0 %v10370_v2 }
 0xe0e   : > { %8113 = vmatprep.subr.bf16.mxu0 %v10376_v16 }
 0xe0f   : > { %10106 = vmatpush3.bf16.msra.mxu1 %v10353_v52  ;;  %v10384_v52 = vld [vmem:[%s13753_s6 + $0x244] ss:$12 sps:$4 sm:$0xff]  }
 0xe10   : > { %10115 = vmatprep.subr.bf16.mxu1 %v10792_v7 }
 0xe11   : > { %8114 = vmatpush1.bf16.msra.mxu0 %v10374_v50 }
 0xe12   : > { %8115 = vmatprep.subr.bf16.mxu0 %v10380_v31 }
 0xe15   : > { %8116 = vmatpush1.bf16.msra.mxu0 %v10378_v11 }
 0xe16   : > { %8117 = vmatprep.subr.bf16.mxu0 %v10384_v52 }
 0xe19   : > { %8118 = vmatpush1.bf16.msra.mxu0 %v10382_v42 }
 0xe1a   : > { %10135 = vmatprep.subr.bf16.mxu0 %v10792_v7 }
 0xe9a   : > { %v7365_v60 = vpop.f32.mrf.mxu1 }
 0xe9c   : > { %v10047_v51 = vpop.f32.mrf.mxu1 }
 0xe9d   : > { %v8856_v51 = vld [vmem:[%s13756_s9 + $0x2] ss:$0 sm:$0xff] }
 0xe9e   : > { %v7368_v56 = vpop.f32.mrf.mxu1 }
 0xea0   : > { %v10048_v8 = vpop.f32.mrf.mxu1 }
 0xea2   : > { %v7457_v48 = vpop.f32.mrf.mxu1 }
 0xea3   : > { %v7411_v4 = vpop.f32.mrf.mxu0 }
 0xea4   : > { %v7693_v26 = vpack.c.bf16 %v7411_v4, %v7365_v60  ;;  %v10059_v19 = vpop.f32.mrf.mxu1  ;;  %v10385_v60 = vld [vmem:[%s13753_s6 + $0x248] ss:$12 sps:$4 sm:$0xff]  }
 0xea5   : > { %v10053_v45 = vpop.f32.mrf.mxu0 }
 0xea6   : > { %10107 = vmatprep.mubr.bf16.mxu1 %v7693_v26  ;;  %v7460_v21 = vpop.f32.mrf.mxu1 }
 0xea7   : > { %v7414_v12 = vpop.f32.mrf.mxu0 }
 0xea8   : > { %v10060_v18 = vpop.f32.mrf.mxu1 }
 0xea9   : > { %v10054_v10 = vpop.f32.mrf.mxu0 }
 0xeaa   : > { %v7549_v49 = vpop.f32.mrf.mxu1 }
 0xeab   : > { %v7503_v0 = vpop.f32.mrf.mxu0 }
 0xeac   : > { %v7694_v13 = vpack.c.bf16 %v7503_v0, %v7457_v48  ;;  %v10071_v58 = vpop.f32.mrf.mxu1 }
 0xead   : > { %v10065_v23 = vpop.f32.mrf.mxu0 }
 0xeae   : > { %10108 = vmatmul.mubr.bf16.vlgmr.msra.gmra.mxu1 %v7694_v13  ;;  %v7552_v28 = vpop.f32.mrf.mxu1 }
 0xeaf   : > { %v7506_v59 = vpop.f32.mrf.mxu0  ;;  %10116 = vmatpush3.bf16.msra.mxu1 %v10357_v57 }
 0xeb0   : > { %v10072_v36 = vpop.f32.mrf.mxu1  ;;  %10117 = vmatprep.subr.bf16.mxu1 %v10792_v7 }
 0xeb1   : > { %v10066_v32 = vpop.f32.mrf.mxu0 }
 0xeb2   : > { %v7641_v9 = vpop.f32.mrf.mxu1 }
 0xeb3   : > { %v7595_v3 = vpop.f32.mrf.mxu0  ;;  %10118 = vmatpush3.bf16.msra.mxu1 %v10361_v34 }
 0xeb4   : > { %v7695_v55 = vpack.c.bf16 %v7595_v3, %v7549_v49  ;;  %v10083_v6 = vpop.f32.mrf.mxu1  ;;  %10119 = vmatprep.subr.bf16.mxu1 %v10792_v7 }
 0xeb5   : > { %v10077_v29 = vpop.f32.mrf.mxu0 }
 0xeb6   : > { %10111 = vmatprep.mubr.bf16.mxu1 %v7695_v55  ;;  %v7644_v38 = vpop.f32.mrf.mxu1 }
 0xeb7   : > { %v7598_v30 = vpop.f32.mrf.mxu0  ;;  %10120 = vmatpush3.bf16.msra.mxu1 %v10365_v22 }
 0xeb8   : > { %v10084_v5 = vpop.f32.mrf.mxu1  ;;  %10121 = vmatprep.subr.bf16.mxu1 %v10792_v7 }
 0xeb9   : > { %v10078_v54 = vpop.f32.mrf.mxu0 }
 0xebb   : > { %v7687_v15 = vpop.f32.mrf.mxu0  ;;  %10122 = vmatpush3.bf16.msra.mxu1 %v10369_v40 }
 0xebc   : > { %v7696_v14 = vpack.c.bf16 %v7687_v15, %v7641_v9  ;;  %10123 = vmatprep.subr.bf16.mxu1 %v10792_v7 }
 0xebd   : > { %v10089_v27 = vpop.f32.mrf.mxu0 }
 0xebe   : > { %10112 = vmatmul.mubr.bf16.gmra.mxu1 %v7696_v14 }
 0xebf   : > { %v7690_v25 = vpop.f32.mrf.mxu0  ;;  %10131 = vmatprep.mubr.msk.bf16.mxu1 %vm10793_vm11, %v10792_v7  ;;  %10124 = vmatpush3.bf16.msra.mxu1 %v10373_v62 }
 0xec0   : > { %10125 = vmatprep.subr.bf16.mxu1 %v10792_v7 }
 0xec1   : > { %v10090_v24 = vpop.f32.mrf.mxu0 }
 0xec3   : > { %10126 = vmatpush3.bf16.msra.mxu1 %v10377_v63 }
 0xec4   : > { %10127 = vmatprep.subr.bf16.mxu1 %v10792_v7 }
 0xec7   : > { %10128 = vmatpush3.bf16.msra.mxu1 %v10381_v39 }
 0xec8   : > { %10129 = vmatprep.subr.bf16.mxu1 %v10792_v7 }
 0xecb   : > { %10130 = vmatpush3.bf16.msra.mxu1 %v10385_v60 }
 0xecc   : > { %10167 = vmatprep.subr.bf16.mxu1 %v10792_v7 }
 0xf6e   : > { %v10109_v56 = vpop.f32.mrf.mxu1 }
 0xf6f   : > { %v7794_v8 = vadd.f32 %v10109_v56, %v8856_v51 }
 0xf70   : > { %v7785_v48 = vpop.f32.mrf.mxu1 }
 0xf71   : > { %v7786_v4 = vadd.f32 %v8856_v51, %v7785_v48  ;;  %v7828_v26 = vrot.slane %v7794_v8, 4 }
 0xf72   : > { %v10110_v19 = vpop.f32.mrf.mxu1 }
 0xf73   : > { %v7816_v45 = vrot.slane %v7786_v4, 4  ;;  %v7797_v21 = vadd.f32 %v10110_v19, %v8856_v51  ;;  %v7829_v0 = vadd.f32 %v7828_v26, %v7794_v8 }
 0xf74   : > { %v7788_v12 = vpop.f32.mrf.mxu1 }
 0xf75   : > { %v7817_v18 = vadd.f32 %v7816_v45, %v7786_v4  ;;  %v7834_v10 = vrot.slane %v7797_v21, 4  ;;  %v7789_v49 = vadd.f32 %v8856_v51, %v7788_v12  ;;  %v7830_v59 = vrot.slane %v7829_v0, 2 }
 0xf77   : > { %v7818_v13 = vrot.slane %v7817_v18, 2  ;;  %v7822_v58 = vrot.slane %v7789_v49, 4  ;;  %v7835_v23 = vadd.f32 %v7834_v10, %v7797_v21  ;;  %v7831_v55 = vadd.f32 %v7830_v59, %v7829_v0 }
 0xf79   : > { %v7823_v28 = vadd.f32 %v7822_v58, %v7789_v49  ;;  %v7819_v36 = vadd.f32 %v7818_v13, %v7817_v18  ;;  %v7836_v9 = vrot.slane %v7835_v23, 2  ;;  %v7832_v14 = vrot.slane %v7831_v55, 1 }
 0xf7b   : > { %v7824_v32 = vrot.slane %v7823_v28, 2  ;;  %v7820_v29 = vrot.slane %v7819_v36, 1  ;;  %v7837_v54 = vadd.f32 %v7836_v9, %v7835_v23  ;;  %v7833_v41 = vadd.f32 %v7832_v14, %v7831_v55 }
 0xf7d   : > { %v7825_v3 = vadd.f32 %v7824_v32, %v7823_v28  ;;  %v7821_v53 = vadd.f32 %v7820_v29, %v7819_v36  ;;  %v7838_v34 = vrot.slane %v7837_v54, 1  ;;  %v7866_v42 = vmul.f32 0.125, %v7833_v41 }
 0xf7e   : > { %v10113_v6 = vpop.f32.mrf.mxu1 }
 0xf7f   : > { %v7826_v38 = vrot.slane %v7825_v3, 1  ;;  %v7810_v30 = vadd.f32 %v10113_v6, %v8856_v51  ;;  %v7864_v44 = vmul.f32 0.125, %v7821_v53  ;;  %v7839_v63 = vadd.f32 %v7838_v34, %v7837_v54 }
 0xf80   : > { %v7801_v5 = vpop.f32.mrf.mxu1  ;;  %v7928_v12 = vpack.c.bf16 %v7866_v42, %v7866_v42 }
 0xf81   : > { %v7827_v15 = vadd.f32 %v7826_v38, %v7825_v3  ;;  %v7852_v27 = vrot.slane %v7810_v30, 4  ;;  %v7802_v25 = vadd.f32 %v8856_v51, %v7801_v5  ;;  %v7926_v56 = vpack.c.bf16 %v7864_v44, %v7864_v44 }
 0xf82   : > { %v10114_v24 = vpop.f32.mrf.mxu1  ;;  %v7867_v26 = vmul.f32 0.125, %v7839_v63  ;;  %v7960_v32 = vunpack.c.l.b16 %v7928_v12 }
 0xf83   : > { %v7813_v43 = vadd.f32 %v10114_v24, %v8856_v51  ;;  %v7853_v57 = vadd.f32 %v7852_v27, %v7810_v30  ;;  %v7840_v17 = vrot.slane %v7802_v25, 4  ;;  %v7865_v35 = vmul.f32 0.125, %v7827_v15 }
 0xf84   : > { %v7804_v47 = vpop.f32.mrf.mxu1  ;;  %v7958_v10 = vunpack.c.l.b16 %v7926_v56  ;;  %v7929_v23 = vpack.c.bf16 %v7867_v26, %v7867_v26 }
 0xf85   : > { %v7858_v33 = vrot.slane %v7813_v43, 4  ;;  %v7805_v22 = vadd.f32 %v8856_v51, %v7804_v47  ;;  %v7854_v1 = vrot.slane %v7853_v57, 2  ;;  %v7841_v40 = vadd.f32 %v7840_v17, %v7802_v25  ;;  %v8897_v17 = vld [vmem:[%s13754_s7 + $0x9] sm:$0x7] }
 0xf86   : > { %v7927_v31 = vpack.c.bf16 %v7865_v35, %v7865_v35  ;;  %v7961_v38 = vunpack.c.l.b16 %v7929_v23  ;;  %v7942_v47 = vrot.slane %v8897_v17, %v13927_v20  ;;  %v10390_v23 = vld [vmem:[%s13755_s8 + $0xd8] sm:$0xff]  }
 0xf87   : > { %v7859_v2 = vadd.f32 %v7858_v33, %v7813_v43  ;;  %v7846_v62 = vrot.slane %v7805_v22, 4  ;;  %v7855_v16 = vadd.f32 %v7854_v1, %v7853_v57  ;;  %v7842_v50 = vrot.slane %v7841_v40, 2 }
 0xf88   : > { %v7959_v19 = vunpack.c.l.b16 %v7927_v31  ;;  %v7946_v33 = vrot.slane %v8897_v17, %v13928_v61 }
 0xf89   : > { %v7860_v11 = vrot.slane %v7859_v2, 2  ;;  %v7847_v39 = vadd.f32 %v7846_v62, %v7805_v22  ;;  %v7856_v52 = vrot.slane %v7855_v16, 1  ;;  %v7843_v60 = vadd.f32 %v7842_v50, %v7841_v40 }
 0xf8a   : > { %v7966_v28 = vsel %vm4944_vm3, %v7959_v19, %v7958_v10  ;;  %v7938_v40 = vrot.slane %v8897_v17, %v13926_v37  ;;  %v10386_v10 = vld [vmem:[%s13755_s8 + $0xf8] sm:$0xff]  }
 0xf8b   : > { %v7861_v8 = vadd.f32 %v7860_v11, %v7859_v2  ;;  %v7848_v48 = vrot.slane %v7847_v39, 2  ;;  %v7857_v4 = vadd.f32 %v7856_v52, %v7855_v16  ;;  %v7844_v51 = vrot.slane %v7843_v60, 1  ;;  %v10727_v52 = vld [vmem:[%s13750_s3] ss:$0 sm:$0xff] }
 0xf8c   : > { %v7967_v55 = vsel %vm4946_vm4, %v7960_v32, %v7966_v28  ;;  %v10391_v28 = vld [vmem:[%s13755_s8 + $0xd0] sm:$0xff]   ;;  %v10394_v32 = vld [vmem:[%s13757_s10 + $0x38] sm:$0xff]  }
 0xf8d   : > { %v7862_v45 = vrot.slane %v7861_v8, 1  ;;  %v7849_v21 = vadd.f32 %v7848_v48, %v7847_v39  ;;  %v7845_v18 = vadd.f32 %v7844_v51, %v7843_v60  ;;  %v7870_v13 = vmul.f32 0.125, %v7857_v4 }
 0xf8e   : > { %v7968_v54 = vsel %vm4948_vm5, %v7961_v38, %v7967_v55 }
 0xf8f   : > { %v7863_v49 = vadd.f32 %v7862_v45, %v7861_v8  ;;  %v7850_v0 = vrot.slane %v7849_v21, 1  ;;  %v7868_v58 = vmul.f32 0.125, %v7845_v18  ;;  %v7932_v6 = vpack.c.bf16 %v7870_v13, %v7870_v13  ;;  %v10388_v13 = vld [vmem:[%s13755_s8 + $0xe8] sm:$0xff]  }
 0xf91   : > { %v7871_v59 = vmul.f32 0.125, %v7863_v49  ;;  %v7851_v36 = vadd.f32 %v7850_v0, %v7849_v21  ;;  %v7930_v9 = vpack.c.bf16 %v7868_v58, %v7868_v58  ;;  %v7964_v14 = vunpack.c.l.b16 %v7932_v6  ;;  %v10387_v0 = vld [vmem:[%s13755_s8 + $0xf0] sm:$0xff]   ;;  %v10389_v58 = vld [vmem:[%s13755_s8 + $0xe0] sm:$0xff]  }
 0xf93   : > { %v7869_v3 = vmul.f32 0.125, %v7851_v36  ;;  %v7962_v29 = vunpack.c.l.b16 %v7930_v9  ;;  %v7933_v30 = vpack.c.bf16 %v7871_v59, %v7871_v59  ;;  %v10392_v59 = vld [vmem:[%s13755_s8 + $0xc8] sm:$0xff]   ;;  %v10393_v36 = vld [vmem:[%s13755_s8 + $0xc0] sm:$0xff]   ;;  %v10395_v9 = vld [vmem:[%s13757_s10 + $0x30] sm:$0xff]  }
 0xf95   : > { %v7931_v5 = vpack.c.bf16 %v7869_v3, %v7869_v3  ;;  %v7969_v27 = vsel %vm4950_vm6, %v7962_v29, %v7968_v54  ;;  %v7965_v25 = vunpack.c.l.b16 %v7933_v30  ;;  %v10396_v3 = vld [vmem:[%s13757_s10 + $0x28] sm:$0xff]   ;;  %v10398_v54 = vld [vmem:[%s13757_s10 + $0x18] sm:$0xff]  }
 0xf97   : > { %v7963_v15 = vunpack.c.l.b16 %v7931_v5  ;;  %v10397_v5 = vld [vmem:[%s13757_s10 + $0x20] sm:$0xff]  }
 0xf99   : > { %v7970_v24 = vsel %vm4952_vm7, %v7963_v15, %v7969_v27  ;;  %v10399_v15 = vld [vmem:[%s13757_s10 + $0x10] sm:$0xff]   ;;  %v10401_v27 = vld [vmem:[%s13757_s10] sm:$0xff]  }
 0xf9a   : > { %v7971_v53 = vsel %vm4954_vm8, %v7964_v14, %v7970_v24  ;;  %v10400_v14 = vld [vmem:[%s13757_s10 + $0x8] sm:$0xff]  }
 0xf9b   : > { %v7972_v43 = vsel %vm4956_vm9, %v7965_v25, %v7971_v53  ;;  %v8940_v25 = vld [vmem:[%s13756_s9 + $0x3] ss:$0 sm:$0xff] }
 0xf9c   : > { %v7973_v57 = vpack.c.b16 %v7972_v43, %v7972_v43 }
 0xf9e   : > { %8136 = vmatmul.mubr.bf16.vlgmr.msra.gmra.mxu0 %v7973_v57  ;;  %10132 = vmatmul.mubr.bf16.vlgmr.msra.gmra.mxu1 %v7973_v57 }
 0xf9f   : > { %10137 = vmatprep.mubr.msk.bf16.mxu0 %vm10793_vm11, %v10792_v7  ;;  %10183 = vmatprep.mubr.msk.bf16.mxu1 %vm10793_vm11, %v10792_v7 }
 0xfa0   : > { %10168 = vmatpush3.bf16.msra.mxu1 %v10394_v32 }
 0xfa1   : > { %10169 = vmatprep.subr.bf16.mxu1 %v10792_v7 }
 0xfa4   : > { %10170 = vmatpush3.bf16.msra.mxu1 %v10395_v9 }
 0xfa5   : > { %10171 = vmatprep.subr.bf16.mxu1 %v10792_v7 }
 0xfa8   : > { %10172 = vmatpush3.bf16.msra.mxu1 %v10396_v3 }
 0xfa9   : > { %10173 = vmatprep.subr.bf16.mxu1 %v10792_v7 }
 0xfac   : > { %10174 = vmatpush3.bf16.msra.mxu1 %v10397_v5 }
 0xfad   : > { %10175 = vmatprep.subr.bf16.mxu1 %v10792_v7 }
 0xfb0   : > { %10176 = vmatpush3.bf16.msra.mxu1 %v10398_v54 }
 0xfb1   : > { %10177 = vmatprep.subr.bf16.mxu1 %v10792_v7 }
 0xfb4   : > { %10178 = vmatpush3.bf16.msra.mxu1 %v10399_v15 }
 0xfb5   : > { %10179 = vmatprep.subr.bf16.mxu1 %v10792_v7 }
 0xfb8   : > { %10180 = vmatpush3.bf16.msra.mxu1 %v10400_v14 }
 0xfb9   : > { %10181 = vmatprep.subr.bf16.mxu1 %v10792_v7 }
 0xfbc   : > { %10182 = vmatpush3.bf16.msra.mxu1 %v10401_v27 }
0x105e   : > { %v8137_v34 = vpop.f32.mrf.mxu0  ;;  %v8178_v35 = vpop.f32.mrf.mxu1 }
0x105f   : > { %v8179_v16 = vadd.f32 %v8178_v35, %v7946_v33  ;;  %v8138_v31 = vadd.f32 %v8137_v34, %v7938_v40 }
0x1060   : > { %v8139_v22 = vpop.f32.mrf.mxu0  ;;  %v10133_v41 = vpop.f32.mrf.mxu1 }
0x1061   : > { %v8140_v1 = vadd.f32 %v8139_v22, %v7942_v47  ;;  %v8186_v20 = vpack.c.bf16 %v8179_v16, %v8179_v16  ;;  %v8184_v11 = vpack.c.bf16 %v8138_v31, %v8138_v31 }
0x1062   : > { %v8141_v44 = vpop.f32.mrf.mxu0  ;;  %v8181_v2 = vpop.f32.mrf.mxu1 }
0x1063   : > { %v8185_v62 = vpack.c.bf16 %v8140_v1, %v8140_v1  ;;  %v8245_v39 = vsel %vm5829_vm12, %v8186_v20, 0  ;;  %v8407_v44 = vld [vmem:[%s13758_s11] sm:$0x1] }
0x1064   : > { %v8142_v50 = vpop.f32.mrf.mxu0  ;;  %v10134_v63 = vpop.f32.mrf.mxu1 }
0x1065   : > { %10136 = vmatpush3.bf16.xpose.msra.mxu0 %v8185_v62 }
0x1066   : > { %10141 = vmatprep.subr.bf16.mxu0 %v10792_v7 }
0x106c   : > { %10138 = vmatmul.mubr.bf16.vlgmr.msra.gmra.mxu0 %v8184_v11 }
0x106d   : > { %10142 = vmatpush3.bf16.msra.mxu0 %v8245_v39  ;;  %10143 = vmatprep.mubr.msk.bf16.mxu0 %vm10793_vm11, %v10792_v7 }
0x106e   : > { %10147 = vmatprep.subr.bf16.mxu0 %v10792_v7 }
0x112c   : > { %v8221_v37 = vpop.f32.mrf.mxu0 }
0x112d   : > { %v8227_v61 = vmul.f32 0.17677669, %v8221_v37 }
0x112e   : > { %v10139_v42 = vpop.f32.mrf.mxu0 }
0x112f   : > { %v8228_v60 = vadd.f32 %v10727_v52, %v8227_v61 }
0x1130   : > { %v8224_v56 = vpop.f32.mrf.mxu0 }
0x1131   : > { %v8229_v8 = vsel %vm5729_vm13, %v8228_v60, -inf }
0x1132   : > { %8230 = vmax.xlane.f32.xlu0 %v8229_v8  ;;  %v10140_v48 = vpop.f32.mrf.mxu0 }
0x11bb   : > { %v8231_v4 = vpop.xlane.xlu0 %8230 }
0x11bc   : > { %v8232_v51 = vsub.f32 %v8228_v60, %v8231_v4 }
0x11be   : > { %v8233_v26 = vmul.f32 1.442695, %v8232_v51 }
0x11c0   : > { %10722 = vpow2.f32 %v8233_v26 }
0x11cd   : > { %v10723_v19 = vpop.eup %10722 }
0x11ce   : > { %v8235_v45 = vsel %vm5729_vm13, %v10723_v19, 0.0 }
0x11cf   : > { %8236 = vadd.xlane.f32.xlu1 %v8235_v45 }
0x1258   : > { %v8237_v21 = vpop.xlane.xlu1 %8236 }
0x1259   : > { %10724 = vrcp.f32 %v8237_v21 }
0x1266   : > { %v10725_v12 = vpop.eup %10724 }
0x1267   : > { %v8239_v18 = vmul.f32 %v10725_v12, %v10723_v19 }
0x1269   : > { %v8240_v49 = vpack.c.bf16 %v8239_v18, %v8239_v18 }
0x126b   : > { %10144 = vmatmul.mubr.msk.bf16.vlgmr.msra.gmra.mxu0 %vm5729_vm13, %v8240_v49 }
0x126c   : > { %10148 = vmatpush3.bf16.msra.mxu0 %v10386_v10  ;;  %10163 = vmatprep.mubr.msk.bf16.mxu0 %vm10793_vm11, %v10792_v7 }
0x126d   : > { %10149 = vmatprep.subr.bf16.mxu0 %v10792_v7 }
0x1270   : > { %10150 = vmatpush3.bf16.msra.mxu0 %v10387_v0 }
0x1271   : > { %10151 = vmatprep.subr.bf16.mxu0 %v10792_v7 }
0x1274   : > { %10152 = vmatpush3.bf16.msra.mxu0 %v10388_v13 }
0x1275   : > { %10153 = vmatprep.subr.bf16.mxu0 %v10792_v7 }
0x1278   : > { %10154 = vmatpush3.bf16.msra.mxu0 %v10389_v58 }
0x1279   : > { %10155 = vmatprep.subr.bf16.mxu0 %v10792_v7 }
0x127c   : > { %10156 = vmatpush3.bf16.msra.mxu0 %v10390_v23 }
0x127d   : > { %10157 = vmatprep.subr.bf16.mxu0 %v10792_v7 }
0x1280   : > { %10158 = vmatpush3.bf16.msra.mxu0 %v10391_v28 }
0x1281   : > { %10159 = vmatprep.subr.bf16.mxu0 %v10792_v7 }
0x1284   : > { %10160 = vmatpush3.bf16.msra.mxu0 %v10392_v59 }
0x1285   : > { %10161 = vmatprep.subr.bf16.mxu0 %v10792_v7 }
0x1288   : > { %10162 = vmatpush3.bf16.msra.mxu0 %v10393_v36 }
0x132b   : > { %v8281_v55 = vpop.f32.mrf.mxu0 }
0x132c   : > { %v8287_v6 = vpack.c.bf16 %v8281_v55, %v8281_v55 }
0x132d   : > { %v10145_v29 = vpop.f32.mrf.mxu0 }
0x132e   : > { %10164 = vmatmul.mubr.bf16.vlgmr.msra.gmra.mxu0 %v8287_v6 }
0x132f   : > { %v8284_v38 = vpop.f32.mrf.mxu0 }
0x1331   : > { %v10146_v30 = vpop.f32.mrf.mxu0 }
0x13ee   : > { %v8376_v24 = vpop.f32.mrf.mxu0 }
0x13ef   : > { %v8377_v53 = vadd.f32 %v8940_v25, %v8376_v24 }
0x13f0   : > { %v10165_v43 = vpop.f32.mrf.mxu0 }
0x13f1   : > { %v8382_v57 = vsel %vm6318_vm14, %v8377_v53, 0.0 }
0x13f2   : > { %v8383_v17 = vrot.slane %v8382_v57, 4  ;;  %v8379_v47 = vpop.f32.mrf.mxu0 }
0x13f4   : > { %v8384_v7 = vadd.f32 %v8383_v17, %v8382_v57  ;;  %v10166_v34 = vpop.f32.mrf.mxu0 }
0x13f6   : > { %v8385_v35 = vrot.slane %v8384_v7, 2 }
0x13f8   : > { %v8386_v33 = vadd.f32 %v8385_v35, %v8384_v7 }
0x13fa   : > { %v8387_v22 = vrot.slane %v8386_v33, 1 }
0x13fc   : > { %v8388_v41 = vadd.f32 %v8387_v22, %v8386_v33 }
0x13fe   : > { %v8389_v1 = vmul.f32 0.14285715, %v8388_v41 }
0x1400   : > { %v8390_v40 = vpack.c.bf16 %v8389_v1, %v8389_v1 }
0x1402   : > { %10184 = vmatmul.mubr.bf16.vlgmr.msra.gmra.mxu1 %v8390_v40 }
0x14c2   : > { %v8490_v46 = vpop.f32.mrf.mxu1 }
0x14c3   : > { %v8491_v2 = vadd.f32 %v8490_v46, %v8407_v44 }
0x14c4   : > { %v10185_v62 = vpop.f32.mrf.mxu1 }
0x14c5   : > { %8496 = vst [vmem:[%s418_s26] sm:$0x1] %v8491_v2 }
0x14c6   : > { %v8493_v16 = vpop.f32.mrf.mxu1 }
0x14c7   : > { %10741 = shalt.err (!%p10738_p3)
}
0x14c8   : > { %s10742_s16 = scalar_lea.hbm %s13706_s20, 16  ;;  %s10746_s18 = scalar_lea.hbm %s13759_s12, 32 }
0x14c9   : > { %p10743_p4 = scmp.ne.s32.totalorder %s13706_s20, %s10742_s16  ;;  %p10747_p9 = scmp.lt.s32.totalorder %s13706_s20, %s13759_s12 }
0x14ca   : > { %p10748_p10 = scmp.lt.s32.totalorder %s10746_s18, %s10742_s16 }
0x14cb   : > { %p10744_p7 = pnand %p10743_p4, %p10900_p5 }
0x14cc   : > { %p10749_p11 = por %p10748_p10, %p10747_p9 }
0x14cd   : > { %p10745_p8 = pneg %p10744_p7 }
0x14cf   : > { %p10750_p12 = pnand %p10749_p11, %p10745_p8 }
0x14d1   : > { %10753 = shalt.err (!%p10750_p12)
}
0x14d2   : > { %10188 = dma.vmem_to_hbm [thread:$0]  (%p10900_p5), %s13708_s17, 16, %s13706_s20, %s8498_s4   ;;  %v10186_v50 = vpop.f32.mrf.mxu1 }
0x14d3 PF: > { %p10194_p13 = scmp.ge.s32.totalorder %s10788_s24, 2  ;;  %s8522_s28 = sand.u32 1, %s10776_s21  }
0x14d4   : > { %s8523_s15 = scalar_lea.sflag [#allocation3], %s8522_s28 }
0x14d5   : > { %p10191_p0 = pnand %p10194_p13, %p10904_p6 }
0x14d7   : > { %p10192_p1 = pneg %p10191_p0 }
0x14d9   : > { %10771 = dma.done.wait (%p10192_p1), %s8523_s15, 16  }
0x14da   : > { %10773 = vsyncadd (%p10192_p1), %s8523_s15, 4294967280  ;;  %s13929_s13 = sld [smem:[#allocation5_spill]]  ;;  %p22_p2 = scmp.ge.s32.totalorder %s10887_s27, 4  }
0x14db   : > { %s13930_s21 = smov %s10780_s22  ;;  %s13931_s22 = smov %s10784_s23 }
0x14dc   : > { %s13933_s24 = smov %s10887_s27  ;;  %24 = sbr.rel (!%p22_p2) target bundleno = 5 (0x5), region = 118 }
0x14e0   : > { %s13932_s23 = smov %s13929_s13 }
0x14e1   :  { %8527 = vsyncpa [#allocation3], 1 }
0x14e2   :  { %8529 = vsyncpa [#allocation3 + $0x1], 1 }

</bundles_post_ra>
